<compile_context>
chip_gen: v6e
topology: v6e:2x2x1
jax: 0.10.0
libtpu: 0.0.40
codegen_flags: <defaults>
</compile_context>

<pallas_src>
import functools

import jax
import jax.numpy as jnp
from jax.experimental import pallas as pl
from jax.experimental.pallas import tpu as pltpu

# ---------------- scaled-down ViT-B/16 config ----------------
PATCH = 16
IMG = 32
CHANNELS = 3
D = 64                       # hidden dim (768 in ViT-B/16)
HEADS = 4                    # 12 in ViT-B/16
HEAD_DIM = D // HEADS
MLP = 4 * D                  # 3072 in ViT-B/16
LAYERS = 2                   # 12 in ViT-B/16
INTER = 32                   # inter_dim (256 in the reference module)
NUM_CLASSES = 10             # cfg.TEACHER.NUM_CLASSES
LN_EPS = 1e-6                # torchvision ViT uses LayerNorm(eps=1e-6)
OUT_PAD = 128                # lane-dense packed logits: [0:10]=mc, [10:11]=binary
N_PATCH = (IMG // PATCH) ** 2
SEQ = N_PATCH + 1
PFLAT = CHANNELS * PATCH * PATCH


def _gelu_exact(x):
    # erf via Abramowitz-Stegun 7.1.26 (|err| < 1.5e-7): matches torch.nn.GELU (erf-exact)
    # to f32 noise without relying on an erf lowering inside Mosaic.
    z = x * 0.7071067811865476
    az = jnp.abs(z)
    t = 1.0 / (1.0 + 0.3275911 * az)
    poly = ((((1.061405429 * t - 1.453152027) * t + 1.421413741) * t
             - 0.284496736) * t + 0.254829592) * t
    erf_abs = 1.0 - poly * jnp.exp(-az * az)
    erf = jnp.where(z >= 0, erf_abs, -erf_abs)
    return 0.5 * x * (1.0 + erf)


def _ln(x, g, b):
    mu = jnp.mean(x, axis=-1, keepdims=True)
    var = jnp.mean(jnp.square(x - mu), axis=-1, keepdims=True)
    return (x - mu) * jax.lax.rsqrt(var + LN_EPS) * g + b


# ---------------- single fused kernel: whole forward for TB images per grid step ----------------
def _vit_teacher_kernel(
    TB,
    patches_ref, embed_ref, sel_ref, bias_ref,
    patch_w_ref, ln_p_ref, qkw_ref, qkb_ref, attw_ref, b64_ref,
    mlp1_w_ref, mlp1_b_ref, mlp2_w_ref,
    lnf_ref, c1_w_ref, c2_w_ref, c3_w_ref, cb_ref,
    out_ref,
):
    f32 = jnp.float32
    bf16 = jnp.bfloat16
    R = TB * SEQ  # rows in this batch tile

    # ---- patch embedding; embed_ref already carries conv bias + cls token + positional emb ----
    seq = (jnp.dot(patches_ref[...], patch_w_ref[...], preferred_element_type=f32)
           + embed_ref[...])                                          # (R, D) f32

    attn_bias = bias_ref[...]                                         # (R, R): 0 in-image, -1e30 cross
    lane = jax.lax.broadcasted_iota(jnp.int32, (1, D), 1)             # lane ids for head masks

    # ---- transformer encoder: static unroll, all weights VMEM-resident ----
    for l in range(LAYERS):
        # pre-LN multi-head self-attention (block-diagonal across the TB images in the slab)
        y = _ln(seq, ln_p_ref[4 * l + 0], ln_p_ref[4 * l + 1])
        yb = y.astype(bf16)
        v_full = (jnp.dot(yb, attw_ref[2 * l + 0], preferred_element_type=f32)
                  + b64_ref[3 * l + 0]).astype(bf16)                  # (R, D) all heads' V

        a = jnp.zeros((R, D), f32)
        for h in range(HEADS):
            qi = (l * HEADS + h) * 2
            # per-head weight slabs are 128-lane-aligned (pre-split in the wrapper);
            # 1/sqrt(head_dim) is folded into the Q weights/bias.
            q = jnp.dot(yb, qkw_ref[qi], preferred_element_type=f32) + qkb_ref[qi]        # (R, HD)
            k = jnp.dot(yb, qkw_ref[qi + 1], preferred_element_type=f32) + qkb_ref[qi + 1]
            s = jax.lax.dot_general(q.astype(bf16), k.astype(bf16),
                                    (((1,), (1,)), ((), ())),
                                    preferred_element_type=f32)        # (R, R)
            s = s + attn_bias
            p = jnp.exp(s - jnp.max(s, axis=-1, keepdims=True))
            p = p / jnp.sum(p, axis=-1, keepdims=True)                 # exact softmax divide
            pv = jnp.dot(p.astype(bf16), v_full, preferred_element_type=f32)              # (R, D)
            hmask = (lane >= h * HEAD_DIM) & (lane < (h + 1) * HEAD_DIM)
            a = a + jnp.where(hmask, pv, 0.0)                          # VPU select, no lane concat
        seq = seq + (jnp.dot(a.astype(bf16), attw_ref[2 * l + 1], preferred_element_type=f32)
                     + b64_ref[3 * l + 1])

        # pre-LN MLP (erf-exact GELU)
        y = _ln(seq, ln_p_ref[4 * l + 2], ln_p_ref[4 * l + 3])
        h1 = (jnp.dot(y.astype(bf16), mlp1_w_ref[l], preferred_element_type=f32)
              + mlp1_b_ref[l])
        h1 = _gelu_exact(h1)
        seq = seq + (jnp.dot(h1.astype(bf16), mlp2_w_ref[l], preferred_element_type=f32)
                     + b64_ref[3 * l + 2])

    # ---- class-token extraction (exact 0/1 select matmul), final LN, fused heads ----
    cls = jnp.dot(sel_ref[...], seq, preferred_element_type=f32)       # (TB, D)
    feat = _ln(cls, lnf_ref[0], lnf_ref[1])
    # fused mc/binary classifier trunks; Dropout(p=0.2) is identity at inference
    hc = jnp.maximum(jnp.dot(feat.astype(bf16), c1_w_ref[...], preferred_element_type=f32)
                     + cb_ref[0][:, :2 * INTER], 0.0)
    hc = jnp.maximum(jnp.dot(hc.astype(bf16), c2_w_ref[...], preferred_element_type=f32)
                     + cb_ref[1][:, :2 * INTER], 0.0)
    out_ref[...] = (jnp.dot(hc.astype(bf16), c3_w_ref[...], preferred_element_type=f32)
                    + cb_ref[2])                                        # (TB, OUT_PAD) f32


# ---------------- deterministic parameter init (PyTorch-like structure) ----------------
def init_params(key):
    keys = iter(jax.random.split(key, 64))

    def dense(fan_in, fan_out):
        kw, kb = jax.random.split(next(keys))
        w = jax.random.normal(kw, (fan_in, fan_out), jnp.float32) / jnp.sqrt(float(fan_in))
        b = 0.01 * jax.random.normal(kb, (fan_out,), jnp.float32)
        return w, b

    params = {}
    # conv_proj(3, D, kernel=16, stride=16) == matmul over flattened (c, ph, pw) patches
    params["patch_w"], params["patch_b"] = dense(PFLAT, D)
    params["cls"] = 0.02 * jax.random.normal(next(keys), (1, 1, D), jnp.float32)
    params["pos"] = 0.02 * jax.random.normal(next(keys), (1, SEQ, D), jnp.float32)

    layers = []
    for _ in range(LAYERS):
        layer = {}
        layer["ln1_g"] = jnp.ones((D,), jnp.float32)
        layer["ln1_b"] = jnp.zeros((D,), jnp.float32)
        layer["qkv_w"], layer["qkv_b"] = dense(D, 3 * D)       # MHA in_proj (q|k|v)
        layer["out_w"], layer["out_b"] = dense(D, D)           # MHA out_proj
        layer["ln2_g"] = jnp.ones((D,), jnp.float32)
        layer["ln2_b"] = jnp.zeros((D,), jnp.float32)
        layer["mlp1_w"], layer["mlp1_b"] = dense(D, MLP)
        layer["mlp2_w"], layer["mlp2_b"] = dense(MLP, D)
        layers.append(layer)
    params["layers"] = layers

    params["ln_g"] = jnp.ones((D,), jnp.float32)               # encoder final LayerNorm
    params["ln_b"] = jnp.zeros((D,), jnp.float32)

    # mc_classifier: Linear(D,INTER) ReLU Linear(INTER,INTER) ReLU Dropout Linear(INTER,NUM_CLASSES)
    params["mc1_w"], params["mc1_b"] = dense(D, INTER)
    params["mc2_w"], params["mc2_b"] = dense(INTER, INTER)
    params["mc3_w"], params["mc3_b"] = dense(INTER, NUM_CLASSES)
    # binary_classifier: same trunk, final Linear(INTER, 1)
    params["bc1_w"], params["bc1_b"] = dense(D, INTER)
    params["bc2_w"], params["bc2_b"] = dense(INTER, INTER)
    params["bc3_w"], params["bc3_b"] = dense(INTER, 1)
    return params


# ---------------- weight packing (per-head slabs, bf16 matmul operands, fused heads) ----------------
def _pack_params(params):
    bf16 = jnp.bfloat16
    f32 = jnp.float32
    scale = 1.0 / float(HEAD_DIM) ** 0.5

    qkw, qkb, attw, b64, ln_p = [], [], [], [], []
    mlp1_w, mlp1_b, mlp2_w = [], [], []
    for lyr in params["layers"]:
        W, bvec = lyr["qkv_w"], lyr["qkv_b"]
        for h in range(HEADS):
            lo = h * HEAD_DIM
            qkw.append(W[:, lo:lo + HEAD_DIM] * scale)            # scale folded into Q
            qkw.append(W[:, D + lo:D + lo + HEAD_DIM])
            qkb.append(bvec[lo:lo + HEAD_DIM][None, :] * scale)
            qkb.append(bvec[D + lo:D + lo + HEAD_DIM][None, :])
        attw.append(W[:, 2 * D:3 * D])                            # V projection (all heads)
        attw.append(lyr["out_w"])
        b64.append(bvec[2 * D:3 * D][None, :])
        b64.append(lyr["out_b"][None, :])
        b64.append(lyr["mlp2_b"][None, :])
        ln_p += [lyr["ln1_g"][None, :], lyr["ln1_b"][None, :],
                 lyr["ln2_g"][None, :], lyr["ln2_b"][None, :]]
        mlp1_w.append(lyr["mlp1_w"])
        mlp1_b.append(lyr["mlp1_b"][None, :])
        mlp2_w.append(lyr["mlp2_w"])

    # embed[0] = cls + pos[0]; embed[1:] = pos[1:] + conv bias  (cls "patch" row is all-zero)
    embed = jnp.concatenate(
        [params["cls"][0] + params["pos"][0, :1],
         params["pos"][0, 1:] + params["patch_b"][None, :]], axis=0).astype(f32)   # (SEQ, D)

    # fused classifier: [mc | binary] trunks, block-diagonal layer 2, padded lane-dense final layer
    zi = jnp.zeros((INTER, INTER), f32)
    c1_w = jnp.concatenate([params["mc1_w"], params["bc1_w"]], axis=1).astype(bf16)
    c2_w = jnp.concatenate(
        [jnp.concatenate([params["mc2_w"], zi], axis=1),
         jnp.concatenate([zi, params["bc2_w"]], axis=1)], axis=0).astype(bf16)
    c3_w = jnp.zeros((2 * INTER, OUT_PAD), f32)
    c3_w = c3_w.at[:INTER, :NUM_CLASSES].set(params["mc3_w"])
    c3_w = c3_w.at[INTER:, NUM_CLASSES:NUM_CLASSES + 1].set(params["bc3_w"]).astype(bf16)
    cb = jnp.zeros((3, 1, OUT_PAD), f32)
    cb = cb.at[0, 0, :2 * INTER].set(jnp.concatenate([params["mc1_b"], params["bc1_b"]]))
    cb = cb.at[1, 0, :2 * INTER].set(jnp.concatenate([params["mc2_b"], params["bc2_b"]]))
    cb = cb.at[2, 0, :NUM_CLASSES].set(params["mc3_b"])
    cb = cb.at[2, 0, NUM_CLASSES].set(params["bc3_b"][0])

    return dict(
        patch_w=params["patch_w"].astype(bf16),
        embed=embed,
        ln_p=jnp.stack(ln_p).astype(f32),                  # (LAYERS*4, 1, D)
        qkw=jnp.stack(qkw).astype(bf16),                   # (LAYERS*HEADS*2, D, HEAD_DIM)
        qkb=jnp.stack(qkb).astype(f32),                    # (LAYERS*HEADS*2, 1, HEAD_DIM)
        attw=jnp.stack(attw).astype(bf16),                 # (LAYERS*2, D, D)
        b64=jnp.stack(b64).astype(f32),                    # (LAYERS*3, 1, D)
        mlp1_w=jnp.stack(mlp1_w).astype(bf16),             # (LAYERS, D, MLP)
        mlp1_b=jnp.stack(mlp1_b).astype(f32),              # (LAYERS, 1, MLP)
        mlp2_w=jnp.stack(mlp2_w).astype(bf16),             # (LAYERS, MLP, D)
        lnf=jnp.stack([params["ln_g"][None, :], params["ln_b"][None, :]]).astype(f32),
        c1_w=c1_w, c2_w=c2_w, c3_w=c3_w, cb=cb,
    )


# ---------------- forward (matches ViT_Teacher.forward, eval mode) ----------------
def vit_teacher_forward(params, x):
    assert x.shape[1:] == (CHANNELS, IMG, IMG)
    B = x.shape[0]
    f32 = jnp.float32

    # Batch-tile choice: TB multiple of 8 (sublane-dense stores), grid steps even and >= 2
    # so both v7x TensorCores get work under dimension_semantics=("parallel",).
    Bp = ((B + 15) // 16) * 16
    TB = 8
    for cand in (32, 16):
        if Bp % cand == 0 and (Bp // cand) >= 2 and (Bp // cand) % 2 == 0:
            TB = cand
            break
    steps = Bp // TB
    R = TB * SEQ

    # _process_input: conv_proj as patch-flatten (row-major patch order); prepend a zero "cls"
    # patch row so one (R, PFLAT) x (PFLAT, D) matmul produces the full token sequence.
    xp = jnp.pad(x.astype(f32), ((0, Bp - B), (0, 0), (0, 0), (0, 0)))
    nh, nw = IMG // PATCH, IMG // PATCH
    patches = (xp.reshape(Bp, CHANNELS, nh, PATCH, nw, PATCH)
               .transpose(0, 2, 4, 1, 3, 5)
               .reshape(Bp, N_PATCH, PFLAT))
    patches = jnp.concatenate([jnp.zeros((Bp, 1, PFLAT), f32), patches], axis=1)
    patches = patches.reshape(Bp * SEQ, PFLAT).astype(jnp.bfloat16)   # halves the per-step DMA

    packed = _pack_params(params)
    embed_tiled = jnp.tile(packed["embed"], (TB, 1))                  # (R, D)

    # exact 0/1 class-token selection matrix and block-diagonal attention bias for the tile
    sel = jnp.zeros((TB, R), f32).at[jnp.arange(TB), jnp.arange(TB) * SEQ].set(1.0)
    img_id = jnp.repeat(jnp.arange(TB), SEQ)
    attn_bias = jnp.where(img_id[:, None] == img_id[None, :], 0.0, -1e30).astype(f32)

    operands = [
        patches,                   # blocked (R, PFLAT) per grid step
        embed_tiled, sel, attn_bias,
        packed["patch_w"], packed["ln_p"], packed["qkw"], packed["qkb"],
        packed["attw"], packed["b64"], packed["mlp1_w"], packed["mlp1_b"], packed["mlp2_w"],
        packed["lnf"], packed["c1_w"], packed["c2_w"], packed["c3_w"], packed["cb"],
    ]

    def full_spec(arr):
        nd = arr.ndim
        return pl.BlockSpec(arr.shape, lambda b, _nd=nd: (0,) * _nd)

    in_specs = [pl.BlockSpec((R, PFLAT), lambda b: (b, 0))]
    in_specs += [full_spec(a) for a in operands[1:]]

    # advisory cost estimate for the XLA scheduler
    per_layer = (2 * SEQ * D * D
                 + HEADS * (2 * 2 * SEQ * D * HEAD_DIM + 2 * SEQ * SEQ * HEAD_DIM + 2 * SEQ * SEQ * D)
                 + 2 * SEQ * D * D + 2 * SEQ * D * MLP + 2 * SEQ * MLP * D)
    per_img = (2 * SEQ * PFLAT * D + LAYERS * per_layer
               + 2 * (D * 2 * INTER + (2 * INTER) ** 2 + 2 * INTER * OUT_PAD))
    weight_bytes = sum(int(a.size) * a.dtype.itemsize for a in operands[1:])
    cost = pl.CostEstimate(
        flops=int(Bp * per_img),
        transcendentals=int(Bp * LAYERS * (HEADS * SEQ * SEQ + SEQ * MLP)),
        bytes_accessed=int(patches.size * 2 + weight_bytes + Bp * OUT_PAD * 4),
    )

    out = pl.pallas_call(
        functools.partial(_vit_teacher_kernel, TB),
        grid=(steps,),
        in_specs=in_specs,
        out_specs=pl.BlockSpec((TB, OUT_PAD), lambda b: (b, 0)),
        out_shape=jax.ShapeDtypeStruct((Bp, OUT_PAD), f32),
        compiler_params=pltpu.CompilerParams(dimension_semantics=("parallel",)),
        cost_estimate=cost,
    )(*operands)

    logits = out[:B]                                        # drop batch padding
    mc_logit = logits[:, :NUM_CLASSES]
    binary_logit = logits[:, NUM_CLASSES:NUM_CLASSES + 1]
    return mc_logit, binary_logit


if __name__ == "__main__":
    key = jax.random.PRNGKey(0)
    kp, kx = jax.random.split(key)
    params = init_params(kp)
    B = 16
    x = jax.random.normal(kx, (B, CHANNELS, IMG, IMG), jnp.float32)

    fwd = jax.jit(vit_teacher_forward)
    mc_logit, binary_logit = fwd(params, x)
    jax.block_until_ready((mc_logit, binary_logit))

    assert mc_logit.shape == (B, NUM_CLASSES)
    assert binary_logit.shape == (B, 1)
    assert bool(jnp.all(jnp.isfinite(mc_logit))) and bool(jnp.all(jnp.isfinite(binary_logit)))
    print("KERNEL_OK")
</pallas_src>

<mosaic_0001>
module attributes {stable_mosaic.version = 11 : i64} {
  func.func @_vit_teacher_kernel(%arg0: i32, %arg1: memref<40x768xbf16, #tpu.memory_space<vmem>>, %arg2: memref<40x64xf32, #tpu.memory_space<vmem>>, %arg3: memref<8x40xf32, #tpu.memory_space<vmem>>, %arg4: memref<40x40xf32, #tpu.memory_space<vmem>>, %arg5: memref<768x64xbf16, #tpu.memory_space<vmem>>, %arg6: memref<8x1x64xf32, #tpu.memory_space<vmem>>, %arg7: memref<16x64x16xbf16, #tpu.memory_space<vmem>>, %arg8: memref<16x1x16xf32, #tpu.memory_space<vmem>>, %arg9: memref<4x64x64xbf16, #tpu.memory_space<vmem>>, %arg10: memref<6x1x64xf32, #tpu.memory_space<vmem>>, %arg11: memref<2x64x256xbf16, #tpu.memory_space<vmem>>, %arg12: memref<2x1x256xf32, #tpu.memory_space<vmem>>, %arg13: memref<2x256x64xbf16, #tpu.memory_space<vmem>>, %arg14: memref<2x1x64xf32, #tpu.memory_space<vmem>>, %arg15: memref<64x64xbf16, #tpu.memory_space<vmem>>, %arg16: memref<64x64xbf16, #tpu.memory_space<vmem>>, %arg17: memref<64x128xbf16, #tpu.memory_space<vmem>>, %arg18: memref<3x1x128xf32, #tpu.memory_space<vmem>>, %arg19: memref<8x128xf32, #tpu.memory_space<vmem>>) attributes {dimension_semantics = [#tpu.dimension_semantics<parallel>], iteration_bounds = array<i64: 2>, scalar_prefetch = 0 : i64, scratch_operands = 0 : i64, tpu.core_type = #tpu.core_type<tc>, window_params = [{transform_indices = @transform_0, window_bounds = array<i64: 40, 768>}, {pipeline_mode = #tpu.pipeline_mode<synchronous>, transform_indices = @transform_1, window_bounds = array<i64: 40, 64>}, {pipeline_mode = #tpu.pipeline_mode<synchronous>, transform_indices = @transform_2, window_bounds = array<i64: 8, 40>}, {pipeline_mode = #tpu.pipeline_mode<synchronous>, transform_indices = @transform_3, window_bounds = array<i64: 40, 40>}, {pipeline_mode = #tpu.pipeline_mode<synchronous>, transform_indices = @transform_4, window_bounds = array<i64: 768, 64>}, {pipeline_mode = #tpu.pipeline_mode<synchronous>, transform_indices = @transform_5, window_bounds = array<i64: 8, 1, 64>}, {pipeline_mode = #tpu.pipeline_mode<synchronous>, transform_indices = @transform_6, window_bounds = array<i64: 16, 64, 16>}, {pipeline_mode = #tpu.pipeline_mode<synchronous>, transform_indices = @transform_7, window_bounds = array<i64: 16, 1, 16>}, {pipeline_mode = #tpu.pipeline_mode<synchronous>, transform_indices = @transform_8, window_bounds = array<i64: 4, 64, 64>}, {pipeline_mode = #tpu.pipeline_mode<synchronous>, transform_indices = @transform_9, window_bounds = array<i64: 6, 1, 64>}, {pipeline_mode = #tpu.pipeline_mode<synchronous>, transform_indices = @transform_10, window_bounds = array<i64: 2, 64, 256>}, {pipeline_mode = #tpu.pipeline_mode<synchronous>, transform_indices = @transform_11, window_bounds = array<i64: 2, 1, 256>}, {pipeline_mode = #tpu.pipeline_mode<synchronous>, transform_indices = @transform_12, window_bounds = array<i64: 2, 256, 64>}, {pipeline_mode = #tpu.pipeline_mode<synchronous>, transform_indices = @transform_13, window_bounds = array<i64: 2, 1, 64>}, {pipeline_mode = #tpu.pipeline_mode<synchronous>, transform_indices = @transform_14, window_bounds = array<i64: 64, 64>}, {pipeline_mode = #tpu.pipeline_mode<synchronous>, transform_indices = @transform_15, window_bounds = array<i64: 64, 64>}, {pipeline_mode = #tpu.pipeline_mode<synchronous>, transform_indices = @transform_16, window_bounds = array<i64: 64, 128>}, {pipeline_mode = #tpu.pipeline_mode<synchronous>, transform_indices = @transform_17, window_bounds = array<i64: 3, 1, 128>}, {transform_indices = @transform_18, window_bounds = array<i64: 8, 128>}]} {
    %c0 = arith.constant 0 : index
    %c0_0 = arith.constant 0 : index
    %0 = vector.load %arg1[%c0, %c0_0] : memref<40x768xbf16, #tpu.memory_space<vmem>>, vector<40x768xbf16>
    %c0_1 = arith.constant 0 : index
    %c0_2 = arith.constant 0 : index
    %1 = vector.load %arg5[%c0_1, %c0_2] : memref<768x64xbf16, #tpu.memory_space<vmem>>, vector<768x64xbf16>
    %cst = arith.constant dense<0.000000e+00> : vector<40x64xf32>
    %2 = tpu.matmul %0, %1, %cst {dimension_numbers = #tpu.dot_dimension_numbers<[1], [0], [0], [1], [0, 0, 1, 1], [], []>} : vector<40x768xbf16>, vector<768x64xbf16>, vector<40x64xf32> -> vector<40x64xf32>
    %c0_3 = arith.constant 0 : index
    %c0_4 = arith.constant 0 : index
    %3 = vector.load %arg2[%c0_3, %c0_4] : memref<40x64xf32, #tpu.memory_space<vmem>>, vector<40x64xf32>
    %4 = arith.addf %2, %3 : vector<40x64xf32>
    %c0_5 = arith.constant 0 : index
    %c0_6 = arith.constant 0 : index
    %5 = vector.load %arg4[%c0_5, %c0_6] : memref<40x40xf32, #tpu.memory_space<vmem>>, vector<40x40xf32>
    %6 = tpu.iota {dimensions = array<i32: 1>} : vector<1x64xi32>
    %c0_7 = arith.constant 0 : index
    %c0_8 = arith.constant 0 : index
    %c0_9 = arith.constant 0 : index
    %7 = vector.load %arg6[%c0_7, %c0_8, %c0_9] : memref<8x1x64xf32, #tpu.memory_space<vmem>>, vector<1x1x64xf32>
    %8 = vector.shape_cast %7 : vector<1x1x64xf32> to vector<1x64xf32>
    %c1 = arith.constant 1 : index
    %c0_10 = arith.constant 0 : index
    %c0_11 = arith.constant 0 : index
    %9 = vector.load %arg6[%c1, %c0_10, %c0_11] : memref<8x1x64xf32, #tpu.memory_space<vmem>>, vector<1x1x64xf32>
    %10 = vector.shape_cast %9 : vector<1x1x64xf32> to vector<1x64xf32>
    %cst_12 = arith.constant dense<0.000000e+00> : vector<40xf32>
    %11 = vector.multi_reduction <add>, %4, %cst_12 [1] : vector<40x64xf32> to vector<40xf32>
    %12 = vector.shape_cast %11 : vector<40xf32> to vector<40x1xf32>
    %cst_13 = arith.constant 6.400000e+01 : f32
    %13 = vector.broadcast %cst_13 : f32 to vector<40x1xf32>
    %14 = arith.divf %12, %13 : vector<40x1xf32>
    %15 = vector.broadcast %14 : vector<40x1xf32> to vector<40x64xf32>
    %16 = arith.subf %4, %15 : vector<40x64xf32>
    %17 = arith.mulf %16, %16 : vector<40x64xf32>
    %cst_14 = arith.constant dense<0.000000e+00> : vector<40xf32>
    %18 = vector.multi_reduction <add>, %17, %cst_14 [1] : vector<40x64xf32> to vector<40xf32>
    %19 = vector.shape_cast %18 : vector<40xf32> to vector<40x1xf32>
    %cst_15 = arith.constant 6.400000e+01 : f32
    %20 = vector.broadcast %cst_15 : f32 to vector<40x1xf32>
    %21 = arith.divf %19, %20 : vector<40x1xf32>
    %22 = vector.broadcast %14 : vector<40x1xf32> to vector<40x64xf32>
    %23 = arith.subf %4, %22 : vector<40x64xf32>
    %cst_16 = arith.constant 9.99999997E-7 : f32
    %24 = vector.broadcast %cst_16 : f32 to vector<40x1xf32>
    %25 = arith.addf %21, %24 : vector<40x1xf32>
    %26 = math.rsqrt %25 : vector<40x1xf32>
    %27 = vector.broadcast %26 : vector<40x1xf32> to vector<40x64xf32>
    %28 = arith.mulf %23, %27 : vector<40x64xf32>
    %29 = vector.broadcast %8 : vector<1x64xf32> to vector<40x64xf32>
    %30 = arith.mulf %28, %29 : vector<40x64xf32>
    %31 = vector.broadcast %10 : vector<1x64xf32> to vector<40x64xf32>
    %32 = arith.addf %30, %31 : vector<40x64xf32>
    %33 = arith.truncf %32 : vector<40x64xf32> to vector<40x64xbf16>
    %c0_17 = arith.constant 0 : index
    %c0_18 = arith.constant 0 : index
    %c0_19 = arith.constant 0 : index
    %34 = vector.load %arg9[%c0_17, %c0_18, %c0_19] : memref<4x64x64xbf16, #tpu.memory_space<vmem>>, vector<1x64x64xbf16>
    %35 = vector.shape_cast %34 : vector<1x64x64xbf16> to vector<64x64xbf16>
    %cst_20 = arith.constant dense<0.000000e+00> : vector<40x64xf32>
    %36 = tpu.matmul %33, %35, %cst_20 {dimension_numbers = #tpu.dot_dimension_numbers<[1], [0], [0], [1], [0, 0, 1, 1], [], []>} : vector<40x64xbf16>, vector<64x64xbf16>, vector<40x64xf32> -> vector<40x64xf32>
    %c0_21 = arith.constant 0 : index
    %c0_22 = arith.constant 0 : index
    %c0_23 = arith.constant 0 : index
    %37 = vector.load %arg10[%c0_21, %c0_22, %c0_23] : memref<6x1x64xf32, #tpu.memory_space<vmem>>, vector<1x1x64xf32>
    %38 = vector.shape_cast %37 : vector<1x1x64xf32> to vector<1x64xf32>
    %39 = vector.broadcast %38 : vector<1x64xf32> to vector<40x64xf32>
    %40 = arith.addf %36, %39 : vector<40x64xf32>
    %41 = arith.truncf %40 : vector<40x64xf32> to vector<40x64xbf16>
    %cst_24 = arith.constant 0.000000e+00 : f32
    %42 = vector.broadcast %cst_24 : f32 to vector<40x64xf32>
    %c0_25 = arith.constant 0 : index
    %c0_26 = arith.constant 0 : index
    %c0_27 = arith.constant 0 : index
    %43 = vector.load %arg7[%c0_25, %c0_26, %c0_27] : memref<16x64x16xbf16, #tpu.memory_space<vmem>>, vector<1x64x16xbf16>
    %44 = vector.shape_cast %43 : vector<1x64x16xbf16> to vector<64x16xbf16>
    %cst_28 = arith.constant dense<0.000000e+00> : vector<40x16xf32>
    %45 = tpu.matmul %33, %44, %cst_28 {dimension_numbers = #tpu.dot_dimension_numbers<[1], [0], [0], [1], [0, 0, 1, 1], [], []>} : vector<40x64xbf16>, vector<64x16xbf16>, vector<40x16xf32> -> vector<40x16xf32>
    %c0_29 = arith.constant 0 : index
    %c0_30 = arith.constant 0 : index
    %c0_31 = arith.constant 0 : index
    %46 = vector.load %arg8[%c0_29, %c0_30, %c0_31] : memref<16x1x16xf32, #tpu.memory_space<vmem>>, vector<1x1x16xf32>
    %47 = vector.shape_cast %46 : vector<1x1x16xf32> to vector<1x16xf32>
    %48 = vector.broadcast %47 : vector<1x16xf32> to vector<40x16xf32>
    %49 = arith.addf %45, %48 : vector<40x16xf32>
    %c1_32 = arith.constant 1 : index
    %c0_33 = arith.constant 0 : index
    %c0_34 = arith.constant 0 : index
    %50 = vector.load %arg7[%c1_32, %c0_33, %c0_34] : memref<16x64x16xbf16, #tpu.memory_space<vmem>>, vector<1x64x16xbf16>
    %51 = vector.shape_cast %50 : vector<1x64x16xbf16> to vector<64x16xbf16>
    %cst_35 = arith.constant dense<0.000000e+00> : vector<40x16xf32>
    %52 = tpu.matmul %33, %51, %cst_35 {dimension_numbers = #tpu.dot_dimension_numbers<[1], [0], [0], [1], [0, 0, 1, 1], [], []>} : vector<40x64xbf16>, vector<64x16xbf16>, vector<40x16xf32> -> vector<40x16xf32>
    %c1_36 = arith.constant 1 : index
    %c0_37 = arith.constant 0 : index
    %c0_38 = arith.constant 0 : index
    %53 = vector.load %arg8[%c1_36, %c0_37, %c0_38] : memref<16x1x16xf32, #tpu.memory_space<vmem>>, vector<1x1x16xf32>
    %54 = vector.shape_cast %53 : vector<1x1x16xf32> to vector<1x16xf32>
    %55 = vector.broadcast %54 : vector<1x16xf32> to vector<40x16xf32>
    %56 = arith.addf %52, %55 : vector<40x16xf32>
    %57 = arith.truncf %49 : vector<40x16xf32> to vector<40x16xbf16>
    %58 = arith.truncf %56 : vector<40x16xf32> to vector<40x16xbf16>
    %cst_39 = arith.constant dense<0.000000e+00> : vector<40x40xf32>
    %59 = tpu.matmul %57, %58, %cst_39 {dimension_numbers = #tpu.dot_dimension_numbers<[1], [1], [0], [0], [0, 0, 1, 0], [], []>} : vector<40x16xbf16>, vector<40x16xbf16>, vector<40x40xf32> -> vector<40x40xf32>
    %60 = arith.addf %59, %5 : vector<40x40xf32>
    %cst_40 = arith.constant dense<0xFF800000> : vector<40xf32>
    %61 = vector.multi_reduction <maximumf>, %60, %cst_40 [1] : vector<40x40xf32> to vector<40xf32>
    %62 = vector.shape_cast %61 : vector<40xf32> to vector<40x1xf32>
    %63 = vector.broadcast %62 : vector<40x1xf32> to vector<40x40xf32>
    %64 = arith.subf %60, %63 : vector<40x40xf32>
    %65 = math.exp %64 : vector<40x40xf32>
    %cst_41 = arith.constant dense<0.000000e+00> : vector<40xf32>
    %66 = vector.multi_reduction <add>, %65, %cst_41 [1] : vector<40x40xf32> to vector<40xf32>
    %67 = vector.shape_cast %66 : vector<40xf32> to vector<40x1xf32>
    %68 = vector.broadcast %67 : vector<40x1xf32> to vector<40x40xf32>
    %69 = arith.divf %65, %68 : vector<40x40xf32>
    %70 = arith.truncf %69 : vector<40x40xf32> to vector<40x40xbf16>
    %cst_42 = arith.constant dense<0.000000e+00> : vector<40x64xf32>
    %71 = tpu.matmul %70, %41, %cst_42 {dimension_numbers = #tpu.dot_dimension_numbers<[1], [0], [0], [1], [0, 0, 1, 1], [], []>} : vector<40x40xbf16>, vector<40x64xbf16>, vector<40x64xf32> -> vector<40x64xf32>
    %c0_i32 = arith.constant 0 : i32
    %72 = vector.broadcast %c0_i32 : i32 to vector<1x64xi32>
    %73 = arith.cmpi sge, %6, %72 : vector<1x64xi32>
    %c16_i32 = arith.constant 16 : i32
    %74 = vector.broadcast %c16_i32 : i32 to vector<1x64xi32>
    %75 = arith.cmpi slt, %6, %74 : vector<1x64xi32>
    %76 = arith.andi %73, %75 : vector<1x64xi1>
    %cst_43 = arith.constant 0.000000e+00 : f32
    %77 = vector.shape_cast %76 : vector<1x64xi1> to vector<1x64xi1>
    %78 = vector.broadcast %77 : vector<1x64xi1> to vector<40x64xi1>
    %79 = vector.broadcast %cst_43 : f32 to vector<40x64xf32>
    %80 = arith.select %78, %71, %79 : vector<40x64xi1>, vector<40x64xf32>
    %81 = arith.addf %42, %80 : vector<40x64xf32>
    %c2 = arith.constant 2 : index
    %c0_44 = arith.constant 0 : index
    %c0_45 = arith.constant 0 : index
    %82 = vector.load %arg7[%c2, %c0_44, %c0_45] : memref<16x64x16xbf16, #tpu.memory_space<vmem>>, vector<1x64x16xbf16>
    %83 = vector.shape_cast %82 : vector<1x64x16xbf16> to vector<64x16xbf16>
    %cst_46 = arith.constant dense<0.000000e+00> : vector<40x16xf32>
    %84 = tpu.matmul %33, %83, %cst_46 {dimension_numbers = #tpu.dot_dimension_numbers<[1], [0], [0], [1], [0, 0, 1, 1], [], []>} : vector<40x64xbf16>, vector<64x16xbf16>, vector<40x16xf32> -> vector<40x16xf32>
    %c2_47 = arith.constant 2 : index
    %c0_48 = arith.constant 0 : index
    %c0_49 = arith.constant 0 : index
    %85 = vector.load %arg8[%c2_47, %c0_48, %c0_49] : memref<16x1x16xf32, #tpu.memory_space<vmem>>, vector<1x1x16xf32>
    %86 = vector.shape_cast %85 : vector<1x1x16xf32> to vector<1x16xf32>
    %87 = vector.broadcast %86 : vector<1x16xf32> to vector<40x16xf32>
    %88 = arith.addf %84, %87 : vector<40x16xf32>
    %c3 = arith.constant 3 : index
    %c0_50 = arith.constant 0 : index
    %c0_51 = arith.constant 0 : index
    %89 = vector.load %arg7[%c3, %c0_50, %c0_51] : memref<16x64x16xbf16, #tpu.memory_space<vmem>>, vector<1x64x16xbf16>
    %90 = vector.shape_cast %89 : vector<1x64x16xbf16> to vector<64x16xbf16>
    %cst_52 = arith.constant dense<0.000000e+00> : vector<40x16xf32>
    %91 = tpu.matmul %33, %90, %cst_52 {dimension_numbers = #tpu.dot_dimension_numbers<[1], [0], [0], [1], [0, 0, 1, 1], [], []>} : vector<40x64xbf16>, vector<64x16xbf16>, vector<40x16xf32> -> vector<40x16xf32>
    %c3_53 = arith.constant 3 : index
    %c0_54 = arith.constant 0 : index
    %c0_55 = arith.constant 0 : index
    %92 = vector.load %arg8[%c3_53, %c0_54, %c0_55] : memref<16x1x16xf32, #tpu.memory_space<vmem>>, vector<1x1x16xf32>
    %93 = vector.shape_cast %92 : vector<1x1x16xf32> to vector<1x16xf32>
    %94 = vector.broadcast %93 : vector<1x16xf32> to vector<40x16xf32>
    %95 = arith.addf %91, %94 : vector<40x16xf32>
    %96 = arith.truncf %88 : vector<40x16xf32> to vector<40x16xbf16>
    %97 = arith.truncf %95 : vector<40x16xf32> to vector<40x16xbf16>
    %cst_56 = arith.constant dense<0.000000e+00> : vector<40x40xf32>
    %98 = tpu.matmul %96, %97, %cst_56 {dimension_numbers = #tpu.dot_dimension_numbers<[1], [1], [0], [0], [0, 0, 1, 0], [], []>} : vector<40x16xbf16>, vector<40x16xbf16>, vector<40x40xf32> -> vector<40x40xf32>
    %99 = arith.addf %98, %5 : vector<40x40xf32>
    %cst_57 = arith.constant dense<0xFF800000> : vector<40xf32>
    %100 = vector.multi_reduction <maximumf>, %99, %cst_57 [1] : vector<40x40xf32> to vector<40xf32>
    %101 = vector.shape_cast %100 : vector<40xf32> to vector<40x1xf32>
    %102 = vector.broadcast %101 : vector<40x1xf32> to vector<40x40xf32>
    %103 = arith.subf %99, %102 : vector<40x40xf32>
    %104 = math.exp %103 : vector<40x40xf32>
    %cst_58 = arith.constant dense<0.000000e+00> : vector<40xf32>
    %105 = vector.multi_reduction <add>, %104, %cst_58 [1] : vector<40x40xf32> to vector<40xf32>
    %106 = vector.shape_cast %105 : vector<40xf32> to vector<40x1xf32>
    %107 = vector.broadcast %106 : vector<40x1xf32> to vector<40x40xf32>
    %108 = arith.divf %104, %107 : vector<40x40xf32>
    %109 = arith.truncf %108 : vector<40x40xf32> to vector<40x40xbf16>
    %cst_59 = arith.constant dense<0.000000e+00> : vector<40x64xf32>
    %110 = tpu.matmul %109, %41, %cst_59 {dimension_numbers = #tpu.dot_dimension_numbers<[1], [0], [0], [1], [0, 0, 1, 1], [], []>} : vector<40x40xbf16>, vector<40x64xbf16>, vector<40x64xf32> -> vector<40x64xf32>
    %c16_i32_60 = arith.constant 16 : i32
    %111 = vector.broadcast %c16_i32_60 : i32 to vector<1x64xi32>
    %112 = arith.cmpi sge, %6, %111 : vector<1x64xi32>
    %c32_i32 = arith.constant 32 : i32
    %113 = vector.broadcast %c32_i32 : i32 to vector<1x64xi32>
    %114 = arith.cmpi slt, %6, %113 : vector<1x64xi32>
    %115 = arith.andi %112, %114 : vector<1x64xi1>
    %cst_61 = arith.constant 0.000000e+00 : f32
    %116 = vector.shape_cast %115 : vector<1x64xi1> to vector<1x64xi1>
    %117 = vector.broadcast %116 : vector<1x64xi1> to vector<40x64xi1>
    %118 = vector.broadcast %cst_61 : f32 to vector<40x64xf32>
    %119 = arith.select %117, %110, %118 : vector<40x64xi1>, vector<40x64xf32>
    %120 = arith.addf %81, %119 : vector<40x64xf32>
    %c4 = arith.constant 4 : index
    %c0_62 = arith.constant 0 : index
    %c0_63 = arith.constant 0 : index
    %121 = vector.load %arg7[%c4, %c0_62, %c0_63] : memref<16x64x16xbf16, #tpu.memory_space<vmem>>, vector<1x64x16xbf16>
    %122 = vector.shape_cast %121 : vector<1x64x16xbf16> to vector<64x16xbf16>
    %cst_64 = arith.constant dense<0.000000e+00> : vector<40x16xf32>
    %123 = tpu.matmul %33, %122, %cst_64 {dimension_numbers = #tpu.dot_dimension_numbers<[1], [0], [0], [1], [0, 0, 1, 1], [], []>} : vector<40x64xbf16>, vector<64x16xbf16>, vector<40x16xf32> -> vector<40x16xf32>
    %c4_65 = arith.constant 4 : index
    %c0_66 = arith.constant 0 : index
    %c0_67 = arith.constant 0 : index
    %124 = vector.load %arg8[%c4_65, %c0_66, %c0_67] : memref<16x1x16xf32, #tpu.memory_space<vmem>>, vector<1x1x16xf32>
    %125 = vector.shape_cast %124 : vector<1x1x16xf32> to vector<1x16xf32>
    %126 = vector.broadcast %125 : vector<1x16xf32> to vector<40x16xf32>
    %127 = arith.addf %123, %126 : vector<40x16xf32>
    %c5 = arith.constant 5 : index
    %c0_68 = arith.constant 0 : index
    %c0_69 = arith.constant 0 : index
    %128 = vector.load %arg7[%c5, %c0_68, %c0_69] : memref<16x64x16xbf16, #tpu.memory_space<vmem>>, vector<1x64x16xbf16>
    %129 = vector.shape_cast %128 : vector<1x64x16xbf16> to vector<64x16xbf16>
    %cst_70 = arith.constant dense<0.000000e+00> : vector<40x16xf32>
    %130 = tpu.matmul %33, %129, %cst_70 {dimension_numbers = #tpu.dot_dimension_numbers<[1], [0], [0], [1], [0, 0, 1, 1], [], []>} : vector<40x64xbf16>, vector<64x16xbf16>, vector<40x16xf32> -> vector<40x16xf32>
    %c5_71 = arith.constant 5 : index
    %c0_72 = arith.constant 0 : index
    %c0_73 = arith.constant 0 : index
    %131 = vector.load %arg8[%c5_71, %c0_72, %c0_73] : memref<16x1x16xf32, #tpu.memory_space<vmem>>, vector<1x1x16xf32>
    %132 = vector.shape_cast %131 : vector<1x1x16xf32> to vector<1x16xf32>
    %133 = vector.broadcast %132 : vector<1x16xf32> to vector<40x16xf32>
    %134 = arith.addf %130, %133 : vector<40x16xf32>
    %135 = arith.truncf %127 : vector<40x16xf32> to vector<40x16xbf16>
    %136 = arith.truncf %134 : vector<40x16xf32> to vector<40x16xbf16>
    %cst_74 = arith.constant dense<0.000000e+00> : vector<40x40xf32>
    %137 = tpu.matmul %135, %136, %cst_74 {dimension_numbers = #tpu.dot_dimension_numbers<[1], [1], [0], [0], [0, 0, 1, 0], [], []>} : vector<40x16xbf16>, vector<40x16xbf16>, vector<40x40xf32> -> vector<40x40xf32>
    %138 = arith.addf %137, %5 : vector<40x40xf32>
    %cst_75 = arith.constant dense<0xFF800000> : vector<40xf32>
    %139 = vector.multi_reduction <maximumf>, %138, %cst_75 [1] : vector<40x40xf32> to vector<40xf32>
    %140 = vector.shape_cast %139 : vector<40xf32> to vector<40x1xf32>
    %141 = vector.broadcast %140 : vector<40x1xf32> to vector<40x40xf32>
    %142 = arith.subf %138, %141 : vector<40x40xf32>
    %143 = math.exp %142 : vector<40x40xf32>
    %cst_76 = arith.constant dense<0.000000e+00> : vector<40xf32>
    %144 = vector.multi_reduction <add>, %143, %cst_76 [1] : vector<40x40xf32> to vector<40xf32>
    %145 = vector.shape_cast %144 : vector<40xf32> to vector<40x1xf32>
    %146 = vector.broadcast %145 : vector<40x1xf32> to vector<40x40xf32>
    %147 = arith.divf %143, %146 : vector<40x40xf32>
    %148 = arith.truncf %147 : vector<40x40xf32> to vector<40x40xbf16>
    %cst_77 = arith.constant dense<0.000000e+00> : vector<40x64xf32>
    %149 = tpu.matmul %148, %41, %cst_77 {dimension_numbers = #tpu.dot_dimension_numbers<[1], [0], [0], [1], [0, 0, 1, 1], [], []>} : vector<40x40xbf16>, vector<40x64xbf16>, vector<40x64xf32> -> vector<40x64xf32>
    %c32_i32_78 = arith.constant 32 : i32
    %150 = vector.broadcast %c32_i32_78 : i32 to vector<1x64xi32>
    %151 = arith.cmpi sge, %6, %150 : vector<1x64xi32>
    %c48_i32 = arith.constant 48 : i32
    %152 = vector.broadcast %c48_i32 : i32 to vector<1x64xi32>
    %153 = arith.cmpi slt, %6, %152 : vector<1x64xi32>
    %154 = arith.andi %151, %153 : vector<1x64xi1>
    %cst_79 = arith.constant 0.000000e+00 : f32
    %155 = vector.shape_cast %154 : vector<1x64xi1> to vector<1x64xi1>
    %156 = vector.broadcast %155 : vector<1x64xi1> to vector<40x64xi1>
    %157 = vector.broadcast %cst_79 : f32 to vector<40x64xf32>
    %158 = arith.select %156, %149, %157 : vector<40x64xi1>, vector<40x64xf32>
    %159 = arith.addf %120, %158 : vector<40x64xf32>
    %c6 = arith.constant 6 : index
    %c0_80 = arith.constant 0 : index
    %c0_81 = arith.constant 0 : index
    %160 = vector.load %arg7[%c6, %c0_80, %c0_81] : memref<16x64x16xbf16, #tpu.memory_space<vmem>>, vector<1x64x16xbf16>
    %161 = vector.shape_cast %160 : vector<1x64x16xbf16> to vector<64x16xbf16>
    %cst_82 = arith.constant dense<0.000000e+00> : vector<40x16xf32>
    %162 = tpu.matmul %33, %161, %cst_82 {dimension_numbers = #tpu.dot_dimension_numbers<[1], [0], [0], [1], [0, 0, 1, 1], [], []>} : vector<40x64xbf16>, vector<64x16xbf16>, vector<40x16xf32> -> vector<40x16xf32>
    %c6_83 = arith.constant 6 : index
    %c0_84 = arith.constant 0 : index
    %c0_85 = arith.constant 0 : index
    %163 = vector.load %arg8[%c6_83, %c0_84, %c0_85] : memref<16x1x16xf32, #tpu.memory_space<vmem>>, vector<1x1x16xf32>
    %164 = vector.shape_cast %163 : vector<1x1x16xf32> to vector<1x16xf32>
    %165 = vector.broadcast %164 : vector<1x16xf32> to vector<40x16xf32>
    %166 = arith.addf %162, %165 : vector<40x16xf32>
    %c7 = arith.constant 7 : index
    %c0_86 = arith.constant 0 : index
    %c0_87 = arith.constant 0 : index
    %167 = vector.load %arg7[%c7, %c0_86, %c0_87] : memref<16x64x16xbf16, #tpu.memory_space<vmem>>, vector<1x64x16xbf16>
    %168 = vector.shape_cast %167 : vector<1x64x16xbf16> to vector<64x16xbf16>
    %cst_88 = arith.constant dense<0.000000e+00> : vector<40x16xf32>
    %169 = tpu.matmul %33, %168, %cst_88 {dimension_numbers = #tpu.dot_dimension_numbers<[1], [0], [0], [1], [0, 0, 1, 1], [], []>} : vector<40x64xbf16>, vector<64x16xbf16>, vector<40x16xf32> -> vector<40x16xf32>
    %c7_89 = arith.constant 7 : index
    %c0_90 = arith.constant 0 : index
    %c0_91 = arith.constant 0 : index
    %170 = vector.load %arg8[%c7_89, %c0_90, %c0_91] : memref<16x1x16xf32, #tpu.memory_space<vmem>>, vector<1x1x16xf32>
    %171 = vector.shape_cast %170 : vector<1x1x16xf32> to vector<1x16xf32>
    %172 = vector.broadcast %171 : vector<1x16xf32> to vector<40x16xf32>
    %173 = arith.addf %169, %172 : vector<40x16xf32>
    %174 = arith.truncf %166 : vector<40x16xf32> to vector<40x16xbf16>
    %175 = arith.truncf %173 : vector<40x16xf32> to vector<40x16xbf16>
    %cst_92 = arith.constant dense<0.000000e+00> : vector<40x40xf32>
    %176 = tpu.matmul %174, %175, %cst_92 {dimension_numbers = #tpu.dot_dimension_numbers<[1], [1], [0], [0], [0, 0, 1, 0], [], []>} : vector<40x16xbf16>, vector<40x16xbf16>, vector<40x40xf32> -> vector<40x40xf32>
    %177 = arith.addf %176, %5 : vector<40x40xf32>
    %cst_93 = arith.constant dense<0xFF800000> : vector<40xf32>
    %178 = vector.multi_reduction <maximumf>, %177, %cst_93 [1] : vector<40x40xf32> to vector<40xf32>
    %179 = vector.shape_cast %178 : vector<40xf32> to vector<40x1xf32>
    %180 = vector.broadcast %179 : vector<40x1xf32> to vector<40x40xf32>
    %181 = arith.subf %177, %180 : vector<40x40xf32>
    %182 = math.exp %181 : vector<40x40xf32>
    %cst_94 = arith.constant dense<0.000000e+00> : vector<40xf32>
    %183 = vector.multi_reduction <add>, %182, %cst_94 [1] : vector<40x40xf32> to vector<40xf32>
    %184 = vector.shape_cast %183 : vector<40xf32> to vector<40x1xf32>
    %185 = vector.broadcast %184 : vector<40x1xf32> to vector<40x40xf32>
    %186 = arith.divf %182, %185 : vector<40x40xf32>
    %187 = arith.truncf %186 : vector<40x40xf32> to vector<40x40xbf16>
    %cst_95 = arith.constant dense<0.000000e+00> : vector<40x64xf32>
    %188 = tpu.matmul %187, %41, %cst_95 {dimension_numbers = #tpu.dot_dimension_numbers<[1], [0], [0], [1], [0, 0, 1, 1], [], []>} : vector<40x40xbf16>, vector<40x64xbf16>, vector<40x64xf32> -> vector<40x64xf32>
    %c48_i32_96 = arith.constant 48 : i32
    %189 = vector.broadcast %c48_i32_96 : i32 to vector<1x64xi32>
    %190 = arith.cmpi sge, %6, %189 : vector<1x64xi32>
    %c64_i32 = arith.constant 64 : i32
    %191 = vector.broadcast %c64_i32 : i32 to vector<1x64xi32>
    %192 = arith.cmpi slt, %6, %191 : vector<1x64xi32>
    %193 = arith.andi %190, %192 : vector<1x64xi1>
    %cst_97 = arith.constant 0.000000e+00 : f32
    %194 = vector.shape_cast %193 : vector<1x64xi1> to vector<1x64xi1>
    %195 = vector.broadcast %194 : vector<1x64xi1> to vector<40x64xi1>
    %196 = vector.broadcast %cst_97 : f32 to vector<40x64xf32>
    %197 = arith.select %195, %188, %196 : vector<40x64xi1>, vector<40x64xf32>
    %198 = arith.addf %159, %197 : vector<40x64xf32>
    %199 = arith.truncf %198 : vector<40x64xf32> to vector<40x64xbf16>
    %c1_98 = arith.constant 1 : index
    %c0_99 = arith.constant 0 : index
    %c0_100 = arith.constant 0 : index
    %200 = vector.load %arg9[%c1_98, %c0_99, %c0_100] : memref<4x64x64xbf16, #tpu.memory_space<vmem>>, vector<1x64x64xbf16>
    %201 = vector.shape_cast %200 : vector<1x64x64xbf16> to vector<64x64xbf16>
    %cst_101 = arith.constant dense<0.000000e+00> : vector<40x64xf32>
    %202 = tpu.matmul %199, %201, %cst_101 {dimension_numbers = #tpu.dot_dimension_numbers<[1], [0], [0], [1], [0, 0, 1, 1], [], []>} : vector<40x64xbf16>, vector<64x64xbf16>, vector<40x64xf32> -> vector<40x64xf32>
    %c1_102 = arith.constant 1 : index
    %c0_103 = arith.constant 0 : index
    %c0_104 = arith.constant 0 : index
    %203 = vector.load %arg10[%c1_102, %c0_103, %c0_104] : memref<6x1x64xf32, #tpu.memory_space<vmem>>, vector<1x1x64xf32>
    %204 = vector.shape_cast %203 : vector<1x1x64xf32> to vector<1x64xf32>
    %205 = vector.broadcast %204 : vector<1x64xf32> to vector<40x64xf32>
    %206 = arith.addf %202, %205 : vector<40x64xf32>
    %207 = arith.addf %4, %206 : vector<40x64xf32>
    %c2_105 = arith.constant 2 : index
    %c0_106 = arith.constant 0 : index
    %c0_107 = arith.constant 0 : index
    %208 = vector.load %arg6[%c2_105, %c0_106, %c0_107] : memref<8x1x64xf32, #tpu.memory_space<vmem>>, vector<1x1x64xf32>
    %209 = vector.shape_cast %208 : vector<1x1x64xf32> to vector<1x64xf32>
    %c3_108 = arith.constant 3 : index
    %c0_109 = arith.constant 0 : index
    %c0_110 = arith.constant 0 : index
    %210 = vector.load %arg6[%c3_108, %c0_109, %c0_110] : memref<8x1x64xf32, #tpu.memory_space<vmem>>, vector<1x1x64xf32>
    %211 = vector.shape_cast %210 : vector<1x1x64xf32> to vector<1x64xf32>
    %cst_111 = arith.constant dense<0.000000e+00> : vector<40xf32>
    %212 = vector.multi_reduction <add>, %207, %cst_111 [1] : vector<40x64xf32> to vector<40xf32>
    %213 = vector.shape_cast %212 : vector<40xf32> to vector<40x1xf32>
    %cst_112 = arith.constant 6.400000e+01 : f32
    %214 = vector.broadcast %cst_112 : f32 to vector<40x1xf32>
    %215 = arith.divf %213, %214 : vector<40x1xf32>
    %216 = vector.broadcast %215 : vector<40x1xf32> to vector<40x64xf32>
    %217 = arith.subf %207, %216 : vector<40x64xf32>
    %218 = arith.mulf %217, %217 : vector<40x64xf32>
    %cst_113 = arith.constant dense<0.000000e+00> : vector<40xf32>
    %219 = vector.multi_reduction <add>, %218, %cst_113 [1] : vector<40x64xf32> to vector<40xf32>
    %220 = vector.shape_cast %219 : vector<40xf32> to vector<40x1xf32>
    %cst_114 = arith.constant 6.400000e+01 : f32
    %221 = vector.broadcast %cst_114 : f32 to vector<40x1xf32>
    %222 = arith.divf %220, %221 : vector<40x1xf32>
    %223 = vector.broadcast %215 : vector<40x1xf32> to vector<40x64xf32>
    %224 = arith.subf %207, %223 : vector<40x64xf32>
    %cst_115 = arith.constant 9.99999997E-7 : f32
    %225 = vector.broadcast %cst_115 : f32 to vector<40x1xf32>
    %226 = arith.addf %222, %225 : vector<40x1xf32>
    %227 = math.rsqrt %226 : vector<40x1xf32>
    %228 = vector.broadcast %227 : vector<40x1xf32> to vector<40x64xf32>
    %229 = arith.mulf %224, %228 : vector<40x64xf32>
    %230 = vector.broadcast %209 : vector<1x64xf32> to vector<40x64xf32>
    %231 = arith.mulf %229, %230 : vector<40x64xf32>
    %232 = vector.broadcast %211 : vector<1x64xf32> to vector<40x64xf32>
    %233 = arith.addf %231, %232 : vector<40x64xf32>
    %234 = arith.truncf %233 : vector<40x64xf32> to vector<40x64xbf16>
    %c0_116 = arith.constant 0 : index
    %c0_117 = arith.constant 0 : index
    %c0_118 = arith.constant 0 : index
    %235 = vector.load %arg11[%c0_116, %c0_117, %c0_118] : memref<2x64x256xbf16, #tpu.memory_space<vmem>>, vector<1x64x256xbf16>
    %236 = vector.shape_cast %235 : vector<1x64x256xbf16> to vector<64x256xbf16>
    %cst_119 = arith.constant dense<0.000000e+00> : vector<40x256xf32>
    %237 = tpu.matmul %234, %236, %cst_119 {dimension_numbers = #tpu.dot_dimension_numbers<[1], [0], [0], [1], [0, 0, 1, 1], [], []>} : vector<40x64xbf16>, vector<64x256xbf16>, vector<40x256xf32> -> vector<40x256xf32>
    %c0_120 = arith.constant 0 : index
    %c0_121 = arith.constant 0 : index
    %c0_122 = arith.constant 0 : index
    %238 = vector.load %arg12[%c0_120, %c0_121, %c0_122] : memref<2x1x256xf32, #tpu.memory_space<vmem>>, vector<1x1x256xf32>
    %239 = vector.shape_cast %238 : vector<1x1x256xf32> to vector<1x256xf32>
    %240 = vector.broadcast %239 : vector<1x256xf32> to vector<40x256xf32>
    %241 = arith.addf %237, %240 : vector<40x256xf32>
    %cst_123 = arith.constant 0.707106769 : f32
    %242 = vector.broadcast %cst_123 : f32 to vector<40x256xf32>
    %243 = arith.mulf %241, %242 : vector<40x256xf32>
    %244 = math.absf %243 : vector<40x256xf32>
    %cst_124 = arith.constant 0.327591091 : f32
    %245 = vector.broadcast %cst_124 : f32 to vector<40x256xf32>
    %246 = arith.mulf %245, %244 : vector<40x256xf32>
    %cst_125 = arith.constant 1.000000e+00 : f32
    %247 = vector.broadcast %cst_125 : f32 to vector<40x256xf32>
    %248 = arith.addf %247, %246 : vector<40x256xf32>
    %cst_126 = arith.constant 1.000000e+00 : f32
    %249 = vector.broadcast %cst_126 : f32 to vector<40x256xf32>
    %250 = arith.divf %249, %248 : vector<40x256xf32>
    %cst_127 = arith.constant 1.06140542 : f32
    %251 = vector.broadcast %cst_127 : f32 to vector<40x256xf32>
    %252 = arith.mulf %251, %250 : vector<40x256xf32>
    %cst_128 = arith.constant 1.45315206 : f32
    %253 = vector.broadcast %cst_128 : f32 to vector<40x256xf32>
    %254 = arith.subf %252, %253 : vector<40x256xf32>
    %255 = arith.mulf %254, %250 : vector<40x256xf32>
    %cst_129 = arith.constant 1.42141378 : f32
    %256 = vector.broadcast %cst_129 : f32 to vector<40x256xf32>
    %257 = arith.addf %255, %256 : vector<40x256xf32>
    %258 = arith.mulf %257, %250 : vector<40x256xf32>
    %cst_130 = arith.constant 0.284496725 : f32
    %259 = vector.broadcast %cst_130 : f32 to vector<40x256xf32>
    %260 = arith.subf %258, %259 : vector<40x256xf32>
    %261 = arith.mulf %260, %250 : vector<40x256xf32>
    %cst_131 = arith.constant 0.254829586 : f32
    %262 = vector.broadcast %cst_131 : f32 to vector<40x256xf32>
    %263 = arith.addf %261, %262 : vector<40x256xf32>
    %264 = arith.mulf %263, %250 : vector<40x256xf32>
    %cst_132 = arith.constant 0.000000e+00 : f32
    %265 = vector.broadcast %cst_132 : f32 to vector<40x256xf32>
    %266 = arith.subf %265, %244 : vector<40x256xf32>
    %267 = arith.mulf %266, %244 : vector<40x256xf32>
    %268 = math.exp %267 : vector<40x256xf32>
    %269 = arith.mulf %264, %268 : vector<40x256xf32>
    %cst_133 = arith.constant 1.000000e+00 : f32
    %270 = vector.broadcast %cst_133 : f32 to vector<40x256xf32>
    %271 = arith.subf %270, %269 : vector<40x256xf32>
    %cst_134 = arith.constant 0.000000e+00 : f32
    %272 = vector.broadcast %cst_134 : f32 to vector<40x256xf32>
    %273 = arith.cmpf oge, %243, %272 : vector<40x256xf32>
    %cst_135 = arith.constant 0.000000e+00 : f32
    %274 = vector.broadcast %cst_135 : f32 to vector<40x256xf32>
    %275 = arith.subf %274, %271 : vector<40x256xf32>
    %276 = arith.select %273, %271, %275 : vector<40x256xi1>, vector<40x256xf32>
    %cst_136 = arith.constant 5.000000e-01 : f32
    %277 = vector.broadcast %cst_136 : f32 to vector<40x256xf32>
    %278 = arith.mulf %277, %241 : vector<40x256xf32>
    %cst_137 = arith.constant 1.000000e+00 : f32
    %279 = vector.broadcast %cst_137 : f32 to vector<40x256xf32>
    %280 = arith.addf %279, %276 : vector<40x256xf32>
    %281 = arith.mulf %278, %280 : vector<40x256xf32>
    %282 = arith.truncf %281 : vector<40x256xf32> to vector<40x256xbf16>
    %c0_138 = arith.constant 0 : index
    %c0_139 = arith.constant 0 : index
    %c0_140 = arith.constant 0 : index
    %283 = vector.load %arg13[%c0_138, %c0_139, %c0_140] : memref<2x256x64xbf16, #tpu.memory_space<vmem>>, vector<1x256x64xbf16>
    %284 = vector.shape_cast %283 : vector<1x256x64xbf16> to vector<256x64xbf16>
    %cst_141 = arith.constant dense<0.000000e+00> : vector<40x64xf32>
    %285 = tpu.matmul %282, %284, %cst_141 {dimension_numbers = #tpu.dot_dimension_numbers<[1], [0], [0], [1], [0, 0, 1, 1], [], []>} : vector<40x256xbf16>, vector<256x64xbf16>, vector<40x64xf32> -> vector<40x64xf32>
    %c2_142 = arith.constant 2 : index
    %c0_143 = arith.constant 0 : index
    %c0_144 = arith.constant 0 : index
    %286 = vector.load %arg10[%c2_142, %c0_143, %c0_144] : memref<6x1x64xf32, #tpu.memory_space<vmem>>, vector<1x1x64xf32>
    %287 = vector.shape_cast %286 : vector<1x1x64xf32> to vector<1x64xf32>
    %288 = vector.broadcast %287 : vector<1x64xf32> to vector<40x64xf32>
    %289 = arith.addf %285, %288 : vector<40x64xf32>
    %290 = arith.addf %207, %289 : vector<40x64xf32>
    %c4_145 = arith.constant 4 : index
    %c0_146 = arith.constant 0 : index
    %c0_147 = arith.constant 0 : index
    %291 = vector.load %arg6[%c4_145, %c0_146, %c0_147] : memref<8x1x64xf32, #tpu.memory_space<vmem>>, vector<1x1x64xf32>
    %292 = vector.shape_cast %291 : vector<1x1x64xf32> to vector<1x64xf32>
    %c5_148 = arith.constant 5 : index
    %c0_149 = arith.constant 0 : index
    %c0_150 = arith.constant 0 : index
    %293 = vector.load %arg6[%c5_148, %c0_149, %c0_150] : memref<8x1x64xf32, #tpu.memory_space<vmem>>, vector<1x1x64xf32>
    %294 = vector.shape_cast %293 : vector<1x1x64xf32> to vector<1x64xf32>
    %cst_151 = arith.constant dense<0.000000e+00> : vector<40xf32>
    %295 = vector.multi_reduction <add>, %290, %cst_151 [1] : vector<40x64xf32> to vector<40xf32>
    %296 = vector.shape_cast %295 : vector<40xf32> to vector<40x1xf32>
    %cst_152 = arith.constant 6.400000e+01 : f32
    %297 = vector.broadcast %cst_152 : f32 to vector<40x1xf32>
    %298 = arith.divf %296, %297 : vector<40x1xf32>
    %299 = vector.broadcast %298 : vector<40x1xf32> to vector<40x64xf32>
    %300 = arith.subf %290, %299 : vector<40x64xf32>
    %301 = arith.mulf %300, %300 : vector<40x64xf32>
    %cst_153 = arith.constant dense<0.000000e+00> : vector<40xf32>
    %302 = vector.multi_reduction <add>, %301, %cst_153 [1] : vector<40x64xf32> to vector<40xf32>
    %303 = vector.shape_cast %302 : vector<40xf32> to vector<40x1xf32>
    %cst_154 = arith.constant 6.400000e+01 : f32
    %304 = vector.broadcast %cst_154 : f32 to vector<40x1xf32>
    %305 = arith.divf %303, %304 : vector<40x1xf32>
    %306 = vector.broadcast %298 : vector<40x1xf32> to vector<40x64xf32>
    %307 = arith.subf %290, %306 : vector<40x64xf32>
    %cst_155 = arith.constant 9.99999997E-7 : f32
    %308 = vector.broadcast %cst_155 : f32 to vector<40x1xf32>
    %309 = arith.addf %305, %308 : vector<40x1xf32>
    %310 = math.rsqrt %309 : vector<40x1xf32>
    %311 = vector.broadcast %310 : vector<40x1xf32> to vector<40x64xf32>
    %312 = arith.mulf %307, %311 : vector<40x64xf32>
    %313 = vector.broadcast %292 : vector<1x64xf32> to vector<40x64xf32>
    %314 = arith.mulf %312, %313 : vector<40x64xf32>
    %315 = vector.broadcast %294 : vector<1x64xf32> to vector<40x64xf32>
    %316 = arith.addf %314, %315 : vector<40x64xf32>
    %317 = arith.truncf %316 : vector<40x64xf32> to vector<40x64xbf16>
    %c2_156 = arith.constant 2 : index
    %c0_157 = arith.constant 0 : index
    %c0_158 = arith.constant 0 : index
    %318 = vector.load %arg9[%c2_156, %c0_157, %c0_158] : memref<4x64x64xbf16, #tpu.memory_space<vmem>>, vector<1x64x64xbf16>
    %319 = vector.shape_cast %318 : vector<1x64x64xbf16> to vector<64x64xbf16>
    %cst_159 = arith.constant dense<0.000000e+00> : vector<40x64xf32>
    %320 = tpu.matmul %317, %319, %cst_159 {dimension_numbers = #tpu.dot_dimension_numbers<[1], [0], [0], [1], [0, 0, 1, 1], [], []>} : vector<40x64xbf16>, vector<64x64xbf16>, vector<40x64xf32> -> vector<40x64xf32>
    %c3_160 = arith.constant 3 : index
    %c0_161 = arith.constant 0 : index
    %c0_162 = arith.constant 0 : index
    %321 = vector.load %arg10[%c3_160, %c0_161, %c0_162] : memref<6x1x64xf32, #tpu.memory_space<vmem>>, vector<1x1x64xf32>
    %322 = vector.shape_cast %321 : vector<1x1x64xf32> to vector<1x64xf32>
    %323 = vector.broadcast %322 : vector<1x64xf32> to vector<40x64xf32>
    %324 = arith.addf %320, %323 : vector<40x64xf32>
    %325 = arith.truncf %324 : vector<40x64xf32> to vector<40x64xbf16>
    %cst_163 = arith.constant 0.000000e+00 : f32
    %326 = vector.broadcast %cst_163 : f32 to vector<40x64xf32>
    %c8 = arith.constant 8 : index
    %c0_164 = arith.constant 0 : index
    %c0_165 = arith.constant 0 : index
    %327 = vector.load %arg7[%c8, %c0_164, %c0_165] : memref<16x64x16xbf16, #tpu.memory_space<vmem>>, vector<1x64x16xbf16>
    %328 = vector.shape_cast %327 : vector<1x64x16xbf16> to vector<64x16xbf16>
    %cst_166 = arith.constant dense<0.000000e+00> : vector<40x16xf32>
    %329 = tpu.matmul %317, %328, %cst_166 {dimension_numbers = #tpu.dot_dimension_numbers<[1], [0], [0], [1], [0, 0, 1, 1], [], []>} : vector<40x64xbf16>, vector<64x16xbf16>, vector<40x16xf32> -> vector<40x16xf32>
    %c8_167 = arith.constant 8 : index
    %c0_168 = arith.constant 0 : index
    %c0_169 = arith.constant 0 : index
    %330 = vector.load %arg8[%c8_167, %c0_168, %c0_169] : memref<16x1x16xf32, #tpu.memory_space<vmem>>, vector<1x1x16xf32>
    %331 = vector.shape_cast %330 : vector<1x1x16xf32> to vector<1x16xf32>
    %332 = vector.broadcast %331 : vector<1x16xf32> to vector<40x16xf32>
    %333 = arith.addf %329, %332 : vector<40x16xf32>
    %c9 = arith.constant 9 : index
    %c0_170 = arith.constant 0 : index
    %c0_171 = arith.constant 0 : index
    %334 = vector.load %arg7[%c9, %c0_170, %c0_171] : memref<16x64x16xbf16, #tpu.memory_space<vmem>>, vector<1x64x16xbf16>
    %335 = vector.shape_cast %334 : vector<1x64x16xbf16> to vector<64x16xbf16>
    %cst_172 = arith.constant dense<0.000000e+00> : vector<40x16xf32>
    %336 = tpu.matmul %317, %335, %cst_172 {dimension_numbers = #tpu.dot_dimension_numbers<[1], [0], [0], [1], [0, 0, 1, 1], [], []>} : vector<40x64xbf16>, vector<64x16xbf16>, vector<40x16xf32> -> vector<40x16xf32>
    %c9_173 = arith.constant 9 : index
    %c0_174 = arith.constant 0 : index
    %c0_175 = arith.constant 0 : index
    %337 = vector.load %arg8[%c9_173, %c0_174, %c0_175] : memref<16x1x16xf32, #tpu.memory_space<vmem>>, vector<1x1x16xf32>
    %338 = vector.shape_cast %337 : vector<1x1x16xf32> to vector<1x16xf32>
    %339 = vector.broadcast %338 : vector<1x16xf32> to vector<40x16xf32>
    %340 = arith.addf %336, %339 : vector<40x16xf32>
    %341 = arith.truncf %333 : vector<40x16xf32> to vector<40x16xbf16>
    %342 = arith.truncf %340 : vector<40x16xf32> to vector<40x16xbf16>
    %cst_176 = arith.constant dense<0.000000e+00> : vector<40x40xf32>
    %343 = tpu.matmul %341, %342, %cst_176 {dimension_numbers = #tpu.dot_dimension_numbers<[1], [1], [0], [0], [0, 0, 1, 0], [], []>} : vector<40x16xbf16>, vector<40x16xbf16>, vector<40x40xf32> -> vector<40x40xf32>
    %344 = arith.addf %343, %5 : vector<40x40xf32>
    %cst_177 = arith.constant dense<0xFF800000> : vector<40xf32>
    %345 = vector.multi_reduction <maximumf>, %344, %cst_177 [1] : vector<40x40xf32> to vector<40xf32>
    %346 = vector.shape_cast %345 : vector<40xf32> to vector<40x1xf32>
    %347 = vector.broadcast %346 : vector<40x1xf32> to vector<40x40xf32>
    %348 = arith.subf %344, %347 : vector<40x40xf32>
    %349 = math.exp %348 : vector<40x40xf32>
    %cst_178 = arith.constant dense<0.000000e+00> : vector<40xf32>
    %350 = vector.multi_reduction <add>, %349, %cst_178 [1] : vector<40x40xf32> to vector<40xf32>
    %351 = vector.shape_cast %350 : vector<40xf32> to vector<40x1xf32>
    %352 = vector.broadcast %351 : vector<40x1xf32> to vector<40x40xf32>
    %353 = arith.divf %349, %352 : vector<40x40xf32>
    %354 = arith.truncf %353 : vector<40x40xf32> to vector<40x40xbf16>
    %cst_179 = arith.constant dense<0.000000e+00> : vector<40x64xf32>
    %355 = tpu.matmul %354, %325, %cst_179 {dimension_numbers = #tpu.dot_dimension_numbers<[1], [0], [0], [1], [0, 0, 1, 1], [], []>} : vector<40x40xbf16>, vector<40x64xbf16>, vector<40x64xf32> -> vector<40x64xf32>
    %c0_i32_180 = arith.constant 0 : i32
    %356 = vector.broadcast %c0_i32_180 : i32 to vector<1x64xi32>
    %357 = arith.cmpi sge, %6, %356 : vector<1x64xi32>
    %c16_i32_181 = arith.constant 16 : i32
    %358 = vector.broadcast %c16_i32_181 : i32 to vector<1x64xi32>
    %359 = arith.cmpi slt, %6, %358 : vector<1x64xi32>
    %360 = arith.andi %357, %359 : vector<1x64xi1>
    %cst_182 = arith.constant 0.000000e+00 : f32
    %361 = vector.shape_cast %360 : vector<1x64xi1> to vector<1x64xi1>
    %362 = vector.broadcast %361 : vector<1x64xi1> to vector<40x64xi1>
    %363 = vector.broadcast %cst_182 : f32 to vector<40x64xf32>
    %364 = arith.select %362, %355, %363 : vector<40x64xi1>, vector<40x64xf32>
    %365 = arith.addf %326, %364 : vector<40x64xf32>
    %c10 = arith.constant 10 : index
    %c0_183 = arith.constant 0 : index
    %c0_184 = arith.constant 0 : index
    %366 = vector.load %arg7[%c10, %c0_183, %c0_184] : memref<16x64x16xbf16, #tpu.memory_space<vmem>>, vector<1x64x16xbf16>
    %367 = vector.shape_cast %366 : vector<1x64x16xbf16> to vector<64x16xbf16>
    %cst_185 = arith.constant dense<0.000000e+00> : vector<40x16xf32>
    %368 = tpu.matmul %317, %367, %cst_185 {dimension_numbers = #tpu.dot_dimension_numbers<[1], [0], [0], [1], [0, 0, 1, 1], [], []>} : vector<40x64xbf16>, vector<64x16xbf16>, vector<40x16xf32> -> vector<40x16xf32>
    %c10_186 = arith.constant 10 : index
    %c0_187 = arith.constant 0 : index
    %c0_188 = arith.constant 0 : index
    %369 = vector.load %arg8[%c10_186, %c0_187, %c0_188] : memref<16x1x16xf32, #tpu.memory_space<vmem>>, vector<1x1x16xf32>
    %370 = vector.shape_cast %369 : vector<1x1x16xf32> to vector<1x16xf32>
    %371 = vector.broadcast %370 : vector<1x16xf32> to vector<40x16xf32>
    %372 = arith.addf %368, %371 : vector<40x16xf32>
    %c11 = arith.constant 11 : index
    %c0_189 = arith.constant 0 : index
    %c0_190 = arith.constant 0 : index
    %373 = vector.load %arg7[%c11, %c0_189, %c0_190] : memref<16x64x16xbf16, #tpu.memory_space<vmem>>, vector<1x64x16xbf16>
    %374 = vector.shape_cast %373 : vector<1x64x16xbf16> to vector<64x16xbf16>
    %cst_191 = arith.constant dense<0.000000e+00> : vector<40x16xf32>
    %375 = tpu.matmul %317, %374, %cst_191 {dimension_numbers = #tpu.dot_dimension_numbers<[1], [0], [0], [1], [0, 0, 1, 1], [], []>} : vector<40x64xbf16>, vector<64x16xbf16>, vector<40x16xf32> -> vector<40x16xf32>
    %c11_192 = arith.constant 11 : index
    %c0_193 = arith.constant 0 : index
    %c0_194 = arith.constant 0 : index
    %376 = vector.load %arg8[%c11_192, %c0_193, %c0_194] : memref<16x1x16xf32, #tpu.memory_space<vmem>>, vector<1x1x16xf32>
    %377 = vector.shape_cast %376 : vector<1x1x16xf32> to vector<1x16xf32>
    %378 = vector.broadcast %377 : vector<1x16xf32> to vector<40x16xf32>
    %379 = arith.addf %375, %378 : vector<40x16xf32>
    %380 = arith.truncf %372 : vector<40x16xf32> to vector<40x16xbf16>
    %381 = arith.truncf %379 : vector<40x16xf32> to vector<40x16xbf16>
    %cst_195 = arith.constant dense<0.000000e+00> : vector<40x40xf32>
    %382 = tpu.matmul %380, %381, %cst_195 {dimension_numbers = #tpu.dot_dimension_numbers<[1], [1], [0], [0], [0, 0, 1, 0], [], []>} : vector<40x16xbf16>, vector<40x16xbf16>, vector<40x40xf32> -> vector<40x40xf32>
    %383 = arith.addf %382, %5 : vector<40x40xf32>
    %cst_196 = arith.constant dense<0xFF800000> : vector<40xf32>
    %384 = vector.multi_reduction <maximumf>, %383, %cst_196 [1] : vector<40x40xf32> to vector<40xf32>
    %385 = vector.shape_cast %384 : vector<40xf32> to vector<40x1xf32>
    %386 = vector.broadcast %385 : vector<40x1xf32> to vector<40x40xf32>
    %387 = arith.subf %383, %386 : vector<40x40xf32>
    %388 = math.exp %387 : vector<40x40xf32>
    %cst_197 = arith.constant dense<0.000000e+00> : vector<40xf32>
    %389 = vector.multi_reduction <add>, %388, %cst_197 [1] : vector<40x40xf32> to vector<40xf32>
    %390 = vector.shape_cast %389 : vector<40xf32> to vector<40x1xf32>
    %391 = vector.broadcast %390 : vector<40x1xf32> to vector<40x40xf32>
    %392 = arith.divf %388, %391 : vector<40x40xf32>
    %393 = arith.truncf %392 : vector<40x40xf32> to vector<40x40xbf16>
    %cst_198 = arith.constant dense<0.000000e+00> : vector<40x64xf32>
    %394 = tpu.matmul %393, %325, %cst_198 {dimension_numbers = #tpu.dot_dimension_numbers<[1], [0], [0], [1], [0, 0, 1, 1], [], []>} : vector<40x40xbf16>, vector<40x64xbf16>, vector<40x64xf32> -> vector<40x64xf32>
    %c16_i32_199 = arith.constant 16 : i32
    %395 = vector.broadcast %c16_i32_199 : i32 to vector<1x64xi32>
    %396 = arith.cmpi sge, %6, %395 : vector<1x64xi32>
    %c32_i32_200 = arith.constant 32 : i32
    %397 = vector.broadcast %c32_i32_200 : i32 to vector<1x64xi32>
    %398 = arith.cmpi slt, %6, %397 : vector<1x64xi32>
    %399 = arith.andi %396, %398 : vector<1x64xi1>
    %cst_201 = arith.constant 0.000000e+00 : f32
    %400 = vector.shape_cast %399 : vector<1x64xi1> to vector<1x64xi1>
    %401 = vector.broadcast %400 : vector<1x64xi1> to vector<40x64xi1>
    %402 = vector.broadcast %cst_201 : f32 to vector<40x64xf32>
    %403 = arith.select %401, %394, %402 : vector<40x64xi1>, vector<40x64xf32>
    %404 = arith.addf %365, %403 : vector<40x64xf32>
    %c12 = arith.constant 12 : index
    %c0_202 = arith.constant 0 : index
    %c0_203 = arith.constant 0 : index
    %405 = vector.load %arg7[%c12, %c0_202, %c0_203] : memref<16x64x16xbf16, #tpu.memory_space<vmem>>, vector<1x64x16xbf16>
    %406 = vector.shape_cast %405 : vector<1x64x16xbf16> to vector<64x16xbf16>
    %cst_204 = arith.constant dense<0.000000e+00> : vector<40x16xf32>
    %407 = tpu.matmul %317, %406, %cst_204 {dimension_numbers = #tpu.dot_dimension_numbers<[1], [0], [0], [1], [0, 0, 1, 1], [], []>} : vector<40x64xbf16>, vector<64x16xbf16>, vector<40x16xf32> -> vector<40x16xf32>
    %c12_205 = arith.constant 12 : index
    %c0_206 = arith.constant 0 : index
    %c0_207 = arith.constant 0 : index
    %408 = vector.load %arg8[%c12_205, %c0_206, %c0_207] : memref<16x1x16xf32, #tpu.memory_space<vmem>>, vector<1x1x16xf32>
    %409 = vector.shape_cast %408 : vector<1x1x16xf32> to vector<1x16xf32>
    %410 = vector.broadcast %409 : vector<1x16xf32> to vector<40x16xf32>
    %411 = arith.addf %407, %410 : vector<40x16xf32>
    %c13 = arith.constant 13 : index
    %c0_208 = arith.constant 0 : index
    %c0_209 = arith.constant 0 : index
    %412 = vector.load %arg7[%c13, %c0_208, %c0_209] : memref<16x64x16xbf16, #tpu.memory_space<vmem>>, vector<1x64x16xbf16>
    %413 = vector.shape_cast %412 : vector<1x64x16xbf16> to vector<64x16xbf16>
    %cst_210 = arith.constant dense<0.000000e+00> : vector<40x16xf32>
    %414 = tpu.matmul %317, %413, %cst_210 {dimension_numbers = #tpu.dot_dimension_numbers<[1], [0], [0], [1], [0, 0, 1, 1], [], []>} : vector<40x64xbf16>, vector<64x16xbf16>, vector<40x16xf32> -> vector<40x16xf32>
    %c13_211 = arith.constant 13 : index
    %c0_212 = arith.constant 0 : index
    %c0_213 = arith.constant 0 : index
    %415 = vector.load %arg8[%c13_211, %c0_212, %c0_213] : memref<16x1x16xf32, #tpu.memory_space<vmem>>, vector<1x1x16xf32>
    %416 = vector.shape_cast %415 : vector<1x1x16xf32> to vector<1x16xf32>
    %417 = vector.broadcast %416 : vector<1x16xf32> to vector<40x16xf32>
    %418 = arith.addf %414, %417 : vector<40x16xf32>
    %419 = arith.truncf %411 : vector<40x16xf32> to vector<40x16xbf16>
    %420 = arith.truncf %418 : vector<40x16xf32> to vector<40x16xbf16>
    %cst_214 = arith.constant dense<0.000000e+00> : vector<40x40xf32>
    %421 = tpu.matmul %419, %420, %cst_214 {dimension_numbers = #tpu.dot_dimension_numbers<[1], [1], [0], [0], [0, 0, 1, 0], [], []>} : vector<40x16xbf16>, vector<40x16xbf16>, vector<40x40xf32> -> vector<40x40xf32>
    %422 = arith.addf %421, %5 : vector<40x40xf32>
    %cst_215 = arith.constant dense<0xFF800000> : vector<40xf32>
    %423 = vector.multi_reduction <maximumf>, %422, %cst_215 [1] : vector<40x40xf32> to vector<40xf32>
    %424 = vector.shape_cast %423 : vector<40xf32> to vector<40x1xf32>
    %425 = vector.broadcast %424 : vector<40x1xf32> to vector<40x40xf32>
    %426 = arith.subf %422, %425 : vector<40x40xf32>
    %427 = math.exp %426 : vector<40x40xf32>
    %cst_216 = arith.constant dense<0.000000e+00> : vector<40xf32>
    %428 = vector.multi_reduction <add>, %427, %cst_216 [1] : vector<40x40xf32> to vector<40xf32>
    %429 = vector.shape_cast %428 : vector<40xf32> to vector<40x1xf32>
    %430 = vector.broadcast %429 : vector<40x1xf32> to vector<40x40xf32>
    %431 = arith.divf %427, %430 : vector<40x40xf32>
    %432 = arith.truncf %431 : vector<40x40xf32> to vector<40x40xbf16>
    %cst_217 = arith.constant dense<0.000000e+00> : vector<40x64xf32>
    %433 = tpu.matmul %432, %325, %cst_217 {dimension_numbers = #tpu.dot_dimension_numbers<[1], [0], [0], [1], [0, 0, 1, 1], [], []>} : vector<40x40xbf16>, vector<40x64xbf16>, vector<40x64xf32> -> vector<40x64xf32>
    %c32_i32_218 = arith.constant 32 : i32
    %434 = vector.broadcast %c32_i32_218 : i32 to vector<1x64xi32>
    %435 = arith.cmpi sge, %6, %434 : vector<1x64xi32>
    %c48_i32_219 = arith.constant 48 : i32
    %436 = vector.broadcast %c48_i32_219 : i32 to vector<1x64xi32>
    %437 = arith.cmpi slt, %6, %436 : vector<1x64xi32>
    %438 = arith.andi %435, %437 : vector<1x64xi1>
    %cst_220 = arith.constant 0.000000e+00 : f32
    %439 = vector.shape_cast %438 : vector<1x64xi1> to vector<1x64xi1>
    %440 = vector.broadcast %439 : vector<1x64xi1> to vector<40x64xi1>
    %441 = vector.broadcast %cst_220 : f32 to vector<40x64xf32>
    %442 = arith.select %440, %433, %441 : vector<40x64xi1>, vector<40x64xf32>
    %443 = arith.addf %404, %442 : vector<40x64xf32>
    %c14 = arith.constant 14 : index
    %c0_221 = arith.constant 0 : index
    %c0_222 = arith.constant 0 : index
    %444 = vector.load %arg7[%c14, %c0_221, %c0_222] : memref<16x64x16xbf16, #tpu.memory_space<vmem>>, vector<1x64x16xbf16>
    %445 = vector.shape_cast %444 : vector<1x64x16xbf16> to vector<64x16xbf16>
    %cst_223 = arith.constant dense<0.000000e+00> : vector<40x16xf32>
    %446 = tpu.matmul %317, %445, %cst_223 {dimension_numbers = #tpu.dot_dimension_numbers<[1], [0], [0], [1], [0, 0, 1, 1], [], []>} : vector<40x64xbf16>, vector<64x16xbf16>, vector<40x16xf32> -> vector<40x16xf32>
    %c14_224 = arith.constant 14 : index
    %c0_225 = arith.constant 0 : index
    %c0_226 = arith.constant 0 : index
    %447 = vector.load %arg8[%c14_224, %c0_225, %c0_226] : memref<16x1x16xf32, #tpu.memory_space<vmem>>, vector<1x1x16xf32>
    %448 = vector.shape_cast %447 : vector<1x1x16xf32> to vector<1x16xf32>
    %449 = vector.broadcast %448 : vector<1x16xf32> to vector<40x16xf32>
    %450 = arith.addf %446, %449 : vector<40x16xf32>
    %c15 = arith.constant 15 : index
    %c0_227 = arith.constant 0 : index
    %c0_228 = arith.constant 0 : index
    %451 = vector.load %arg7[%c15, %c0_227, %c0_228] : memref<16x64x16xbf16, #tpu.memory_space<vmem>>, vector<1x64x16xbf16>
    %452 = vector.shape_cast %451 : vector<1x64x16xbf16> to vector<64x16xbf16>
    %cst_229 = arith.constant dense<0.000000e+00> : vector<40x16xf32>
    %453 = tpu.matmul %317, %452, %cst_229 {dimension_numbers = #tpu.dot_dimension_numbers<[1], [0], [0], [1], [0, 0, 1, 1], [], []>} : vector<40x64xbf16>, vector<64x16xbf16>, vector<40x16xf32> -> vector<40x16xf32>
    %c15_230 = arith.constant 15 : index
    %c0_231 = arith.constant 0 : index
    %c0_232 = arith.constant 0 : index
    %454 = vector.load %arg8[%c15_230, %c0_231, %c0_232] : memref<16x1x16xf32, #tpu.memory_space<vmem>>, vector<1x1x16xf32>
    %455 = vector.shape_cast %454 : vector<1x1x16xf32> to vector<1x16xf32>
    %456 = vector.broadcast %455 : vector<1x16xf32> to vector<40x16xf32>
    %457 = arith.addf %453, %456 : vector<40x16xf32>
    %458 = arith.truncf %450 : vector<40x16xf32> to vector<40x16xbf16>
    %459 = arith.truncf %457 : vector<40x16xf32> to vector<40x16xbf16>
    %cst_233 = arith.constant dense<0.000000e+00> : vector<40x40xf32>
    %460 = tpu.matmul %458, %459, %cst_233 {dimension_numbers = #tpu.dot_dimension_numbers<[1], [1], [0], [0], [0, 0, 1, 0], [], []>} : vector<40x16xbf16>, vector<40x16xbf16>, vector<40x40xf32> -> vector<40x40xf32>
    %461 = arith.addf %460, %5 : vector<40x40xf32>
    %cst_234 = arith.constant dense<0xFF800000> : vector<40xf32>
    %462 = vector.multi_reduction <maximumf>, %461, %cst_234 [1] : vector<40x40xf32> to vector<40xf32>
    %463 = vector.shape_cast %462 : vector<40xf32> to vector<40x1xf32>
    %464 = vector.broadcast %463 : vector<40x1xf32> to vector<40x40xf32>
    %465 = arith.subf %461, %464 : vector<40x40xf32>
    %466 = math.exp %465 : vector<40x40xf32>
    %cst_235 = arith.constant dense<0.000000e+00> : vector<40xf32>
    %467 = vector.multi_reduction <add>, %466, %cst_235 [1] : vector<40x40xf32> to vector<40xf32>
    %468 = vector.shape_cast %467 : vector<40xf32> to vector<40x1xf32>
    %469 = vector.broadcast %468 : vector<40x1xf32> to vector<40x40xf32>
    %470 = arith.divf %466, %469 : vector<40x40xf32>
    %471 = arith.truncf %470 : vector<40x40xf32> to vector<40x40xbf16>
    %cst_236 = arith.constant dense<0.000000e+00> : vector<40x64xf32>
    %472 = tpu.matmul %471, %325, %cst_236 {dimension_numbers = #tpu.dot_dimension_numbers<[1], [0], [0], [1], [0, 0, 1, 1], [], []>} : vector<40x40xbf16>, vector<40x64xbf16>, vector<40x64xf32> -> vector<40x64xf32>
    %c48_i32_237 = arith.constant 48 : i32
    %473 = vector.broadcast %c48_i32_237 : i32 to vector<1x64xi32>
    %474 = arith.cmpi sge, %6, %473 : vector<1x64xi32>
    %c64_i32_238 = arith.constant 64 : i32
    %475 = vector.broadcast %c64_i32_238 : i32 to vector<1x64xi32>
    %476 = arith.cmpi slt, %6, %475 : vector<1x64xi32>
    %477 = arith.andi %474, %476 : vector<1x64xi1>
    %cst_239 = arith.constant 0.000000e+00 : f32
    %478 = vector.shape_cast %477 : vector<1x64xi1> to vector<1x64xi1>
    %479 = vector.broadcast %478 : vector<1x64xi1> to vector<40x64xi1>
    %480 = vector.broadcast %cst_239 : f32 to vector<40x64xf32>
    %481 = arith.select %479, %472, %480 : vector<40x64xi1>, vector<40x64xf32>
    %482 = arith.addf %443, %481 : vector<40x64xf32>
    %483 = arith.truncf %482 : vector<40x64xf32> to vector<40x64xbf16>
    %c3_240 = arith.constant 3 : index
    %c0_241 = arith.constant 0 : index
    %c0_242 = arith.constant 0 : index
    %484 = vector.load %arg9[%c3_240, %c0_241, %c0_242] : memref<4x64x64xbf16, #tpu.memory_space<vmem>>, vector<1x64x64xbf16>
    %485 = vector.shape_cast %484 : vector<1x64x64xbf16> to vector<64x64xbf16>
    %cst_243 = arith.constant dense<0.000000e+00> : vector<40x64xf32>
    %486 = tpu.matmul %483, %485, %cst_243 {dimension_numbers = #tpu.dot_dimension_numbers<[1], [0], [0], [1], [0, 0, 1, 1], [], []>} : vector<40x64xbf16>, vector<64x64xbf16>, vector<40x64xf32> -> vector<40x64xf32>
    %c4_244 = arith.constant 4 : index
    %c0_245 = arith.constant 0 : index
    %c0_246 = arith.constant 0 : index
    %487 = vector.load %arg10[%c4_244, %c0_245, %c0_246] : memref<6x1x64xf32, #tpu.memory_space<vmem>>, vector<1x1x64xf32>
    %488 = vector.shape_cast %487 : vector<1x1x64xf32> to vector<1x64xf32>
    %489 = vector.broadcast %488 : vector<1x64xf32> to vector<40x64xf32>
    %490 = arith.addf %486, %489 : vector<40x64xf32>
    %491 = arith.addf %290, %490 : vector<40x64xf32>
    %c6_247 = arith.constant 6 : index
    %c0_248 = arith.constant 0 : index
    %c0_249 = arith.constant 0 : index
    %492 = vector.load %arg6[%c6_247, %c0_248, %c0_249] : memref<8x1x64xf32, #tpu.memory_space<vmem>>, vector<1x1x64xf32>
    %493 = vector.shape_cast %492 : vector<1x1x64xf32> to vector<1x64xf32>
    %c7_250 = arith.constant 7 : index
    %c0_251 = arith.constant 0 : index
    %c0_252 = arith.constant 0 : index
    %494 = vector.load %arg6[%c7_250, %c0_251, %c0_252] : memref<8x1x64xf32, #tpu.memory_space<vmem>>, vector<1x1x64xf32>
    %495 = vector.shape_cast %494 : vector<1x1x64xf32> to vector<1x64xf32>
    %cst_253 = arith.constant dense<0.000000e+00> : vector<40xf32>
    %496 = vector.multi_reduction <add>, %491, %cst_253 [1] : vector<40x64xf32> to vector<40xf32>
    %497 = vector.shape_cast %496 : vector<40xf32> to vector<40x1xf32>
    %cst_254 = arith.constant 6.400000e+01 : f32
    %498 = vector.broadcast %cst_254 : f32 to vector<40x1xf32>
    %499 = arith.divf %497, %498 : vector<40x1xf32>
    %500 = vector.broadcast %499 : vector<40x1xf32> to vector<40x64xf32>
    %501 = arith.subf %491, %500 : vector<40x64xf32>
    %502 = arith.mulf %501, %501 : vector<40x64xf32>
    %cst_255 = arith.constant dense<0.000000e+00> : vector<40xf32>
    %503 = vector.multi_reduction <add>, %502, %cst_255 [1] : vector<40x64xf32> to vector<40xf32>
    %504 = vector.shape_cast %503 : vector<40xf32> to vector<40x1xf32>
    %cst_256 = arith.constant 6.400000e+01 : f32
    %505 = vector.broadcast %cst_256 : f32 to vector<40x1xf32>
    %506 = arith.divf %504, %505 : vector<40x1xf32>
    %507 = vector.broadcast %499 : vector<40x1xf32> to vector<40x64xf32>
    %508 = arith.subf %491, %507 : vector<40x64xf32>
    %cst_257 = arith.constant 9.99999997E-7 : f32
    %509 = vector.broadcast %cst_257 : f32 to vector<40x1xf32>
    %510 = arith.addf %506, %509 : vector<40x1xf32>
    %511 = math.rsqrt %510 : vector<40x1xf32>
    %512 = vector.broadcast %511 : vector<40x1xf32> to vector<40x64xf32>
    %513 = arith.mulf %508, %512 : vector<40x64xf32>
    %514 = vector.broadcast %493 : vector<1x64xf32> to vector<40x64xf32>
    %515 = arith.mulf %513, %514 : vector<40x64xf32>
    %516 = vector.broadcast %495 : vector<1x64xf32> to vector<40x64xf32>
    %517 = arith.addf %515, %516 : vector<40x64xf32>
    %518 = arith.truncf %517 : vector<40x64xf32> to vector<40x64xbf16>
    %c1_258 = arith.constant 1 : index
    %c0_259 = arith.constant 0 : index
    %c0_260 = arith.constant 0 : index
    %519 = vector.load %arg11[%c1_258, %c0_259, %c0_260] : memref<2x64x256xbf16, #tpu.memory_space<vmem>>, vector<1x64x256xbf16>
    %520 = vector.shape_cast %519 : vector<1x64x256xbf16> to vector<64x256xbf16>
    %cst_261 = arith.constant dense<0.000000e+00> : vector<40x256xf32>
    %521 = tpu.matmul %518, %520, %cst_261 {dimension_numbers = #tpu.dot_dimension_numbers<[1], [0], [0], [1], [0, 0, 1, 1], [], []>} : vector<40x64xbf16>, vector<64x256xbf16>, vector<40x256xf32> -> vector<40x256xf32>
    %c1_262 = arith.constant 1 : index
    %c0_263 = arith.constant 0 : index
    %c0_264 = arith.constant 0 : index
    %522 = vector.load %arg12[%c1_262, %c0_263, %c0_264] : memref<2x1x256xf32, #tpu.memory_space<vmem>>, vector<1x1x256xf32>
    %523 = vector.shape_cast %522 : vector<1x1x256xf32> to vector<1x256xf32>
    %524 = vector.broadcast %523 : vector<1x256xf32> to vector<40x256xf32>
    %525 = arith.addf %521, %524 : vector<40x256xf32>
    %cst_265 = arith.constant 0.707106769 : f32
    %526 = vector.broadcast %cst_265 : f32 to vector<40x256xf32>
    %527 = arith.mulf %525, %526 : vector<40x256xf32>
    %528 = math.absf %527 : vector<40x256xf32>
    %cst_266 = arith.constant 0.327591091 : f32
    %529 = vector.broadcast %cst_266 : f32 to vector<40x256xf32>
    %530 = arith.mulf %529, %528 : vector<40x256xf32>
    %cst_267 = arith.constant 1.000000e+00 : f32
    %531 = vector.broadcast %cst_267 : f32 to vector<40x256xf32>
    %532 = arith.addf %531, %530 : vector<40x256xf32>
    %cst_268 = arith.constant 1.000000e+00 : f32
    %533 = vector.broadcast %cst_268 : f32 to vector<40x256xf32>
    %534 = arith.divf %533, %532 : vector<40x256xf32>
    %cst_269 = arith.constant 1.06140542 : f32
    %535 = vector.broadcast %cst_269 : f32 to vector<40x256xf32>
    %536 = arith.mulf %535, %534 : vector<40x256xf32>
    %cst_270 = arith.constant 1.45315206 : f32
    %537 = vector.broadcast %cst_270 : f32 to vector<40x256xf32>
    %538 = arith.subf %536, %537 : vector<40x256xf32>
    %539 = arith.mulf %538, %534 : vector<40x256xf32>
    %cst_271 = arith.constant 1.42141378 : f32
    %540 = vector.broadcast %cst_271 : f32 to vector<40x256xf32>
    %541 = arith.addf %539, %540 : vector<40x256xf32>
    %542 = arith.mulf %541, %534 : vector<40x256xf32>
    %cst_272 = arith.constant 0.284496725 : f32
    %543 = vector.broadcast %cst_272 : f32 to vector<40x256xf32>
    %544 = arith.subf %542, %543 : vector<40x256xf32>
    %545 = arith.mulf %544, %534 : vector<40x256xf32>
    %cst_273 = arith.constant 0.254829586 : f32
    %546 = vector.broadcast %cst_273 : f32 to vector<40x256xf32>
    %547 = arith.addf %545, %546 : vector<40x256xf32>
    %548 = arith.mulf %547, %534 : vector<40x256xf32>
    %cst_274 = arith.constant 0.000000e+00 : f32
    %549 = vector.broadcast %cst_274 : f32 to vector<40x256xf32>
    %550 = arith.subf %549, %528 : vector<40x256xf32>
    %551 = arith.mulf %550, %528 : vector<40x256xf32>
    %552 = math.exp %551 : vector<40x256xf32>
    %553 = arith.mulf %548, %552 : vector<40x256xf32>
    %cst_275 = arith.constant 1.000000e+00 : f32
    %554 = vector.broadcast %cst_275 : f32 to vector<40x256xf32>
    %555 = arith.subf %554, %553 : vector<40x256xf32>
    %cst_276 = arith.constant 0.000000e+00 : f32
    %556 = vector.broadcast %cst_276 : f32 to vector<40x256xf32>
    %557 = arith.cmpf oge, %527, %556 : vector<40x256xf32>
    %cst_277 = arith.constant 0.000000e+00 : f32
    %558 = vector.broadcast %cst_277 : f32 to vector<40x256xf32>
    %559 = arith.subf %558, %555 : vector<40x256xf32>
    %560 = arith.select %557, %555, %559 : vector<40x256xi1>, vector<40x256xf32>
    %cst_278 = arith.constant 5.000000e-01 : f32
    %561 = vector.broadcast %cst_278 : f32 to vector<40x256xf32>
    %562 = arith.mulf %561, %525 : vector<40x256xf32>
    %cst_279 = arith.constant 1.000000e+00 : f32
    %563 = vector.broadcast %cst_279 : f32 to vector<40x256xf32>
    %564 = arith.addf %563, %560 : vector<40x256xf32>
    %565 = arith.mulf %562, %564 : vector<40x256xf32>
    %566 = arith.truncf %565 : vector<40x256xf32> to vector<40x256xbf16>
    %c1_280 = arith.constant 1 : index
    %c0_281 = arith.constant 0 : index
    %c0_282 = arith.constant 0 : index
    %567 = vector.load %arg13[%c1_280, %c0_281, %c0_282] : memref<2x256x64xbf16, #tpu.memory_space<vmem>>, vector<1x256x64xbf16>
    %568 = vector.shape_cast %567 : vector<1x256x64xbf16> to vector<256x64xbf16>
    %cst_283 = arith.constant dense<0.000000e+00> : vector<40x64xf32>
    %569 = tpu.matmul %566, %568, %cst_283 {dimension_numbers = #tpu.dot_dimension_numbers<[1], [0], [0], [1], [0, 0, 1, 1], [], []>} : vector<40x256xbf16>, vector<256x64xbf16>, vector<40x64xf32> -> vector<40x64xf32>
    %c5_284 = arith.constant 5 : index
    %c0_285 = arith.constant 0 : index
    %c0_286 = arith.constant 0 : index
    %570 = vector.load %arg10[%c5_284, %c0_285, %c0_286] : memref<6x1x64xf32, #tpu.memory_space<vmem>>, vector<1x1x64xf32>
    %571 = vector.shape_cast %570 : vector<1x1x64xf32> to vector<1x64xf32>
    %572 = vector.broadcast %571 : vector<1x64xf32> to vector<40x64xf32>
    %573 = arith.addf %569, %572 : vector<40x64xf32>
    %574 = arith.addf %491, %573 : vector<40x64xf32>
    %c0_287 = arith.constant 0 : index
    %c0_288 = arith.constant 0 : index
    %575 = vector.load %arg3[%c0_287, %c0_288] : memref<8x40xf32, #tpu.memory_space<vmem>>, vector<8x40xf32>
    %cst_289 = arith.constant dense<0.000000e+00> : vector<8x64xf32>
    %576 = tpu.matmul %575, %574, %cst_289 {dimension_numbers = #tpu.dot_dimension_numbers<[1], [0], [0], [1], [0, 0, 1, 1], [], []>} : vector<8x40xf32>, vector<40x64xf32>, vector<8x64xf32> -> vector<8x64xf32>
    %c0_290 = arith.constant 0 : index
    %c0_291 = arith.constant 0 : index
    %c0_292 = arith.constant 0 : index
    %577 = vector.load %arg14[%c0_290, %c0_291, %c0_292] : memref<2x1x64xf32, #tpu.memory_space<vmem>>, vector<1x1x64xf32>
    %578 = vector.shape_cast %577 : vector<1x1x64xf32> to vector<1x64xf32>
    %c1_293 = arith.constant 1 : index
    %c0_294 = arith.constant 0 : index
    %c0_295 = arith.constant 0 : index
    %579 = vector.load %arg14[%c1_293, %c0_294, %c0_295] : memref<2x1x64xf32, #tpu.memory_space<vmem>>, vector<1x1x64xf32>
    %580 = vector.shape_cast %579 : vector<1x1x64xf32> to vector<1x64xf32>
    %cst_296 = arith.constant dense<0.000000e+00> : vector<8xf32>
    %581 = vector.multi_reduction <add>, %576, %cst_296 [1] : vector<8x64xf32> to vector<8xf32>
    %582 = vector.shape_cast %581 : vector<8xf32> to vector<8x1xf32>
    %cst_297 = arith.constant 6.400000e+01 : f32
    %583 = vector.broadcast %cst_297 : f32 to vector<8x1xf32>
    %584 = arith.divf %582, %583 : vector<8x1xf32>
    %585 = vector.broadcast %584 : vector<8x1xf32> to vector<8x64xf32>
    %586 = arith.subf %576, %585 : vector<8x64xf32>
    %587 = arith.mulf %586, %586 : vector<8x64xf32>
    %cst_298 = arith.constant dense<0.000000e+00> : vector<8xf32>
    %588 = vector.multi_reduction <add>, %587, %cst_298 [1] : vector<8x64xf32> to vector<8xf32>
    %589 = vector.shape_cast %588 : vector<8xf32> to vector<8x1xf32>
    %cst_299 = arith.constant 6.400000e+01 : f32
    %590 = vector.broadcast %cst_299 : f32 to vector<8x1xf32>
    %591 = arith.divf %589, %590 : vector<8x1xf32>
    %592 = vector.broadcast %584 : vector<8x1xf32> to vector<8x64xf32>
    %593 = arith.subf %576, %592 : vector<8x64xf32>
    %cst_300 = arith.constant 9.99999997E-7 : f32
    %594 = vector.broadcast %cst_300 : f32 to vector<8x1xf32>
    %595 = arith.addf %591, %594 : vector<8x1xf32>
    %596 = math.rsqrt %595 : vector<8x1xf32>
    %597 = vector.broadcast %596 : vector<8x1xf32> to vector<8x64xf32>
    %598 = arith.mulf %593, %597 : vector<8x64xf32>
    %599 = vector.broadcast %578 : vector<1x64xf32> to vector<8x64xf32>
    %600 = arith.mulf %598, %599 : vector<8x64xf32>
    %601 = vector.broadcast %580 : vector<1x64xf32> to vector<8x64xf32>
    %602 = arith.addf %600, %601 : vector<8x64xf32>
    %603 = arith.truncf %602 : vector<8x64xf32> to vector<8x64xbf16>
    %c0_301 = arith.constant 0 : index
    %c0_302 = arith.constant 0 : index
    %604 = vector.load %arg15[%c0_301, %c0_302] : memref<64x64xbf16, #tpu.memory_space<vmem>>, vector<64x64xbf16>
    %cst_303 = arith.constant dense<0.000000e+00> : vector<8x64xf32>
    %605 = tpu.matmul %603, %604, %cst_303 {dimension_numbers = #tpu.dot_dimension_numbers<[1], [0], [0], [1], [0, 0, 1, 1], [], []>} : vector<8x64xbf16>, vector<64x64xbf16>, vector<8x64xf32> -> vector<8x64xf32>
    %c0_304 = arith.constant 0 : index
    %c0_305 = arith.constant 0 : index
    %c0_306 = arith.constant 0 : index
    %606 = vector.load %arg18[%c0_304, %c0_305, %c0_306] : memref<3x1x128xf32, #tpu.memory_space<vmem>>, vector<1x1x128xf32>
    %607 = vector.shape_cast %606 : vector<1x1x128xf32> to vector<1x128xf32>
    %608 = vector.extract_strided_slice %607 {offsets = [0, 0], sizes = [1, 64], strides = [1, 1]} : vector<1x128xf32> to vector<1x64xf32>
    %609 = vector.broadcast %608 : vector<1x64xf32> to vector<8x64xf32>
    %610 = arith.addf %605, %609 : vector<8x64xf32>
    %cst_307 = arith.constant 0.000000e+00 : f32
    %611 = vector.broadcast %cst_307 : f32 to vector<8x64xf32>
    %612 = arith.maximumf %610, %611 : vector<8x64xf32>
    %613 = arith.truncf %612 : vector<8x64xf32> to vector<8x64xbf16>
    %c0_308 = arith.constant 0 : index
    %c0_309 = arith.constant 0 : index
    %614 = vector.load %arg16[%c0_308, %c0_309] : memref<64x64xbf16, #tpu.memory_space<vmem>>, vector<64x64xbf16>
    %cst_310 = arith.constant dense<0.000000e+00> : vector<8x64xf32>
    %615 = tpu.matmul %613, %614, %cst_310 {dimension_numbers = #tpu.dot_dimension_numbers<[1], [0], [0], [1], [0, 0, 1, 1], [], []>} : vector<8x64xbf16>, vector<64x64xbf16>, vector<8x64xf32> -> vector<8x64xf32>
    %c1_311 = arith.constant 1 : index
    %c0_312 = arith.constant 0 : index
    %c0_313 = arith.constant 0 : index
    %616 = vector.load %arg18[%c1_311, %c0_312, %c0_313] : memref<3x1x128xf32, #tpu.memory_space<vmem>>, vector<1x1x128xf32>
    %617 = vector.shape_cast %616 : vector<1x1x128xf32> to vector<1x128xf32>
    %618 = vector.extract_strided_slice %617 {offsets = [0, 0], sizes = [1, 64], strides = [1, 1]} : vector<1x128xf32> to vector<1x64xf32>
    %619 = vector.broadcast %618 : vector<1x64xf32> to vector<8x64xf32>
    %620 = arith.addf %615, %619 : vector<8x64xf32>
    %cst_314 = arith.constant 0.000000e+00 : f32
    %621 = vector.broadcast %cst_314 : f32 to vector<8x64xf32>
    %622 = arith.maximumf %620, %621 : vector<8x64xf32>
    %623 = arith.truncf %622 : vector<8x64xf32> to vector<8x64xbf16>
    %c0_315 = arith.constant 0 : index
    %c0_316 = arith.constant 0 : index
    %624 = vector.load %arg17[%c0_315, %c0_316] : memref<64x128xbf16, #tpu.memory_space<vmem>>, vector<64x128xbf16>
    %cst_317 = arith.constant dense<0.000000e+00> : vector<8x128xf32>
    %625 = tpu.matmul %623, %624, %cst_317 {dimension_numbers = #tpu.dot_dimension_numbers<[1], [0], [0], [1], [0, 0, 1, 1], [], []>} : vector<8x64xbf16>, vector<64x128xbf16>, vector<8x128xf32> -> vector<8x128xf32>
    %c2_318 = arith.constant 2 : index
    %c0_319 = arith.constant 0 : index
    %c0_320 = arith.constant 0 : index
    %626 = vector.load %arg18[%c2_318, %c0_319, %c0_320] : memref<3x1x128xf32, #tpu.memory_space<vmem>>, vector<1x1x128xf32>
    %627 = vector.shape_cast %626 : vector<1x1x128xf32> to vector<1x128xf32>
    %628 = vector.broadcast %627 : vector<1x128xf32> to vector<8x128xf32>
    %629 = arith.addf %625, %628 : vector<8x128xf32>
    %c0_321 = arith.constant 0 : index
    %c0_322 = arith.constant 0 : index
    %630 = vector.load %arg19[%c0_321, %c0_322] : memref<8x128xf32, #tpu.memory_space<vmem>>, vector<8x128xf32>
    tpu.vector_store %arg19[%c0_321, %c0_322], %629 {strides = array<i32>} : memref<8x128xf32, #tpu.memory_space<vmem>>, vector<8x128xf32>,
    return
  }
  func.func @transform_0(%arg0: i32) -> (i32, i32) {
    %c0_i32 = arith.constant 0 : i32
    %c0_i32_0 = arith.constant 0 : i32
    return %arg0, %c0_i32 : i32, i32
  }
  func.func @transform_1(%arg0: i32) -> (i32, i32) {
    %c0_i32 = arith.constant 0 : i32
    %c0_i32_0 = arith.constant 0 : i32
    %c0_i32_1 = arith.constant 0 : i32
    return %c0_i32, %c0_i32_0 : i32, i32
  }
  func.func @transform_2(%arg0: i32) -> (i32, i32) {
    %c0_i32 = arith.constant 0 : i32
    %c0_i32_0 = arith.constant 0 : i32
    %c0_i32_1 = arith.constant 0 : i32
    return %c0_i32, %c0_i32_0 : i32, i32
  }
  func.func @transform_3(%arg0: i32) -> (i32, i32) {
    %c0_i32 = arith.constant 0 : i32
    %c0_i32_0 = arith.constant 0 : i32
    %c0_i32_1 = arith.constant 0 : i32
    return %c0_i32, %c0_i32_0 : i32, i32
  }
  func.func @transform_4(%arg0: i32) -> (i32, i32) {
    %c0_i32 = arith.constant 0 : i32
    %c0_i32_0 = arith.constant 0 : i32
    %c0_i32_1 = arith.constant 0 : i32
    return %c0_i32, %c0_i32_0 : i32, i32
  }
  func.func @transform_5(%arg0: i32) -> (i32, i32, i32) {
    %c0_i32 = arith.constant 0 : i32
    %c0_i32_0 = arith.constant 0 : i32
    %c0_i32_1 = arith.constant 0 : i32
    %c0_i32_2 = arith.constant 0 : i32
    return %c0_i32, %c0_i32_0, %c0_i32_1 : i32, i32, i32
  }
  func.func @transform_6(%arg0: i32) -> (i32, i32, i32) {
    %c0_i32 = arith.constant 0 : i32
    %c0_i32_0 = arith.constant 0 : i32
    %c0_i32_1 = arith.constant 0 : i32
    %c0_i32_2 = arith.constant 0 : i32
    return %c0_i32, %c0_i32_0, %c0_i32_1 : i32, i32, i32
  }
  func.func @transform_7(%arg0: i32) -> (i32, i32, i32) {
    %c0_i32 = arith.constant 0 : i32
    %c0_i32_0 = arith.constant 0 : i32
    %c0_i32_1 = arith.constant 0 : i32
    %c0_i32_2 = arith.constant 0 : i32
    return %c0_i32, %c0_i32_0, %c0_i32_1 : i32, i32, i32
  }
  func.func @transform_8(%arg0: i32) -> (i32, i32, i32) {
    %c0_i32 = arith.constant 0 : i32
    %c0_i32_0 = arith.constant 0 : i32
    %c0_i32_1 = arith.constant 0 : i32
    %c0_i32_2 = arith.constant 0 : i32
    return %c0_i32, %c0_i32_0, %c0_i32_1 : i32, i32, i32
  }
  func.func @transform_9(%arg0: i32) -> (i32, i32, i32) {
    %c0_i32 = arith.constant 0 : i32
    %c0_i32_0 = arith.constant 0 : i32
    %c0_i32_1 = arith.constant 0 : i32
    %c0_i32_2 = arith.constant 0 : i32
    return %c0_i32, %c0_i32_0, %c0_i32_1 : i32, i32, i32
  }
  func.func @transform_10(%arg0: i32) -> (i32, i32, i32) {
    %c0_i32 = arith.constant 0 : i32
    %c0_i32_0 = arith.constant 0 : i32
    %c0_i32_1 = arith.constant 0 : i32
    %c0_i32_2 = arith.constant 0 : i32
    return %c0_i32, %c0_i32_0, %c0_i32_1 : i32, i32, i32
  }
  func.func @transform_11(%arg0: i32) -> (i32, i32, i32) {
    %c0_i32 = arith.constant 0 : i32
    %c0_i32_0 = arith.constant 0 : i32
    %c0_i32_1 = arith.constant 0 : i32
    %c0_i32_2 = arith.constant 0 : i32
    return %c0_i32, %c0_i32_0, %c0_i32_1 : i32, i32, i32
  }
  func.func @transform_12(%arg0: i32) -> (i32, i32, i32) {
    %c0_i32 = arith.constant 0 : i32
    %c0_i32_0 = arith.constant 0 : i32
    %c0_i32_1 = arith.constant 0 : i32
    %c0_i32_2 = arith.constant 0 : i32
    return %c0_i32, %c0_i32_0, %c0_i32_1 : i32, i32, i32
  }
  func.func @transform_13(%arg0: i32) -> (i32, i32, i32) {
    %c0_i32 = arith.constant 0 : i32
    %c0_i32_0 = arith.constant 0 : i32
    %c0_i32_1 = arith.constant 0 : i32
    %c0_i32_2 = arith.constant 0 : i32
    return %c0_i32, %c0_i32_0, %c0_i32_1 : i32, i32, i32
  }
  func.func @transform_14(%arg0: i32) -> (i32, i32) {
    %c0_i32 = arith.constant 0 : i32
    %c0_i32_0 = arith.constant 0 : i32
    %c0_i32_1 = arith.constant 0 : i32
    return %c0_i32, %c0_i32_0 : i32, i32
  }
  func.func @transform_15(%arg0: i32) -> (i32, i32) {
    %c0_i32 = arith.constant 0 : i32
    %c0_i32_0 = arith.constant 0 : i32
    %c0_i32_1 = arith.constant 0 : i32
    return %c0_i32, %c0_i32_0 : i32, i32
  }
  func.func @transform_16(%arg0: i32) -> (i32, i32) {
    %c0_i32 = arith.constant 0 : i32
    %c0_i32_0 = arith.constant 0 : i32
    %c0_i32_1 = arith.constant 0 : i32
    return %c0_i32, %c0_i32_0 : i32, i32
  }
  func.func @transform_17(%arg0: i32) -> (i32, i32, i32) {
    %c0_i32 = arith.constant 0 : i32
    %c0_i32_0 = arith.constant 0 : i32
    %c0_i32_1 = arith.constant 0 : i32
    %c0_i32_2 = arith.constant 0 : i32
    return %c0_i32, %c0_i32_0, %c0_i32_1 : i32, i32, i32
  }
  func.func @transform_18(%arg0: i32) -> (i32, i32) {
    %c0_i32 = arith.constant 0 : i32
    %c0_i32_0 = arith.constant 0 : i32
    return %arg0, %c0_i32 : i32, i32
  }
}

</mosaic_0001>

<bundles_post_ra>
// kernel: tile.9
= control target key start
LH: loop header
LB: loop body
LE: loop exit
PB: predicated region body
PF: predicated region fallthrough
CT: control target
= control target key end

     0   :  { %vm3_vm0 = vcmask 523264   ;;  %s120_s0 = inlined_call_operand.vmem [shape: f32[8,5,64], index: 0, kind: input, shape index: {}]   ;;  %s121_s1 = inlined_call_operand.vmem [shape: f32[40,64], index: 1, kind: output, shape index: {}]  }
   0x1   :  { %v2_v0 = vld [vmem:[%s120_s0] sm:$0x1f]   ;;  %v40_v1 = vld [vmem:[%s120_s0 + $0x8] sm:$0x1f]   ;;  %v42_v2 = vld [vmem:[%s120_s0 + $0x10] sm:$0x1f]  }
   0x2   :  { %4 = vst.msk [vmem:[%s121_s1] sm:$0x1f] %vm3_vm0, %v2_v0   ;;  %41 = vst.msk [vmem:[%s121_s1 + $0x5] sm:$0x1f] %vm3_vm0, %v40_v1   ;;  %v44_v3 = vld [vmem:[%s120_s0 + $0x18] sm:$0x1f]  }
   0x3   :  { %43 = vst.msk [vmem:[%s121_s1 + $0xa] sm:$0x1f] %vm3_vm0, %v42_v2   ;;  %v46_v4 = vld [vmem:[%s120_s0 + $0x20] sm:$0x1f]   ;;  %v48_v5 = vld [vmem:[%s120_s0 + $0x28] sm:$0x1f]  }
   0x4   :  { %45 = vst.msk [vmem:[%s121_s1 + $0xf] sm:$0x1f] %vm3_vm0, %v44_v3   ;;  %47 = vst.msk [vmem:[%s121_s1 + $0x14] sm:$0x1f] %vm3_vm0, %v46_v4   ;;  %v50_v6 = vld [vmem:[%s120_s0 + $0x30] sm:$0x1f]  }
   0x5   :  { %49 = vst.msk [vmem:[%s121_s1 + $0x19] sm:$0x1f] %vm3_vm0, %v48_v5   ;;  %v52_v7 = vld [vmem:[%s120_s0 + $0x38] sm:$0x1f]   ;;  %51 = vst.msk [vmem:[%s121_s1 + $0x1e] sm:$0x1f] %vm3_vm0, %v50_v6  }
   0x6   :  { %53 = vst.msk [vmem:[%s121_s1 + $0x23] sm:$0x1f] %vm3_vm0, %v52_v7  }

// kernel: eq.8
= control target key start
LH: loop header
LB: loop body
LE: loop exit
PB: predicated region body
PF: predicated region fallthrough
CT: control target
= control target key end

     0   :  { %s69_s10 = smov 35   ;;  %s70_s11 = smov 25   ;;  %vm3_vm0 = vcmask 39936   ;;  %vm9_vm1 = vcmask 326936   ;;  %vm15_vm2 = vcmask 285936   ;;  %vm21_vm3 = vcmask 244936   ;;  %s113_s0 = inlined_call_operand.vmem [shape: s32[8,5], index: 0, kind: input, shape index: {}]   ;;  %s114_s1 = inlined_call_operand.vmem [shape: s32[40], index: 1, kind: output, shape index: {}]  }
   0x1   :  { %v55_v0 = vld [vmem:[%s113_s0 + $0x7] sm:$0x1]   ;;  %v57_v1 = vld [vmem:[%s113_s0 + $0x5] sm:$0x1]   ;;  %v56_v2 = vld [vmem:[%s113_s0 + $0x6] sm:$0x1]  }
   0x2   :  { %7 = vrot.lane.b32.xlu0 %v55_v0, %s69_s10  ;;  %19 = vrot.lane.b32.xlu1 %v57_v1, %s70_s11  ;;  %v58_v3 = vld [vmem:[%s113_s0 + $0x4] sm:$0x1]   ;;  %v2_v4 = vld [vmem:[%s113_s0] sm:$0x1]   ;;  %s71_s18 = smov 30   ;;  %s72_s19 = smov 20  }
   0x3   :  { %4 = vst.msk [vmem:[#allocation0] sm:$0x1] %vm3_vm0, %v2_v4   ;;  %v59_v5 = vld [vmem:[%s113_s0 + $0x3] sm:$0x1]   ;;  %v60_v6 = vld [vmem:[%s113_s0 + $0x2] sm:$0x1]  }
   0x4   :  { %s73_s24 = smov 15   ;;  %s74_s25 = smov 10   ;;  %v61_v7 = vld [vmem:[%s113_s0 + $0x1] sm:$0x1]   ;;  %vm27_vm4 = vcmask 203936   ;;  %vm33_vm5 = vcmask 162936  }
   0x5   :  { %s75_s0 = smov 5   ;;  %vm39_vm6 = vcmask 121936   ;;  %vm45_vm7 = vcmask 80936  }
   0x6   :  { %13 = vrot.lane.b32.xlu0 %v56_v2, %s71_s18  ;;  %25 = vrot.lane.b32.xlu1 %v58_v3, %s72_s19 }
   0xa   :  { %31 = vrot.lane.b32.xlu0 %v59_v5, %s73_s24  ;;  %37 = vrot.lane.b32.xlu1 %v60_v6, %s74_s25 }
   0xe   :  { %43 = vrot.lane.b32.xlu0 %v61_v7, %s75_s0 }
  0x74   :  { %v8_v8 = vpop.permute.xlu0 %7   ;;  %v20_v9 = vpop.permute.xlu1 %19  }
  0x75   :  { %10 = vst.msk [vmem:[#allocation0] sm:$0x1] %vm9_vm1, %v8_v8  }
  0x78   :  { %v14_v10 = vpop.permute.xlu0 %13   ;;  %v26_v11 = vpop.permute.xlu1 %25  }
  0x79   :  { %16 = vst.msk [vmem:[#allocation0] sm:$0x1] %vm15_vm2, %v14_v10  }
  0x7a   :  { %22 = vst.msk [vmem:[#allocation0] sm:$0x1] %vm21_vm3, %v20_v9  }
  0x7b   :  { %28 = vst.msk [vmem:[#allocation0] sm:$0x1] %vm27_vm4, %v26_v11  }
  0x7c   :  { %v32_v12 = vpop.permute.xlu0 %31   ;;  %v38_v13 = vpop.permute.xlu1 %37  }
  0x7d   :  { %34 = vst.msk [vmem:[#allocation0] sm:$0x1] %vm33_vm5, %v32_v12  }
  0x7e   :  { %40 = vst.msk [vmem:[#allocation0] sm:$0x1] %vm39_vm6, %v38_v13  }
  0x80   :  { %v44_v14 = vpop.permute.xlu0 %43  }
  0x81   :  { %46 = vst.msk [vmem:[#allocation0] sm:$0x1] %vm45_vm7, %v44_v14  }
  0x88   :  { %v51_v15 = vld [vmem:[#allocation0] sm:$0x1] }
  0x89   :  { %54 = vst [vmem:[%s114_s1] sm:$0x1] %v51_v15 }

// kernel: vit_teacher_forward.1
= control target key start
LH: loop header
LB: loop body
LE: loop exit
PB: predicated region body
PF: predicated region fallthrough
CT: control target
= control target key end

     0   :  { %s9386_s27 = smov 0   ;;  %s11918_s0 = inlined_call_operand.vmem [shape: bf16[80,768], index: 0, kind: input, shape index: {}]   ;;  %s11919_s1 = inlined_call_operand.vmem [shape: f32[40,64], index: 1, kind: input, shape index: {}]   ;;  %s11920_s2 = inlined_call_operand.vmem [shape: f32[8,40], index: 2, kind: input, shape index: {}]   ;;  %s11921_s3 = inlined_call_operand.vmem [shape: f32[40,40], index: 3, kind: input, shape index: {}]   ;;  %s11922_s4 = inlined_call_operand.vmem [shape: bf16[768,64], index: 4, kind: input, shape index: {}]   ;;  %s11923_s5 = inlined_call_operand.vmem [shape: f32[8,1,64], index: 5, kind: input, shape index: {}]   ;;  %s11924_s6 = inlined_call_operand.vmem [shape: bf16[16,64,16], index: 6, kind: input, shape index: {}]   ;;  %s11925_s7 = inlined_call_operand.vmem [shape: f32[16,1,16], index: 7, kind: input, shape index: {}]   ;;  %s11926_s8 = inlined_call_operand.vmem [shape: bf16[4,64,64], index: 8, kind: input, shape index: {}]   ;;  %s11927_s9 = inlined_call_operand.vmem [shape: f32[6,1,64], index: 9, kind: input, shape index: {}]   ;;  %s11928_s10 = inlined_call_operand.vmem [shape: bf16[2,64,256], index: 10, kind: input, shape index: {}]   ;;  %s11929_s11 = inlined_call_operand.vmem [shape: f32[2,1,256], index: 11, kind: input, shape index: {}]   ;;  %s11930_s12 = inlined_call_operand.vmem [shape: bf16[2,256,64], index: 12, kind: input, shape index: {}]   ;;  %s11931_s13 = inlined_call_operand.vmem [shape: f32[2,1,64], index: 13, kind: input, shape index: {}]   ;;  %s11932_s14 = inlined_call_operand.vmem [shape: bf16[64,64], index: 14, kind: input, shape index: {}]   ;;  %s11933_s15 = inlined_call_operand.vmem [shape: bf16[64,64], index: 15, kind: input, shape index: {}]   ;;  %s11934_s16 = inlined_call_operand.vmem [shape: bf16[64,128], index: 16, kind: input, shape index: {}]   ;;  %s11935_s17 = inlined_call_operand.vmem [shape: f32[3,1,128], index: 17, kind: input, shape index: {}]   ;;  %s11936_s18 = inlined_call_operand.vmem [shape: f32[16,128], index: 18, kind: output, shape index: {}]  }
   0x1   :  { %11948 = sst [smem:[#allocation4_spill]] %s11918_s0 }
   0x2   :  { %11949 = sst [smem:[#allocation5_spill]] %s11919_s1 }
   0x3   :  { %11950 = sst [smem:[#allocation6_spill]] %s11920_s2 }
   0x4 LB: > { %s9392_s28 = sadd.s32 4294967295, %s9286_s27   ;;  %p6968_p0 = scmp.ge.s32.totalorder %s9286_s27, 1  ;;  %s9286_s27 = sphi %s9386_s27, %s28_s27  }
   0x5   : > { %p514_p1 = scmp.lt.s32.totalorder %s9286_s27, 3 }
   0x7   : > { %p515_p2 = pnand %p6968_p0, %p514_p1 }
   0x9   : > { %518 = sbr.rel (%p515_p2) target bundleno = 10535 (0x2927), region = 92 }
   0xe   : > { %v8763_v0 = vld [vmem:[%s11922_s4 + $0x78] sm:$0xff]   ;;  %v8767_v4 = vld [vmem:[%s11922_s4 + $0x70] sm:$0xff]   ;;  %v8771_v8 = vld [vmem:[%s11922_s4 + $0x68] sm:$0xff]   ;;  %s568_s29 = smul.u32 5, %s9392_s28  ;;  %s11951_s25 = sld [smem:[#allocation4_spill]]  ;;  %vm1243_vm0 = vcmask 523264  }
   0xf   : > { %v8764_v1 = vld [vmem:[%s11922_s4 + $0x38] sm:$0xff]   ;;  %7587 = vmatprep.subr.bf16.mxu0 %v8763_v0  ;;  %v8768_v5 = vld [vmem:[%s11922_s4 + $0x30] sm:$0xff]   ;;  %v8772_v9 = vld [vmem:[%s11922_s4 + $0x28] sm:$0xff]   ;;  %s11952_s20 = sld [smem:[#allocation5_spill]]  ;;  %vm9289_vm1 = vmmov 0   ;;  %vm1783_vm2 = vcmask 1043456  }
  0x10   : > { %v8765_v2 = vld [vmem:[%s11922_s4 + $0xf8] sm:$0xff]   ;;  %7588 = vmatpush3.bf16.msra.mxu0 %v8764_v1  ;;  %v8769_v6 = vld [vmem:[%s11922_s4 + $0xf0] sm:$0xff]   ;;  %v8773_v10 = vld [vmem:[%s11922_s4 + $0xe8] sm:$0xff]   ;;  %p569_p3 = scmp.lt.s32.totalorder %s568_s29, 9  ;;  %vm1640_vm3 = vcmask 130048   ;;  %vm1715_vm4 = vcmask 326656  }
  0x11   : > { %v8766_v3 = vld [vmem:[%s11922_s4 + $0xb8] sm:$0xff]   ;;  %7621 = vmatprep.subr.bf16.mxu1 %v8765_v2  ;;  %7589 = vmatprep.subr.bf16.mxu0 %v8767_v4  ;;  %v8770_v7 = vld [vmem:[%s11922_s4 + $0xb0] sm:$0xff]   ;;  %v8774_v11 = vld [vmem:[%s11922_s4 + $0xa8] sm:$0xff]   ;;  %p575_p4 = scmp.lt.s32.totalorder %s9392_s28, 1 }
  0x12   : > { %7622 = vmatpush3.bf16.msra.mxu1 %v8766_v3  ;;  %v8775_v12 = vld [vmem:[%s11922_s4 + $0x60] sm:$0xff]   ;;  %v8779_v16 = vld [vmem:[%s11922_s4 + $0x58] sm:$0xff]   ;;  %v8783_v20 = vld [vmem:[%s11922_s4 + $0x50] sm:$0xff]   ;;  %s11969_s29 = smov (!%p569_p3, %s568_s29), 9 }
  0x13   : > { %7623 = vmatprep.subr.bf16.mxu1 %v8769_v6  ;;  %v8776_v13 = vld [vmem:[%s11922_s4 + $0x20] sm:$0xff]   ;;  %v8780_v17 = vld [vmem:[%s11922_s4 + $0x18] sm:$0xff]   ;;  %v8784_v21 = vld [vmem:[%s11922_s4 + $0x10] sm:$0xff]   ;;  %s8751_s30 = smul.u32 24, %s11969_s29  ;;  %s11971_s28 = smov (!%p575_p4, %s9392_s28), 1 }
  0x14   : > { %7590 = vmatpush3.bf16.msra.mxu0 %v8768_v5  ;;  %v8777_v14 = vld [vmem:[%s11922_s4 + $0xe0] sm:$0xff]   ;;  %v8781_v18 = vld [vmem:[%s11922_s4 + $0xd8] sm:$0xff]   ;;  %v8785_v22 = vld [vmem:[%s11922_s4 + $0xd0] sm:$0xff]  }
  0x15   : > { %7591 = vmatprep.subr.bf16.mxu0 %v8771_v8  ;;  %v8778_v15 = vld [vmem:[%s11922_s4 + $0xa0] sm:$0xff]   ;;  %v8782_v19 = vld [vmem:[%s11922_s4 + $0x98] sm:$0xff]   ;;  %v8786_v23 = vld [vmem:[%s11922_s4 + $0x90] sm:$0xff]   ;;  %s9487_s26 = scalar_lea.vmem %s11951_s25, %s8751_s30  ;;  %s6970_s25 = sshll.u32 %s11971_s28, 3 }
  0x16   : > { %7624 = vmatpush3.bf16.msra.mxu1 %v8770_v7  ;;  %v8787_v24 = vld [vmem:[%s11922_s4 + $0x48] sm:$0xff]   ;;  %v8791_v28 = vld [vmem:[%s11922_s4 + $0x40] sm:$0xff]   ;;  %v8798_v34 = vld [vmem:[%s11922_s4 + $0x178] sm:$0xff]   ;;  %s578_s30 = scalar_lea.vmem %s11936_s18, %s6970_s25 }
  0x17   : > { %7625 = vmatprep.subr.bf16.mxu1 %v8773_v10  ;;  %v8788_v25 = vld [vmem:[%s11922_s4 + $0x8] sm:$0xff]   ;;  %v8792_v29 = vld [vmem:[%s11922_s4] sm:$0xff]   ;;  %v8802_v37 = vld [vmem:[%s11922_s4 + $0x138] sm:$0xff]  }
  0x18   : > { %7592 = vmatpush3.bf16.msra.mxu0 %v8772_v9  ;;  %v8789_v26 = vld [vmem:[%s11922_s4 + $0xc8] sm:$0xff]   ;;  %v8793_v30 = vld [vmem:[%s11922_s4 + $0xc0] sm:$0xff]   ;;  %v8803_v38 = vld [vmem:[%s11922_s4 + $0x170] sm:$0xff]  }
  0x19   : > { %7593 = vmatprep.subr.bf16.mxu0 %v8775_v12  ;;  %v8790_v27 = vld [vmem:[%s11922_s4 + $0x88] sm:$0xff]   ;;  %v8794_v31 = vld [vmem:[%s9487_s26] ss:$24 sps:$4 sm:$0xff]   ;;  %v8796_v32 = vld [vmem:[%s9487_s26 + $0x4] ss:$24 sps:$4 sm:$0xff]  }
  0x1a   : > { %7626 = vmatpush3.bf16.msra.mxu1 %v8774_v11  ;;  %v8797_v33 = vld [vmem:[%s11922_s4 + $0x80] sm:$0xff]   ;;  %1097 = vmatprep.mubr.bf16.mxu0 %v8796_v32  ;;  %v8804_v39 = vld [vmem:[%s11922_s4 + $0x130] sm:$0xff]   ;;  %v8805_v40 = vld [vmem:[%s11922_s4 + $0x168] sm:$0xff]  }
  0x1b   : > { %7627 = vmatprep.subr.bf16.mxu1 %v8777_v14  ;;  %v8799_v35 = vld [vmem:[%s9487_s26 + $0x8] ss:$24 sps:$4 sm:$0xff]   ;;  %v8801_v36 = vld [vmem:[%s9487_s26 + $0xc] ss:$24 sps:$4 sm:$0xff]   ;;  %v8810_v44 = vld [vmem:[%s9487_s26 + $0x3c] ss:$24 sps:$4 sm:$0xff]  }
  0x1c   : > { %7594 = vmatpush3.bf16.msra.mxu0 %v8776_v13  ;;  %1153 = vmatprep.mubr.bf16.mxu1 %v8801_v36  ;;  %v8806_v41 = vld [vmem:[%s9487_s26 + $0x34] ss:$24 sps:$4 sm:$0xff]   ;;  %v8809_v43 = vld [vmem:[%s9487_s26 + $0x30] ss:$24 sps:$4 sm:$0xff]   ;;  %v8813_v46 = vld [vmem:[%s11922_s4 + $0x160] sm:$0xff]  }
  0x1d   : > { %7595 = vmatprep.subr.bf16.mxu0 %v8779_v16  ;;  %v8808_v42 = vld [vmem:[%s11922_s4 + $0x128] sm:$0xff]   ;;  %v8812_v45 = vld [vmem:[%s9487_s26 + $0x38] ss:$24 sps:$4 sm:$0xff]   ;;  %v8814_v47 = vld [vmem:[%s11922_s4 + $0x120] sm:$0xff]  }
  0x1e   : > { %7628 = vmatpush3.bf16.msra.mxu1 %v8778_v15  ;;  %v592_v48 = vld [vmem:[%s9487_s26 + $0x60] sm:$0xff]  ;;  %v8815_v49 = vld [vmem:[%s11922_s4 + $0x158] sm:$0xff]   ;;  %v593_v52 = vld [vmem:[%s9487_s26 + $0x68] sm:$0xff] }
  0x1f   : > { %7629 = vmatprep.subr.bf16.mxu1 %v8781_v18  ;;  %v6984_v50 = vcombine.high %v592_v48, %v592_v48  ;;  %v6983_v51 = vcombine.low %v592_v48, %v592_v48  ;;  %v8817_v53 = vld [vmem:[%s11922_s4 + $0x118] sm:$0xff]   ;;  %v6986_v54 = vcombine.high %v593_v52, %v593_v52  ;;  %v6985_v55 = vcombine.low %v593_v52, %v593_v52  ;;  %v8819_v56 = vld [vmem:[%s11922_s4 + $0x150] sm:$0xff]   ;;  %v8823_v58 = vld [vmem:[%s11922_s4 + $0x148] sm:$0xff]  }
  0x20   : > { %7596 = vmatpush3.bf16.msra.mxu0 %v8780_v17  ;;  %v8820_v57 = vld [vmem:[%s11922_s4 + $0x110] sm:$0xff]   ;;  %v8824_v60 = vld [vmem:[%s11922_s4 + $0x108] sm:$0xff]   ;;  %v8825_v61 = vld [vmem:[%s11922_s4 + $0x140] sm:$0xff]  }
  0x21   : > { %7597 = vmatprep.subr.bf16.mxu0 %v8783_v20  ;;  %v8829_v59 = vld [vmem:[%s9487_s26 + $0x14] ss:$24 sps:$4 sm:$0xff]   ;;  %v8826_v62 = vld [vmem:[%s11922_s4 + $0x100] sm:$0xff]   ;;  %v8827_v63 = vld [vmem:[%s9487_s26 + $0x10] ss:$24 sps:$4 sm:$0xff]  }
  0x22   : > { %7630 = vmatpush3.bf16.msra.mxu1 %v8782_v19  ;;  %v8830_v0 = vld [vmem:[%s9487_s26 + $0x44] ss:$24 sps:$4 sm:$0xff]   ;;  %v594_v1 = vld [vmem:[%s9487_s26 + $0x70] sm:$0xff]  ;;  %v8832_v2 = vld [vmem:[%s9487_s26 + $0x40] ss:$24 sps:$4 sm:$0xff]   ;;  %s11967_s26 = sld [smem:[#allocation6_spill]] }
  0x23   : > { %7631 = vmatprep.subr.bf16.mxu1 %v8785_v22  ;;  %v6988_v3 = vcombine.high %v594_v1, %v594_v1  ;;  %v6987_v4 = vcombine.low %v594_v1, %v594_v1 }
  0x24   : > { %7598 = vmatpush3.bf16.msra.mxu0 %v8784_v21 }
  0x25   : > { %7599 = vmatprep.subr.bf16.mxu0 %v8787_v24 }
  0x26   : > { %7632 = vmatpush3.bf16.msra.mxu1 %v8786_v23 }
  0x27   : > { %7633 = vmatprep.subr.bf16.mxu1 %v8789_v26 }
  0x28   : > { %7600 = vmatpush3.bf16.msra.mxu0 %v8788_v25 }
  0x29   : > { %7601 = vmatprep.subr.bf16.mxu0 %v8791_v28 }
  0x2a   : > { %7634 = vmatpush3.bf16.msra.mxu1 %v8790_v27 }
  0x2b   : > { %7635 = vmatprep.subr.bf16.mxu1 %v8793_v30  ;;  %v691_v30 = vld [vmem:[%s11952_s20] sm:$0xff] }
  0x2c   : > { %7602 = vmatpush3.bf16.msra.mxu0 %v8792_v29 }
  0x2d   : > { %7655 = vmatprep.subr.bf16.mxu0 %v8798_v34  ;;  %v692_v34 = vld [vmem:[%s11952_s20 + $0x8] sm:$0xff] }
  0x2e   : > { %7636 = vmatpush3.bf16.msra.mxu1 %v8797_v33 }
  0x2f   : > { %1098 = vmatmul.mubr.bf16.vlgmr.msra.gmra.mxu0 %v8794_v31 }
  0x30   : > { %7656 = vmatpush3.bf16.msra.mxu0 %v8802_v37  ;;  %1105 = vmatprep.mubr.bf16.mxu0 %v8806_v41 }
  0x31   : > { %1154 = vmatmul.mubr.bf16.vlgmr.msra.gmra.mxu1 %v8799_v35  ;;  %7657 = vmatprep.subr.bf16.mxu0 %v8803_v38 }
  0x32   : > { %1161 = vmatprep.mubr.bf16.mxu1 %v8810_v44 }
  0x34   : > { %7658 = vmatpush3.bf16.msra.mxu0 %v8804_v39 }
  0x35   : > { %7659 = vmatprep.subr.bf16.mxu0 %v8805_v40 }
  0x37   : > { %1106 = vmatmul.mubr.bf16.gmra.mxu0 %v8809_v43 }
  0x38   : > { %7660 = vmatpush3.bf16.msra.mxu0 %v8808_v42  ;;  %1113 = vmatprep.mubr.bf16.mxu0 %v6984_v50  ;;  %v693_v42 = vld [vmem:[%s11952_s20 + $0x10] sm:$0xff]  ;;  %v694_v50 = vld [vmem:[%s11952_s20 + $0x18] sm:$0xff] }
  0x39   : > { %1162 = vmatmul.mubr.bf16.gmra.mxu1 %v8812_v45  ;;  %7661 = vmatprep.subr.bf16.mxu0 %v8813_v46 }
  0x3a   : > { %1169 = vmatprep.mubr.bf16.mxu1 %v6986_v54 }
  0x3c   : > { %7662 = vmatpush3.bf16.msra.mxu0 %v8814_v47 }
  0x3d   : > { %7663 = vmatprep.subr.bf16.mxu0 %v8815_v49 }
  0x3f   : > { %1114 = vmatmul.mubr.bf16.gmra.mxu0 %v6983_v51 }
  0x40   : > { %7664 = vmatpush3.bf16.msra.mxu0 %v8817_v53  ;;  %1209 = vmatprep.mubr.bf16.mxu0 %v8829_v59 }
  0x41   : > { %1170 = vmatmul.mubr.bf16.gmra.mxu1 %v6985_v55  ;;  %7665 = vmatprep.subr.bf16.mxu0 %v8819_v56 }
  0x44   : > { %7666 = vmatpush3.bf16.msra.mxu0 %v8820_v57 }
  0x45   : > { %7667 = vmatprep.subr.bf16.mxu0 %v8823_v58 }
  0x48   : > { %7668 = vmatpush3.bf16.msra.mxu0 %v8824_v60 }
  0x49   : > { %7669 = vmatprep.subr.bf16.mxu0 %v8825_v61 }
  0x4c   : > { %7670 = vmatpush3.bf16.msra.mxu0 %v8826_v62  ;;  %v695_v62 = vld [vmem:[%s11952_s20 + $0x20] sm:$0xff] }
  0x4f   : > { %1210 = vmatmul.mubr.bf16.vlgmr.msra.gmra.mxu0 %v8827_v63 }
  0x50   : > { %1217 = vmatprep.mubr.bf16.mxu0 %v8830_v0 }
  0x57   : > { %1218 = vmatmul.mubr.bf16.gmra.mxu0 %v8832_v2 }
  0x58   : > { %1225 = vmatprep.mubr.bf16.mxu0 %v6988_v3 }
  0x5f   : > { %1226 = vmatmul.mubr.bf16.gmra.mxu0 %v6987_v4 }
  0xef   : > { %v7603_v5 = vpop.f32.mrf.mxu0 }
  0xf1   : > { %v7604_v6 = vpop.f32.mrf.mxu0  ;;  %v7637_v7 = vpop.f32.mrf.mxu1 }
  0xf2   : > { %v7605_v29 = vadd.f32 %v7604_v6, %v7603_v5 }
  0xf3   : > { %v7606_v8 = vpop.f32.mrf.mxu0  ;;  %v7638_v9 = vpop.f32.mrf.mxu1 }
  0xf4   : > { %v1100_v32 = vadd.f32 %v7605_v29, %v691_v30  ;;  %v7639_v33 = vadd.f32 %v7638_v9, %v7637_v7 }
  0xf5   : > { %v7607_v10 = vpop.f32.mrf.mxu0  ;;  %v7640_v11 = vpop.f32.mrf.mxu1 }
  0xf6   : > { %v7608_v31 = vadd.f32 %v7607_v10, %v7606_v8  ;;  %v1156_v39 = vadd.f32 %v7639_v33, %v1100_v32 }
  0xf7   : > { %v7609_v12 = vpop.f32.mrf.mxu0  ;;  %v7641_v13 = vpop.f32.mrf.mxu1 }
  0xf8   : > { %v1103_v36 = vadd.f32 %v7608_v31, %v692_v34  ;;  %v7642_v37 = vadd.f32 %v7641_v13, %v7640_v11 }
  0xf9   : > { %v7610_v14 = vpop.f32.mrf.mxu0  ;;  %v7643_v15 = vpop.f32.mrf.mxu1 }
  0xfa   : > { %v7611_v40 = vadd.f32 %v7610_v14, %v7609_v12  ;;  %v1159_v45 = vadd.f32 %v7642_v37, %v1103_v36 }
  0xfb   : > { %v7612_v16 = vpop.f32.mrf.mxu0  ;;  %v7644_v17 = vpop.f32.mrf.mxu1 }
  0xfc   : > { %v1108_v48 = vadd.f32 %v7611_v40, %v693_v42  ;;  %v7645_v49 = vadd.f32 %v7644_v17, %v7643_v15  ;;  %v8835_v42 = vld [vmem:[%s11926_s8 + $0x18] sm:$0xff]  }
  0xfd   : > { %v7613_v18 = vpop.f32.mrf.mxu0  ;;  %v7646_v19 = vpop.f32.mrf.mxu1 }
  0xfe   : > { %v7614_v46 = vadd.f32 %v7613_v18, %v7612_v16  ;;  %v1164_v58 = vadd.f32 %v7645_v49, %v1108_v48  ;;  %v8839_v48 = vld [vmem:[%s11926_s8 + $0x8] sm:$0xff]  }
  0xff   : > { %v7615_v20 = vpop.f32.mrf.mxu0  ;;  %v7647_v21 = vpop.f32.mrf.mxu1  ;;  %v8840_v49 = vld [vmem:[%s11924_s6 + $0x28] sm:$0xff]  }
 0x100   : > { %v1111_v55 = vadd.f32 %v7614_v46, %v694_v50  ;;  %v7648_v56 = vadd.f32 %v7647_v21, %v7646_v19  ;;  %v8837_v46 = vld [vmem:[%s11926_s8 + $0x10] sm:$0xff]   ;;  %v8841_v50 = vld [vmem:[%s11926_s8] sm:$0xff]  }
 0x101   : > { %v7616_v22 = vpop.f32.mrf.mxu0  ;;  %v7649_v23 = vpop.f32.mrf.mxu1 }
 0x102   : > { %v7617_v59 = vadd.f32 %v7616_v22, %v7615_v20  ;;  %v1167_v1 = vadd.f32 %v7648_v56, %v1111_v55 }
 0x103   : > { %v7618_v24 = vpop.f32.mrf.mxu0  ;;  %v7650_v25 = vpop.f32.mrf.mxu1 }
 0x104   : > { %v1116_v3 = vadd.f32 %v7617_v59, %v695_v62  ;;  %v7651_v4 = vadd.f32 %v7650_v25, %v7649_v23 }
 0x105   : > { %v7619_v26 = vpop.f32.mrf.mxu0  ;;  %v7652_v27 = vpop.f32.mrf.mxu1 }
 0x106   : > { %v1172_v10 = vadd.f32 %v7651_v4, %v1116_v3 }
 0x107   : > { %v7653_v28 = vpop.f32.mrf.mxu1 }
 0x10f   : > { %v7671_v35 = vpop.f32.mrf.mxu0 }
 0x111   : > { %v7672_v38 = vpop.f32.mrf.mxu0 }
 0x112   : > { %v7673_v41 = vadd.f32 %v7672_v38, %v7671_v35 }
 0x113   : > { %v7674_v43 = vpop.f32.mrf.mxu0 }
 0x114   : > { %v9570_v44 = vadd.f32 %v7673_v41, %v1156_v39 }
 0x115   : > { %v7675_v47 = vpop.f32.mrf.mxu0 }
 0x116   : > { %v7676_v51 = vadd.f32 %v7675_v47, %v7674_v43  ;;  %v1244_v52 = vsel %vm1243_vm0, %v9570_v44, 0.0  ;;  %v8836_v43 = vld [vmem:[%s11924_s6 + $0x38] sm:$0xff]   ;;  %v8838_v47 = vld [vmem:[%s11924_s6 + $0x30] sm:$0xff]  }
 0x117   : > { %v7677_v53 = vpop.f32.mrf.mxu0  ;;  %1245 = vadd.xlane.f32.xlu0 %v1244_v52 }
 0x118   : > { %v9577_v54 = vadd.f32 %v7676_v51, %v1159_v45  ;;  %v11942_v45 = vmov 0.0   ;;  %v8842_v51 = vld [vmem:[%s11924_s6 + $0x20] sm:$0xff]  }
 0x119   : > { %v7678_v57 = vpop.f32.mrf.mxu0  ;;  %8014 = vmatprep.subr.bf16.mxu1 %v11942_v45  ;;  %8054 = vmatprep.subr.bf16.mxu0 %v11942_v45 }
 0x11a   : > { %v7679_v60 = vadd.f32 %v7678_v57, %v7677_v53  ;;  %v1247_v61 = vsel %vm1243_vm0, %v9577_v54, 0.0  ;;  %8015 = vmatpush3.bf16.msra.mxu1 %v8835_v42  ;;  %8055 = vmatpush3.bf16.msra.mxu0 %v8836_v43 }
 0x11b   : > { %v7680_v63 = vpop.f32.mrf.mxu0  ;;  %1248 = vadd.xlane.f32.xlu0 %v1247_v61  ;;  %8016 = vmatprep.subr.bf16.mxu1 %v11942_v45 }
 0x11c   : > { %v9584_v0 = vadd.f32 %v7679_v60, %v1164_v58  ;;  %8056 = vmatprep.subr.bf16.mxu0 %v11942_v45  ;;  %8022 = vmatprep.mubr.msk.bf16.mxu1 %vm9289_vm1, %v11942_v45 }
 0x11d   : > { %v7681_v2 = vpop.f32.mrf.mxu0  ;;  %8062 = vmatprep.mubr.msk.bf16.mxu0 %vm9289_vm1, %v11942_v45 }
 0x11e   : > { %v7682_v5 = vadd.f32 %v7681_v2, %v7680_v63  ;;  %v1250_v6 = vsel %vm1243_vm0, %v9584_v0, 0.0  ;;  %8017 = vmatpush3.bf16.msra.mxu1 %v8837_v46  ;;  %8057 = vmatpush3.bf16.msra.mxu0 %v8838_v47 }
 0x11f   : > { %v7683_v7 = vpop.f32.mrf.mxu0  ;;  %1251 = vadd.xlane.f32.xlu1 %v1250_v6  ;;  %8018 = vmatprep.subr.bf16.mxu1 %v11942_v45 }
 0x120   : > { %v9588_v8 = vadd.f32 %v7682_v5, %v1167_v1  ;;  %8058 = vmatprep.subr.bf16.mxu0 %v11942_v45 }
 0x121   : > { %v7684_v9 = vpop.f32.mrf.mxu0 }
 0x122   : > { %v7685_v11 = vadd.f32 %v7684_v9, %v7683_v7  ;;  %v1253_v12 = vsel %vm1243_vm0, %v9588_v8, 0.0  ;;  %8019 = vmatpush3.bf16.msra.mxu1 %v8839_v48  ;;  %8059 = vmatpush3.bf16.msra.mxu0 %v8840_v49  ;;  %v7038_v7 = vld [vmem:[%s11923_s5] ss:$0 sm:$0xff] }
 0x123   : > { %v7686_v13 = vpop.f32.mrf.mxu0  ;;  %1254 = vadd.xlane.f32.xlu1 %v1253_v12  ;;  %8020 = vmatprep.subr.bf16.mxu1 %v11942_v45  ;;  %v7039_v12 = vld [vmem:[%s11923_s5 + $0x1] ss:$0 sm:$0xff] }
 0x124   : > { %v9592_v14 = vadd.f32 %v7685_v11, %v1172_v10  ;;  %8060 = vmatprep.subr.bf16.mxu0 %v11942_v45 }
 0x125   : > { %v7687_v15 = vpop.f32.mrf.mxu0 }
 0x126   : > { %v1256_v16 = vsel %vm1243_vm0, %v9592_v14, 0.0  ;;  %8021 = vmatpush3.bf16.msra.mxu1 %v8841_v50  ;;  %8061 = vmatpush3.bf16.msra.mxu0 %v8842_v51 }
 0x127   : > { %1257 = vadd.xlane.f32.xlu0 %v1256_v16  ;;  %8034 = vmatprep.subr.bf16.mxu1 %v11942_v45 }
 0x128   : > { %8092 = vmatprep.subr.bf16.mxu0 %v11942_v45 }
 0x1a0   : > { %v1246_v17 = vpop.xlane.xlu0 %1245 }
 0x1a1   : > { %v1260_v18 = vmul.f32 0.015625, %v1246_v17 }
 0x1a3   : > { %v9597_v19 = vsub.f32 %v9570_v44, %v1260_v18 }
 0x1a4   : > { %v1249_v20 = vpop.xlane.xlu0 %1248 }
 0x1a5   : > { %v1261_v21 = vmul.f32 0.015625, %v1249_v20  ;;  %v1270_v22 = vmul.f32 %v9597_v19, %v9597_v19  ;;  %v8843_v20 = vld [vmem:[%s11924_s6 + $0x18] sm:$0xff]  }
 0x1a7   : > { %v9602_v23 = vsub.f32 %v9577_v54, %v1261_v21  ;;  %v1275_v24 = vsel %vm1243_vm0, %v1270_v22, 0.0 }
 0x1a8   : > { %v1252_v25 = vpop.xlane.xlu1 %1251  ;;  %1276 = vadd.xlane.f32.xlu1 %v1275_v24 }
 0x1a9   : > { %v1262_v26 = vmul.f32 0.015625, %v1252_v25  ;;  %v1271_v27 = vmul.f32 %v9602_v23, %v9602_v23  ;;  %v8844_v25 = vld [vmem:[%s11924_s6 + $0x10] sm:$0xff]  }
 0x1ab   : > { %v9608_v28 = vsub.f32 %v9584_v0, %v1262_v26  ;;  %v1278_v29 = vsel %vm1243_vm0, %v1271_v27, 0.0 }
 0x1ac   : > { %v1255_v30 = vpop.xlane.xlu1 %1254  ;;  %1279 = vadd.xlane.f32.xlu0 %v1278_v29 }
 0x1ad   : > { %v1263_v31 = vmul.f32 0.015625, %v1255_v30  ;;  %v1272_v32 = vmul.f32 %v9608_v28, %v9608_v28 }
 0x1af   : > { %v9614_v33 = vsub.f32 %v9588_v8, %v1263_v31  ;;  %v1281_v34 = vsel %vm1243_vm0, %v1272_v32, 0.0  ;;  %v8845_v32 = vld [vmem:[%s11924_s6 + $0x8] sm:$0xff]  }
 0x1b0   : > { %1282 = vadd.xlane.f32.xlu1 %v1281_v34  ;;  %v1258_v35 = vpop.xlane.xlu0 %1257  ;;  %v8846_v34 = vld [vmem:[%s11924_s6] sm:$0xff]  }
 0x1b1   : > { %v1264_v36 = vmul.f32 0.015625, %v1258_v35  ;;  %v1273_v37 = vmul.f32 %v9614_v33, %v9614_v33 }
 0x1b3   : > { %v9620_v38 = vsub.f32 %v9592_v14, %v1264_v36  ;;  %v1284_v39 = vsel %vm1243_vm0, %v1273_v37, 0.0 }
 0x1b4   : > { %1285 = vadd.xlane.f32.xlu0 %v1284_v39 }
 0x1b5   : > { %v1274_v40 = vmul.f32 %v9620_v38, %v9620_v38 }
 0x1b7   : > { %v1287_v41 = vsel %vm1243_vm0, %v1274_v40, 0.0 }
 0x1b8   : > { %1288 = vadd.xlane.f32.xlu1 %v1287_v41 }
 0x231   : > { %v1277_v52 = vpop.xlane.xlu1 %1276 }
 0x232   : > { %v1290_v53 = vmul.f32 0.015625, %v1277_v52 }
 0x234   : > { %v1295_v55 = vadd.f32 1e-06, %v1290_v53 }
 0x235   : > { %v1280_v56 = vpop.xlane.xlu0 %1279 }
 0x236   : > { %8983 = vrsqrt.f32 %v1295_v55  ;;  %v1291_v57 = vmul.f32 0.015625, %v1280_v56  ;;  %v7040_v55 = vld [vmem:[%s11927_s9] ss:$0 sm:$0xff]  ;;  %v7065_v56 = vld [vmem:[%s11925_s7 + $0x1] ss:$0 sm:$0xff] }
 0x238   : > { %v1296_v58 = vadd.f32 1e-06, %v1291_v57 }
 0x239   : > { %v1283_v59 = vpop.xlane.xlu1 %1282 }
 0x23a   : > { %8985 = vrsqrt.f32 %v1296_v58  ;;  %v1292_v60 = vmul.f32 0.015625, %v1283_v59 }
 0x23c   : > { %v1297_v61 = vadd.f32 1e-06, %v1292_v60 }
 0x23d   : > { %v1286_v62 = vpop.xlane.xlu0 %1285 }
 0x23e   : > { %8987 = vrsqrt.f32 %v1297_v61  ;;  %v1293_v63 = vmul.f32 0.015625, %v1286_v62 }
 0x240   : > { %v1298_v1 = vadd.f32 1e-06, %v1293_v63 }
 0x241   : > { %v1289_v2 = vpop.xlane.xlu1 %1288 }
 0x242   : > { %8989 = vrsqrt.f32 %v1298_v1  ;;  %v1294_v3 = vmul.f32 0.015625, %v1289_v2 }
 0x243   : > { %v8984_v4 = vpop.eup %8983 }
 0x244   : > { %v1305_v5 = vmul.f32 %v8984_v4, %v9597_v19  ;;  %v1299_v6 = vadd.f32 1e-06, %v1294_v3 }
 0x246   : > { %8991 = vrsqrt.f32 %v1299_v6  ;;  %v1316_v10 = vmul.f32 %v7038_v7, %v1305_v5 }
 0x247   : > { %v8986_v9 = vpop.eup %8985 }
 0x248   : > { %v1306_v11 = vmul.f32 %v8986_v9, %v9602_v23  ;;  %v1327_v16 = vadd.f32 %v7039_v12, %v1316_v10 }
 0x24a   : > { %v1317_v13 = vmul.f32 %v7038_v7, %v1306_v11 }
 0x24b   : > { %v8988_v15 = vpop.eup %8987 }
 0x24c   : > { %v1328_v17 = vadd.f32 %v7039_v12, %v1317_v13  ;;  %v1307_v18 = vmul.f32 %v8988_v15, %v9608_v28 }
 0x24e   : > { %v9673_v19 = vpack.c.bf16 %v1328_v17, %v1327_v16  ;;  %v1318_v22 = vmul.f32 %v7038_v7, %v1307_v18 }
 0x24f   : > { %v8990_v21 = vpop.eup %8989 }
 0x250   : > { %v1308_v23 = vmul.f32 %v8990_v21, %v9614_v33  ;;  %8023 = vmatmul.mubr.msk.bf16.vlgmr.msra.gmra.mxu1 %vm1243_vm0, %v9673_v19  ;;  %8063 = vmatmul.mubr.msk.bf16.vlgmr.msra.gmra.mxu0 %vm1243_vm0, %v9673_v19  ;;  %v1329_v27 = vadd.f32 %v7039_v12, %v1318_v22 }
 0x251   : > { %8026 = vmatprep.mubr.msk.bf16.mxu1 %vm9289_vm1, %v11942_v45  ;;  %8066 = vmatprep.mubr.msk.bf16.mxu0 %vm9289_vm1, %v11942_v45 }
 0x252   : > { %v1319_v24 = vmul.f32 %v7038_v7, %v1308_v23  ;;  %8035 = vmatpush3.bf16.msra.mxu1 %v8843_v20 }
 0x253   : > { %v8992_v26 = vpop.eup %8991  ;;  %8036 = vmatprep.subr.bf16.mxu1 %v11942_v45 }
 0x254   : > { %v1330_v28 = vadd.f32 %v7039_v12, %v1319_v24  ;;  %v1309_v29 = vmul.f32 %v8992_v26, %v9620_v38 }
 0x256   : > { %v9692_v30 = vpack.c.bf16 %v1330_v28, %v1329_v27  ;;  %v1320_v31 = vmul.f32 %v7038_v7, %v1309_v29  ;;  %8037 = vmatpush3.bf16.msra.mxu1 %v8844_v25 }
 0x257   : > { %8038 = vmatprep.subr.bf16.mxu1 %v11942_v45 }
 0x258   : > { %8027 = vmatmul.mubr.msk.bf16.gmra.mxu1 %vm1243_vm0, %v9692_v30  ;;  %8067 = vmatmul.mubr.msk.bf16.gmra.mxu0 %vm1243_vm0, %v9692_v30  ;;  %v1331_v33 = vadd.f32 %v7039_v12, %v1320_v31 }
 0x259   : > { %8030 = vmatprep.mubr.msk.bf16.mxu1 %vm9289_vm1, %v11942_v45  ;;  %8070 = vmatprep.mubr.msk.bf16.mxu0 %vm9289_vm1, %v11942_v45 }
 0x25a   : > { %8039 = vmatpush3.bf16.msra.mxu1 %v8845_v32  ;;  %v9710_v35 = vpack.c.bf16 %v1331_v33, %v1331_v33  ;;  %v7048_v33 = vld [vmem:[%s11925_s7] ss:$0 sm:$0xff] }
 0x25b   : > { %8040 = vmatprep.subr.bf16.mxu1 %v11942_v45 }
 0x25e   : > { %8041 = vmatpush3.bf16.msra.mxu1 %v8846_v34 }
 0x25f   : > { %8074 = vmatprep.subr.bf16.mxu1 %v11942_v45 }
 0x260   : > { %8031 = vmatmul.mubr.msk.bf16.gmra.mxu1 %vm1243_vm0, %v9710_v35  ;;  %8071 = vmatmul.mubr.msk.bf16.gmra.mxu0 %vm1243_vm0, %v9710_v35 }
 0x261   : > { %8042 = vmatprep.mubr.msk.bf16.mxu1 %vm9289_vm1, %v11942_v45  ;;  %8098 = vmatprep.mubr.msk.bf16.mxu0 %vm9289_vm1, %v11942_v45 }
 0x268   : > { %8043 = vmatmul.mubr.msk.bf16.vlgmr.msra.gmra.mxu1 %vm1243_vm0, %v9673_v19 }
 0x269   : > { %8046 = vmatprep.mubr.msk.bf16.mxu1 %vm9289_vm1, %v11942_v45 }
 0x270   : > { %8047 = vmatmul.mubr.msk.bf16.gmra.mxu1 %vm1243_vm0, %v9692_v30 }
 0x271   : > { %8050 = vmatprep.mubr.msk.bf16.mxu1 %vm9289_vm1, %v11942_v45 }
 0x278   : > { %8051 = vmatmul.mubr.msk.bf16.gmra.mxu1 %vm1243_vm0, %v9710_v35 }
 0x279   : > { %8080 = vmatprep.mubr.msk.bf16.mxu1 %vm9289_vm1, %v11942_v45 }
 0x310   : > { %v1417_v36 = vpop.f32.mrf.mxu1  ;;  %v1612_v37 = vpop.f32.mrf.mxu0 }
 0x311   : > { %v1418_v18 = vadd.f32 %v7040_v55, %v1417_v36  ;;  %v1613_v26 = vadd.f32 %v7065_v56, %v1612_v37 }
 0x312   : > { %v8024_v38 = vpop.f32.mrf.mxu1  ;;  %v8064_v39 = vpop.f32.mrf.mxu0 }
 0x314   : > { %v1420_v40 = vpop.f32.mrf.mxu1  ;;  %v1615_v41 = vpop.f32.mrf.mxu0 }
 0x315   : > { %v1421_v13 = vadd.f32 %v7040_v55, %v1420_v40  ;;  %v1616_v23 = vadd.f32 %v7065_v56, %v1615_v41  ;;  %v8847_v40 = vld [vmem:[%s11924_s6 + $0x58] sm:$0xff]  }
 0x316   : > { %v8025_v42 = vpop.f32.mrf.mxu1  ;;  %v8065_v43 = vpop.f32.mrf.mxu0 }
 0x317   : > { %v9750_v21 = vpack.c.bf16 %v1421_v13, %v1418_v18  ;;  %v1637_v28 = vpack.c.bf16 %v1616_v23, %v1613_v26  ;;  %v9828_v13 = vld [vmem:[%s11921_s3 + $0x20] sm:$0xff] }
 0x318   : > { %v1425_v46 = vpop.f32.mrf.mxu1  ;;  %v1620_v47 = vpop.f32.mrf.mxu0  ;;  %v9836_v26 = vld [vmem:[%s11925_s7 + $0x2] ss:$0 sm:$0xff] }
 0x319   : > { %v1426_v9 = vadd.f32 %v7040_v55, %v1425_v46  ;;  %v1621_v12 = vadd.f32 %v7065_v56, %v1620_v47  ;;  %v1651_v32 = vsel %vm1640_vm3, %v1637_v28, 0  ;;  %v8848_v46 = vld [vmem:[%s11924_s6 + $0x50] sm:$0xff]  }
 0x31a   : > { %v8028_v48 = vpop.f32.mrf.mxu1  ;;  %v8068_v49 = vpop.f32.mrf.mxu0 }
 0x31b   : > { %v8849_v49 = vld [vmem:[%s11924_s6 + $0x48] sm:$0xff]  }
 0x31c   : > { %v1428_v50 = vpop.f32.mrf.mxu1  ;;  %v1623_v51 = vpop.f32.mrf.mxu0 }
 0x31d   : > { %v1429_v2 = vadd.f32 %v7040_v55, %v1428_v50  ;;  %v1624_v5 = vadd.f32 %v7065_v56, %v1623_v51  ;;  %v8850_v51 = vld [vmem:[%s11924_s6 + $0x40] sm:$0xff]  }
 0x31e   : > { %v8029_v52 = vpop.f32.mrf.mxu1  ;;  %v8069_v53 = vpop.f32.mrf.mxu0 }
 0x31f   : > { %v9746_v15 = vpack.c.bf16 %v1429_v2, %v1426_v9  ;;  %v1638_v17 = vpack.c.bf16 %v1624_v5, %v1621_v12 }
 0x320   : > { %v1433_v57 = vpop.f32.mrf.mxu1  ;;  %v1628_v58 = vpop.f32.mrf.mxu0 }
 0x321   : > { %v1434_v59 = vadd.f32 %v7040_v55, %v1433_v57  ;;  %v1629_v60 = vadd.f32 %v7065_v56, %v1628_v58  ;;  %v1654_v24 = vsel %vm1640_vm3, %v1638_v17, 0  ;;  %v9801_v55 = vld [vmem:[%s11921_s3] sm:$0xff] }
 0x322   : > { %v8032_v61 = vpop.f32.mrf.mxu1  ;;  %v8072_v62 = vpop.f32.mrf.mxu0 }
 0x323   : > { %v1441_v63 = vpack.c.bf16 %v1434_v59, %v1434_v59  ;;  %v1639_v1 = vpack.c.bf16 %v1629_v60, %v1629_v60  ;;  %v9807_v59 = vld [vmem:[%s11921_s3 + $0x8] sm:$0xff] }
 0x324   : > { %v1436_v3 = vpop.f32.mrf.mxu1  ;;  %v1631_v4 = vpop.f32.mrf.mxu0 }
 0x325   : > { %v9740_v6 = vsel %vm1783_vm2, %v1441_v63, 0  ;;  %v1657_v7 = vsel %vm1640_vm3, %v1639_v1, 0  ;;  %v9814_v1 = vld [vmem:[%s11921_s3 + $0x10] sm:$0xff] }
 0x326   : > { %v8033_v10 = vpop.f32.mrf.mxu1  ;;  %v8073_v11 = vpop.f32.mrf.mxu0  ;;  %8075 = vmatpush3.bf16.xpose.msra.mxu1 %v1657_v7  ;;  %8093 = vmatpush3.bf16.msra.mxu0 %v9740_v6  ;;  %v9821_v7 = vld [vmem:[%s11921_s3 + $0x18] sm:$0xff] }
 0x327   : > { %8094 = vmatprep.subr.bf16.mxu0 %v11942_v45  ;;  %8076 = vmatprep.subr.bf16.mxu1 %v11942_v45 }
 0x328   : > { %v1515_v16 = vpop.f32.mrf.mxu1 }
 0x329   : > { %v1516_v38 = vadd.f32 %v7048_v33, %v1515_v16 }
 0x32a   : > { %v8044_v20 = vpop.f32.mrf.mxu1  ;;  %8095 = vmatpush3.bf16.msra.mxu0 %v9746_v15 }
 0x32b   : > { %8096 = vmatprep.subr.bf16.mxu0 %v11942_v45 }
 0x32c   : > { %v1518_v22 = vpop.f32.mrf.mxu1 }
 0x32d   : > { %v1519_v36 = vadd.f32 %v7048_v33, %v1518_v22 }
 0x32e   : > { %v8045_v25 = vpop.f32.mrf.mxu1  ;;  %8077 = vmatpush3.bf16.xpose.msra.mxu1 %v1654_v24  ;;  %8097 = vmatpush3.bf16.msra.mxu0 %v9750_v21 }
 0x32f   : > { %8078 = vmatprep.subr.bf16.mxu1 %v11942_v45  ;;  %8130 = vmatprep.subr.bf16.mxu0 %v11942_v45  ;;  %v1634_v41 = vpack.c.bf16 %v1519_v36, %v1516_v38 }
 0x330   : > { %v1523_v27 = vpop.f32.mrf.mxu1 }
 0x331   : > { %v1524_v48 = vadd.f32 %v7048_v33, %v1523_v27 }
 0x332   : > { %v8048_v29 = vpop.f32.mrf.mxu1 }
 0x334   : > { %v1526_v31 = vpop.f32.mrf.mxu1 }
 0x335   : > { %v1527_v47 = vadd.f32 %v7048_v33, %v1526_v31 }
 0x336   : > { %v8049_v34 = vpop.f32.mrf.mxu1  ;;  %8079 = vmatpush3.bf16.xpose.msra.mxu1 %v1651_v32 }
 0x337   : > { %8110 = vmatprep.subr.bf16.mxu1 %v11942_v45  ;;  %v1635_v50 = vpack.c.bf16 %v1527_v47, %v1524_v48 }
 0x338   : > { %v1531_v37 = vpop.f32.mrf.mxu1 }
 0x339   : > { %v1532_v52 = vadd.f32 %v7048_v33, %v1531_v37 }
 0x33a   : > { %v8052_v39 = vpop.f32.mrf.mxu1 }
 0x33b   : > { %v1636_v53 = vpack.c.bf16 %v1532_v52, %v1532_v52 }
 0x33c   : > { %v1534_v42 = vpop.f32.mrf.mxu1 }
 0x33d   : > { %8081 = vmatmul.mubr.msk.bf16.vlgmr.msra.gmra.mxu1 %vm1640_vm3, %v1634_v41 }
 0x33e   : > { %v8053_v43 = vpop.f32.mrf.mxu1  ;;  %8084 = vmatprep.mubr.msk.bf16.mxu1 %vm9289_vm1, %v11942_v45  ;;  %8111 = vmatpush3.bf16.msra.mxu1 %v8847_v40 }
 0x33f   : > { %8112 = vmatprep.subr.bf16.mxu1 %v11942_v45 }
 0x342   : > { %8113 = vmatpush3.bf16.msra.mxu1 %v8848_v46 }
 0x343   : > { %8114 = vmatprep.subr.bf16.mxu1 %v11942_v45 }
 0x345   : > { %8085 = vmatmul.mubr.msk.bf16.gmra.mxu1 %vm1640_vm3, %v1635_v50 }
 0x346   : > { %8088 = vmatprep.mubr.msk.bf16.mxu1 %vm9289_vm1, %v11942_v45  ;;  %8115 = vmatpush3.bf16.msra.mxu1 %v8849_v49 }
 0x347   : > { %8116 = vmatprep.subr.bf16.mxu1 %v11942_v45 }
 0x34a   : > { %8117 = vmatpush3.bf16.msra.mxu1 %v8850_v51 }
 0x34b   : > { %8150 = vmatprep.subr.bf16.mxu1 %v11942_v45 }
 0x34d   : > { %8089 = vmatmul.mubr.msk.bf16.gmra.mxu1 %vm1640_vm3, %v1636_v53 }
 0x34e   : > { %8118 = vmatprep.mubr.msk.bf16.mxu1 %vm9289_vm1, %v11942_v45 }
 0x355   : > { %8119 = vmatmul.mubr.msk.bf16.vlgmr.msra.gmra.mxu1 %vm1243_vm0, %v9673_v19 }
 0x356   : > { %8122 = vmatprep.mubr.msk.bf16.mxu1 %vm9289_vm1, %v11942_v45 }
 0x35d   : > { %8123 = vmatmul.mubr.msk.bf16.gmra.mxu1 %vm1243_vm0, %v9692_v30 }
 0x35e   : > { %8126 = vmatprep.mubr.msk.bf16.mxu1 %vm9289_vm1, %v11942_v45 }
 0x365   : > { %8127 = vmatmul.mubr.msk.bf16.gmra.mxu1 %vm1243_vm0, %v9710_v35 }
 0x366   : > { %8156 = vmatprep.mubr.msk.bf16.mxu1 %vm9289_vm1, %v11942_v45 }
 0x3fd   : > { %v1693_v56 = vpop.f32.mrf.mxu1 }
 0x3fe   : > { %v1694_v57 = vadd.f32 %v1693_v56, %v9801_v55 }
 0x3ff   : > { %v8082_v58 = vpop.f32.mrf.mxu1 }
 0x400   : > { %v1716_v60 = vsel %vm1715_vm4, %v1694_v57, -inf }
 0x401   : > { %1717 = vmax.xlane.f32.xlu0 %v1716_v60  ;;  %v1696_v61 = vpop.f32.mrf.mxu1 }
 0x402   : > { %v1697_v62 = vadd.f32 %v1696_v61, %v9807_v59 }
 0x403   : > { %v8083_v63 = vpop.f32.mrf.mxu1 }
 0x404   : > { %v1719_v2 = vsel %vm1715_vm4, %v1697_v62, -inf }
 0x405   : > { %1720 = vmax.xlane.f32.xlu1 %v1719_v2  ;;  %v1701_v3 = vpop.f32.mrf.mxu1 }
 0x406   : > { %v1702_v4 = vadd.f32 %v1701_v3, %v9814_v1 }
 0x407   : > { %v8086_v5 = vpop.f32.mrf.mxu1 }
 0x408   : > { %v1722_v9 = vsel %vm1715_vm4, %v1702_v4, -inf }
 0x409   : > { %1723 = vmax.xlane.f32.xlu0 %v1722_v9  ;;  %v1704_v10 = vpop.f32.mrf.mxu1 }
 0x40a   : > { %v1705_v11 = vadd.f32 %v1704_v10, %v9821_v7 }
 0x40b   : > { %v8087_v12 = vpop.f32.mrf.mxu1 }
 0x40c   : > { %v1725_v16 = vsel %vm1715_vm4, %v1705_v11, -inf }
 0x40d   : > { %1726 = vmax.xlane.f32.xlu1 %v1725_v16  ;;  %v1709_v17 = vpop.f32.mrf.mxu1 }
 0x40e   : > { %v1710_v18 = vadd.f32 %v1709_v17, %v9828_v13 }
 0x40f   : > { %v8090_v20 = vpop.f32.mrf.mxu1 }
 0x410   : > { %v1728_v22 = vsel %vm1715_vm4, %v1710_v18, -inf }
 0x411   : > { %1729 = vmax.xlane.f32.xlu0 %v1728_v22  ;;  %v1712_v23 = vpop.f32.mrf.mxu1 }
 0x413   : > { %v8091_v24 = vpop.f32.mrf.mxu1 }
 0x415   : > { %v1933_v25 = vpop.f32.mrf.mxu1 }
 0x416   : > { %v9839_v29 = vadd.f32 %v9836_v26, %v1933_v25 }
 0x417   : > { %v8120_v27 = vpop.f32.mrf.mxu1 }
 0x419   : > { %v1936_v28 = vpop.f32.mrf.mxu1 }
 0x41a   : > { %v9842_v31 = vadd.f32 %v9836_v26, %v1936_v28 }
 0x41b   : > { %v8121_v32 = vpop.f32.mrf.mxu1 }
 0x41c   : > { %v2052_v33 = vpack.c.bf16 %v9842_v31, %v9839_v29  ;;  %v8858_v29 = vld [vmem:[%s11924_s6 + $0x80] sm:$0xff]  }
 0x41d   : > { %v1941_v34 = vpop.f32.mrf.mxu1 }
 0x41e   : > { %v9847_v38 = vadd.f32 %v9836_v26, %v1941_v34 }
 0x41f   : > { %v8124_v36 = vpop.f32.mrf.mxu1 }
 0x421   : > { %v1944_v37 = vpop.f32.mrf.mxu1 }
 0x422   : > { %v9850_v39 = vadd.f32 %v9836_v26, %v1944_v37  ;;  %v8851_v37 = vld [vmem:[%s11924_s6 + $0x78] sm:$0xff]  }
 0x423   : > { %v8125_v40 = vpop.f32.mrf.mxu1 }
 0x424   : > { %v2053_v41 = vpack.c.bf16 %v9850_v39, %v9847_v38 }
 0x425   : > { %v9854_v42 = vpop.f32.mrf.mxu1 }
 0x426   : > { %v1950_v31 = vadd.f32 %v9836_v26, %v9854_v42 }
 0x427   : > { %v8128_v43 = vpop.f32.mrf.mxu1 }
 0x429   : > { %v1952_v46 = vpop.f32.mrf.mxu1 }
 0x42a   : > { %v8852_v46 = vld [vmem:[%s11924_s6 + $0x70] sm:$0xff]  }
 0x42b   : > { %v8129_v47 = vpop.f32.mrf.mxu1 }
 0x48a   : > { %v1718_v48 = vpop.xlane.xlu0 %1717 }
 0x48b   : > { %v1731_v49 = vsub.f32 %v1694_v57, %v1718_v48 }
 0x48d   : > { %v1736_v50 = vmul.f32 1.442695, %v1731_v49 }
 0x48e   : > { %v1721_v51 = vpop.xlane.xlu1 %1720 }
 0x48f   : > { %8993 = vpow2.f32 %v1736_v50  ;;  %v1732_v52 = vsub.f32 %v1697_v62, %v1721_v51  ;;  %v8853_v50 = vld [vmem:[%s11924_s6 + $0x68] sm:$0xff]  }
 0x491   : > { %v1738_v53 = vmul.f32 1.442695, %v1732_v52 }
 0x492   : > { %v1724_v56 = vpop.xlane.xlu0 %1723 }
 0x493   : > { %8995 = vpow2.f32 %v1738_v53  ;;  %v1733_v58 = vsub.f32 %v1702_v4, %v1724_v56  ;;  %v8854_v53 = vld [vmem:[%s11924_s6 + $0x60] sm:$0xff]  }
 0x495   : > { %v1740_v60 = vmul.f32 1.442695, %v1733_v58 }
 0x496   : > { %v1727_v61 = vpop.xlane.xlu1 %1726 }
 0x497   : > { %8997 = vpow2.f32 %v1740_v60  ;;  %v1734_v63 = vsub.f32 %v1705_v11, %v1727_v61 }
 0x499   : > { %v1742_v2 = vmul.f32 1.442695, %v1734_v63 }
 0x49a   : > { %v1730_v3 = vpop.xlane.xlu0 %1729 }
 0x49b   : > { %8999 = vpow2.f32 %v1742_v2  ;;  %v1735_v5 = vsub.f32 %v1710_v18, %v1730_v3 }
 0x49c   : > { %v8994_v9 = vpop.eup %8993 }
 0x49d   : > { %v1744_v10 = vmul.f32 1.442695, %v1735_v5  ;;  %v1746_v57 = vsel %vm1715_vm4, %v8994_v9, 0.0 }
 0x49e   : > { %1747 = vadd.xlane.f32.xlu1 %v1746_v57 }
 0x49f   : > { %9001 = vpow2.f32 %v1744_v10 }
 0x4a0   : > { %v8996_v12 = vpop.eup %8995 }
 0x4a1   : > { %v1749_v62 = vsel %vm1715_vm4, %v8996_v12, 0.0 }
 0x4a2   : > { %1750 = vadd.xlane.f32.xlu0 %v1749_v62 }
 0x4a4   : > { %v8998_v16 = vpop.eup %8997 }
 0x4a5   : > { %v1752_v4 = vsel %vm1715_vm4, %v8998_v16, 0.0 }
 0x4a6   : > { %1753 = vadd.xlane.f32.xlu1 %v1752_v4 }
 0x4a8   : > { %v9000_v17 = vpop.eup %8999 }
 0x4a9   : > { %v1755_v11 = vsel %vm1715_vm4, %v9000_v17, 0.0 }
 0x4aa   : > { %1756 = vadd.xlane.f32.xlu0 %v1755_v11 }
 0x4ac   : > { %v9002_v20 = vpop.eup %9001 }
 0x4ad   : > { %v1758_v18 = vsel %vm1715_vm4, %v9002_v20, 0.0 }
 0x4ae   : > { %1759 = vadd.xlane.f32.xlu1 %v1758_v18 }
 0x527   : > { %v1748_v22 = vpop.xlane.xlu1 %1747 }
 0x528   : > { %9003 = vrcp.f32 %v1748_v22 }
 0x52b   : > { %v1751_v23 = vpop.xlane.xlu0 %1750 }
 0x52c   : > { %9005 = vrcp.f32 %v1751_v23 }
 0x52f   : > { %v1754_v24 = vpop.xlane.xlu1 %1753 }
 0x530   : > { %9007 = vrcp.f32 %v1754_v24 }
 0x533   : > { %v1757_v25 = vpop.xlane.xlu0 %1756 }
 0x534   : > { %9009 = vrcp.f32 %v1757_v25  ;;  %v7105_v25 = vld [vmem:[%s11925_s7 + $0x3] ss:$0 sm:$0xff] }
 0x535   : > { %v9004_v27 = vpop.eup %9003 }
 0x536   : > { %v1762_v34 = vmul.f32 %v9004_v27, %v8994_v9 }
 0x537   : > { %v1760_v28 = vpop.xlane.xlu1 %1759 }
 0x538   : > { %9011 = vrcp.f32 %v1760_v28 }
 0x539   : > { %v9006_v32 = vpop.eup %9005 }
 0x53a   : > { %v1764_v36 = vmul.f32 %v9006_v32, %v8996_v12 }
 0x53c   : > { %v1771_v40 = vpack.c.bf16 %v1764_v36, %v1762_v34 }
 0x53d   : > { %v9008_v43 = vpop.eup %9007 }
 0x53e   : > { %8099 = vmatmul.mubr.msk.bf16.vlgmr.msra.gmra.mxu0 %vm1715_vm4, %v1771_v40  ;;  %v1766_v48 = vmul.f32 %v9008_v43, %v8998_v16 }
 0x53f   : > { %8102 = vmatprep.mubr.msk.bf16.mxu0 %vm9289_vm1, %v11942_v45  ;;  %8131 = vmatpush3.bf16.msra.mxu0 %v8851_v37 }
 0x540   : > { %8132 = vmatprep.subr.bf16.mxu0 %v11942_v45 }
 0x541   : > { %v9010_v47 = vpop.eup %9009 }
 0x542   : > { %v1768_v49 = vmul.f32 %v9010_v47, %v9000_v17 }
 0x543   : > { %8133 = vmatpush3.bf16.msra.mxu0 %v8852_v46 }
 0x544   : > { %v1772_v51 = vpack.c.bf16 %v1768_v49, %v1766_v48  ;;  %8134 = vmatprep.subr.bf16.mxu0 %v11942_v45 }
 0x545   : > { %v9012_v52 = vpop.eup %9011 }
 0x546   : > { %8103 = vmatmul.mubr.msk.bf16.gmra.mxu0 %vm1715_vm4, %v1772_v51  ;;  %v1770_v56 = vmul.f32 %v9012_v52, %v9002_v20 }
 0x547   : > { %8106 = vmatprep.mubr.msk.bf16.mxu0 %vm9289_vm1, %v11942_v45  ;;  %8135 = vmatpush3.bf16.msra.mxu0 %v8853_v50 }
 0x548   : > { %8136 = vmatprep.subr.bf16.mxu0 %v11942_v45  ;;  %v1773_v58 = vpack.c.bf16 %v1770_v56, %v1770_v56  ;;  %v8856_v56 = vld [vmem:[%s11924_s6 + $0x90] sm:$0xff]  }
 0x54b   : > { %8137 = vmatpush3.bf16.msra.mxu0 %v8854_v53  ;;  %v8855_v53 = vld [vmem:[%s11924_s6 + $0x98] sm:$0xff]  }
 0x54c   : > { %8168 = vmatprep.subr.bf16.mxu0 %v11942_v45 }
 0x54e   : > { %8107 = vmatmul.mubr.msk.bf16.gmra.mxu0 %vm1715_vm4, %v1773_v58  ;;  %v8857_v58 = vld [vmem:[%s11924_s6 + $0x88] sm:$0xff]  }
 0x54f   : > { %8138 = vmatprep.mubr.msk.bf16.mxu0 %vm9289_vm1, %v11942_v45 }
 0x556   : > { %8139 = vmatmul.mubr.msk.bf16.vlgmr.msra.gmra.mxu0 %vm1243_vm0, %v9673_v19 }
 0x557   : > { %8169 = vmatpush3.bf16.msra.mxu0 %v9740_v6  ;;  %8142 = vmatprep.mubr.msk.bf16.mxu0 %vm9289_vm1, %v11942_v45 }
 0x558   : > { %8170 = vmatprep.subr.bf16.mxu0 %v11942_v45 }
 0x55b   : > { %8171 = vmatpush3.bf16.msra.mxu0 %v9746_v15 }
 0x55c   : > { %8172 = vmatprep.subr.bf16.mxu0 %v11942_v45 }
 0x55e   : > { %8143 = vmatmul.mubr.msk.bf16.gmra.mxu0 %vm1243_vm0, %v9692_v30 }
 0x55f   : > { %8173 = vmatpush3.bf16.msra.mxu0 %v9750_v21  ;;  %8146 = vmatprep.mubr.msk.bf16.mxu0 %vm9289_vm1, %v11942_v45 }
 0x560   : > { %8206 = vmatprep.subr.bf16.mxu0 %v11942_v45 }
 0x566   : > { %8147 = vmatmul.mubr.msk.bf16.gmra.mxu0 %vm1243_vm0, %v9710_v35 }
 0x567   : > { %8174 = vmatprep.mubr.msk.bf16.mxu0 %vm9289_vm1, %v11942_v45 }
 0x5fe   : > { %v9904_v60 = vpop.f32.mrf.mxu0 }
 0x600   : > { %v8100_v61 = vpop.f32.mrf.mxu0 }
 0x602   : > { %v9906_v63 = vpop.f32.mrf.mxu0 }
 0x604   : > { %v8101_v2 = vpop.f32.mrf.mxu0 }
 0x606   : > { %v9908_v3 = vpop.f32.mrf.mxu0 }
 0x608   : > { %v8104_v5 = vpop.f32.mrf.mxu0 }
 0x60a   : > { %v9910_v9 = vpop.f32.mrf.mxu0 }
 0x60c   : > { %v8105_v10 = vpop.f32.mrf.mxu0 }
 0x60e   : > { %v9912_v57 = vpop.f32.mrf.mxu0 }
 0x610   : > { %v8108_v12 = vpop.f32.mrf.mxu0 }
 0x612   : > { %v1840_v62 = vpop.f32.mrf.mxu0 }
 0x614   : > { %v8109_v16 = vpop.f32.mrf.mxu0 }
 0x616   : > { %v2030_v4 = vpop.f32.mrf.mxu0 }
 0x617   : > { %v2031_v50 = vadd.f32 %v7105_v25, %v2030_v4 }
 0x618   : > { %v8140_v17 = vpop.f32.mrf.mxu0 }
 0x61a   : > { %v2033_v11 = vpop.f32.mrf.mxu0 }
 0x61b   : > { %v2034_v48 = vadd.f32 %v7105_v25, %v2033_v11 }
 0x61c   : > { %v8141_v20 = vpop.f32.mrf.mxu0 }
 0x61d   : > { %v2055_v51 = vpack.c.bf16 %v2034_v48, %v2031_v50 }
 0x61e   : > { %v2038_v18 = vpop.f32.mrf.mxu0 }
 0x61f   : > { %v2039_v46 = vadd.f32 %v7105_v25, %v2038_v18  ;;  %v2068_v52 = vsel %vm1640_vm3, %v2055_v51, 0 }
 0x620   : > { %v8144_v22 = vpop.f32.mrf.mxu0 }
 0x622   : > { %v2041_v23 = vpop.f32.mrf.mxu0 }
 0x623   : > { %v2042_v37 = vadd.f32 %v7105_v25, %v2041_v23 }
 0x624   : > { %v8145_v24 = vpop.f32.mrf.mxu0 }
 0x625   : > { %v2056_v47 = vpack.c.bf16 %v2042_v37, %v2039_v46 }
 0x626   : > { %v2046_v27 = vpop.f32.mrf.mxu0 }
 0x627   : > { %v2047_v28 = vadd.f32 %v7105_v25, %v2046_v27  ;;  %v2071_v49 = vsel %vm1640_vm3, %v2056_v47, 0 }
 0x628   : > { %v8148_v32 = vpop.f32.mrf.mxu0 }
 0x629   : > { %v2057_v34 = vpack.c.bf16 %v2047_v28, %v2047_v28  ;;  %v9981_v32 = vld [vmem:[%s11925_s7 + $0x4] ss:$0 sm:$0xff] }
 0x62a   : > { %v2049_v36 = vpop.f32.mrf.mxu0 }
 0x62b   : > { %v2074_v40 = vsel %vm1640_vm3, %v2057_v34, 0 }
 0x62c   : > { %v8149_v43 = vpop.f32.mrf.mxu0  ;;  %8151 = vmatpush3.bf16.xpose.msra.mxu1 %v2074_v40 }
 0x62d   : > { %8152 = vmatprep.subr.bf16.mxu1 %v11942_v45 }
 0x634   : > { %8153 = vmatpush3.bf16.xpose.msra.mxu1 %v2071_v49 }
 0x635   : > { %8154 = vmatprep.subr.bf16.mxu1 %v11942_v45 }
 0x63c   : > { %8155 = vmatpush3.bf16.xpose.msra.mxu1 %v2068_v52 }
 0x63d   : > { %8186 = vmatprep.subr.bf16.mxu1 %v11942_v45 }
 0x643   : > { %8157 = vmatmul.mubr.msk.bf16.vlgmr.msra.gmra.mxu1 %vm1640_vm3, %v2052_v33  ;;  %v2054_v33 = vpack.c.bf16 %v1950_v31, %v1950_v31 }
 0x644   : > { %8160 = vmatprep.mubr.msk.bf16.mxu1 %vm9289_vm1, %v11942_v45  ;;  %8187 = vmatpush3.bf16.msra.mxu1 %v8855_v53 }
 0x645   : > { %8188 = vmatprep.subr.bf16.mxu1 %v11942_v45 }
 0x648   : > { %8189 = vmatpush3.bf16.msra.mxu1 %v8856_v56 }
 0x649   : > { %8190 = vmatprep.subr.bf16.mxu1 %v11942_v45 }
 0x64b   : > { %8161 = vmatmul.mubr.msk.bf16.gmra.mxu1 %vm1640_vm3, %v2053_v41 }
 0x64c   : > { %8164 = vmatprep.mubr.msk.bf16.mxu1 %vm9289_vm1, %v11942_v45  ;;  %8191 = vmatpush3.bf16.msra.mxu1 %v8857_v58 }
 0x64d   : > { %8192 = vmatprep.subr.bf16.mxu1 %v11942_v45 }
 0x650   : > { %8193 = vmatpush3.bf16.msra.mxu1 %v8858_v29 }
 0x651   : > { %8226 = vmatprep.subr.bf16.mxu1 %v11942_v45 }
 0x653   : > { %8165 = vmatmul.mubr.msk.bf16.gmra.mxu1 %vm1640_vm3, %v2054_v33 }
 0x654   : > { %8194 = vmatprep.mubr.msk.bf16.mxu1 %vm9289_vm1, %v11942_v45 }
 0x65b   : > { %8195 = vmatmul.mubr.msk.bf16.vlgmr.msra.gmra.mxu1 %vm1243_vm0, %v9673_v19 }
 0x65c   : > { %8198 = vmatprep.mubr.msk.bf16.mxu1 %vm9289_vm1, %v11942_v45 }
 0x663   : > { %8199 = vmatmul.mubr.msk.bf16.gmra.mxu1 %vm1243_vm0, %v9692_v30 }
 0x664   : > { %8202 = vmatprep.mubr.msk.bf16.mxu1 %vm9289_vm1, %v11942_v45 }
 0x66b   : > { %8203 = vmatmul.mubr.msk.bf16.gmra.mxu1 %vm1243_vm0, %v9710_v35 }
 0x66c   : > { %8232 = vmatprep.mubr.msk.bf16.mxu1 %vm9289_vm1, %v11942_v45 }
 0x703   : > { %v2110_v26 = vpop.f32.mrf.mxu1 }
 0x704   : > { %v2111_v38 = vadd.f32 %v2110_v26, %v9801_v55 }
 0x705   : > { %v8158_v39 = vpop.f32.mrf.mxu1 }
 0x706   : > { %v2132_v41 = vsel %vm1715_vm4, %v2111_v38, -inf }
 0x707   : > { %2133 = vmax.xlane.f32.xlu0 %v2132_v41  ;;  %v2113_v42 = vpop.f32.mrf.mxu1 }
 0x708   : > { %v2114_v61 = vadd.f32 %v2113_v42, %v9807_v59 }
 0x709   : > { %v8159_v2 = vpop.f32.mrf.mxu1 }
 0x70a   : > { %v2135_v5 = vsel %vm1715_vm4, %v2114_v61, -inf }
 0x70b   : > { %2136 = vmax.xlane.f32.xlu1 %v2135_v5  ;;  %v2118_v10 = vpop.f32.mrf.mxu1 }
 0x70c   : > { %v2119_v12 = vadd.f32 %v2118_v10, %v9814_v1 }
 0x70d   : > { %v8162_v62 = vpop.f32.mrf.mxu1 }
 0x70e   : > { %v2138_v16 = vsel %vm1715_vm4, %v2119_v12, -inf }
 0x70f   : > { %2139 = vmax.xlane.f32.xlu0 %v2138_v16  ;;  %v2121_v4 = vpop.f32.mrf.mxu1 }
 0x710   : > { %v2122_v17 = vadd.f32 %v2121_v4, %v9821_v7 }
 0x711   : > { %v8163_v11 = vpop.f32.mrf.mxu1 }
 0x712   : > { %v2141_v20 = vsel %vm1715_vm4, %v2122_v17, -inf }
 0x713   : > { %2142 = vmax.xlane.f32.xlu1 %v2141_v20  ;;  %v2126_v18 = vpop.f32.mrf.mxu1 }
 0x714   : > { %v2127_v22 = vadd.f32 %v2126_v18, %v9828_v13 }
 0x715   : > { %v8166_v23 = vpop.f32.mrf.mxu1 }
 0x716   : > { %v2144_v24 = vsel %vm1715_vm4, %v2127_v22, -inf }
 0x717   : > { %2145 = vmax.xlane.f32.xlu0 %v2144_v24  ;;  %v2129_v25 = vpop.f32.mrf.mxu1 }
 0x719   : > { %v8167_v27 = vpop.f32.mrf.mxu1 }
 0x71b   : > { %v2345_v28 = vpop.f32.mrf.mxu1 }
 0x71c   : > { %v9984_v37 = vadd.f32 %v9981_v32, %v2345_v28 }
 0x71d   : > { %v8196_v34 = vpop.f32.mrf.mxu1 }
 0x71f   : > { %v2348_v36 = vpop.f32.mrf.mxu1 }
 0x720   : > { %v9987_v40 = vadd.f32 %v9981_v32, %v2348_v36 }
 0x721   : > { %v8197_v43 = vpop.f32.mrf.mxu1 }
 0x722   : > { %v2464_v46 = vpack.c.bf16 %v9987_v40, %v9984_v37  ;;  %v8866_v37 = vld [vmem:[%s11924_s6 + $0xc0] sm:$0xff]  }
 0x723   : > { %v2353_v47 = vpop.f32.mrf.mxu1 }
 0x724   : > { %v9992_v50 = vadd.f32 %v9981_v32, %v2353_v47 }
 0x725   : > { %v8200_v48 = vpop.f32.mrf.mxu1 }
 0x727   : > { %v2356_v49 = vpop.f32.mrf.mxu1 }
 0x728   : > { %v9995_v51 = vadd.f32 %v9981_v32, %v2356_v49 }
 0x729   : > { %v8201_v52 = vpop.f32.mrf.mxu1 }
 0x72a   : > { %v2465_v53 = vpack.c.bf16 %v9995_v51, %v9992_v50 }
 0x72b   : > { %v9999_v56 = vpop.f32.mrf.mxu1 }
 0x72c   : > { %v2362_v40 = vadd.f32 %v9981_v32, %v9999_v56 }
 0x72d   : > { %v8204_v58 = vpop.f32.mrf.mxu1 }
 0x72f   : > { %v2364_v29 = vpop.f32.mrf.mxu1 }
 0x731   : > { %v8205_v31 = vpop.f32.mrf.mxu1 }
 0x790   : > { %v2134_v33 = vpop.xlane.xlu0 %2133 }
 0x791   : > { %v2147_v26 = vsub.f32 %v2111_v38, %v2134_v33  ;;  %v8859_v33 = vld [vmem:[%s11924_s6 + $0xb8] sm:$0xff]  }
 0x793   : > { %v2152_v39 = vmul.f32 1.442695, %v2147_v26 }
 0x794   : > { %v2137_v41 = vpop.xlane.xlu1 %2136 }
 0x795   : > { %9013 = vpow2.f32 %v2152_v39  ;;  %v2148_v42 = vsub.f32 %v2114_v61, %v2137_v41  ;;  %v8860_v41 = vld [vmem:[%s11924_s6 + $0xb0] sm:$0xff]  }
 0x797   : > { %v2154_v2 = vmul.f32 1.442695, %v2148_v42 }
 0x798   : > { %v2140_v5 = vpop.xlane.xlu0 %2139 }
 0x799   : > { %9015 = vpow2.f32 %v2154_v2  ;;  %v2149_v10 = vsub.f32 %v2119_v12, %v2140_v5 }
 0x79b   : > { %v2156_v62 = vmul.f32 1.442695, %v2149_v10  ;;  %v8861_v10 = vld [vmem:[%s11924_s6 + $0xa8] sm:$0xff]  }
 0x79c   : > { %v2143_v16 = vpop.xlane.xlu1 %2142 }
 0x79d   : > { %9017 = vpow2.f32 %v2156_v62  ;;  %v2150_v4 = vsub.f32 %v2122_v17, %v2143_v16 }
 0x79f   : > { %v2158_v11 = vmul.f32 1.442695, %v2150_v4  ;;  %v8862_v4 = vld [vmem:[%s11924_s6 + $0xa0] sm:$0xff]  }
 0x7a0   : > { %v2146_v20 = vpop.xlane.xlu0 %2145 }
 0x7a1   : > { %9019 = vpow2.f32 %v2158_v11  ;;  %v2151_v18 = vsub.f32 %v2127_v22, %v2146_v20 }
 0x7a2   : > { %v9014_v23 = vpop.eup %9013 }
 0x7a3   : > { %v2160_v24 = vmul.f32 1.442695, %v2151_v18  ;;  %v2162_v38 = vsel %vm1715_vm4, %v9014_v23, 0.0  ;;  %v1238_v18 = vlaneseq }
 0x7a4   : > { %2163 = vadd.xlane.f32.xlu1 %v2162_v38 }
 0x7a5   : > { %9021 = vpow2.f32 %v2160_v24 }
 0x7a6   : > { %v9016_v25 = vpop.eup %9015 }
 0x7a7   : > { %v2165_v61 = vsel %vm1715_vm4, %v9016_v25, 0.0 }
 0x7a8   : > { %2166 = vadd.xlane.f32.xlu0 %v2165_v61 }
 0x7aa   : > { %v9018_v27 = vpop.eup %9017 }
 0x7ab   : > { %v2168_v12 = vsel %vm1715_vm4, %v9018_v27, 0.0 }
 0x7ac   : > { %2169 = vadd.xlane.f32.xlu1 %v2168_v12 }
 0x7ae   : > { %v9020_v28 = vpop.eup %9019 }
 0x7af   : > { %v2171_v17 = vsel %vm1715_vm4, %v9020_v28, 0.0 }
 0x7b0   : > { %2172 = vadd.xlane.f32.xlu0 %v2171_v17 }
 0x7b2   : > { %v9022_v34 = vpop.eup %9021 }
 0x7b3   : > { %v2174_v22 = vsel %vm1715_vm4, %v9022_v34, 0.0 }
 0x7b4   : > { %2175 = vadd.xlane.f32.xlu1 %v2174_v22 }
 0x82d   : > { %v2164_v36 = vpop.xlane.xlu1 %2163 }
 0x82e   : > { %9023 = vrcp.f32 %v2164_v36 }
 0x831   : > { %v2167_v43 = vpop.xlane.xlu0 %2166 }
 0x832   : > { %9025 = vrcp.f32 %v2167_v43 }
 0x835   : > { %v2170_v47 = vpop.xlane.xlu1 %2169 }
 0x836   : > { %9027 = vrcp.f32 %v2170_v47 }
 0x839   : > { %v2173_v48 = vpop.xlane.xlu0 %2172 }
 0x83a   : > { %9029 = vrcp.f32 %v2173_v48 }
 0x83b   : > { %v9024_v49 = vpop.eup %9023 }
 0x83c   : > { %v2178_v29 = vmul.f32 %v9024_v49, %v9014_v23  ;;  %v10050_v23 = vand.u32 127, %v1238_v18 }
 0x83d   : > { %v2176_v52 = vpop.xlane.xlu1 %2175 }
 0x83e   : > { %9031 = vrcp.f32 %v2176_v52  ;;  %vm2255_vm5 = vcmp.ge.s32.totalorder %v10050_v23, 16  ;;  %vm2256_vm6 = vcmp.lt.s32.totalorder %v10050_v23, 32  ;;  %vm1844_vm7 = vcmp.lt.s32.totalorder %v10050_v23, 16 }
 0x83f   : > { %v9026_v58 = vpop.eup %9025  ;;  %vm10055_vm8 = vmand %vm2255_vm5, %vm2256_vm6  ;;  %v1849_v17 = vsel %vm1844_vm7, %v9906_v63, 0.0  ;;  %v1851_v63 = vsel %vm1844_vm7, %v9910_v9, 0.0  ;;  %vm2667_vm9 = vcmp.ge.s32.totalorder %v10050_v23, 32  ;;  %vm2668_vm10 = vcmp.lt.s32.totalorder %v10050_v23, 48 }
 0x840   : > { %v2180_v31 = vmul.f32 %v9026_v58, %v9016_v25  ;;  %v1848_v25 = vsel %vm1844_vm7, %v9904_v60, 0.0  ;;  %v1850_v60 = vsel %vm1844_vm7, %v9908_v3, 0.0  ;;  %v1852_v3 = vsel %vm1844_vm7, %v9912_v57, 0.0  ;;  %v7145_v57 = vld [vmem:[%s11925_s7 + $0x5] ss:$0 sm:$0xff]  ;;  %vm10230_vm11 = vmand %vm2667_vm9, %vm2668_vm10 }
 0x841   : > { %vm3079_vm12 = vcmp.ge.s32.totalorder %v10050_v23, 48  ;;  %vm3080_vm13 = vcmp.lt.s32.totalorder %v10050_v23, 64  ;;  %v7396_v23 = vld [vmem:[%s11925_s7 + $0xd] ss:$0 sm:$0xff] }
 0x842   : > { %v2187_v26 = vpack.c.bf16 %v2180_v31, %v2178_v29  ;;  %vm10334_vm14 = vmand %vm3079_vm12, %vm3080_vm13 }
 0x843   : > { %v9028_v39 = vpop.eup %9027 }
 0x844   : > { %8175 = vmatmul.mubr.msk.bf16.vlgmr.msra.gmra.mxu0 %vm1715_vm4, %v2187_v26  ;;  %v2182_v2 = vmul.f32 %v9028_v39, %v9018_v27 }
 0x845   : > { %8178 = vmatprep.mubr.msk.bf16.mxu0 %vm9289_vm1, %v11942_v45  ;;  %8207 = vmatpush3.bf16.msra.mxu0 %v8859_v33 }
 0x846   : > { %8208 = vmatprep.subr.bf16.mxu0 %v11942_v45 }
 0x847   : > { %v9030_v42 = vpop.eup %9029 }
 0x848   : > { %v2184_v5 = vmul.f32 %v9030_v42, %v9020_v28 }
 0x849   : > { %8209 = vmatpush3.bf16.msra.mxu0 %v8860_v41 }
 0x84a   : > { %v2188_v62 = vpack.c.bf16 %v2184_v5, %v2182_v2  ;;  %8210 = vmatprep.subr.bf16.mxu0 %v11942_v45 }
 0x84b   : > { %v9032_v16 = vpop.eup %9031 }
 0x84c   : > { %8179 = vmatmul.mubr.msk.bf16.gmra.mxu0 %vm1715_vm4, %v2188_v62  ;;  %v2186_v11 = vmul.f32 %v9032_v16, %v9022_v34 }
 0x84d   : > { %8182 = vmatprep.mubr.msk.bf16.mxu0 %vm9289_vm1, %v11942_v45  ;;  %8211 = vmatpush3.bf16.msra.mxu0 %v8861_v10 }
 0x84e   : > { %8212 = vmatprep.subr.bf16.mxu0 %v11942_v45  ;;  %v2189_v20 = vpack.c.bf16 %v2186_v11, %v2186_v11 }
 0x851   : > { %8213 = vmatpush3.bf16.msra.mxu0 %v8862_v4 }
 0x852   : > { %8244 = vmatprep.subr.bf16.mxu0 %v11942_v45 }
 0x854   : > { %8183 = vmatmul.mubr.msk.bf16.gmra.mxu0 %vm1715_vm4, %v2189_v20 }
 0x855   : > { %8214 = vmatprep.mubr.msk.bf16.mxu0 %vm9289_vm1, %v11942_v45 }
 0x85c   : > { %8215 = vmatmul.mubr.msk.bf16.vlgmr.msra.gmra.mxu0 %vm1243_vm0, %v9673_v19 }
 0x85d   : > { %8245 = vmatpush3.bf16.msra.mxu0 %v9740_v6  ;;  %8218 = vmatprep.mubr.msk.bf16.mxu0 %vm9289_vm1, %v11942_v45 }
 0x85e   : > { %8246 = vmatprep.subr.bf16.mxu0 %v11942_v45 }
 0x861   : > { %8247 = vmatpush3.bf16.msra.mxu0 %v9746_v15 }
 0x862   : > { %8248 = vmatprep.subr.bf16.mxu0 %v11942_v45 }
 0x864   : > { %8219 = vmatmul.mubr.msk.bf16.gmra.mxu0 %vm1243_vm0, %v9692_v30 }
 0x865   : > { %8249 = vmatpush3.bf16.msra.mxu0 %v9750_v21  ;;  %8222 = vmatprep.mubr.msk.bf16.mxu0 %vm9289_vm1, %v11942_v45 }
 0x866   : > { %8282 = vmatprep.subr.bf16.mxu0 %v11942_v45 }
 0x86c   : > { %8223 = vmatmul.mubr.msk.bf16.gmra.mxu0 %vm1243_vm0, %v9710_v35 }
 0x86d   : > { %8250 = vmatprep.mubr.msk.bf16.mxu0 %vm9289_vm1, %v11942_v45 }
 0x904   : > { %v2233_v38 = vpop.f32.mrf.mxu0 }
 0x905   : > { %v2260_v61 = vsel %vm10055_vm8, %v2233_v38, 0.0 }
 0x906   : > { %v10064_v27 = vadd.f32 %v2260_v61, %v1848_v25  ;;  %v8176_v12 = vpop.f32.mrf.mxu0 }
 0x908   : > { %v2236_v28 = vpop.f32.mrf.mxu0 }
 0x909   : > { %v2261_v34 = vsel %vm10055_vm8, %v2236_v28, 0.0 }
 0x90a   : > { %v10071_v22 = vadd.f32 %v2261_v34, %v1849_v17  ;;  %v8177_v36 = vpop.f32.mrf.mxu0 }
 0x90c   : > { %v2241_v43 = vpop.f32.mrf.mxu0 }
 0x90d   : > { %v2262_v47 = vsel %vm10055_vm8, %v2241_v43, 0.0 }
 0x90e   : > { %v10078_v48 = vadd.f32 %v2262_v47, %v1850_v60  ;;  %v8180_v49 = vpop.f32.mrf.mxu0 }
 0x910   : > { %v2244_v52 = vpop.f32.mrf.mxu0 }
 0x911   : > { %v2263_v58 = vsel %vm10055_vm8, %v2244_v52, 0.0 }
 0x912   : > { %v10085_v29 = vadd.f32 %v2263_v58, %v1851_v63  ;;  %v8181_v31 = vpop.f32.mrf.mxu0 }
 0x913   : > { %v8863_v31 = vld [vmem:[%s11924_s6 + $0xd8] sm:$0xff]  }
 0x914   : > { %v2249_v33 = vpop.f32.mrf.mxu0 }
 0x915   : > { %v2264_v26 = vsel %vm10055_vm8, %v2249_v33, 0.0  ;;  %v8864_v33 = vld [vmem:[%s11924_s6 + $0xd0] sm:$0xff]  }
 0x916   : > { %v10092_v39 = vadd.f32 %v2264_v26, %v1852_v3  ;;  %v8184_v41 = vpop.f32.mrf.mxu0  ;;  %v8865_v3 = vld [vmem:[%s11924_s6 + $0xc8] sm:$0xff]  }
 0x918   : > { %v2252_v42 = vpop.f32.mrf.mxu0 }
 0x91a   : > { %v8185_v2 = vpop.f32.mrf.mxu0 }
 0x91c   : > { %v2442_v9 = vpop.f32.mrf.mxu0 }
 0x91d   : > { %v2443_v52 = vadd.f32 %v7145_v57, %v2442_v9 }
 0x91e   : > { %v8216_v5 = vpop.f32.mrf.mxu0 }
 0x920   : > { %v2445_v10 = vpop.f32.mrf.mxu0 }
 0x921   : > { %v2446_v47 = vadd.f32 %v7145_v57, %v2445_v10 }
 0x922   : > { %v8217_v62 = vpop.f32.mrf.mxu0 }
 0x923   : > { %v2467_v63 = vpack.c.bf16 %v2446_v47, %v2443_v52 }
 0x924   : > { %v2450_v16 = vpop.f32.mrf.mxu0 }
 0x925   : > { %v2451_v43 = vadd.f32 %v7145_v57, %v2450_v16  ;;  %v2480_v58 = vsel %vm1640_vm3, %v2467_v63, 0 }
 0x926   : > { %v8220_v4 = vpop.f32.mrf.mxu0 }
 0x928   : > { %v2453_v11 = vpop.f32.mrf.mxu0 }
 0x929   : > { %v2454_v17 = vadd.f32 %v7145_v57, %v2453_v11 }
 0x92a   : > { %v8221_v20 = vpop.f32.mrf.mxu0 }
 0x92b   : > { %v2468_v60 = vpack.c.bf16 %v2454_v17, %v2451_v43 }
 0x92c   : > { %v2458_v38 = vpop.f32.mrf.mxu0 }
 0x92d   : > { %v2459_v25 = vadd.f32 %v7145_v57, %v2458_v38  ;;  %v2483_v49 = vsel %vm1640_vm3, %v2468_v60, 0 }
 0x92e   : > { %v8224_v61 = vpop.f32.mrf.mxu0 }
 0x92f   : > { %v2469_v12 = vpack.c.bf16 %v2459_v25, %v2459_v25  ;;  %v10161_v61 = vld [vmem:[%s11925_s7 + $0x6] ss:$0 sm:$0xff] }
 0x930   : > { %v2461_v28 = vpop.f32.mrf.mxu0 }
 0x931   : > { %v2486_v34 = vsel %vm1640_vm3, %v2469_v12, 0 }
 0x932   : > { %v8225_v36 = vpop.f32.mrf.mxu0  ;;  %8227 = vmatpush3.bf16.xpose.msra.mxu1 %v2486_v34 }
 0x933   : > { %8228 = vmatprep.subr.bf16.mxu1 %v11942_v45 }
 0x93a   : > { %8229 = vmatpush3.bf16.xpose.msra.mxu1 %v2483_v49 }
 0x93b   : > { %8230 = vmatprep.subr.bf16.mxu1 %v11942_v45 }
 0x942   : > { %8231 = vmatpush3.bf16.xpose.msra.mxu1 %v2480_v58 }
 0x943   : > { %8262 = vmatprep.subr.bf16.mxu1 %v11942_v45 }
 0x949   : > { %8233 = vmatmul.mubr.msk.bf16.vlgmr.msra.gmra.mxu1 %vm1640_vm3, %v2464_v46  ;;  %v2466_v46 = vpack.c.bf16 %v2362_v40, %v2362_v40 }
 0x94a   : > { %8236 = vmatprep.mubr.msk.bf16.mxu1 %vm9289_vm1, %v11942_v45  ;;  %8263 = vmatpush3.bf16.msra.mxu1 %v8863_v31 }
 0x94b   : > { %8264 = vmatprep.subr.bf16.mxu1 %v11942_v45 }
 0x94e   : > { %8265 = vmatpush3.bf16.msra.mxu1 %v8864_v33 }
 0x94f   : > { %8266 = vmatprep.subr.bf16.mxu1 %v11942_v45 }
 0x951   : > { %8237 = vmatmul.mubr.msk.bf16.gmra.mxu1 %vm1640_vm3, %v2465_v53 }
 0x952   : > { %8240 = vmatprep.mubr.msk.bf16.mxu1 %vm9289_vm1, %v11942_v45  ;;  %8267 = vmatpush3.bf16.msra.mxu1 %v8865_v3 }
 0x953   : > { %8268 = vmatprep.subr.bf16.mxu1 %v11942_v45 }
 0x956   : > { %8269 = vmatpush3.bf16.msra.mxu1 %v8866_v37 }
 0x957   : > { %8302 = vmatprep.subr.bf16.mxu1 %v11942_v45 }
 0x959   : > { %8241 = vmatmul.mubr.msk.bf16.gmra.mxu1 %vm1640_vm3, %v2466_v46 }
 0x95a   : > { %8270 = vmatprep.mubr.msk.bf16.mxu1 %vm9289_vm1, %v11942_v45 }
 0x961   : > { %8271 = vmatmul.mubr.msk.bf16.vlgmr.msra.gmra.mxu1 %vm1243_vm0, %v9673_v19 }
 0x962   : > { %8274 = vmatprep.mubr.msk.bf16.mxu1 %vm9289_vm1, %v11942_v45 }
 0x969   : > { %8275 = vmatmul.mubr.msk.bf16.gmra.mxu1 %vm1243_vm0, %v9692_v30 }
 0x96a   : > { %8278 = vmatprep.mubr.msk.bf16.mxu1 %vm9289_vm1, %v11942_v45 }
 0x971   : > { %8279 = vmatmul.mubr.msk.bf16.gmra.mxu1 %vm1243_vm0, %v9710_v35 }
 0x972   : > { %8308 = vmatprep.mubr.msk.bf16.mxu1 %vm9289_vm1, %v11942_v45 }
 0xa09   : > { %v2522_v32 = vpop.f32.mrf.mxu1 }
 0xa0a   : > { %v2523_v50 = vadd.f32 %v2522_v32, %v9801_v55 }
 0xa0b   : > { %v8234_v51 = vpop.f32.mrf.mxu1 }
 0xa0c   : > { %v2544_v53 = vsel %vm1715_vm4, %v2523_v50, -inf }
 0xa0d   : > { %2545 = vmax.xlane.f32.xlu0 %v2544_v53  ;;  %v2525_v56 = vpop.f32.mrf.mxu1 }
 0xa0e   : > { %v2526_v26 = vadd.f32 %v2525_v56, %v9807_v59 }
 0xa0f   : > { %v8235_v41 = vpop.f32.mrf.mxu1 }
 0xa10   : > { %v2547_v42 = vsel %vm1715_vm4, %v2526_v26, -inf }
 0xa11   : > { %2548 = vmax.xlane.f32.xlu1 %v2547_v42  ;;  %v2530_v2 = vpop.f32.mrf.mxu1 }
 0xa12   : > { %v2531_v9 = vadd.f32 %v2530_v2, %v9814_v1 }
 0xa13   : > { %v8238_v5 = vpop.f32.mrf.mxu1 }
 0xa14   : > { %v2550_v10 = vsel %vm1715_vm4, %v2531_v9, -inf }
 0xa15   : > { %2551 = vmax.xlane.f32.xlu0 %v2550_v10  ;;  %v2533_v62 = vpop.f32.mrf.mxu1 }
 0xa16   : > { %v2534_v55 = vadd.f32 %v2533_v62, %v9821_v7 }
 0xa17   : > { %v8239_v16 = vpop.f32.mrf.mxu1 }
 0xa18   : > { %v2553_v4 = vsel %vm1715_vm4, %v2534_v55, -inf }
 0xa19   : > { %2554 = vmax.xlane.f32.xlu1 %v2553_v4  ;;  %v2538_v11 = vpop.f32.mrf.mxu1 }
 0xa1a   : > { %v2539_v59 = vadd.f32 %v2538_v11, %v9828_v13 }
 0xa1b   : > { %v8242_v20 = vpop.f32.mrf.mxu1 }
 0xa1c   : > { %v2556_v57 = vsel %vm1715_vm4, %v2539_v59, -inf }
 0xa1d   : > { %2557 = vmax.xlane.f32.xlu0 %v2556_v57  ;;  %v2541_v38 = vpop.f32.mrf.mxu1 }
 0xa1f   : > { %v8243_v1 = vpop.f32.mrf.mxu1 }
 0xa21   : > { %v2757_v25 = vpop.f32.mrf.mxu1 }
 0xa22   : > { %v10164_v28 = vadd.f32 %v10161_v61, %v2757_v25 }
 0xa23   : > { %v8272_v7 = vpop.f32.mrf.mxu1 }
 0xa25   : > { %v2760_v12 = vpop.f32.mrf.mxu1 }
 0xa26   : > { %v10167_v17 = vadd.f32 %v10161_v61, %v2760_v12 }
 0xa27   : > { %v8273_v13 = vpop.f32.mrf.mxu1 }
 0xa28   : > { %v2876_v34 = vpack.c.bf16 %v10167_v17, %v10164_v28  ;;  %v9265_v17 = vld [vmem:[%s11921_s3] sm:$0xff] }
 0xa29   : > { %v2765_v36 = vpop.f32.mrf.mxu1 }
 0xa2a   : > { %v10172_v47 = vadd.f32 %v10161_v61, %v2765_v36 }
 0xa2b   : > { %v8276_v43 = vpop.f32.mrf.mxu1 }
 0xa2d   : > { %v2768_v60 = vpop.f32.mrf.mxu1 }
 0xa2e   : > { %v10175_v49 = vadd.f32 %v10161_v61, %v2768_v60 }
 0xa2f   : > { %v8277_v52 = vpop.f32.mrf.mxu1 }
 0xa30   : > { %v2877_v63 = vpack.c.bf16 %v10175_v49, %v10172_v47 }
 0xa31   : > { %v10179_v58 = vpop.f32.mrf.mxu1 }
 0xa33   : > { %v8280_v31 = vpop.f32.mrf.mxu1 }
 0xa35   : > { %v2776_v33 = vpop.f32.mrf.mxu1 }
 0xa36   : > { %v8867_v33 = vld [vmem:[%s11924_s6 + $0xf8] sm:$0xff]  }
 0xa37   : > { %v8281_v3 = vpop.f32.mrf.mxu1 }
 0xa96   : > { %v2546_v37 = vpop.xlane.xlu0 %2545 }
 0xa97   : > { %v2559_v40 = vsub.f32 %v2523_v50, %v2546_v37 }
 0xa99   : > { %v2564_v46 = vmul.f32 1.442695, %v2559_v40  ;;  %v8868_v40 = vld [vmem:[%s11924_s6 + $0xf0] sm:$0xff]  }
 0xa9a   : > { %v2549_v32 = vpop.xlane.xlu1 %2548 }
 0xa9b   : > { %9033 = vpow2.f32 %v2564_v46  ;;  %v2560_v51 = vsub.f32 %v2526_v26, %v2549_v32 }
 0xa9d   : > { %v2566_v53 = vmul.f32 1.442695, %v2560_v51 }
 0xa9e   : > { %v2552_v56 = vpop.xlane.xlu0 %2551 }
 0xa9f   : > { %9035 = vpow2.f32 %v2566_v53  ;;  %v2561_v41 = vsub.f32 %v2531_v9, %v2552_v56  ;;  %v8869_v53 = vld [vmem:[%s11924_s6 + $0xe8] sm:$0xff]  }
 0xaa1   : > { %v2568_v42 = vmul.f32 1.442695, %v2561_v41 }
 0xaa2   : > { %v2555_v2 = vpop.xlane.xlu1 %2554 }
 0xaa3   : > { %9037 = vpow2.f32 %v2568_v42  ;;  %v2562_v5 = vsub.f32 %v2534_v55, %v2555_v2  ;;  %v8870_v42 = vld [vmem:[%s11924_s6 + $0xe0] sm:$0xff]  }
 0xaa5   : > { %v2570_v10 = vmul.f32 1.442695, %v2562_v5 }
 0xaa6   : > { %v2558_v62 = vpop.xlane.xlu0 %2557 }
 0xaa7   : > { %9039 = vpow2.f32 %v2570_v10  ;;  %v2563_v16 = vsub.f32 %v2539_v59, %v2558_v62 }
 0xaa8   : > { %v9034_v4 = vpop.eup %9033 }
 0xaa9   : > { %v2572_v11 = vmul.f32 1.442695, %v2563_v16  ;;  %v2574_v50 = vsel %vm1715_vm4, %v9034_v4, 0.0 }
 0xaaa   : > { %2575 = vadd.xlane.f32.xlu1 %v2574_v50 }
 0xaab   : > { %9041 = vpow2.f32 %v2572_v11 }
 0xaac   : > { %v9036_v20 = vpop.eup %9035 }
 0xaad   : > { %v2577_v26 = vsel %vm1715_vm4, %v9036_v20, 0.0 }
 0xaae   : > { %2578 = vadd.xlane.f32.xlu0 %v2577_v26 }
 0xab0   : > { %v9038_v57 = vpop.eup %9037 }
 0xab1   : > { %v2580_v9 = vsel %vm1715_vm4, %v9038_v57, 0.0 }
 0xab2   : > { %2581 = vadd.xlane.f32.xlu1 %v2580_v9 }
 0xab4   : > { %v9040_v38 = vpop.eup %9039 }
 0xab5   : > { %v2583_v55 = vsel %vm1715_vm4, %v9040_v38, 0.0 }
 0xab6   : > { %2584 = vadd.xlane.f32.xlu0 %v2583_v55 }
 0xab8   : > { %v9042_v1 = vpop.eup %9041 }
 0xab9   : > { %v2586_v59 = vsel %vm1715_vm4, %v9042_v1, 0.0 }
 0xaba   : > { %2587 = vadd.xlane.f32.xlu1 %v2586_v59 }
 0xb33   : > { %v2576_v25 = vpop.xlane.xlu1 %2575 }
 0xb34   : > { %9043 = vrcp.f32 %v2576_v25 }
 0xb37   : > { %v2579_v7 = vpop.xlane.xlu0 %2578 }
 0xb38   : > { %9045 = vrcp.f32 %v2579_v7 }
 0xb3b   : > { %v2582_v12 = vpop.xlane.xlu1 %2581 }
 0xb3c   : > { %9047 = vrcp.f32 %v2582_v12 }
 0xb3f   : > { %v2585_v13 = vpop.xlane.xlu0 %2584 }
 0xb40   : > { %9049 = vrcp.f32 %v2585_v13 }
 0xb41   : > { %v9044_v36 = vpop.eup %9043 }
 0xb42   : > { %v2590_v52 = vmul.f32 %v9044_v36, %v9034_v4 }
 0xb43   : > { %v2588_v43 = vpop.xlane.xlu1 %2587 }
 0xb44   : > { %9051 = vrcp.f32 %v2588_v43 }
 0xb45   : > { %v9046_v60 = vpop.eup %9045 }
 0xb46   : > { %v2592_v31 = vmul.f32 %v9046_v60, %v9036_v20 }
 0xb48   : > { %v2599_v3 = vpack.c.bf16 %v2592_v31, %v2590_v52  ;;  %v7185_v52 = vld [vmem:[%s11925_s7 + $0x7] ss:$0 sm:$0xff] }
 0xb49   : > { %v9048_v37 = vpop.eup %9047 }
 0xb4a   : > { %8251 = vmatmul.mubr.msk.bf16.vlgmr.msra.gmra.mxu0 %vm1715_vm4, %v2599_v3  ;;  %v2594_v32 = vmul.f32 %v9048_v37, %v9038_v57 }
 0xb4b   : > { %8254 = vmatprep.mubr.msk.bf16.mxu0 %vm9289_vm1, %v11942_v45  ;;  %8283 = vmatpush3.bf16.msra.mxu0 %v8867_v33 }
 0xb4c   : > { %8284 = vmatprep.subr.bf16.mxu0 %v11942_v45 }
 0xb4d   : > { %v9050_v46 = vpop.eup %9049 }
 0xb4e   : > { %v2596_v51 = vmul.f32 %v9050_v46, %v9040_v38 }
 0xb4f   : > { %8285 = vmatpush3.bf16.msra.mxu0 %v8868_v40 }
 0xb50   : > { %v2600_v56 = vpack.c.bf16 %v2596_v51, %v2594_v32  ;;  %8286 = vmatprep.subr.bf16.mxu0 %v11942_v45 }
 0xb51   : > { %v9052_v41 = vpop.eup %9051 }
 0xb52   : > { %8255 = vmatmul.mubr.msk.bf16.gmra.mxu0 %vm1715_vm4, %v2600_v56  ;;  %v2598_v2 = vmul.f32 %v9052_v41, %v9042_v1 }
 0xb53   : > { %8258 = vmatprep.mubr.msk.bf16.mxu0 %vm9289_vm1, %v11942_v45  ;;  %8287 = vmatpush3.bf16.msra.mxu0 %v8869_v53 }
 0xb54   : > { %8288 = vmatprep.subr.bf16.mxu0 %v11942_v45  ;;  %v2601_v5 = vpack.c.bf16 %v2598_v2, %v2598_v2 }
 0xb57   : > { %8289 = vmatpush3.bf16.msra.mxu0 %v8870_v42 }
 0xb58   : > { %8320 = vmatprep.subr.bf16.mxu0 %v11942_v45 }
 0xb5a   : > { %8259 = vmatmul.mubr.msk.bf16.gmra.mxu0 %vm1715_vm4, %v2601_v5 }
 0xb5b   : > { %8290 = vmatprep.mubr.msk.bf16.mxu0 %vm9289_vm1, %v11942_v45 }
 0xb62   : > { %8291 = vmatmul.mubr.msk.bf16.vlgmr.msra.gmra.mxu0 %vm1243_vm0, %v9673_v19 }
 0xb63   : > { %8321 = vmatpush3.bf16.msra.mxu0 %v9740_v6  ;;  %8294 = vmatprep.mubr.msk.bf16.mxu0 %vm9289_vm1, %v11942_v45 }
 0xb64   : > { %8322 = vmatprep.subr.bf16.mxu0 %v11942_v45 }
 0xb67   : > { %8323 = vmatpush3.bf16.msra.mxu0 %v9746_v15 }
 0xb68   : > { %8324 = vmatprep.subr.bf16.mxu0 %v11942_v45 }
 0xb6a   : > { %8295 = vmatmul.mubr.msk.bf16.gmra.mxu0 %vm1243_vm0, %v9692_v30 }
 0xb6b   : > { %8325 = vmatpush3.bf16.msra.mxu0 %v9750_v21  ;;  %8298 = vmatprep.mubr.msk.bf16.mxu0 %vm9289_vm1, %v11942_v45 }
 0xb72   : > { %8299 = vmatmul.mubr.msk.bf16.gmra.mxu0 %vm1243_vm0, %v9710_v35 }
 0xb73   : > { %8326 = vmatprep.mubr.msk.bf16.mxu0 %vm9289_vm1, %v11942_v45 }
 0xc0a   : > { %v2645_v30 = vpop.f32.mrf.mxu0 }
 0xc0b   : > { %v2672_v6 = vsel %vm10230_vm11, %v2645_v30, 0.0  ;;  %v2774_v30 = vadd.f32 %v10161_v61, %v10179_v58  ;;  %v9266_v61 = vld [vmem:[%s11921_s3 + $0x8] sm:$0xff] }
 0xc0c   : > { %v10237_v15 = vadd.f32 %v2672_v6, %v10064_v27  ;;  %v8252_v21 = vpop.f32.mrf.mxu0 }
 0xc0d   : > { %v2878_v6 = vpack.c.bf16 %v2774_v30, %v2774_v30 }
 0xc0e   : > { %v2648_v35 = vpop.f32.mrf.mxu0 }
 0xc0f   : > { %v2673_v10 = vsel %vm10230_vm11, %v2648_v35, 0.0 }
 0xc10   : > { %v10242_v62 = vadd.f32 %v2673_v10, %v10071_v22  ;;  %v8253_v16 = vpop.f32.mrf.mxu0 }
 0xc11   : > { %v9267_v16 = vld [vmem:[%s11921_s3 + $0x10] sm:$0xff] }
 0xc12   : > { %v2653_v4 = vpop.f32.mrf.mxu0 }
 0xc13   : > { %v2674_v11 = vsel %vm10230_vm11, %v2653_v4, 0.0 }
 0xc14   : > { %v10247_v50 = vadd.f32 %v2674_v11, %v10078_v48  ;;  %v8256_v20 = vpop.f32.mrf.mxu0 }
 0xc16   : > { %v2656_v26 = vpop.f32.mrf.mxu0 }
 0xc17   : > { %v2675_v27 = vsel %vm10230_vm11, %v2656_v26, 0.0 }
 0xc18   : > { %v10252_v57 = vadd.f32 %v2675_v27, %v10085_v29  ;;  %v8257_v9 = vpop.f32.mrf.mxu0  ;;  %v9268_v27 = vld [vmem:[%s11921_s3 + $0x18] sm:$0xff] }
 0xc1a   : > { %v2661_v38 = vpop.f32.mrf.mxu0 }
 0xc1b   : > { %v2676_v22 = vsel %vm10230_vm11, %v2661_v38, 0.0 }
 0xc1c   : > { %v10257_v55 = vadd.f32 %v2676_v22, %v10092_v39  ;;  %v8260_v1 = vpop.f32.mrf.mxu0 }
 0xc1e   : > { %v2664_v59 = vpop.f32.mrf.mxu0 }
 0xc1f   : > { %v9269_v59 = vld [vmem:[%s11921_s3 + $0x20] sm:$0xff] }
 0xc20   : > { %v8261_v48 = vpop.f32.mrf.mxu0 }
 0xc22   : > { %v2854_v25 = vpop.f32.mrf.mxu0 }
 0xc23   : > { %v2855_v42 = vadd.f32 %v7185_v52, %v2854_v25 }
 0xc24   : > { %v8292_v7 = vpop.f32.mrf.mxu0 }
 0xc26   : > { %v2857_v12 = vpop.f32.mrf.mxu0 }
 0xc27   : > { %v2858_v56 = vadd.f32 %v7185_v52, %v2857_v12 }
 0xc28   : > { %v8293_v13 = vpop.f32.mrf.mxu0 }
 0xc29   : > { %v2879_v2 = vpack.c.bf16 %v2858_v56, %v2855_v42 }
 0xc2a   : > { %v2862_v36 = vpop.f32.mrf.mxu0 }
 0xc2b   : > { %v2863_v51 = vadd.f32 %v7185_v52, %v2862_v36  ;;  %v2892_v5 = vsel %vm1640_vm3, %v2879_v2, 0 }
 0xc2c   : > { %v8296_v43 = vpop.f32.mrf.mxu0 }
 0xc2e   : > { %v2865_v60 = vpop.f32.mrf.mxu0 }
 0xc2f   : > { %v2866_v40 = vadd.f32 %v7185_v52, %v2865_v60 }
 0xc30   : > { %v8297_v29 = vpop.f32.mrf.mxu0 }
 0xc31   : > { %v2880_v53 = vpack.c.bf16 %v2866_v40, %v2863_v51 }
 0xc32   : > { %v2870_v31 = vpop.f32.mrf.mxu0 }
 0xc33   : > { %v2871_v33 = vadd.f32 %v7185_v52, %v2870_v31  ;;  %v2895_v41 = vsel %vm1640_vm3, %v2880_v53, 0 }
 0xc34   : > { %v8300_v3 = vpop.f32.mrf.mxu0 }
 0xc35   : > { %v2881_v39 = vpack.c.bf16 %v2871_v33, %v2871_v33 }
 0xc36   : > { %v2873_v37 = vpop.f32.mrf.mxu0 }
 0xc37   : > { %v2898_v46 = vsel %vm1640_vm3, %v2881_v39, 0 }
 0xc38   : > { %v8301_v32 = vpop.f32.mrf.mxu0  ;;  %8303 = vmatpush3.bf16.xpose.msra.mxu1 %v2898_v46 }
 0xc39   : > { %8304 = vmatprep.subr.bf16.mxu1 %v11942_v45 }
 0xc40   : > { %8305 = vmatpush3.bf16.xpose.msra.mxu1 %v2895_v41 }
 0xc41   : > { %8306 = vmatprep.subr.bf16.mxu1 %v11942_v45 }
 0xc48   : > { %8307 = vmatpush3.bf16.xpose.msra.mxu1 %v2892_v5 }
 0xc49   : > { %8338 = vmatprep.subr.bf16.mxu1 %v11942_v45 }
 0xc4f   : > { %8309 = vmatmul.mubr.msk.bf16.vlgmr.msra.gmra.mxu1 %vm1640_vm3, %v2876_v34 }
 0xc50   : > { %8312 = vmatprep.mubr.msk.bf16.mxu1 %vm9289_vm1, %v11942_v45 }
 0xc57   : > { %8313 = vmatmul.mubr.msk.bf16.gmra.mxu1 %vm1640_vm3, %v2877_v63 }
 0xc58   : > { %8316 = vmatprep.mubr.msk.bf16.mxu1 %vm9289_vm1, %v11942_v45 }
 0xc5f   : > { %8317 = vmatmul.mubr.msk.bf16.gmra.mxu1 %vm1640_vm3, %v2878_v6 }
 0xc60   : > { %8346 = vmatprep.mubr.msk.bf16.mxu1 %vm9289_vm1, %v11942_v45 }
 0xd0f   : > { %v2934_v28 = vpop.f32.mrf.mxu1 }
 0xd10   : > { %v2935_v34 = vadd.f32 %v9265_v17, %v2934_v28 }
 0xd11   : > { %v8310_v47 = vpop.f32.mrf.mxu1 }
 0xd12   : > { %v2956_v49 = vsel %vm1715_vm4, %v2935_v34, -inf  ;;  %v8871_v47 = vld [vmem:[%s11926_s8 + $0x38] sm:$0xff]  }
 0xd13   : > { %2957 = vmax.xlane.f32.xlu0 %v2956_v49  ;;  %v2937_v63 = vpop.f32.mrf.mxu1  ;;  %8339 = vmatpush3.bf16.msra.mxu1 %v8871_v47  ;;  %v8872_v49 = vld [vmem:[%s11926_s8 + $0x30] sm:$0xff]  }
 0xd14   : > { %v2938_v58 = vadd.f32 %v9266_v61, %v2937_v63  ;;  %8340 = vmatprep.subr.bf16.mxu1 %v11942_v45 }
 0xd15   : > { %v8311_v21 = vpop.f32.mrf.mxu1 }
 0xd16   : > { %v2959_v35 = vsel %vm1715_vm4, %v2938_v58, -inf }
 0xd17   : > { %2960 = vmax.xlane.f32.xlu1 %v2959_v35  ;;  %v2942_v10 = vpop.f32.mrf.mxu1  ;;  %8341 = vmatpush3.bf16.msra.mxu1 %v8872_v49 }
 0xd18   : > { %v2943_v4 = vadd.f32 %v9267_v16, %v2942_v10  ;;  %8342 = vmatprep.subr.bf16.mxu1 %v11942_v45 }
 0xd19   : > { %v8314_v11 = vpop.f32.mrf.mxu1 }
 0xd1a   : > { %v2962_v20 = vsel %vm1715_vm4, %v2943_v4, -inf }
 0xd1b   : > { %2963 = vmax.xlane.f32.xlu0 %v2962_v20  ;;  %v2945_v26 = vpop.f32.mrf.mxu1 }
 0xd1c   : > { %v2946_v9 = vadd.f32 %v9268_v27, %v2945_v26 }
 0xd1d   : > { %v8315_v38 = vpop.f32.mrf.mxu1 }
 0xd1e   : > { %v2965_v22 = vsel %vm1715_vm4, %v2946_v9, -inf }
 0xd1f   : > { %2966 = vmax.xlane.f32.xlu1 %v2965_v22  ;;  %v2950_v1 = vpop.f32.mrf.mxu1 }
 0xd20   : > { %v2951_v48 = vadd.f32 %v9269_v59, %v2950_v1 }
 0xd21   : > { %v8318_v25 = vpop.f32.mrf.mxu1 }
 0xd22   : > { %v2968_v7 = vsel %vm1715_vm4, %v2951_v48, -inf  ;;  %v8873_v25 = vld [vmem:[%s11926_s8 + $0x28] sm:$0xff]  }
 0xd23   : > { %2969 = vmax.xlane.f32.xlu0 %v2968_v7  ;;  %v2953_v12 = vpop.f32.mrf.mxu1  ;;  %8343 = vmatpush3.bf16.msra.mxu1 %v8873_v25  ;;  %v8874_v7 = vld [vmem:[%s11926_s8 + $0x20] sm:$0xff]  }
 0xd24   : > { %8344 = vmatprep.subr.bf16.mxu1 %v11942_v45 }
 0xd25   : > { %v8319_v13 = vpop.f32.mrf.mxu1 }
 0xd26   : > { %v11957_v13 = vmov 0 }
 0xd27   : > { %8345 = vmatpush3.bf16.msra.mxu1 %v8874_v7  ;;  %v11958_v13 = vsel %vm10334_vm14, 4294967295, %v11957_v13 }
 0xd28   : > { %11959 = vst [vmem:[#allocation2_spill] sm:$0xff] %v11958_v13 }
 0xd9c   : > { %v2958_v36 = vpop.xlane.xlu0 %2957 }
 0xd9d   : > { %v2971_v43 = vsub.f32 %v2935_v34, %v2958_v36 }
 0xd9f   : > { %v2976_v60 = vmul.f32 1.442695, %v2971_v43 }
 0xda0   : > { %v2961_v29 = vpop.xlane.xlu1 %2960 }
 0xda1   : > { %9053 = vpow2.f32 %v2976_v60  ;;  %v2972_v52 = vsub.f32 %v2938_v58, %v2961_v29 }
 0xda3   : > { %v2978_v31 = vmul.f32 1.442695, %v2972_v52 }
 0xda4   : > { %v2964_v33 = vpop.xlane.xlu0 %2963 }
 0xda5   : > { %9055 = vpow2.f32 %v2978_v31  ;;  %v2973_v3 = vsub.f32 %v2943_v4, %v2964_v33 }
 0xda7   : > { %v2980_v39 = vmul.f32 1.442695, %v2973_v3 }
 0xda8   : > { %v2967_v37 = vpop.xlane.xlu1 %2966 }
 0xda9   : > { %9057 = vpow2.f32 %v2980_v39  ;;  %v2974_v40 = vsub.f32 %v2946_v9, %v2967_v37 }
 0xdab   : > { %v2982_v46 = vmul.f32 1.442695, %v2974_v40 }
 0xdac   : > { %v2970_v32 = vpop.xlane.xlu0 %2969 }
 0xdad   : > { %9059 = vpow2.f32 %v2982_v46  ;;  %v2975_v51 = vsub.f32 %v2951_v48, %v2970_v32 }
 0xdae   : > { %v9054_v53 = vpop.eup %9053 }
 0xdaf   : > { %v2984_v56 = vmul.f32 1.442695, %v2975_v51  ;;  %v2986_v41 = vsel %vm1715_vm4, %v9054_v53, 0.0 }
 0xdb0   : > { %2987 = vadd.xlane.f32.xlu1 %v2986_v41 }
 0xdb1   : > { %9061 = vpow2.f32 %v2984_v56 }
 0xdb2   : > { %v9056_v42 = vpop.eup %9055 }
 0xdb3   : > { %v2989_v2 = vsel %vm1715_vm4, %v9056_v42, 0.0 }
 0xdb4   : > { %2990 = vadd.xlane.f32.xlu0 %v2989_v2 }
 0xdb6   : > { %v9058_v5 = vpop.eup %9057 }
 0xdb7   : > { %v2992_v30 = vsel %vm1715_vm4, %v9058_v5, 0.0 }
 0xdb8   : > { %2993 = vadd.xlane.f32.xlu1 %v2992_v30 }
 0xdba   : > { %v9060_v6 = vpop.eup %9059 }
 0xdbb   : > { %v2995_v28 = vsel %vm1715_vm4, %v9060_v6, 0.0 }
 0xdbc   : > { %2996 = vadd.xlane.f32.xlu0 %v2995_v28 }
 0xdbe   : > { %v9062_v17 = vpop.eup %9061 }
 0xdbf   : > { %v2998_v34 = vsel %vm1715_vm4, %v9062_v17, 0.0 }
 0xdc0   : > { %2999 = vadd.xlane.f32.xlu1 %v2998_v34 }
 0xe39   : > { %v2988_v63 = vpop.xlane.xlu1 %2987 }
 0xe3a   : > { %9063 = vrcp.f32 %v2988_v63 }
 0xe3d   : > { %v2991_v61 = vpop.xlane.xlu0 %2990 }
 0xe3e   : > { %9065 = vrcp.f32 %v2991_v61 }
 0xe41   : > { %v2994_v58 = vpop.xlane.xlu1 %2993 }
 0xe42   : > { %9067 = vrcp.f32 %v2994_v58 }
 0xe45   : > { %v2997_v21 = vpop.xlane.xlu0 %2996 }
 0xe46   : > { %9069 = vrcp.f32 %v2997_v21 }
 0xe47   : > { %v9064_v35 = vpop.eup %9063 }
 0xe48   : > { %v3002_v4 = vmul.f32 %v9064_v35, %v9054_v53 }
 0xe49   : > { %v3000_v10 = vpop.xlane.xlu1 %2999 }
 0xe4a   : > { %9071 = vrcp.f32 %v3000_v10 }
 0xe4b   : > { %v9066_v16 = vpop.eup %9065 }
 0xe4c   : > { %v3004_v11 = vmul.f32 %v9066_v16, %v9056_v42 }
 0xe4e   : > { %v3011_v20 = vpack.c.bf16 %v3004_v11, %v3002_v4 }
 0xe4f   : > { %v9068_v26 = vpop.eup %9067 }
 0xe50   : > { %8327 = vmatmul.mubr.msk.bf16.vlgmr.msra.gmra.mxu0 %vm1715_vm4, %v3011_v20  ;;  %v3006_v9 = vmul.f32 %v9068_v26, %v9058_v5 }
 0xe51   : > { %8330 = vmatprep.mubr.msk.bf16.mxu0 %vm9289_vm1, %v11942_v45 }
 0xe53   : > { %v9070_v27 = vpop.eup %9069 }
 0xe54   : > { %v3008_v38 = vmul.f32 %v9070_v27, %v9060_v6 }
 0xe56   : > { %v3012_v22 = vpack.c.bf16 %v3008_v38, %v3006_v9 }
 0xe57   : > { %v9072_v1 = vpop.eup %9071 }
 0xe58   : > { %8331 = vmatmul.mubr.msk.bf16.gmra.mxu0 %vm1715_vm4, %v3012_v22  ;;  %v3010_v59 = vmul.f32 %v9072_v1, %v9062_v17 }
 0xe59   : > { %8334 = vmatprep.mubr.msk.bf16.mxu0 %vm9289_vm1, %v11942_v45 }
 0xe5a   : > { %v3013_v48 = vpack.c.bf16 %v3010_v59, %v3010_v59 }
 0xe60   : > { %8335 = vmatmul.mubr.msk.bf16.gmra.mxu0 %vm1715_vm4, %v3013_v48 }
 0xf10   : > { %v3057_v12 = vpop.f32.mrf.mxu0 }
 0xf11   : > { %v3084_v43 = vsel %vm10334_vm14, %v3057_v12, 0.0 }
 0xf12   : > { %v8328_v36 = vpop.f32.mrf.mxu0  ;;  %v3089_v52 = vadd.f32 %v3084_v43, %v10237_v15 }
 0xf14   : > { %v3060_v60 = vpop.f32.mrf.mxu0 }
 0xf15   : > { %v3085_v29 = vsel %vm10334_vm14, %v3060_v60, 0.0 }
 0xf16   : > { %v3090_v31 = vadd.f32 %v3085_v29, %v10242_v62  ;;  %v8329_v33 = vpop.f32.mrf.mxu0 }
 0xf18   : > { %v3094_v3 = vpack.c.bf16 %v3090_v31, %v3089_v52  ;;  %v3065_v39 = vpop.f32.mrf.mxu0 }
 0xf19   : > { %v3086_v40 = vsel %vm10334_vm14, %v3065_v39, 0.0 }
 0xf1a   : > { %v8332_v37 = vpop.f32.mrf.mxu0  ;;  %8347 = vmatmul.mubr.msk.bf16.vlgmr.msra.gmra.mxu1 %vm1243_vm0, %v3094_v3  ;;  %v3091_v15 = vadd.f32 %v3086_v40, %v10247_v50  ;;  %v7208_v50 = vld [vmem:[%s11927_s9 + $0x1] ss:$0 sm:$0xff] }
 0xf1b   : > { %8350 = vmatprep.mubr.msk.bf16.mxu1 %vm9289_vm1, %v11942_v45 }
 0xf1c   : > { %v3068_v46 = vpop.f32.mrf.mxu0 }
 0xf1d   : > { %v3087_v32 = vsel %vm10334_vm14, %v3068_v46, 0.0 }
 0xf1e   : > { %v3092_v62 = vadd.f32 %v3087_v32, %v10252_v57  ;;  %v8333_v51 = vpop.f32.mrf.mxu0 }
 0xf20   : > { %v3095_v53 = vpack.c.bf16 %v3092_v62, %v3091_v15  ;;  %v3073_v56 = vpop.f32.mrf.mxu0 }
 0xf21   : > { %v3088_v41 = vsel %vm10334_vm14, %v3073_v56, 0.0 }
 0xf22   : > { %v8336_v42 = vpop.f32.mrf.mxu0  ;;  %8351 = vmatmul.mubr.msk.bf16.gmra.mxu1 %vm1243_vm0, %v3095_v53  ;;  %v3093_v2 = vadd.f32 %v3088_v41, %v10257_v55 }
 0xf23   : > { %8354 = vmatprep.mubr.msk.bf16.mxu1 %vm9289_vm1, %v11942_v45  ;;  %v8877_v42 = vld [vmem:[%s11928_s10 + $0x34] ss:$8 sps:$4 sm:$0xff]  }
 0xf24   : > { %v3076_v5 = vpop.f32.mrf.mxu0  ;;  %v3096_v6 = vpack.c.bf16 %v3093_v2, %v3093_v2  ;;  %v8875_v2 = vld [vmem:[%s11928_s10 + $0x30] ss:$8 sps:$4 sm:$0xff]   ;;  %3379 = vmatprep.subr.bf16.mxu0 %v8877_v42  ;;  %v8891_v42 = vld [vmem:[%s11930_s12 + $0x68] sm:$0xff]  }
 0xf25   : > { %3380 = vmatpush1.bf16.msra.mxu0 %v8875_v2  ;;  %v8880_v5 = vld [vmem:[%s11928_s10 + $0x24] ss:$8 sps:$4 sm:$0xff]  }
 0xf26   : > { %v8337_v30 = vpop.f32.mrf.mxu0  ;;  %3381 = vmatprep.subr.bf16.mxu0 %v8880_v5  ;;  %v8892_v2 = vld [vmem:[%s11930_s12 + $0x28] sm:$0xff]   ;;  %v8893_v5 = vld [vmem:[%s11930_s12 + $0x60] sm:$0xff]  }
 0xf27   : > { %v8878_v30 = vld [vmem:[%s11928_s10 + $0x20] ss:$8 sps:$4 sm:$0xff]  }
 0xf29   : > { %3382 = vmatpush1.bf16.msra.mxu0 %v8878_v30  ;;  %v8894_v30 = vld [vmem:[%s11930_s12 + $0x20] sm:$0xff]  }
 0xf2a   : > { %8355 = vmatmul.mubr.msk.bf16.gmra.mxu1 %vm1243_vm0, %v3096_v6  ;;  %v8883_v6 = vld [vmem:[%s11928_s10 + $0x14] ss:$8 sps:$4 sm:$0xff]  }
 0xf2b   : > { %3383 = vmatprep.subr.bf16.mxu0 %v8883_v6  ;;  %v8895_v6 = vld [vmem:[%s11930_s12 + $0x58] sm:$0xff]  }
 0xfda   : > { %v3181_v57 = vpop.f32.mrf.mxu1 }
 0xfdb   : > { %v3182_v28 = vadd.f32 %v7208_v50, %v3181_v57  ;;  %v8886_v57 = vld [vmem:[%s11928_s10 + $0x4] ss:$8 sps:$4 sm:$0xff]  }
 0xfdc   : > { %v8348_v17 = vpop.f32.mrf.mxu1 }
 0xfdd   : > { %v10364_v34 = vadd.f32 %v3182_v28, %v9570_v44  ;;  %v8884_v28 = vld [vmem:[%s11928_s10] ss:$8 sps:$4 sm:$0xff]   ;;  %v11940_v17 = vmov 0  }
 0xfde   : > { %v3184_v47 = vpop.f32.mrf.mxu1  ;;  %3403 = vmatprep.mubr.bf16.mxu0 %v11940_v17 }
 0xfdf   : > { %v3185_v49 = vadd.f32 %v7208_v50, %v3184_v47  ;;  %v3212_v55 = vsel %vm1243_vm0, %v10364_v34, 0.0 }
 0xfe0   : > { %3213 = vadd.xlane.f32.xlu0 %v3212_v55  ;;  %v8349_v63 = vpop.f32.mrf.mxu1 }
 0xfe1   : > { %v10369_v61 = vadd.f32 %v3185_v49, %v9577_v54 }
 0xfe2   : > { %v3189_v58 = vpop.f32.mrf.mxu1 }
 0xfe3   : > { %v3190_v21 = vadd.f32 %v7208_v50, %v3189_v58  ;;  %v3215_v35 = vsel %vm1243_vm0, %v10369_v61, 0.0 }
 0xfe4   : > { %3216 = vadd.xlane.f32.xlu1 %v3215_v35  ;;  %v8352_v10 = vpop.f32.mrf.mxu1 }
 0xfe5   : > { %v10374_v44 = vadd.f32 %v3190_v21, %v9584_v0 }
 0xfe6   : > { %v3192_v16 = vpop.f32.mrf.mxu1 }
 0xfe7   : > { %v3193_v4 = vadd.f32 %v7208_v50, %v3192_v16  ;;  %v3218_v11 = vsel %vm1243_vm0, %v10374_v44, 0.0 }
 0xfe8   : > { %3219 = vadd.xlane.f32.xlu0 %v3218_v11  ;;  %v8353_v20 = vpop.f32.mrf.mxu1 }
 0xfe9   : > { %v10379_v54 = vadd.f32 %v3193_v4, %v9588_v8 }
 0xfea   : > { %v3197_v26 = vpop.f32.mrf.mxu1 }
 0xfeb   : > { %v3198_v27 = vadd.f32 %v7208_v50, %v3197_v26  ;;  %v3221_v9 = vsel %vm1243_vm0, %v10379_v54, 0.0  ;;  %v8881_v50 = vld [vmem:[%s11928_s10 + $0x10] ss:$8 sps:$4 sm:$0xff]  }
 0xfec   : > { %3222 = vadd.xlane.f32.xlu1 %v3221_v9  ;;  %v8356_v38 = vpop.f32.mrf.mxu1  ;;  %3384 = vmatpush1.bf16.msra.mxu0 %v8881_v50  ;;  %v8896_v50 = vld [vmem:[%s11930_s12 + $0x18] sm:$0xff]  }
 0xfed   : > { %v10384_v0 = vadd.f32 %v3198_v27, %v9592_v14  ;;  %3385 = vmatprep.subr.bf16.mxu0 %v8886_v57  ;;  %v8897_v57 = vld [vmem:[%s11930_s12 + $0x50] sm:$0xff]  }
 0xfee   : > { %v3200_v22 = vpop.f32.mrf.mxu1 }
 0xfef   : > { %v3224_v1 = vsel %vm1243_vm0, %v10384_v0, 0.0 }
 0xff0   : > { %3225 = vadd.xlane.f32.xlu0 %v3224_v1  ;;  %v8357_v59 = vpop.f32.mrf.mxu1  ;;  %3386 = vmatpush1.bf16.msra.mxu0 %v8884_v28  ;;  %v7218_v1 = vld [vmem:[%s11923_s5 + $0x2] ss:$0 sm:$0xff]  ;;  %v8898_v28 = vld [vmem:[%s11930_s12 + $0x10] sm:$0xff]  }
 0xff1   : > { %8358 = vmatprep.subr.bf16.mxu0 %v11942_v45 }
0x1069   : > { %v3214_v48 = vpop.xlane.xlu0 %3213 }
0x106a   : > { %v3227_v25 = vmul.f32 0.015625, %v3214_v48 }
0x106c   : > { %v10389_v8 = vsub.f32 %v10364_v34, %v3227_v25 }
0x106d   : > { %v3217_v7 = vpop.xlane.xlu1 %3216 }
0x106e   : > { %v3228_v12 = vmul.f32 0.015625, %v3217_v7  ;;  %v3237_v36 = vmul.f32 %v10389_v8, %v10389_v8  ;;  %v7219_v7 = vld [vmem:[%s11923_s5 + $0x3] ss:$0 sm:$0xff] }
0x1070   : > { %v10394_v43 = vsub.f32 %v10369_v61, %v3228_v12  ;;  %v3242_v14 = vsel %vm1243_vm0, %v3237_v36, 0.0 }
0x1071   : > { %v3220_v60 = vpop.xlane.xlu0 %3219  ;;  %3243 = vadd.xlane.f32.xlu1 %v3242_v14 }
0x1072   : > { %v3229_v29 = vmul.f32 0.015625, %v3220_v60  ;;  %v3238_v52 = vmul.f32 %v10394_v43, %v10394_v43 }
0x1074   : > { %v10400_v31 = vsub.f32 %v10374_v44, %v3229_v29  ;;  %v3245_v33 = vsel %vm1243_vm0, %v3238_v52, 0.0 }
0x1075   : > { %v3223_v3 = vpop.xlane.xlu1 %3222  ;;  %3246 = vadd.xlane.f32.xlu0 %v3245_v33 }
0x1076   : > { %v3230_v39 = vmul.f32 0.015625, %v3223_v3  ;;  %v3239_v37 = vmul.f32 %v10400_v31, %v10400_v31 }
0x1078   : > { %v10406_v40 = vsub.f32 %v10379_v54, %v3230_v39  ;;  %v3248_v46 = vsel %vm1243_vm0, %v3239_v37, 0.0 }
0x1079   : > { %3249 = vadd.xlane.f32.xlu1 %v3248_v46  ;;  %v3226_v32 = vpop.xlane.xlu0 %3225 }
0x107a   : > { %v3231_v15 = vmul.f32 0.015625, %v3226_v32  ;;  %v3240_v62 = vmul.f32 %v10406_v40, %v10406_v40 }
0x107c   : > { %v10412_v51 = vsub.f32 %v10384_v0, %v3231_v15  ;;  %v3251_v53 = vsel %vm1243_vm0, %v3240_v62, 0.0 }
0x107d   : > { %3252 = vadd.xlane.f32.xlu0 %v3251_v53 }
0x107e   : > { %v3241_v56 = vmul.f32 %v10412_v51, %v10412_v51 }
0x1080   : > { %v3254_v41 = vsel %vm1243_vm0, %v3241_v56, 0.0  ;;  %v8889_v56 = vld [vmem:[%s11930_s12 + $0x70] sm:$0xff]  }
0x1081   : > { %3255 = vadd.xlane.f32.xlu1 %v3254_v41  ;;  %v8890_v41 = vld [vmem:[%s11930_s12 + $0x30] sm:$0xff]  }
0x10fa   : > { %v3244_v47 = vpop.xlane.xlu1 %3243 }
0x10fb   : > { %v3257_v49 = vmul.f32 0.015625, %v3244_v47  ;;  %v8899_v47 = vld [vmem:[%s11930_s12 + $0x48] sm:$0xff]  }
0x10fd   : > { %v3262_v55 = vadd.f32 1e-06, %v3257_v49  ;;  %v8900_v49 = vld [vmem:[%s11930_s12 + $0x8] sm:$0xff]  }
0x10fe   : > { %v3247_v63 = vpop.xlane.xlu0 %3246 }
0x10ff   : > { %9073 = vrsqrt.f32 %v3262_v55  ;;  %v3258_v58 = vmul.f32 0.015625, %v3247_v63  ;;  %v8901_v55 = vld [vmem:[%s11930_s12 + $0x40] sm:$0xff]  }
0x1100   : > { %v8902_v63 = vld [vmem:[%s11930_s12] sm:$0xff]  }
0x1101   : > { %v3263_v21 = vadd.f32 1e-06, %v3258_v58  ;;  %v10512_v58 = vshrl.u32 %v1238_v18, 7 }
0x1102   : > { %v3250_v35 = vpop.xlane.xlu1 %3249 }
0x1103   : > { %9075 = vrsqrt.f32 %v3263_v21  ;;  %v3259_v10 = vmul.f32 0.015625, %v3250_v35  ;;  %11960 = vst [vmem:[#allocation3_spill] sm:$0xff] %v10512_v58  ;;  %v11939_v21 = vsub.s32 0, %v10512_v58  ;;  %v3310_v35 = vld [vmem:[%s11929_s11] sm:$0x3] }
0x1105   : > { %v3264_v16 = vadd.f32 1e-06, %v3259_v10  ;;  %v11938_v10 = vsub.s32 1, %v10512_v58 }
0x1106   : > { %v3253_v4 = vpop.xlane.xlu0 %3252 }
0x1107   : > { %9077 = vrsqrt.f32 %v3264_v16  ;;  %v3260_v11 = vmul.f32 0.015625, %v3253_v4  ;;  %v10521_v16 = vrot.slane %v3310_v35, %v11939_v21  ;;  %v10525_v4 = vrot.slane %v3310_v35, %v11938_v10 }
0x1109   : > { %v3265_v20 = vadd.f32 1e-06, %v3260_v11 }
0x110a   : > { %v3256_v26 = vpop.xlane.xlu1 %3255 }
0x110b   : > { %9079 = vrsqrt.f32 %v3265_v20  ;;  %v3261_v27 = vmul.f32 0.015625, %v3256_v26 }
0x110c   : > { %v9074_v9 = vpop.eup %9073 }
0x110d   : > { %v3272_v38 = vmul.f32 %v9074_v9, %v10389_v8  ;;  %v3266_v22 = vadd.f32 1e-06, %v3261_v27 }
0x110f   : > { %9081 = vrsqrt.f32 %v3266_v22  ;;  %v3283_v48 = vmul.f32 %v7218_v1, %v3272_v38 }
0x1110   : > { %v9076_v59 = vpop.eup %9075 }
0x1111   : > { %v3273_v25 = vmul.f32 %v9076_v59, %v10394_v43  ;;  %v3294_v14 = vadd.f32 %v7219_v7, %v3283_v48 }
0x1113   : > { %v3284_v12 = vmul.f32 %v7218_v1, %v3273_v25 }
0x1114   : > { %v9078_v36 = vpop.eup %9077 }
0x1115   : > { %v3295_v60 = vadd.f32 %v7219_v7, %v3284_v12  ;;  %v3274_v8 = vmul.f32 %v9078_v36, %v10400_v31 }
0x1117   : > { %v3299_v29 = vpack.c.bf16 %v3295_v60, %v3294_v14  ;;  %v3285_v3 = vmul.f32 %v7218_v1, %v3274_v8 }
0x1118   : > { %v9080_v52 = vpop.eup %9079 }
0x1119   : > { %v3275_v33 = vmul.f32 %v9080_v52, %v10406_v40  ;;  %7228 = vmatmul.mubr.msk.bf16.vlgmr.msra.gmra.mxu0 %vm1243_vm0, %v3299_v29  ;;  %v3296_v46 = vadd.f32 %v7219_v7, %v3285_v3  ;;  %v8887_v40 = vld [vmem:[%s11930_s12 + $0x78] sm:$0xff]  }
0x111a   : > { %3413 = vmatprep.mubr.bf16.mxu0 %v11940_v17  ;;  %7807 = vmatprep.subr.bf16.mxu1 %v8887_v40 }
0x111b   : > { %v3286_v43 = vmul.f32 %v7218_v1, %v3275_v33 }
0x111c   : > { %v9082_v39 = vpop.eup %9081 }
0x111d   : > { %v3276_v37 = vmul.f32 %v9082_v39, %v10412_v51  ;;  %v3297_v32 = vadd.f32 %v7219_v7, %v3286_v43  ;;  %v8888_v51 = vld [vmem:[%s11930_s12 + $0x38] sm:$0xff]  }
0x111e   : > { %7808 = vmatpush3.bf16.msra.mxu1 %v8888_v51 }
0x111f   : > { %v3300_v15 = vpack.c.bf16 %v3297_v32, %v3296_v46  ;;  %v3287_v62 = vmul.f32 %v7218_v1, %v3276_v37  ;;  %7809 = vmatprep.subr.bf16.mxu1 %v8889_v56 }
0x1121   : > { %7229 = vmatmul.mubr.msk.bf16.gmra.mxu0 %vm1243_vm0, %v3300_v15  ;;  %v3298_v31 = vadd.f32 %v7219_v7, %v3287_v62 }
0x1122   : > { %3423 = vmatprep.mubr.bf16.mxu0 %v11940_v17  ;;  %7810 = vmatpush3.bf16.msra.mxu1 %v8890_v41 }
0x1123   : > { %v3301_v53 = vpack.c.bf16 %v3298_v31, %v3298_v31  ;;  %7811 = vmatprep.subr.bf16.mxu1 %v8891_v42 }
0x1126   : > { %7812 = vmatpush3.bf16.msra.mxu1 %v8892_v2 }
0x1127   : > { %7813 = vmatprep.subr.bf16.mxu1 %v8893_v5 }
0x1129   : > { %7230 = vmatmul.mubr.msk.bf16.gmra.mxu0 %vm1243_vm0, %v3301_v53 }
0x112a   : > { %8366 = vmatprep.mubr.msk.bf16.mxu0 %vm9289_vm1, %v11942_v45  ;;  %7814 = vmatpush3.bf16.msra.mxu1 %v8894_v30 }
0x112b   : > { %7815 = vmatprep.subr.bf16.mxu1 %v8895_v6 }
0x112e   : > { %7816 = vmatpush3.bf16.msra.mxu1 %v8896_v50 }
0x112f   : > { %7817 = vmatprep.subr.bf16.mxu1 %v8897_v57 }
0x1132   : > { %7818 = vmatpush3.bf16.msra.mxu1 %v8898_v28 }
0x1133   : > { %7819 = vmatprep.subr.bf16.mxu1 %v8899_v47 }
0x1136   : > { %7820 = vmatpush3.bf16.msra.mxu1 %v8900_v49 }
0x1137   : > { %7821 = vmatprep.subr.bf16.mxu1 %v8901_v55 }
0x113a   : > { %7822 = vmatpush3.bf16.msra.mxu1 %v8902_v63 }
0x113b   : > { %8398 = vmatprep.subr.bf16.mxu1 %v11942_v45 }
0x11d9   : > { %v3405_v11 = vpop.f32.mrf.mxu0 }
0x11da   : > { %v10528_v18 = vadd.f32 %v3405_v11, %v10521_v16 }
0x11db   : > { %v3407_v20 = vpop.f32.mrf.mxu0 }
0x11dc   : > { %v10531_v26 = vmul.f32 0.70710677, %v10528_v18  ;;  %v3408_v27 = vadd.f32 %v3407_v20, %v10525_v4 }
0x11dd   : > { %v3409_v9 = vpop.f32.mrf.mxu0 }
0x11de   : > { %v3442_v38 = vand.u32 2147483647, %v10531_v26  ;;  %v10535_v22 = vmul.f32 0.70710677, %v3408_v27  ;;  %v10538_v1 = vadd.f32 %v3409_v9, %v10521_v16  ;;  %vm3642_vm6 = vcmp.ge.f32.partialorder %v10531_v26, 0.0 }
0x11df   : > { %v3411_v59 = vpop.f32.mrf.mxu0 }
0x11e0   : > { %v3452_v48 = vmul.f32 0.3275911, %v3442_v38  ;;  %v3443_v25 = vand.u32 2147483647, %v10535_v22  ;;  %v10542_v7 = vmul.f32 0.70710677, %v10538_v1  ;;  %v10545_v12 = vadd.f32 %v3411_v59, %v10525_v4 }
0x11e1   : > { %v3415_v36 = vpop.f32.mrf.mxu0  ;;  %v3582_v60 = vsub.f32 0.0, %v3442_v38  ;;  %vm3643_vm15 = vcmp.ge.f32.partialorder %v10535_v22, 0.0 }
0x11e2   : > { %v3462_v14 = vadd.f32 1.0, %v3452_v48  ;;  %v3453_v8 = vmul.f32 0.3275911, %v3443_v25  ;;  %v3444_v29 = vand.u32 2147483647, %v10542_v7  ;;  %v3583_v32 = vsub.f32 0.0, %v3443_v25 }
0x11e3   : > { %v10549_v52 = vmul.f32 0.70710677, %v10545_v12  ;;  %v3417_v33 = vpop.f32.mrf.mxu0  ;;  %v3592_v46 = vmul.f32 %v3582_v60, %v3442_v38  ;;  %v10553_v15 = vadd.f32 %v3415_v36, %v10521_v16  ;;  %vm3644_vm5 = vcmp.ge.f32.partialorder %v10542_v7, 0.0 }
0x11e4   : > { %9083 = vrcp.f32 %v3462_v14  ;;  %v3463_v3 = vadd.f32 1.0, %v3453_v8  ;;  %v3454_v43 = vmul.f32 0.3275911, %v3444_v29  ;;  %v10556_v62 = vadd.f32 %v3417_v33, %v10525_v4 }
0x11e5   : > { %v3445_v39 = vand.u32 2147483647, %v10549_v52  ;;  %v3419_v37 = vpop.f32.mrf.mxu0  ;;  %v3584_v53 = vsub.f32 0.0, %v3444_v29  ;;  %v10559_v56 = vmul.f32 0.70710677, %v10553_v15  ;;  %v3593_v5 = vmul.f32 %v3583_v32, %v3443_v25 }
0x11e6   : > { %9085 = vrcp.f32 %v3463_v3  ;;  %v3464_v31 = vadd.f32 1.0, %v3454_v43  ;;  %v10562_v42 = vmul.f32 0.70710677, %v10556_v62  ;;  %v3602_v6 = vmul.f32 1.442695, %v3592_v46 }
0x11e7   : > { %v3455_v40 = vmul.f32 0.3275911, %v3445_v39  ;;  %v3421_v51 = vpop.f32.mrf.mxu0  ;;  %v3446_v30 = vand.u32 2147483647, %v10559_v56  ;;  %v3594_v50 = vmul.f32 %v3584_v53, %v3444_v29  ;;  %v10567_v28 = vadd.f32 %v3419_v37, %v10521_v16 }
0x11e8   : > { %9087 = vrcp.f32 %v3464_v31  ;;  %v3447_v57 = vand.u32 2147483647, %v10562_v42  ;;  %v3604_v11 = vmul.f32 1.442695, %v3593_v5  ;;  %v3585_v20 = vsub.f32 0.0, %v3445_v39 }
0x11e9   : > { %v3465_v41 = vadd.f32 1.0, %v3455_v40  ;;  %v3425_v2 = vpop.f32.mrf.mxu0  ;;  %v3456_v49 = vmul.f32 0.3275911, %v3446_v30  ;;  %v10570_v63 = vmul.f32 0.70710677, %v10567_v28  ;;  %v10573_v38 = vadd.f32 %v3421_v51, %v10525_v4 }
0x11ea   : > { %v3457_v55 = vmul.f32 0.3275911, %v3447_v57  ;;  %v3606_v59 = vmul.f32 1.442695, %v3594_v50  ;;  %v3586_v14 = vsub.f32 0.0, %v3446_v30  ;;  %v3587_v60 = vsub.f32 0.0, %v3447_v57 }
0x11eb   : > { %v3427_v47 = vpop.f32.mrf.mxu0  ;;  %9089 = vrcp.f32 %v3465_v41  ;;  %v3466_v9 = vadd.f32 1.0, %v3456_v49  ;;  %v3448_v25 = vand.u32 2147483647, %v10570_v63  ;;  %v10577_v8 = vmul.f32 0.70710677, %v10573_v38 }
0x11ec   : > { %9091 = vpow2.f32 %v3602_v6  ;;  %v3467_v48 = vadd.f32 1.0, %v3457_v55  ;;  %v10582_v33 = vmul.f32 0.5, %v10528_v18  ;;  %v10584_v3 = vmul.f32 0.5, %v3408_v27 }
0x11ed   : > { %v3429_v35 = vpop.f32.mrf.mxu0  ;;  %9093 = vrcp.f32 %v3466_v9  ;;  %v3458_v43 = vmul.f32 0.3275911, %v3448_v25  ;;  %v3595_v46 = vmul.f32 %v3585_v20, %v3445_v39  ;;  %v3449_v32 = vand.u32 2147483647, %v10577_v8 }
0x11ee   : > { %9095 = vrcp.f32 %v3467_v48  ;;  %v3588_v53 = vsub.f32 0.0, %v3448_v25  ;;  %v10589_v40 = vadd.f32 %v3425_v2, %v10521_v16  ;;  %v3596_v41 = vmul.f32 %v3586_v14, %v3446_v30 }
0x11ef   : > { %v3430_v36 = vpop.f32.mrf.mxu0  ;;  %9097 = vpow2.f32 %v3604_v11  ;;  %v3468_v31 = vadd.f32 1.0, %v3458_v43  ;;  %v3597_v27 = vmul.f32 %v3587_v60, %v3447_v57  ;;  %v3459_v5 = vmul.f32 0.3275911, %v3449_v32 }
0x11f0   : > { %9099 = vpow2.f32 %v3606_v59  ;;  %v10595_v50 = vmul.f32 0.5, %v10538_v1  ;;  %v10598_v39 = vmul.f32 0.70710677, %v10589_v40  ;;  %v3608_v2 = vmul.f32 1.442695, %v3595_v46 }
0x11f1   : > { %v10579_v29 = vpop.eup %9083  ;;  %9101 = vrcp.f32 %v3468_v31  ;;  %v3469_v55 = vadd.f32 1.0, %v3459_v5  ;;  %v10604_v35 = vadd.f32 %v3427_v47, %v10525_v4  ;;  %v3598_v11 = vmul.f32 %v3588_v53, %v3448_v25 }
0x11f2   : > { %v3492_v37 = vmul.f32 1.0614054, %v10579_v29  ;;  %v10608_v1 = vand.u32 2147483647, %v10598_v39  ;;  %v3610_v9 = vmul.f32 1.442695, %v3596_v41 }
0x11f3   : > { %v10591_v51 = vpop.eup %9085  ;;  %v3612_v59 = vmul.f32 1.442695, %v3597_v27  ;;  %9103 = vrcp.f32 %v3469_v55  ;;  %v3589_v60 = vsub.f32 0.0, %v3449_v32  ;;  %v10617_v25 = vmul.f32 0.70710677, %v10604_v35 }
0x11f4   : > { %v7231_v18 = vadd.f32 -1.4531521, %v3492_v37  ;;  %v3493_v6 = vmul.f32 1.0614054, %v10591_v51  ;;  %v3460_v4 = vmul.f32 0.3275911, %v10608_v1  ;;  %9105 = vpow2.f32 %v3608_v2 }
0x11f5   : > { %v10600_v49 = vpop.eup %9087  ;;  %v3614_v31 = vmul.f32 1.442695, %v3598_v11  ;;  %9107 = vpow2.f32 %v3610_v9  ;;  %v10621_v5 = vand.u32 2147483647, %v10617_v25  ;;  %v3599_v55 = vmul.f32 %v3589_v60, %v3449_v32 }
0x11f6   : > { %v3512_v16 = vmul.f32 %v10579_v29, %v7231_v18  ;;  %v7232_v30 = vadd.f32 -1.4531521, %v3493_v6  ;;  %v3494_v57 = vmul.f32 1.0614054, %v10600_v49  ;;  %v3470_v53 = vadd.f32 1.0, %v3460_v4 }
0x11f7   : > { %9109 = vpow2.f32 %v3612_v59  ;;  %v3590_v21 = vsub.f32 0.0, %v10608_v1  ;;  %vm3645_vm9 = vcmp.ge.f32.partialorder %v10549_v52, 0.0  ;;  %v3591_v22 = vsub.f32 0.0, %v10621_v5 }
0x11f8   : > { %v3522_v20 = vadd.f32 1.4214138, %v3512_v16  ;;  %v10610_v48 = vpop.eup %9089  ;;  %v3513_v36 = vmul.f32 %v10591_v51, %v7232_v30  ;;  %v7233_v14 = vadd.f32 -1.4531521, %v3494_v57  ;;  %9111 = vrcp.f32 %v3470_v53 }
0x11f9   : > { %v3495_v43 = vmul.f32 1.0614054, %v10610_v48  ;;  %v9092_v18 = vpop.eup %9091  ;;  %9113 = vpow2.f32 %v3614_v31  ;;  %vm3647_vm10 = vcmp.ge.f32.partialorder %v10562_v42, 0.0  ;;  %vm3648_vm12 = vcmp.ge.f32.partialorder %v10570_v63, 0.0 }
0x11fa   : > { %v3532_v47 = vmul.f32 %v10579_v29, %v3522_v20  ;;  %v3523_v37 = vadd.f32 1.4214138, %v3513_v36  ;;  %v3514_v46 = vmul.f32 %v10600_v49, %v7233_v14  ;;  %v10623_v6 = vpop.eup %9093  ;;  %vm3646_vm13 = vcmp.ge.f32.partialorder %v10559_v56, 0.0 }
0x11fb   : > { %v7234_v27 = vadd.f32 -1.4531521, %v3495_v43  ;;  %v10626_v30 = vpop.eup %9095  ;;  %v3496_v20 = vmul.f32 1.0614054, %v10623_v6  ;;  %v3678_v56 = vmul.f32 0.5, %v10567_v28 }
0x11fc   : > { %v7241_v41 = vadd.f32 -0.28449672, %v3532_v47  ;;  %v3533_v16 = vmul.f32 %v10591_v51, %v3523_v37  ;;  %v3524_v2 = vadd.f32 1.4214138, %v3514_v46  ;;  %v9098_v9 = vpop.eup %9097  ;;  %v3497_v4 = vmul.f32 1.0614054, %v10626_v30 }
0x11fd   : > { %v3515_v11 = vmul.f32 %v10610_v48, %v7234_v27  ;;  %v3461_v47 = vmul.f32 0.3275911, %v10621_v5  ;;  %v9100_v43 = vpop.eup %9099  ;;  %v7235_v60 = vadd.f32 -1.4531521, %v3496_v20  ;;  %v3616_v27 = vmul.f32 1.442695, %v3599_v55 }
0x11fe   : > { %v3552_v57 = vmul.f32 %v10579_v29, %v7241_v41  ;;  %v7242_v36 = vadd.f32 -0.28449672, %v3533_v16  ;;  %v3534_v14 = vmul.f32 %v10600_v49, %v3524_v2  ;;  %v7236_v41 = vadd.f32 -1.4531521, %v3497_v4  ;;  %v10635_v10 = vpop.eup %9101 }
0x11ff   : > { %v3525_v32 = vadd.f32 1.4214138, %v3515_v11  ;;  %v3516_v2 = vmul.f32 %v10623_v6, %v7235_v60  ;;  %v3498_v11 = vmul.f32 1.0614054, %v10635_v10 }
0x1200   : > { %v3562_v59 = vadd.f32 0.2548296, %v3552_v57  ;;  %v3553_v37 = vmul.f32 %v10591_v51, %v7242_v36  ;;  %v7243_v46 = vadd.f32 -0.28449672, %v3534_v14  ;;  %v3517_v31 = vmul.f32 %v10626_v30, %v7236_v41  ;;  %v10644_v4 = vpop.eup %9103 }
0x1201   : > { %v3535_v16 = vmul.f32 %v10610_v48, %v3525_v32  ;;  %v3526_v55 = vadd.f32 1.4214138, %v3516_v2  ;;  %v3471_v14 = vadd.f32 1.0, %v3461_v47  ;;  %v7237_v60 = vadd.f32 -1.4531521, %v3498_v11 }
0x1202   : > { %v3572_v53 = vmul.f32 %v10579_v29, %v3562_v59  ;;  %v3563_v17 = vadd.f32 0.2548296, %v3553_v37  ;;  %v3554_v57 = vmul.f32 %v10600_v49, %v7243_v46  ;;  %v3527_v32 = vadd.f32 1.4214138, %v3517_v31 }
0x1203   : > { %v7244_v36 = vadd.f32 -0.28449672, %v3535_v16  ;;  %v3536_v41 = vmul.f32 %v10623_v6, %v3526_v55  ;;  %v3518_v16 = vmul.f32 %v10635_v10, %v7237_v60  ;;  %v3600_v31 = vmul.f32 %v3590_v21, %v10608_v1 }
0x1204   : > { %v3622_v20 = vmul.f32 %v9092_v18, %v3572_v53  ;;  %v3573_v29 = vmul.f32 %v10591_v51, %v3563_v17  ;;  %v3564_v59 = vadd.f32 0.2548296, %v3554_v57  ;;  %v3499_v18 = vmul.f32 1.0614054, %v10644_v4  ;;  %v9106_v53 = vpop.eup %9105 }
0x1205   : > { %v3555_v46 = vmul.f32 %v10610_v48, %v7244_v36  ;;  %v3537_v51 = vmul.f32 %v10626_v30, %v3527_v32  ;;  %v7245_v57 = vadd.f32 -0.28449672, %v3536_v41  ;;  %9115 = vrcp.f32 %v3471_v14  ;;  %v9108_v11 = vpop.eup %9107 }
0x1206   : > { %v3632_v37 = vsub.f32 1.0, %v3622_v20  ;;  %v3623_v47 = vmul.f32 %v9098_v9, %v3573_v29  ;;  %v3574_v17 = vmul.f32 %v10600_v49, %v3564_v59  ;;  %v3528_v45 = vadd.f32 1.4214138, %v3518_v16  ;;  %v9110_v58 = vpop.eup %9109 }
0x1207   : > { %v3565_v2 = vadd.f32 0.2548296, %v3555_v46  ;;  %v7246_v55 = vadd.f32 -0.28449672, %v3537_v51  ;;  %v3556_v49 = vmul.f32 %v10623_v6, %v7245_v57  ;;  %v7238_v9 = vadd.f32 -1.4531521, %v3499_v18  ;;  %v10660_v29 = vpop.eup %9111 }
0x1208   : > { %v3633_v20 = vsub.f32 1.0, %v3623_v47  ;;  %v3624_v36 = vmul.f32 %v9100_v43, %v3574_v17  ;;  %v3652_v59 = vsub.f32 0.0, %v3632_v37  ;;  %v3538_v43 = vmul.f32 %v10635_v10, %v3528_v45  ;;  %v9114_v41 = vpop.eup %9113 }
0x1209   : > { %v3575_v13 = vmul.f32 %v10610_v48, %v3565_v2  ;;  %v3557_v21 = vmul.f32 %v10626_v30, %v7246_v55  ;;  %v3566_v14 = vadd.f32 0.2548296, %v3556_v49  ;;  %v3519_v46 = vmul.f32 %v10644_v4, %v7238_v9 }
0x120a   : > { %v3653_v32 = vsub.f32 0.0, %v3633_v20  ;;  %v3634_v60 = vsub.f32 1.0, %v3624_v36  ;;  %9117 = vpow2.f32 %v3616_v27  ;;  %v3618_v17 = vmul.f32 1.442695, %v3600_v31 }
0x120b   : > { %v3625_v1 = vmul.f32 %v9106_v53, %v3575_v13  ;;  %v3567_v47 = vadd.f32 0.2548296, %v3557_v21  ;;  %v3576_v16 = vmul.f32 %v10623_v6, %v3566_v14  ;;  %v7247_v2 = vadd.f32 -0.28449672, %v3538_v43 }
0x120c   : > { %v3654_v48 = vsub.f32 0.0, %v3634_v60  ;;  %v3663_v18 = vsel %vm3643_vm15, %v3633_v20, %v3653_v32  ;;  %v3529_v45 = vadd.f32 1.4214138, %v3519_v46  ;;  %v3500_v57 = vmul.f32 1.0614054, %v10660_v29 }
0x120d   : > { %v3635_v51 = vsub.f32 1.0, %v3625_v1  ;;  %v3577_v53 = vmul.f32 %v10626_v30, %v3567_v47  ;;  %v3662_v36 = vsel %vm3642_vm6, %v3632_v37, %v3652_v59  ;;  %v3558_v55 = vmul.f32 %v10635_v10, %v7247_v2 }
0x120e   : > { %v3664_v13 = vsel %vm3644_vm5, %v3634_v60, %v3654_v48  ;;  %v3539_v6 = vmul.f32 %v10644_v4, %v3529_v45  ;;  %v7239_v49 = vadd.f32 -1.4531521, %v3500_v57  ;;  %v3683_v7 = vadd.f32 1.0, %v3663_v18 }
0x120f   : > { %v3684_v27 = vadd.f32 1.0, %v3664_v13  ;;  %v3655_v31 = vsub.f32 0.0, %v3635_v51  ;;  %v3627_v20 = vmul.f32 %v9110_v58, %v3577_v53  ;;  %v3675_v9 = vmul.f32 0.5, %v10545_v12 }
0x1210   : > { %v3626_v32 = vmul.f32 %v9108_v11, %v3576_v16  ;;  %v3682_v60 = vadd.f32 1.0, %v3662_v36  ;;  %v3568_v37 = vadd.f32 0.2548296, %v3558_v55  ;;  %v7248_v59 = vadd.f32 -0.28449672, %v3539_v6 }
0x1211   : > { %v3665_v30 = vsel %vm3645_vm9, %v3635_v51, %v3655_v31  ;;  %v3694_v21 = vmul.f32 %v3684_v27, %v10595_v50  ;;  %v3520_v58 = vmul.f32 %v10660_v29, %v7239_v49  ;;  %9119 = vpow2.f32 %v3618_v17 }
0x1212   : > { %v3685_v26 = vadd.f32 1.0, %v3665_v30  ;;  %v3601_v1 = vmul.f32 %v3591_v22, %v10621_v5  ;;  %v10683_v14 = vpop.eup %9115  ;;  %v3637_v46 = vsub.f32 1.0, %v3627_v20  ;;  %v3578_v52 = vmul.f32 %v10635_v10, %v3568_v37 }
0x1213   : > { %v3559_v12 = vmul.f32 %v10644_v4, %v7248_v59  ;;  %v3693_v11 = vmul.f32 %v3683_v7, %v10584_v3  ;;  %v3636_v48 = vsub.f32 1.0, %v3626_v32  ;;  %v3530_v47 = vadd.f32 1.4214138, %v3520_v58 }
0x1214   : > { %v3695_v43 = vmul.f32 %v3685_v26, %v3675_v9  ;;  %v3692_v18 = vmul.f32 %v3682_v60, %v10582_v33  ;;  %v3628_v50 = vmul.f32 %v9114_v41, %v3578_v52  ;;  %v3620_v16 = vmul.f32 1.442695, %v3601_v1 }
0x1215   : > { %v3569_v51 = vadd.f32 0.2548296, %v3559_v12  ;;  %v3540_v17 = vmul.f32 %v10660_v29, %v3530_v47  ;;  %v3501_v2 = vmul.f32 1.0614054, %v10683_v14  ;;  %v3657_v53 = vsub.f32 0.0, %v3637_v46 }
0x1216   : > { %v3703_v5 = vpack.c.bf16 %v3695_v43, %v3693_v11  ;;  %v3702_v13 = vpack.c.bf16 %v3694_v21, %v3692_v18  ;;  %v3638_v45 = vsub.f32 1.0, %v3628_v50  ;;  %v3656_v36 = vsub.f32 0.0, %v3636_v48 }
0x1217   : > { %v3579_v10 = vmul.f32 %v10644_v4, %v3569_v51  ;;  %v9118_v57 = vpop.eup %9117  ;;  %v7249_v3 = vadd.f32 -0.28449672, %v3540_v17  ;;  %v7240_v27 = vadd.f32 -1.4531521, %v3501_v2  ;;  %9121 = vpow2.f32 %v3620_v16 }
0x1218   : > { %3876 = vmatprep.mubr.bf16.mxu1 %v3703_v5  ;;  %v3658_v33 = vsub.f32 0.0, %v3638_v45  ;;  %v3667_v4 = vsel %vm3647_vm10, %v3637_v46, %v3657_v53  ;;  %v3666_v6 = vsel %vm3646_vm13, %v3636_v48, %v3656_v36  ;;  %vm3649_vm15 = vcmp.ge.f32.partialorder %v10577_v8, 0.0 }
0x1219   : > { %v3629_v41 = vmul.f32 %v9118_v57, %v3579_v10  ;;  %3877 = vmatmul.mubr.bf16.vlgmr.msra.gmra.mxu1 %v3702_v13  ;;  %v3560_v31 = vmul.f32 %v10660_v29, %v7249_v3  ;;  %v3521_v22 = vmul.f32 %v10683_v14, %v7240_v27  ;;  %v3687_v9 = vadd.f32 1.0, %v3667_v4 }
0x121a   : > { %v3668_v20 = vsel %vm3648_vm12, %v3638_v45, %v3658_v33  ;;  %v3686_v26 = vadd.f32 1.0, %v3666_v6  ;;  %v3677_v37 = vmul.f32 0.5, %v10556_v62  ;;  %v3679_v21 = vmul.f32 0.5, %v10573_v38 }
0x121b   : > { %v3639_v55 = vsub.f32 1.0, %v3629_v41  ;;  %v3570_v49 = vadd.f32 0.2548296, %v3560_v31  ;;  %v3531_v7 = vadd.f32 1.4214138, %v3521_v22  ;;  %v3688_v30 = vadd.f32 1.0, %v3668_v20 }
0x121c   : > { %v3676_v46 = vmul.f32 0.5, %v10553_v15  ;;  %v3697_v8 = vmul.f32 %v3687_v9, %v3677_v37  ;;  %vm3650_vm5 = vcmp.ge.f32.partialorder %v10598_v39, 0.0  ;;  %vm3651_vm6 = vcmp.ge.f32.partialorder %v10617_v25, 0.0  ;;  %v7252_v25 = vld [vmem:[%s11927_s9 + $0x2] ss:$0 sm:$0xff] }
0x121d   : > { %v3659_v42 = vsub.f32 0.0, %v3639_v55  ;;  %v3580_v63 = vmul.f32 %v10660_v29, %v3570_v49  ;;  %v3541_v32 = vmul.f32 %v10683_v14, %v3531_v7  ;;  %v3698_v52 = vmul.f32 %v3688_v30, %v3678_v56 }
0x121e   : > { %v9120_v60 = vpop.eup %9119  ;;  %v3696_v48 = vmul.f32 %v3686_v26, %v3676_v46  ;;  %v3680_v2 = vmul.f32 0.5, %v10589_v40  ;;  %v3681_v53 = vmul.f32 0.5, %v10604_v35  ;;  %v11961_v39 = vmov 0.0  }
0x121f   : > { %v3669_v59 = vsel %vm3649_vm15, %v3639_v55, %v3659_v42  ;;  %v3630_v1 = vmul.f32 %v9120_v60, %v3580_v63  ;;  %v7250_v43 = vadd.f32 -0.28449672, %v3541_v32 }
0x1220   : > { %v3689_v58 = vadd.f32 1.0, %v3669_v59  ;;  %v3704_v62 = vpack.c.bf16 %v3698_v52, %v3696_v48 }
0x1221   : > { %v3640_v29 = vsub.f32 1.0, %v3630_v1  ;;  %v3561_v11 = vmul.f32 %v10683_v14, %v7250_v43 }
0x1222   : > { %v3699_v12 = vmul.f32 %v3689_v58, %v3679_v21 }
0x1223   : > { %v3571_v18 = vadd.f32 0.2548296, %v3561_v11  ;;  %v3660_v50 = vsub.f32 0.0, %v3640_v29 }
0x1224   : > { %v3705_v47 = vpack.c.bf16 %v3699_v12, %v3697_v8  ;;  %v9122_v38 = vpop.eup %9121 }
0x1225   : > { %v3581_v28 = vmul.f32 %v10683_v14, %v3571_v18  ;;  %v3670_v15 = vsel %vm3650_vm5, %v3640_v29, %v3660_v50 }
0x1226   : > { %3884 = vmatprep.mubr.bf16.mxu1 %v3705_v47  ;;  %v3690_v16 = vadd.f32 1.0, %v3670_v15 }
0x1227   : > { %3885 = vmatmul.mubr.bf16.gmra.mxu1 %v3704_v62  ;;  %v3631_v51 = vmul.f32 %v9122_v38, %v3581_v28 }
0x1228   : > { %v3700_v10 = vmul.f32 %v3690_v16, %v3680_v2 }
0x1229   : > { %v3641_v17 = vsub.f32 1.0, %v3631_v51 }
0x122a   : > { %v3706_v36 = vpack.c.bf16 %v3700_v10, %v3700_v10 }
0x122b   : > { %v3661_v5 = vsub.f32 0.0, %v3641_v17 }
0x122d   : > { %v3671_v13 = vsel %vm3651_vm6, %v3641_v17, %v3661_v5 }
0x122e   : > { %v3691_v45 = vadd.f32 1.0, %v3671_v13 }
0x1230   : > { %v3701_v57 = vmul.f32 %v3691_v45, %v3681_v53 }
0x1232   : > { %v3707_v14 = vpack.c.bf16 %v3701_v57, %v3701_v57 }
0x1234   : > { %3892 = vmatprep.mubr.bf16.mxu1 %v3707_v14  ;;  %v8903_v14 = vld [vmem:[%s11926_s8 + $0x58] sm:$0xff]  }
0x1235   : > { %3893 = vmatmul.mubr.bf16.gmra.mxu1 %v3706_v36  ;;  %v8904_v36 = vld [vmem:[%s11924_s6 + $0x138] sm:$0xff]   ;;  %8359 = vmatpush3.bf16.msra.mxu0 %v8903_v14 }
0x1236   : > { %8406 = vmatprep.mubr.msk.bf16.mxu1 %vm9289_vm1, %v11961_v39  ;;  %8399 = vmatpush3.bf16.msra.mxu1 %v8904_v36 }
0x1237   : > { %8360 = vmatprep.subr.bf16.mxu0 %v11961_v39  ;;  %8400 = vmatprep.subr.bf16.mxu1 %v11961_v39 }
0x12d9   : > { %v7823_v3 = vpop.f32.mrf.mxu1 }
0x12db   : > { %v7824_v27 = vpop.f32.mrf.mxu1 }
0x12dc   : > { %v7825_v40 = vadd.f32 %v7824_v27, %v7823_v3  ;;  %v8905_v3 = vld [vmem:[%s11926_s8 + $0x50] sm:$0xff]   ;;  %v8907_v27 = vld [vmem:[%s11926_s8 + $0x48] sm:$0xff]  }
0x12dd   : > { %v7826_v33 = vpop.f32.mrf.mxu1  ;;  %8361 = vmatpush3.bf16.msra.mxu0 %v8905_v3 }
0x12de   : > { %v3879_v41 = vadd.f32 %v7825_v40, %v7252_v25  ;;  %v8908_v40 = vld [vmem:[%s11924_s6 + $0x128] sm:$0xff]   ;;  %8362 = vmatprep.subr.bf16.mxu0 %v11961_v39 }
0x12df   : > { %v7827_v35 = vpop.f32.mrf.mxu1 }
0x12e0   : > { %v10716_v31 = vadd.f32 %v3879_v41, %v10364_v34  ;;  %v7828_v22 = vadd.f32 %v7827_v35, %v7826_v33  ;;  %v8909_v33 = vld [vmem:[%s11926_s8 + $0x40] sm:$0xff]  }
0x12e1   : > { %8363 = vmatpush3.bf16.msra.mxu0 %v8907_v27  ;;  %v8910_v41 = vld [vmem:[%s11924_s6 + $0x120] sm:$0xff]  }
0x12e2   : > { %v3882_v4 = vadd.f32 %v7828_v22, %v7252_v25  ;;  %v3909_v20 = vsel %vm1243_vm0, %v10716_v31, 0.0  ;;  %8364 = vmatprep.subr.bf16.mxu0 %v11961_v39 }
0x12e3   : > { %3910 = vadd.xlane.f32.xlu0 %v3909_v20 }
0x12e4   : > { %v10721_v55 = vadd.f32 %v3882_v4, %v10369_v61 }
0x12e5   : > { %8365 = vmatpush3.bf16.msra.mxu0 %v8909_v33 }
0x12e6   : > { %v3912_v6 = vsel %vm1243_vm0, %v10721_v55, 0.0  ;;  %8378 = vmatprep.subr.bf16.mxu0 %v11961_v39 }
0x12e7   : > { %v7829_v49 = vpop.f32.mrf.mxu1  ;;  %3913 = vadd.xlane.f32.xlu1 %v3912_v6 }
0x12e9   : > { %v7830_v7 = vpop.f32.mrf.mxu1 }
0x12ea   : > { %v7831_v30 = vadd.f32 %v7830_v7, %v7829_v49 }
0x12eb   : > { %v7832_v42 = vpop.f32.mrf.mxu1 }
0x12ec   : > { %v3887_v9 = vadd.f32 %v7831_v30, %v7252_v25 }
0x12ed   : > { %v7833_v34 = vpop.f32.mrf.mxu1 }
0x12ee   : > { %v10726_v63 = vadd.f32 %v3887_v9, %v10374_v44  ;;  %v7834_v32 = vadd.f32 %v7833_v34, %v7832_v42 }
0x12f0   : > { %v3890_v60 = vadd.f32 %v7834_v32, %v7252_v25  ;;  %v3915_v26 = vsel %vm1243_vm0, %v10726_v63, 0.0 }
0x12f1   : > { %3916 = vadd.xlane.f32.xlu0 %v3915_v26  ;;  %v7271_v26 = vld [vmem:[%s11923_s5 + $0x4] ss:$0 sm:$0xff] }
0x12f2   : > { %v10731_v61 = vadd.f32 %v3890_v60, %v10379_v54 }
0x12f4   : > { %v3918_v37 = vsel %vm1243_vm0, %v10731_v61, 0.0 }
0x12f5   : > { %3919 = vadd.xlane.f32.xlu1 %v3918_v37  ;;  %v7835_v56 = vpop.f32.mrf.mxu1 }
0x12f7   : > { %v7836_v59 = vpop.f32.mrf.mxu1 }
0x12f8   : > { %v7837_v21 = vadd.f32 %v7836_v59, %v7835_v56 }
0x12f9   : > { %v7838_v58 = vpop.f32.mrf.mxu1 }
0x12fa   : > { %v3895_v1 = vadd.f32 %v7837_v21, %v7252_v25  ;;  %v8906_v25 = vld [vmem:[%s11924_s6 + $0x130] sm:$0xff]   ;;  %v7272_v58 = vld [vmem:[%s11923_s5 + $0x5] ss:$0 sm:$0xff] }
0x12fb   : > { %v7839_v44 = vpop.f32.mrf.mxu1  ;;  %8401 = vmatpush3.bf16.msra.mxu1 %v8906_v25 }
0x12fc   : > { %v10736_v43 = vadd.f32 %v3895_v1, %v10384_v0  ;;  %8402 = vmatprep.subr.bf16.mxu1 %v11961_v39 }
0x12fe   : > { %v3921_v46 = vsel %vm1243_vm0, %v10736_v43, 0.0 }
0x12ff   : > { %3922 = vadd.xlane.f32.xlu0 %v3921_v46  ;;  %8403 = vmatpush3.bf16.msra.mxu1 %v8908_v40 }
0x1300   : > { %8404 = vmatprep.subr.bf16.mxu1 %v11961_v39 }
0x1303   : > { %8405 = vmatpush3.bf16.msra.mxu1 %v8910_v41 }
0x1304   : > { %8436 = vmatprep.subr.bf16.mxu1 %v11961_v39 }
0x136c   : > { %v3911_v52 = vpop.xlane.xlu0 %3910 }
0x136d   : > { %v3924_v54 = vmul.f32 0.015625, %v3911_v52 }
0x136f   : > { %v10741_v8 = vsub.f32 %v10716_v31, %v3924_v54 }
0x1370   : > { %v3914_v12 = vpop.xlane.xlu1 %3913 }
0x1371   : > { %v3925_v29 = vmul.f32 0.015625, %v3914_v12  ;;  %v3934_v11 = vmul.f32 %v10741_v8, %v10741_v8 }
0x1373   : > { %v10746_v48 = vsub.f32 %v10721_v55, %v3925_v29  ;;  %v3939_v0 = vsel %vm1243_vm0, %v3934_v11, 0.0 }
0x1374   : > { %3940 = vadd.xlane.f32.xlu1 %v3939_v0  ;;  %v8912_v0 = vld [vmem:[%s11924_s6 + $0x110] sm:$0xff]  }
0x1375   : > { %v3935_v47 = vmul.f32 %v10746_v48, %v10746_v48 }
0x1377   : > { %v3942_v18 = vsel %vm1243_vm0, %v3935_v47, 0.0 }
0x1378   : > { %3943 = vadd.xlane.f32.xlu0 %v3942_v18 }
0x137a   : > { %v3917_v62 = vpop.xlane.xlu0 %3916 }
0x137b   : > { %v3926_v50 = vmul.f32 0.015625, %v3917_v62 }
0x137d   : > { %v10753_v28 = vsub.f32 %v10726_v63, %v3926_v50  ;;  %v8913_v50 = vld [vmem:[%s11924_s6 + $0x108] sm:$0xff]  }
0x137e   : > { %v3920_v38 = vpop.xlane.xlu1 %3919 }
0x137f   : > { %v3927_v51 = vmul.f32 0.015625, %v3920_v38  ;;  %v3936_v15 = vmul.f32 %v10753_v28, %v10753_v28 }
0x1381   : > { %v10758_v17 = vsub.f32 %v10731_v61, %v3927_v51  ;;  %v3945_v16 = vsel %vm1243_vm0, %v3936_v15, 0.0 }
0x1382   : > { %3946 = vadd.xlane.f32.xlu1 %v3945_v16  ;;  %v8914_v16 = vld [vmem:[%s11924_s6 + $0x100] sm:$0xff]  }
0x1383   : > { %v3937_v5 = vmul.f32 %v10758_v17, %v10758_v17 }
0x1385   : > { %v3948_v2 = vsel %vm1243_vm0, %v3937_v5, 0.0 }
0x1386   : > { %3949 = vadd.xlane.f32.xlu0 %v3948_v2 }
0x1388   : > { %v3923_v13 = vpop.xlane.xlu0 %3922 }
0x1389   : > { %v3928_v53 = vmul.f32 0.015625, %v3923_v13 }
0x138b   : > { %v10765_v45 = vsub.f32 %v10736_v43, %v3928_v53 }
0x138d   : > { %v3938_v10 = vmul.f32 %v10765_v45, %v10765_v45 }
0x138f   : > { %v3951_v57 = vsel %vm1243_vm0, %v3938_v10, 0.0 }
0x1390   : > { %3952 = vadd.xlane.f32.xlu1 %v3951_v57 }
0x13fd   : > { %v3941_v35 = vpop.xlane.xlu1 %3940 }
0x13fe   : > { %v3954_v22 = vmul.f32 0.015625, %v3941_v35 }
0x1400   : > { %v3959_v4 = vadd.f32 1e-06, %v3954_v22 }
0x1401   : > { %v3944_v20 = vpop.xlane.xlu0 %3943 }
0x1402   : > { %9123 = vrsqrt.f32 %v3959_v4  ;;  %v3955_v6 = vmul.f32 0.015625, %v3944_v20 }
0x1404   : > { %v3960_v49 = vadd.f32 1e-06, %v3955_v6 }
0x1406   : > { %9125 = vrsqrt.f32 %v3960_v49  ;;  %v7282_v49 = vld [vmem:[%s11927_s9 + $0x3] ss:$0 sm:$0xff] }
0x140b   : > { %v3947_v7 = vpop.xlane.xlu1 %3946 }
0x140c   : > { %v3956_v30 = vmul.f32 0.015625, %v3947_v7  ;;  %v7316_v7 = vld [vmem:[%s11925_s7 + $0x9] ss:$0 sm:$0xff] }
0x140e   : > { %v3961_v42 = vadd.f32 1e-06, %v3956_v30 }
0x140f   : > { %v9124_v9 = vpop.eup %9123  ;;  %v3950_v34 = vpop.xlane.xlu0 %3949 }
0x1410   : > { %v3969_v32 = vmul.f32 %v9124_v9, %v10741_v8  ;;  %9127 = vrsqrt.f32 %v3961_v42  ;;  %v3957_v60 = vmul.f32 0.015625, %v3950_v34  ;;  %v8911_v8 = vld [vmem:[%s11924_s6 + $0x118] sm:$0xff]  }
0x1412   : > { %v3962_v37 = vadd.f32 1e-06, %v3957_v60  ;;  %v3980_v59 = vmul.f32 %v7271_v26, %v3969_v32 }
0x1413   : > { %v9126_v56 = vpop.eup %9125 }
0x1414   : > { %v3970_v21 = vmul.f32 %v9126_v56, %v10746_v48  ;;  %9129 = vrsqrt.f32 %v3962_v37  ;;  %v3991_v44 = vadd.f32 %v7272_v58, %v3980_v59 }
0x1416   : > { %v3981_v1 = vmul.f32 %v7271_v26, %v3970_v21 }
0x1418   : > { %v3992_v46 = vadd.f32 %v7272_v58, %v3981_v1 }
0x1419   : > { %v3953_v54 = vpop.xlane.xlu1 %3952 }
0x141a   : > { %v10810_v52 = vpack.c.bf16 %v3992_v46, %v3991_v44  ;;  %v3958_v12 = vmul.f32 0.015625, %v3953_v54 }
0x141c   : > { %8367 = vmatmul.mubr.msk.bf16.vlgmr.msra.gmra.mxu0 %vm1243_vm0, %v10810_v52  ;;  %8407 = vmatmul.mubr.msk.bf16.vlgmr.msra.gmra.mxu1 %vm1243_vm0, %v10810_v52  ;;  %v3963_v11 = vadd.f32 1e-06, %v3958_v12 }
0x141d   : > { %v9128_v29 = vpop.eup %9127  ;;  %8370 = vmatprep.mubr.msk.bf16.mxu0 %vm9289_vm1, %v11961_v39  ;;  %8410 = vmatprep.mubr.msk.bf16.mxu1 %vm9289_vm1, %v11961_v39 }
0x141e   : > { %v3971_v48 = vmul.f32 %v9128_v29, %v10753_v28  ;;  %8379 = vmatpush3.bf16.msra.mxu0 %v8911_v8  ;;  %9131 = vrsqrt.f32 %v3963_v11 }
0x141f   : > { %8380 = vmatprep.subr.bf16.mxu0 %v11961_v39 }
0x1420   : > { %v3982_v18 = vmul.f32 %v7271_v26, %v3971_v48 }
0x1421   : > { %v9130_v47 = vpop.eup %9129 }
0x1422   : > { %v3972_v62 = vmul.f32 %v9130_v47, %v10758_v17  ;;  %8381 = vmatpush3.bf16.msra.mxu0 %v8912_v0  ;;  %v3993_v38 = vadd.f32 %v7272_v58, %v3982_v18 }
0x1423   : > { %8382 = vmatprep.subr.bf16.mxu0 %v11961_v39 }
0x1424   : > { %v3983_v28 = vmul.f32 %v7271_v26, %v3972_v62 }
0x1426   : > { %v3994_v51 = vadd.f32 %v7272_v58, %v3983_v28  ;;  %8383 = vmatpush3.bf16.msra.mxu0 %v8913_v50 }
0x1427   : > { %8384 = vmatprep.subr.bf16.mxu0 %v11961_v39 }
0x1428   : > { %v10834_v15 = vpack.c.bf16 %v3994_v51, %v3993_v38 }
0x142a   : > { %8371 = vmatmul.mubr.msk.bf16.gmra.mxu0 %vm1243_vm0, %v10834_v15  ;;  %8411 = vmatmul.mubr.msk.bf16.gmra.mxu1 %vm1243_vm0, %v10834_v15 }
0x142b   : > { %8374 = vmatprep.mubr.msk.bf16.mxu0 %vm9289_vm1, %v11961_v39  ;;  %8414 = vmatprep.mubr.msk.bf16.mxu1 %vm9289_vm1, %v11961_v39  ;;  %v9132_v17 = vpop.eup %9131 }
0x142c   : > { %8385 = vmatpush3.bf16.msra.mxu0 %v8914_v16  ;;  %v3973_v5 = vmul.f32 %v9132_v17, %v10765_v45 }
0x142d   : > { %8418 = vmatprep.subr.bf16.mxu0 %v11961_v39 }
0x142e   : > { %v3984_v2 = vmul.f32 %v7271_v26, %v3973_v5 }
0x1430   : > { %v3995_v13 = vadd.f32 %v7272_v58, %v3984_v2 }
0x1432   : > { %v10849_v53 = vpack.c.bf16 %v3995_v13, %v3995_v13 }
0x1434   : > { %8375 = vmatmul.mubr.msk.bf16.gmra.mxu0 %vm1243_vm0, %v10849_v53  ;;  %8415 = vmatmul.mubr.msk.bf16.gmra.mxu1 %vm1243_vm0, %v10849_v53 }
0x1435   : > { %8386 = vmatprep.mubr.msk.bf16.mxu0 %vm9289_vm1, %v11961_v39  ;;  %8442 = vmatprep.mubr.msk.bf16.mxu1 %vm9289_vm1, %v11961_v39 }
0x143c   : > { %8387 = vmatmul.mubr.msk.bf16.vlgmr.msra.gmra.mxu0 %vm1243_vm0, %v10810_v52 }
0x143d   : > { %8390 = vmatprep.mubr.msk.bf16.mxu0 %vm9289_vm1, %v11961_v39 }
0x1444   : > { %8391 = vmatmul.mubr.msk.bf16.gmra.mxu0 %vm1243_vm0, %v10834_v15 }
0x1445   : > { %8394 = vmatprep.mubr.msk.bf16.mxu0 %vm9289_vm1, %v11961_v39 }
0x144c   : > { %8395 = vmatmul.mubr.msk.bf16.gmra.mxu0 %vm1243_vm0, %v10849_v53 }
0x144d   : > { %8424 = vmatprep.mubr.msk.bf16.mxu0 %vm9289_vm1, %v11961_v39 }
0x14dc   : > { %v4083_v45 = vpop.f32.mrf.mxu0  ;;  %v4280_v10 = vpop.f32.mrf.mxu1 }
0x14dd   : > { %v4084_v47 = vadd.f32 %v7282_v49, %v4083_v45  ;;  %v4281_v16 = vadd.f32 %v7316_v7, %v4280_v10 }
0x14de   : > { %v8368_v57 = vpop.f32.mrf.mxu0  ;;  %v8408_v14 = vpop.f32.mrf.mxu1 }
0x14df   : > { %v7299_v57 = vld [vmem:[%s11925_s7 + $0x8] ss:$0 sm:$0xff] }
0x14e0   : > { %v4086_v36 = vpop.f32.mrf.mxu0  ;;  %v4283_v3 = vpop.f32.mrf.mxu1 }
0x14e1   : > { %v4087_v29 = vadd.f32 %v7282_v49, %v4086_v36  ;;  %v4284_v28 = vadd.f32 %v7316_v7, %v4283_v3 }
0x14e2   : > { %v8369_v25 = vpop.f32.mrf.mxu0  ;;  %v8409_v27 = vpop.f32.mrf.mxu1 }
0x14e3   : > { %v10888_v62 = vpack.c.bf16 %v4087_v29, %v4084_v47  ;;  %v4305_v5 = vpack.c.bf16 %v4284_v28, %v4281_v16  ;;  %v8915_v27 = vld [vmem:[%s11924_s6 + $0x158] sm:$0xff]  }
0x14e4   : > { %v10960_v29 = vld [vmem:[%s11921_s3 + $0x18] sm:$0xff] }
0x14e5   : > { %v4318_v45 = vsel %vm1640_vm3, %v4305_v5, 0 }
0x14ea   : > { %v4091_v40 = vpop.f32.mrf.mxu0  ;;  %v4288_v33 = vpop.f32.mrf.mxu1 }
0x14eb   : > { %v4092_v46 = vadd.f32 %v7282_v49, %v4091_v40  ;;  %v4289_v12 = vadd.f32 %v7316_v7, %v4288_v33 }
0x14ec   : > { %v8372_v41 = vpop.f32.mrf.mxu0  ;;  %v8412_v35 = vpop.f32.mrf.mxu1 }
0x14ed   : > { %v8916_v35 = vld [vmem:[%s11924_s6 + $0x150] sm:$0xff]  }
0x14ee   : > { %v4094_v22 = vpop.f32.mrf.mxu0  ;;  %v4291_v4 = vpop.f32.mrf.mxu1 }
0x14ef   : > { %v4095_v56 = vadd.f32 %v7282_v49, %v4094_v22  ;;  %v4292_v58 = vadd.f32 %v7316_v7, %v4291_v4 }
0x14f0   : > { %v8373_v20 = vpop.f32.mrf.mxu0  ;;  %v8413_v6 = vpop.f32.mrf.mxu1 }
0x14f1   : > { %v10884_v11 = vpack.c.bf16 %v4095_v56, %v4092_v46  ;;  %v4306_v0 = vpack.c.bf16 %v4292_v58, %v4289_v12  ;;  %v8917_v20 = vld [vmem:[%s11924_s6 + $0x148] sm:$0xff]  }
0x14f3   : > { %v4321_v38 = vsel %vm1640_vm3, %v4306_v0, 0 }
0x14f4   : > { %v4099_v30 = vpop.f32.mrf.mxu0  ;;  %v4296_v42 = vpop.f32.mrf.mxu1 }
0x14f5   : > { %v4100_v9 = vadd.f32 %v7282_v49, %v4099_v30  ;;  %v4297_v34 = vadd.f32 %v7316_v7, %v4296_v42  ;;  %v8918_v49 = vld [vmem:[%s11924_s6 + $0x140] sm:$0xff]  }
0x14f6   : > { %v8376_v32 = vpop.f32.mrf.mxu0  ;;  %v8416_v60 = vpop.f32.mrf.mxu1 }
0x14f7   : > { %v4107_v26 = vpack.c.bf16 %v4100_v9, %v4100_v9  ;;  %v4307_v37 = vpack.c.bf16 %v4297_v34, %v4297_v34  ;;  %v10939_v9 = vld [vmem:[%s11921_s3] sm:$0xff] }
0x14f8   : > { %v4102_v59 = vpop.f32.mrf.mxu0  ;;  %v4299_v21 = vpop.f32.mrf.mxu1 }
0x14f9   : > { %v10878_v1 = vsel %vm1783_vm2, %v4107_v26, 0  ;;  %v4324_v44 = vsel %vm1640_vm3, %v4307_v37, 0  ;;  %v10946_v37 = vld [vmem:[%s11921_s3 + $0x8] sm:$0xff] }
0x14fa   : > { %v8377_v54 = vpop.f32.mrf.mxu0  ;;  %v8417_v8 = vpop.f32.mrf.mxu1  ;;  %8419 = vmatpush3.bf16.xpose.msra.mxu0 %v4324_v44  ;;  %8437 = vmatpush3.bf16.msra.mxu1 %v10878_v1  ;;  %v10953_v44 = vld [vmem:[%s11921_s3 + $0x10] sm:$0xff] }
0x14fb   : > { %8438 = vmatprep.subr.bf16.mxu1 %v11961_v39  ;;  %8420 = vmatprep.subr.bf16.mxu0 %v11961_v39 }
0x14fc   : > { %v4183_v48 = vpop.f32.mrf.mxu0 }
0x14fd   : > { %v4184_v3 = vadd.f32 %v7299_v57, %v4183_v48 }
0x14fe   : > { %v8388_v18 = vpop.f32.mrf.mxu0  ;;  %8439 = vmatpush3.bf16.msra.mxu1 %v10884_v11 }
0x14ff   : > { %8440 = vmatprep.subr.bf16.mxu1 %v11961_v39 }
0x1500   : > { %v4186_v50 = vpop.f32.mrf.mxu0 }
0x1501   : > { %v4187_v36 = vadd.f32 %v7299_v57, %v4186_v50  ;;  %v10967_v50 = vld [vmem:[%s11921_s3 + $0x20] sm:$0xff] }
0x1502   : > { %v8389_v51 = vpop.f32.mrf.mxu0  ;;  %8421 = vmatpush3.bf16.xpose.msra.mxu0 %v4321_v38  ;;  %8441 = vmatpush3.bf16.msra.mxu1 %v10888_v62 }
0x1503   : > { %8422 = vmatprep.subr.bf16.mxu0 %v11961_v39  ;;  %8474 = vmatprep.subr.bf16.mxu1 %v11961_v39  ;;  %v4302_v40 = vpack.c.bf16 %v4187_v36, %v4184_v3 }
0x1504   : > { %v4191_v17 = vpop.f32.mrf.mxu0 }
0x1505   : > { %v4192_v4 = vadd.f32 %v7299_v57, %v4191_v17 }
0x1506   : > { %v8392_v2 = vpop.f32.mrf.mxu0 }
0x1507   : > { %v10974_v2 = vld [vmem:[%s11925_s7 + $0xa] ss:$0 sm:$0xff] }
0x1508   : > { %v4194_v13 = vpop.f32.mrf.mxu0 }
0x1509   : > { %v4195_v22 = vadd.f32 %v7299_v57, %v4194_v13 }
0x150a   : > { %v8393_v14 = vpop.f32.mrf.mxu0  ;;  %8423 = vmatpush3.bf16.xpose.msra.mxu0 %v4318_v45 }
0x150b   : > { %8454 = vmatprep.subr.bf16.mxu0 %v11961_v39  ;;  %v4303_v6 = vpack.c.bf16 %v4195_v22, %v4192_v4 }
0x150c   : > { %v4199_v10 = vpop.f32.mrf.mxu0 }
0x150d   : > { %v4200_v7 = vadd.f32 %v7299_v57, %v4199_v10 }
0x150e   : > { %v8396_v25 = vpop.f32.mrf.mxu0 }
0x150f   : > { %v4304_v30 = vpack.c.bf16 %v4200_v7, %v4200_v7 }
0x1510   : > { %v4202_v33 = vpop.f32.mrf.mxu0 }
0x1511   : > { %8425 = vmatmul.mubr.msk.bf16.vlgmr.msra.gmra.mxu0 %vm1640_vm3, %v4302_v40 }
0x1512   : > { %v8397_v41 = vpop.f32.mrf.mxu0  ;;  %8428 = vmatprep.mubr.msk.bf16.mxu0 %vm9289_vm1, %v11961_v39  ;;  %8455 = vmatpush3.bf16.msra.mxu0 %v8915_v27 }
0x1513   : > { %8456 = vmatprep.subr.bf16.mxu0 %v11961_v39 }
0x1516   : > { %8457 = vmatpush3.bf16.msra.mxu0 %v8916_v35 }
0x1517   : > { %8458 = vmatprep.subr.bf16.mxu0 %v11961_v39 }
0x1519   : > { %8429 = vmatmul.mubr.msk.bf16.gmra.mxu0 %vm1640_vm3, %v4303_v6 }
0x151a   : > { %8432 = vmatprep.mubr.msk.bf16.mxu0 %vm9289_vm1, %v11961_v39  ;;  %8459 = vmatpush3.bf16.msra.mxu0 %v8917_v20 }
0x151b   : > { %8460 = vmatprep.subr.bf16.mxu0 %v11961_v39 }
0x151e   : > { %8461 = vmatpush3.bf16.msra.mxu0 %v8918_v49 }
0x151f   : > { %8494 = vmatprep.subr.bf16.mxu0 %v11961_v39 }
0x1521   : > { %8433 = vmatmul.mubr.msk.bf16.gmra.mxu0 %vm1640_vm3, %v4304_v30 }
0x1522   : > { %8462 = vmatprep.mubr.msk.bf16.mxu0 %vm9289_vm1, %v11961_v39 }
0x1529   : > { %8463 = vmatmul.mubr.msk.bf16.vlgmr.msra.gmra.mxu0 %vm1243_vm0, %v10810_v52 }
0x152a   : > { %8466 = vmatprep.mubr.msk.bf16.mxu0 %vm9289_vm1, %v11961_v39 }
0x1531   : > { %8467 = vmatmul.mubr.msk.bf16.gmra.mxu0 %vm1243_vm0, %v10834_v15 }
0x1532   : > { %8470 = vmatprep.mubr.msk.bf16.mxu0 %vm9289_vm1, %v11961_v39 }
0x1539   : > { %8471 = vmatmul.mubr.msk.bf16.gmra.mxu0 %vm1243_vm0, %v10849_v53 }
0x153a   : > { %8500 = vmatprep.mubr.msk.bf16.mxu0 %vm9289_vm1, %v11961_v39 }
0x15d1   : > { %v4360_v42 = vpop.f32.mrf.mxu0 }
0x15d2   : > { %v4361_v34 = vadd.f32 %v10939_v9, %v4360_v42 }
0x15d3   : > { %v8426_v32 = vpop.f32.mrf.mxu0 }
0x15d4   : > { %v4382_v60 = vsel %vm1715_vm4, %v4361_v34, -inf }
0x15d5   : > { %4383 = vmax.xlane.f32.xlu0 %v4382_v60  ;;  %v4363_v26 = vpop.f32.mrf.mxu0 }
0x15d6   : > { %v4364_v56 = vadd.f32 %v10946_v37, %v4363_v26 }
0x15d7   : > { %v8427_v59 = vpop.f32.mrf.mxu0 }
0x15d8   : > { %v4385_v21 = vsel %vm1715_vm4, %v4364_v56, -inf }
0x15d9   : > { %4386 = vmax.xlane.f32.xlu1 %v4385_v21  ;;  %v4368_v58 = vpop.f32.mrf.mxu0 }
0x15da   : > { %v4369_v46 = vadd.f32 %v10953_v44, %v4368_v58 }
0x15db   : > { %v8430_v54 = vpop.f32.mrf.mxu0 }
0x15dc   : > { %v4388_v8 = vsel %vm1715_vm4, %v4369_v46, -inf }
0x15dd   : > { %4389 = vmax.xlane.f32.xlu0 %v4388_v8  ;;  %v4371_v12 = vpop.f32.mrf.mxu0 }
0x15de   : > { %v4372_v48 = vadd.f32 %v10960_v29, %v4371_v12 }
0x15df   : > { %v8431_v0 = vpop.f32.mrf.mxu0 }
0x15e0   : > { %v4391_v47 = vsel %vm1715_vm4, %v4372_v48, -inf }
0x15e1   : > { %4392 = vmax.xlane.f32.xlu1 %v4391_v47  ;;  %v4376_v18 = vpop.f32.mrf.mxu0 }
0x15e2   : > { %v4377_v28 = vadd.f32 %v10967_v50, %v4376_v18 }
0x15e3   : > { %v8434_v38 = vpop.f32.mrf.mxu0 }
0x15e4   : > { %v4394_v51 = vsel %vm1715_vm4, %v4377_v28, -inf }
0x15e5   : > { %4395 = vmax.xlane.f32.xlu0 %v4394_v51  ;;  %v4379_v16 = vpop.f32.mrf.mxu0 }
0x15e7   : > { %v8435_v17 = vpop.f32.mrf.mxu0 }
0x15e9   : > { %v4593_v5 = vpop.f32.mrf.mxu0 }
0x15ea   : > { %v10977_v57 = vadd.f32 %v10974_v2, %v4593_v5 }
0x15eb   : > { %v8464_v13 = vpop.f32.mrf.mxu0 }
0x15ed   : > { %v4596_v45 = vpop.f32.mrf.mxu0 }
0x15ee   : > { %v10980_v14 = vadd.f32 %v10974_v2, %v4596_v45 }
0x15ef   : > { %v8465_v36 = vpop.f32.mrf.mxu0 }
0x15f0   : > { %v4712_v10 = vpack.c.bf16 %v10980_v14, %v10977_v57  ;;  %v8926_v57 = vld [vmem:[%s11924_s6 + $0x180] sm:$0xff]  }
0x15f1   : > { %v4601_v3 = vpop.f32.mrf.mxu0 }
0x15f2   : > { %v10985_v40 = vadd.f32 %v10974_v2, %v4601_v3 }
0x15f3   : > { %v8468_v25 = vpop.f32.mrf.mxu0 }
0x15f5   : > { %v4604_v27 = vpop.f32.mrf.mxu0 }
0x15f6   : > { %v10988_v33 = vadd.f32 %v10974_v2, %v4604_v27 }
0x15f7   : > { %v8469_v41 = vpop.f32.mrf.mxu0 }
0x15f8   : > { %v4713_v35 = vpack.c.bf16 %v10988_v33, %v10985_v40 }
0x15f9   : > { %v10992_v22 = vpop.f32.mrf.mxu0 }
0x15fa   : > { %v4610_v14 = vadd.f32 %v10974_v2, %v10992_v22 }
0x15fb   : > { %v8472_v4 = vpop.f32.mrf.mxu0 }
0x15fd   : > { %v4612_v20 = vpop.f32.mrf.mxu0 }
0x15fe   : > { %v8919_v20 = vld [vmem:[%s11924_s6 + $0x178] sm:$0xff]  }
0x15ff   : > { %v8473_v6 = vpop.f32.mrf.mxu0 }
0x165e   : > { %v4384_v49 = vpop.xlane.xlu0 %4383 }
0x165f   : > { %v4397_v7 = vsub.f32 %v4361_v34, %v4384_v49 }
0x1661   : > { %v4402_v30 = vmul.f32 1.442695, %v4397_v7  ;;  %v8920_v7 = vld [vmem:[%s11924_s6 + $0x170] sm:$0xff]  }
0x1662   : > { %v4387_v42 = vpop.xlane.xlu1 %4386 }
0x1663   : > { %9133 = vpow2.f32 %v4402_v30  ;;  %v4398_v32 = vsub.f32 %v4364_v56, %v4387_v42 }
0x1665   : > { %v4404_v60 = vmul.f32 1.442695, %v4398_v32 }
0x1666   : > { %v4390_v26 = vpop.xlane.xlu0 %4389 }
0x1667   : > { %9135 = vpow2.f32 %v4404_v60  ;;  %v4399_v59 = vsub.f32 %v4369_v46, %v4390_v26  ;;  %v8921_v60 = vld [vmem:[%s11924_s6 + $0x168] sm:$0xff]  }
0x1669   : > { %v4406_v21 = vmul.f32 1.442695, %v4399_v59 }
0x166a   : > { %v4393_v58 = vpop.xlane.xlu1 %4392 }
0x166b   : > { %9137 = vpow2.f32 %v4406_v21  ;;  %v4400_v54 = vsub.f32 %v4372_v48, %v4393_v58  ;;  %v8922_v21 = vld [vmem:[%s11924_s6 + $0x160] sm:$0xff]  }
0x166d   : > { %v4408_v8 = vmul.f32 1.442695, %v4400_v54 }
0x166e   : > { %v4396_v12 = vpop.xlane.xlu0 %4395 }
0x166f   : > { %9139 = vpow2.f32 %v4408_v8  ;;  %v4401_v0 = vsub.f32 %v4377_v28, %v4396_v12 }
0x1670   : > { %v9134_v47 = vpop.eup %9133 }
0x1671   : > { %v4410_v18 = vmul.f32 1.442695, %v4401_v0  ;;  %v4412_v34 = vsel %vm1715_vm4, %v9134_v47, 0.0 }
0x1672   : > { %4413 = vadd.xlane.f32.xlu1 %v4412_v34 }
0x1673   : > { %9141 = vpow2.f32 %v4410_v18 }
0x1674   : > { %v9136_v38 = vpop.eup %9135 }
0x1675   : > { %v4415_v56 = vsel %vm1715_vm4, %v9136_v38, 0.0 }
0x1676   : > { %4416 = vadd.xlane.f32.xlu0 %v4415_v56 }
0x1678   : > { %v9138_v51 = vpop.eup %9137 }
0x1679   : > { %v4418_v46 = vsel %vm1715_vm4, %v9138_v51, 0.0 }
0x167a   : > { %4419 = vadd.xlane.f32.xlu1 %v4418_v46 }
0x167c   : > { %v9140_v16 = vpop.eup %9139 }
0x167d   : > { %v4421_v48 = vsel %vm1715_vm4, %v9140_v16, 0.0 }
0x167e   : > { %4422 = vadd.xlane.f32.xlu0 %v4421_v48 }
0x1680   : > { %v9142_v17 = vpop.eup %9141 }
0x1681   : > { %v4424_v28 = vsel %vm1715_vm4, %v9142_v17, 0.0 }
0x1682   : > { %4425 = vadd.xlane.f32.xlu1 %v4424_v28 }
0x16fb   : > { %v4414_v5 = vpop.xlane.xlu1 %4413 }
0x16fc   : > { %9143 = vrcp.f32 %v4414_v5 }
0x16ff   : > { %v4417_v13 = vpop.xlane.xlu0 %4416 }
0x1700   : > { %9145 = vrcp.f32 %v4417_v13 }
0x1703   : > { %v4420_v45 = vpop.xlane.xlu1 %4419 }
0x1704   : > { %9147 = vrcp.f32 %v4420_v45 }
0x1707   : > { %v4423_v36 = vpop.xlane.xlu0 %4422 }
0x1708   : > { %9149 = vrcp.f32 %v4423_v36 }
0x1709   : > { %v9144_v3 = vpop.eup %9143 }
0x170a   : > { %v4428_v41 = vmul.f32 %v9144_v3, %v9134_v47 }
0x170b   : > { %v4426_v25 = vpop.xlane.xlu1 %4425 }
0x170c   : > { %9151 = vrcp.f32 %v4426_v25 }
0x170d   : > { %v9146_v27 = vpop.eup %9145 }
0x170e   : > { %v4430_v4 = vmul.f32 %v9146_v27, %v9136_v38  ;;  %v7356_v27 = vld [vmem:[%s11925_s7 + $0xb] ss:$0 sm:$0xff] }
0x1710   : > { %v4437_v6 = vpack.c.bf16 %v4430_v4, %v4428_v41 }
0x1711   : > { %v9148_v49 = vpop.eup %9147 }
0x1712   : > { %8443 = vmatmul.mubr.msk.bf16.vlgmr.msra.gmra.mxu1 %vm1715_vm4, %v4437_v6  ;;  %v4432_v42 = vmul.f32 %v9148_v49, %v9138_v51 }
0x1713   : > { %8446 = vmatprep.mubr.msk.bf16.mxu1 %vm9289_vm1, %v11961_v39  ;;  %8475 = vmatpush3.bf16.msra.mxu1 %v8919_v20 }
0x1714   : > { %8476 = vmatprep.subr.bf16.mxu1 %v11961_v39 }
0x1715   : > { %v9150_v30 = vpop.eup %9149 }
0x1716   : > { %v4434_v32 = vmul.f32 %v9150_v30, %v9140_v16 }
0x1717   : > { %8477 = vmatpush3.bf16.msra.mxu1 %v8920_v7 }
0x1718   : > { %v4438_v26 = vpack.c.bf16 %v4434_v32, %v4432_v42  ;;  %8478 = vmatprep.subr.bf16.mxu1 %v11961_v39 }
0x1719   : > { %v9152_v59 = vpop.eup %9151 }
0x171a   : > { %8447 = vmatmul.mubr.msk.bf16.gmra.mxu1 %vm1715_vm4, %v4438_v26  ;;  %v4436_v58 = vmul.f32 %v9152_v59, %v9142_v17 }
0x171b   : > { %8450 = vmatprep.mubr.msk.bf16.mxu1 %vm9289_vm1, %v11961_v39  ;;  %8479 = vmatpush3.bf16.msra.mxu1 %v8921_v60 }
0x171c   : > { %8480 = vmatprep.subr.bf16.mxu1 %v11961_v39  ;;  %v4439_v54 = vpack.c.bf16 %v4436_v58, %v4436_v58 }
0x171f   : > { %8481 = vmatpush3.bf16.msra.mxu1 %v8922_v21 }
0x1720   : > { %8512 = vmatprep.subr.bf16.mxu1 %v11961_v39 }
0x1722   : > { %8451 = vmatmul.mubr.msk.bf16.gmra.mxu1 %vm1715_vm4, %v4439_v54 }
0x1723   : > { %8482 = vmatprep.mubr.msk.bf16.mxu1 %vm9289_vm1, %v11961_v39 }
0x172a   : > { %8483 = vmatmul.mubr.msk.bf16.vlgmr.msra.gmra.mxu1 %vm1243_vm0, %v10810_v52 }
0x172b   : > { %8513 = vmatpush3.bf16.msra.mxu1 %v10878_v1  ;;  %8486 = vmatprep.mubr.msk.bf16.mxu1 %vm9289_vm1, %v11961_v39 }
0x172c   : > { %8514 = vmatprep.subr.bf16.mxu1 %v11961_v39 }
0x172f   : > { %8515 = vmatpush3.bf16.msra.mxu1 %v10884_v11 }
0x1730   : > { %8516 = vmatprep.subr.bf16.mxu1 %v11961_v39 }
0x1732   : > { %8487 = vmatmul.mubr.msk.bf16.gmra.mxu1 %vm1243_vm0, %v10834_v15 }
0x1733   : > { %8517 = vmatpush3.bf16.msra.mxu1 %v10888_v62  ;;  %8490 = vmatprep.mubr.msk.bf16.mxu1 %vm9289_vm1, %v11961_v39 }
0x1734   : > { %8550 = vmatprep.subr.bf16.mxu1 %v11961_v39 }
0x173a   : > { %8491 = vmatmul.mubr.msk.bf16.gmra.mxu1 %vm1243_vm0, %v10849_v53 }
0x173b   : > { %8518 = vmatprep.mubr.msk.bf16.mxu1 %vm9289_vm1, %v11961_v39 }
0x17d2   : > { %v11042_v8 = vpop.f32.mrf.mxu1 }
0x17d4   : > { %v8444_v12 = vpop.f32.mrf.mxu1 }
0x17d5   : > { %v8923_v12 = vld [vmem:[%s11924_s6 + $0x198] sm:$0xff]  }
0x17d6   : > { %v11044_v0 = vpop.f32.mrf.mxu1 }
0x17d8   : > { %v8445_v47 = vpop.f32.mrf.mxu1 }
0x17d9   : > { %v8924_v47 = vld [vmem:[%s11924_s6 + $0x190] sm:$0xff]  }
0x17da   : > { %v11046_v18 = vpop.f32.mrf.mxu1 }
0x17dc   : > { %v8448_v34 = vpop.f32.mrf.mxu1 }
0x17dd   : > { %v8925_v34 = vld [vmem:[%s11924_s6 + $0x188] sm:$0xff]  }
0x17de   : > { %v11048_v38 = vpop.f32.mrf.mxu1 }
0x17e0   : > { %v8449_v56 = vpop.f32.mrf.mxu1 }
0x17e2   : > { %v11050_v51 = vpop.f32.mrf.mxu1 }
0x17e4   : > { %v8452_v46 = vpop.f32.mrf.mxu1 }
0x17e6   : > { %v4505_v16 = vpop.f32.mrf.mxu1 }
0x17e8   : > { %v8453_v48 = vpop.f32.mrf.mxu1 }
0x17ea   : > { %v4690_v17 = vpop.f32.mrf.mxu1 }
0x17eb   : > { %v4691_v21 = vadd.f32 %v7356_v27, %v4690_v17 }
0x17ec   : > { %v8484_v28 = vpop.f32.mrf.mxu1 }
0x17ee   : > { %v4693_v5 = vpop.f32.mrf.mxu1 }
0x17ef   : > { %v4694_v26 = vadd.f32 %v7356_v27, %v4693_v5 }
0x17f0   : > { %v8485_v13 = vpop.f32.mrf.mxu1 }
0x17f1   : > { %v4715_v58 = vpack.c.bf16 %v4694_v26, %v4691_v21 }
0x17f2   : > { %v4698_v45 = vpop.f32.mrf.mxu1 }
0x17f3   : > { %v4699_v32 = vadd.f32 %v7356_v27, %v4698_v45  ;;  %v4728_v54 = vsel %vm1640_vm3, %v4715_v58, 0 }
0x17f4   : > { %v8488_v36 = vpop.f32.mrf.mxu1 }
0x17f6   : > { %v4701_v3 = vpop.f32.mrf.mxu1 }
0x17f7   : > { %v4702_v7 = vadd.f32 %v7356_v27, %v4701_v3 }
0x17f8   : > { %v8489_v25 = vpop.f32.mrf.mxu1 }
0x17f9   : > { %v4716_v60 = vpack.c.bf16 %v4702_v7, %v4699_v32  ;;  %v11119_v7 = vld [vmem:[%s11925_s7 + $0xc] ss:$0 sm:$0xff] }
0x17fa   : > { %v4706_v41 = vpop.f32.mrf.mxu1 }
0x17fb   : > { %v4707_v4 = vadd.f32 %v7356_v27, %v4706_v41  ;;  %v4731_v59 = vsel %vm1640_vm3, %v4716_v60, 0 }
0x17fc   : > { %v8492_v20 = vpop.f32.mrf.mxu1 }
0x17fd   : > { %v4717_v6 = vpack.c.bf16 %v4707_v4, %v4707_v4 }
0x17fe   : > { %v4709_v49 = vpop.f32.mrf.mxu1 }
0x17ff   : > { %v4734_v30 = vsel %vm1640_vm3, %v4717_v6, 0 }
0x1800   : > { %v8493_v42 = vpop.f32.mrf.mxu1  ;;  %8495 = vmatpush3.bf16.xpose.msra.mxu0 %v4734_v30 }
0x1801   : > { %8496 = vmatprep.subr.bf16.mxu0 %v11961_v39 }
0x1808   : > { %8497 = vmatpush3.bf16.xpose.msra.mxu0 %v4731_v59 }
0x1809   : > { %8498 = vmatprep.subr.bf16.mxu0 %v11961_v39 }
0x1810   : > { %8499 = vmatpush3.bf16.xpose.msra.mxu0 %v4728_v54 }
0x1811   : > { %8530 = vmatprep.subr.bf16.mxu0 %v11961_v39 }
0x1817   : > { %8501 = vmatmul.mubr.msk.bf16.vlgmr.msra.gmra.mxu0 %vm1640_vm3, %v4712_v10  ;;  %v4714_v10 = vpack.c.bf16 %v4610_v14, %v4610_v14 }
0x1818   : > { %8504 = vmatprep.mubr.msk.bf16.mxu0 %vm9289_vm1, %v11961_v39  ;;  %8531 = vmatpush3.bf16.msra.mxu0 %v8923_v12 }
0x1819   : > { %8532 = vmatprep.subr.bf16.mxu0 %v11961_v39 }
0x181c   : > { %8533 = vmatpush3.bf16.msra.mxu0 %v8924_v47 }
0x181d   : > { %8534 = vmatprep.subr.bf16.mxu0 %v11961_v39 }
0x181f   : > { %8505 = vmatmul.mubr.msk.bf16.gmra.mxu0 %vm1640_vm3, %v4713_v35 }
0x1820   : > { %8508 = vmatprep.mubr.msk.bf16.mxu0 %vm9289_vm1, %v11961_v39  ;;  %8535 = vmatpush3.bf16.msra.mxu0 %v8925_v34 }
0x1821   : > { %8536 = vmatprep.subr.bf16.mxu0 %v11961_v39 }
0x1824   : > { %8537 = vmatpush3.bf16.msra.mxu0 %v8926_v57 }
0x1825   : > { %8570 = vmatprep.subr.bf16.mxu0 %v11961_v39 }
0x1827   : > { %8509 = vmatmul.mubr.msk.bf16.gmra.mxu0 %vm1640_vm3, %v4714_v10 }
0x1828   : > { %8538 = vmatprep.mubr.msk.bf16.mxu0 %vm9289_vm1, %v11961_v39 }
0x182f   : > { %8539 = vmatmul.mubr.msk.bf16.vlgmr.msra.gmra.mxu0 %vm1243_vm0, %v10810_v52 }
0x1830   : > { %8542 = vmatprep.mubr.msk.bf16.mxu0 %vm9289_vm1, %v11961_v39 }
0x1837   : > { %8543 = vmatmul.mubr.msk.bf16.gmra.mxu0 %vm1243_vm0, %v10834_v15 }
0x1838   : > { %8546 = vmatprep.mubr.msk.bf16.mxu0 %vm9289_vm1, %v11961_v39 }
0x183f   : > { %8547 = vmatmul.mubr.msk.bf16.gmra.mxu0 %vm1243_vm0, %v10849_v53 }
0x1840   : > { %8576 = vmatprep.mubr.msk.bf16.mxu0 %vm9289_vm1, %v11961_v39 }
0x18d7   : > { %v4770_v2 = vpop.f32.mrf.mxu0 }
0x18d8   : > { %v4771_v40 = vadd.f32 %v10939_v9, %v4770_v2 }
0x18d9   : > { %v8502_v33 = vpop.f32.mrf.mxu0 }
0x18da   : > { %v4792_v35 = vsel %vm1715_vm4, %v4771_v40, -inf }
0x18db   : > { %4793 = vmax.xlane.f32.xlu0 %v4792_v35  ;;  %v4773_v22 = vpop.f32.mrf.mxu0 }
0x18dc   : > { %v4774_v56 = vadd.f32 %v10946_v37, %v4773_v22 }
0x18dd   : > { %v8503_v46 = vpop.f32.mrf.mxu0 }
0x18de   : > { %v4795_v16 = vsel %vm1715_vm4, %v4774_v56, -inf }
0x18df   : > { %4796 = vmax.xlane.f32.xlu1 %v4795_v16  ;;  %v4778_v48 = vpop.f32.mrf.mxu0 }
0x18e0   : > { %v4779_v17 = vadd.f32 %v10953_v44, %v4778_v48 }
0x18e1   : > { %v8506_v28 = vpop.f32.mrf.mxu0 }
0x18e2   : > { %v4798_v5 = vsel %vm1715_vm4, %v4779_v17, -inf }
0x18e3   : > { %4799 = vmax.xlane.f32.xlu0 %v4798_v5  ;;  %v4781_v13 = vpop.f32.mrf.mxu0 }
0x18e4   : > { %v4782_v45 = vadd.f32 %v10960_v29, %v4781_v13 }
0x18e5   : > { %v8507_v36 = vpop.f32.mrf.mxu0 }
0x18e6   : > { %v4801_v3 = vsel %vm1715_vm4, %v4782_v45, -inf }
0x18e7   : > { %4802 = vmax.xlane.f32.xlu1 %v4801_v3  ;;  %v4786_v25 = vpop.f32.mrf.mxu0 }
0x18e8   : > { %v4787_v27 = vadd.f32 %v10967_v50, %v4786_v25 }
0x18e9   : > { %v8510_v41 = vpop.f32.mrf.mxu0 }
0x18ea   : > { %v4804_v4 = vsel %vm1715_vm4, %v4787_v27, -inf }
0x18eb   : > { %4805 = vmax.xlane.f32.xlu0 %v4804_v4  ;;  %v4789_v20 = vpop.f32.mrf.mxu0 }
0x18ed   : > { %v8511_v6 = vpop.f32.mrf.mxu0 }
0x18ef   : > { %v5000_v49 = vpop.f32.mrf.mxu0 }
0x18f0   : > { %v11122_v32 = vadd.f32 %v11119_v7, %v5000_v49 }
0x18f1   : > { %v8540_v30 = vpop.f32.mrf.mxu0 }
0x18f3   : > { %v5003_v42 = vpop.f32.mrf.mxu0 }
0x18f4   : > { %v11125_v60 = vadd.f32 %v11119_v7, %v5003_v42 }
0x18f5   : > { %v8541_v26 = vpop.f32.mrf.mxu0 }
0x18f6   : > { %v5119_v59 = vpack.c.bf16 %v11125_v60, %v11122_v32  ;;  %v8934_v32 = vld [vmem:[%s11924_s6 + $0x1c0] sm:$0xff]  }
0x18f7   : > { %v5008_v21 = vpop.f32.mrf.mxu0 }
0x18f8   : > { %v11130_v12 = vadd.f32 %v11119_v7, %v5008_v21 }
0x18f9   : > { %v8544_v58 = vpop.f32.mrf.mxu0 }
0x18fb   : > { %v5011_v54 = vpop.f32.mrf.mxu0 }
0x18fc   : > { %v11133_v47 = vadd.f32 %v11119_v7, %v5011_v54 }
0x18fd   : > { %v8545_v34 = vpop.f32.mrf.mxu0 }
0x18fe   : > { %v5120_v57 = vpack.c.bf16 %v11133_v47, %v11130_v12 }
0x18ff   : > { %v11137_v14 = vpop.f32.mrf.mxu0 }
0x1900   : > { %v5017_v60 = vadd.f32 %v11119_v7, %v11137_v14 }
0x1901   : > { %v8548_v10 = vpop.f32.mrf.mxu0 }
0x1903   : > { %v5019_v2 = vpop.f32.mrf.mxu0 }
0x1905   : > { %v8549_v33 = vpop.f32.mrf.mxu0 }
0x1964   : > { %v4794_v35 = vpop.xlane.xlu0 %4793 }
0x1965   : > { %v4807_v22 = vsub.f32 %v4771_v40, %v4794_v35 }
0x1967   : > { %v4812_v46 = vmul.f32 1.442695, %v4807_v22 }
0x1968   : > { %v4797_v16 = vpop.xlane.xlu1 %4796 }
0x1969   : > { %9153 = vpow2.f32 %v4812_v46  ;;  %v4808_v48 = vsub.f32 %v4774_v56, %v4797_v16  ;;  %v8927_v16 = vld [vmem:[%s11924_s6 + $0x1b8] sm:$0xff]  }
0x196b   : > { %v4814_v28 = vmul.f32 1.442695, %v4808_v48 }
0x196c   : > { %v4800_v5 = vpop.xlane.xlu0 %4799 }
0x196d   : > { %9155 = vpow2.f32 %v4814_v28  ;;  %v4809_v13 = vsub.f32 %v4779_v17, %v4800_v5  ;;  %v8928_v5 = vld [vmem:[%s11924_s6 + $0x1b0] sm:$0xff]  }
0x196f   : > { %v4816_v36 = vmul.f32 1.442695, %v4809_v13 }
0x1970   : > { %v4803_v3 = vpop.xlane.xlu1 %4802 }
0x1971   : > { %9157 = vpow2.f32 %v4816_v36  ;;  %v4810_v25 = vsub.f32 %v4782_v45, %v4803_v3 }
0x1973   : > { %v4818_v41 = vmul.f32 1.442695, %v4810_v25  ;;  %v8929_v25 = vld [vmem:[%s11924_s6 + $0x1a8] sm:$0xff]  }
0x1974   : > { %v4806_v4 = vpop.xlane.xlu0 %4805 }
0x1975   : > { %9159 = vpow2.f32 %v4818_v41  ;;  %v4811_v20 = vsub.f32 %v4787_v27, %v4806_v4 }
0x1976   : > { %v9154_v6 = vpop.eup %9153 }
0x1977   : > { %v4820_v49 = vmul.f32 1.442695, %v4811_v20  ;;  %v4822_v40 = vsel %vm1715_vm4, %v9154_v6, 0.0  ;;  %v8930_v20 = vld [vmem:[%s11924_s6 + $0x1a0] sm:$0xff]  }
0x1978   : > { %4823 = vadd.xlane.f32.xlu1 %v4822_v40 }
0x1979   : > { %9161 = vpow2.f32 %v4820_v49 }
0x197a   : > { %v9156_v30 = vpop.eup %9155 }
0x197b   : > { %v4825_v56 = vsel %vm1715_vm4, %v9156_v30, 0.0 }
0x197c   : > { %4826 = vadd.xlane.f32.xlu0 %v4825_v56 }
0x197e   : > { %v9158_v42 = vpop.eup %9157 }
0x197f   : > { %v4828_v17 = vsel %vm1715_vm4, %v9158_v42, 0.0 }
0x1980   : > { %4829 = vadd.xlane.f32.xlu1 %v4828_v17 }
0x1982   : > { %v9160_v26 = vpop.eup %9159 }
0x1983   : > { %v4831_v45 = vsel %vm1715_vm4, %v9160_v26, 0.0 }
0x1984   : > { %4832 = vadd.xlane.f32.xlu0 %v4831_v45  ;;  %v4509_v45 = vsel %vm1844_vm7, %v11044_v0, 0.0  ;;  %v4511_v0 = vsel %vm1844_vm7, %v11048_v38, 0.0 }
0x1986   : > { %v9162_v21 = vpop.eup %9161 }
0x1987   : > { %v4834_v27 = vsel %vm1715_vm4, %v9162_v21, 0.0 }
0x1988   : > { %4835 = vadd.xlane.f32.xlu1 %v4834_v27 }
0x1a01   : > { %v4824_v58 = vpop.xlane.xlu1 %4823 }
0x1a02   : > { %9163 = vrcp.f32 %v4824_v58 }
0x1a05   : > { %v4827_v54 = vpop.xlane.xlu0 %4826 }
0x1a06   : > { %9165 = vrcp.f32 %v4827_v54 }
0x1a09   : > { %v4830_v34 = vpop.xlane.xlu1 %4829 }
0x1a0a   : > { %9167 = vrcp.f32 %v4830_v34 }
0x1a0d   : > { %v4833_v10 = vpop.xlane.xlu0 %4832 }
0x1a0e   : > { %9169 = vrcp.f32 %v4833_v10 }
0x1a0f   : > { %v9164_v2 = vpop.eup %9163 }
0x1a10   : > { %v4838_v22 = vmul.f32 %v9164_v2, %v9154_v6 }
0x1a11   : > { %v4836_v33 = vpop.xlane.xlu1 %4835 }
0x1a12   : > { %9171 = vrcp.f32 %v4836_v33 }
0x1a13   : > { %v9166_v35 = vpop.eup %9165 }
0x1a14   : > { %v4840_v46 = vmul.f32 %v9166_v35, %v9156_v30  ;;  %v4508_v30 = vsel %vm1844_vm7, %v11042_v8, 0.0  ;;  %v4510_v8 = vsel %vm1844_vm7, %v11046_v18, 0.0  ;;  %v4512_v18 = vsel %vm1844_vm7, %v11050_v51, 0.0 }
0x1a16   : > { %v4847_v48 = vpack.c.bf16 %v4840_v46, %v4838_v22 }
0x1a17   : > { %v9168_v28 = vpop.eup %9167 }
0x1a18   : > { %8519 = vmatmul.mubr.msk.bf16.vlgmr.msra.gmra.mxu1 %vm1715_vm4, %v4847_v48  ;;  %v4842_v36 = vmul.f32 %v9168_v28, %v9158_v42 }
0x1a19   : > { %8522 = vmatprep.mubr.msk.bf16.mxu1 %vm9289_vm1, %v11961_v39  ;;  %8551 = vmatpush3.bf16.msra.mxu1 %v8927_v16 }
0x1a1a   : > { %8552 = vmatprep.subr.bf16.mxu1 %v11961_v39 }
0x1a1b   : > { %v9170_v13 = vpop.eup %9169 }
0x1a1c   : > { %v4844_v3 = vmul.f32 %v9170_v13, %v9160_v26 }
0x1a1d   : > { %8553 = vmatpush3.bf16.msra.mxu1 %v8928_v5 }
0x1a1e   : > { %v4848_v41 = vpack.c.bf16 %v4844_v3, %v4842_v36  ;;  %8554 = vmatprep.subr.bf16.mxu1 %v11961_v39 }
0x1a1f   : > { %v9172_v4 = vpop.eup %9171 }
0x1a20   : > { %8523 = vmatmul.mubr.msk.bf16.gmra.mxu1 %vm1715_vm4, %v4848_v41  ;;  %v4846_v6 = vmul.f32 %v9172_v4, %v9162_v21 }
0x1a21   : > { %8526 = vmatprep.mubr.msk.bf16.mxu1 %vm9289_vm1, %v11961_v39  ;;  %8555 = vmatpush3.bf16.msra.mxu1 %v8929_v25 }
0x1a22   : > { %8556 = vmatprep.subr.bf16.mxu1 %v11961_v39  ;;  %v4849_v49 = vpack.c.bf16 %v4846_v6, %v4846_v6 }
0x1a25   : > { %8557 = vmatpush3.bf16.msra.mxu1 %v8930_v20 }
0x1a26   : > { %8588 = vmatprep.subr.bf16.mxu1 %v11961_v39 }
0x1a28   : > { %8527 = vmatmul.mubr.msk.bf16.gmra.mxu1 %vm1715_vm4, %v4849_v49 }
0x1a29   : > { %8558 = vmatprep.mubr.msk.bf16.mxu1 %vm9289_vm1, %v11961_v39 }
0x1a30   : > { %8559 = vmatmul.mubr.msk.bf16.vlgmr.msra.gmra.mxu1 %vm1243_vm0, %v10810_v52 }
0x1a31   : > { %8589 = vmatpush3.bf16.msra.mxu1 %v10878_v1  ;;  %8562 = vmatprep.mubr.msk.bf16.mxu1 %vm9289_vm1, %v11961_v39 }
0x1a32   : > { %8590 = vmatprep.subr.bf16.mxu1 %v11961_v39 }
0x1a35   : > { %8591 = vmatpush3.bf16.msra.mxu1 %v10884_v11 }
0x1a36   : > { %8592 = vmatprep.subr.bf16.mxu1 %v11961_v39 }
0x1a38   : > { %8563 = vmatmul.mubr.msk.bf16.gmra.mxu1 %vm1243_vm0, %v10834_v15 }
0x1a39   : > { %8593 = vmatpush3.bf16.msra.mxu1 %v10888_v62  ;;  %8566 = vmatprep.mubr.msk.bf16.mxu1 %vm9289_vm1, %v11961_v39 }
0x1a3a   : > { %8626 = vmatprep.subr.bf16.mxu1 %v11961_v39 }
0x1a40   : > { %8567 = vmatmul.mubr.msk.bf16.gmra.mxu1 %vm1243_vm0, %v10849_v53 }
0x1a41   : > { %8594 = vmatprep.mubr.msk.bf16.mxu1 %vm9289_vm1, %v11961_v39 }
0x1ad8   : > { %v4893_v40 = vpop.f32.mrf.mxu1 }
0x1ad9   : > { %v4915_v56 = vsel %vm10055_vm8, %v4893_v40, 0.0 }
0x1ada   : > { %v11192_v42 = vadd.f32 %v4915_v56, %v4508_v30  ;;  %v8520_v17 = vpop.f32.mrf.mxu1 }
0x1adc   : > { %v4896_v26 = vpop.f32.mrf.mxu1 }
0x1add   : > { %v4916_v21 = vsel %vm10055_vm8, %v4896_v26, 0.0 }
0x1ade   : > { %v11199_v27 = vadd.f32 %v4916_v21, %v4509_v45  ;;  %v8521_v58 = vpop.f32.mrf.mxu1 }
0x1ae0   : > { %v4901_v54 = vpop.f32.mrf.mxu1 }
0x1ae1   : > { %v4917_v34 = vsel %vm10055_vm8, %v4901_v54, 0.0 }
0x1ae2   : > { %v11206_v10 = vadd.f32 %v4917_v34, %v4510_v8  ;;  %v8524_v2 = vpop.f32.mrf.mxu1 }
0x1ae4   : > { %v4904_v33 = vpop.f32.mrf.mxu1 }
0x1ae5   : > { %v4918_v35 = vsel %vm10055_vm8, %v4904_v33, 0.0 }
0x1ae6   : > { %v11213_v22 = vadd.f32 %v4918_v35, %v4511_v0  ;;  %v8525_v46 = vpop.f32.mrf.mxu1  ;;  %v8931_v0 = vld [vmem:[%s11924_s6 + $0x1d8] sm:$0xff]   ;;  %v8932_v35 = vld [vmem:[%s11924_s6 + $0x1d0] sm:$0xff]  }
0x1ae7   : > { %v8933_v46 = vld [vmem:[%s11924_s6 + $0x1c8] sm:$0xff]  }
0x1ae8   : > { %v4909_v16 = vpop.f32.mrf.mxu1 }
0x1ae9   : > { %v4919_v48 = vsel %vm10055_vm8, %v4909_v16, 0.0 }
0x1aea   : > { %v11220_v28 = vadd.f32 %v4919_v48, %v4512_v18  ;;  %v8528_v5 = vpop.f32.mrf.mxu1 }
0x1aec   : > { %v4912_v13 = vpop.f32.mrf.mxu1 }
0x1aee   : > { %v8529_v36 = vpop.f32.mrf.mxu1 }
0x1af0   : > { %v5097_v38 = vpop.f32.mrf.mxu1 }
0x1af1   : > { %v5098_v34 = vadd.f32 %v7396_v23, %v5097_v38 }
0x1af2   : > { %v8560_v3 = vpop.f32.mrf.mxu1 }
0x1af4   : > { %v5100_v25 = vpop.f32.mrf.mxu1 }
0x1af5   : > { %v5101_v54 = vadd.f32 %v7396_v23, %v5100_v25 }
0x1af6   : > { %v8561_v41 = vpop.f32.mrf.mxu1 }
0x1af7   : > { %v5122_v2 = vpack.c.bf16 %v5101_v54, %v5098_v34 }
0x1af8   : > { %v5105_v4 = vpop.f32.mrf.mxu1 }
0x1af9   : > { %v5106_v21 = vadd.f32 %v7396_v23, %v5105_v4  ;;  %v5135_v33 = vsel %vm1640_vm3, %v5122_v2, 0 }
0x1afa   : > { %v8564_v20 = vpop.f32.mrf.mxu1 }
0x1afc   : > { %v5108_v6 = vpop.f32.mrf.mxu1 }
0x1afd   : > { %v5109_v17 = vadd.f32 %v7396_v23, %v5108_v6 }
0x1afe   : > { %v8565_v49 = vpop.f32.mrf.mxu1 }
0x1aff   : > { %v5123_v58 = vpack.c.bf16 %v5109_v17, %v5106_v21 }
0x1b00   : > { %v5113_v51 = vpop.f32.mrf.mxu1 }
0x1b01   : > { %v5114_v24 = vadd.f32 %v7396_v23, %v5113_v51  ;;  %v5138_v8 = vsel %vm1640_vm3, %v5123_v58, 0  ;;  %v11289_v51 = vld [vmem:[%s11925_s7 + $0xe] ss:$0 sm:$0xff] }
0x1b02   : > { %v8568_v40 = vpop.f32.mrf.mxu1 }
0x1b03   : > { %v5124_v30 = vpack.c.bf16 %v5114_v24, %v5114_v24 }
0x1b04   : > { %v5116_v56 = vpop.f32.mrf.mxu1 }
0x1b05   : > { %v5141_v26 = vsel %vm1640_vm3, %v5124_v30, 0 }
0x1b06   : > { %v8569_v45 = vpop.f32.mrf.mxu1  ;;  %8571 = vmatpush3.bf16.xpose.msra.mxu0 %v5141_v26 }
0x1b07   : > { %8572 = vmatprep.subr.bf16.mxu0 %v11961_v39 }
0x1b0e   : > { %8573 = vmatpush3.bf16.xpose.msra.mxu0 %v5138_v8 }
0x1b0f   : > { %8574 = vmatprep.subr.bf16.mxu0 %v11961_v39 }
0x1b16   : > { %8575 = vmatpush3.bf16.xpose.msra.mxu0 %v5135_v33 }
0x1b17   : > { %8606 = vmatprep.subr.bf16.mxu0 %v11961_v39 }
0x1b1d   : > { %8577 = vmatmul.mubr.msk.bf16.vlgmr.msra.gmra.mxu0 %vm1640_vm3, %v5119_v59  ;;  %v5121_v59 = vpack.c.bf16 %v5017_v60, %v5017_v60 }
0x1b1e   : > { %8580 = vmatprep.mubr.msk.bf16.mxu0 %vm9289_vm1, %v11961_v39  ;;  %8607 = vmatpush3.bf16.msra.mxu0 %v8931_v0 }
0x1b1f   : > { %8608 = vmatprep.subr.bf16.mxu0 %v11961_v39 }
0x1b22   : > { %8609 = vmatpush3.bf16.msra.mxu0 %v8932_v35 }
0x1b23   : > { %8610 = vmatprep.subr.bf16.mxu0 %v11961_v39 }
0x1b25   : > { %8581 = vmatmul.mubr.msk.bf16.gmra.mxu0 %vm1640_vm3, %v5120_v57 }
0x1b26   : > { %8584 = vmatprep.mubr.msk.bf16.mxu0 %vm9289_vm1, %v11961_v39  ;;  %8611 = vmatpush3.bf16.msra.mxu0 %v8933_v46 }
0x1b27   : > { %8612 = vmatprep.subr.bf16.mxu0 %v11961_v39 }
0x1b2a   : > { %8613 = vmatpush3.bf16.msra.mxu0 %v8934_v32 }
0x1b2b   : > { %8646 = vmatprep.subr.bf16.mxu0 %v11961_v39 }
0x1b2d   : > { %8585 = vmatmul.mubr.msk.bf16.gmra.mxu0 %vm1640_vm3, %v5121_v59 }
0x1b2e   : > { %8614 = vmatprep.mubr.msk.bf16.mxu0 %vm9289_vm1, %v11961_v39 }
0x1b35   : > { %8615 = vmatmul.mubr.msk.bf16.vlgmr.msra.gmra.mxu0 %vm1243_vm0, %v10810_v52 }
0x1b36   : > { %8618 = vmatprep.mubr.msk.bf16.mxu0 %vm9289_vm1, %v11961_v39 }
0x1b3d   : > { %8619 = vmatmul.mubr.msk.bf16.gmra.mxu0 %vm1243_vm0, %v10834_v15 }
0x1b3e   : > { %8622 = vmatprep.mubr.msk.bf16.mxu0 %vm9289_vm1, %v11961_v39 }
0x1b45   : > { %8623 = vmatmul.mubr.msk.bf16.gmra.mxu0 %vm1243_vm0, %v10849_v53 }
0x1b46   : > { %8652 = vmatprep.mubr.msk.bf16.mxu0 %vm9289_vm1, %v11961_v39 }
0x1bdd   : > { %v5177_v7 = vpop.f32.mrf.mxu0 }
0x1bde   : > { %v5178_v12 = vadd.f32 %v10939_v9, %v5177_v7 }
0x1bdf   : > { %v8578_v47 = vpop.f32.mrf.mxu0 }
0x1be0   : > { %v5199_v57 = vsel %vm1715_vm4, %v5178_v12, -inf }
0x1be1   : > { %5200 = vmax.xlane.f32.xlu0 %v5199_v57  ;;  %v5180_v14 = vpop.f32.mrf.mxu0 }
0x1be2   : > { %v5181_v16 = vadd.f32 %v10946_v37, %v5180_v14 }
0x1be3   : > { %v8579_v18 = vpop.f32.mrf.mxu0 }
0x1be4   : > { %v5202_v48 = vsel %vm1715_vm4, %v5181_v16, -inf }
0x1be5   : > { %5203 = vmax.xlane.f32.xlu1 %v5202_v48  ;;  %v5185_v5 = vpop.f32.mrf.mxu0 }
0x1be6   : > { %v5186_v13 = vadd.f32 %v10953_v44, %v5185_v5 }
0x1be7   : > { %v8582_v36 = vpop.f32.mrf.mxu0 }
0x1be8   : > { %v5205_v38 = vsel %vm1715_vm4, %v5186_v13, -inf }
0x1be9   : > { %5206 = vmax.xlane.f32.xlu0 %v5205_v38  ;;  %v5188_v3 = vpop.f32.mrf.mxu0 }
0x1bea   : > { %v5189_v9 = vadd.f32 %v10960_v29, %v5188_v3 }
0x1beb   : > { %v8583_v25 = vpop.f32.mrf.mxu0 }
0x1bec   : > { %v5208_v41 = vsel %vm1715_vm4, %v5189_v9, -inf }
0x1bed   : > { %5209 = vmax.xlane.f32.xlu1 %v5208_v41  ;;  %v5193_v4 = vpop.f32.mrf.mxu0 }
0x1bee   : > { %v5194_v37 = vadd.f32 %v10967_v50, %v5193_v4 }
0x1bef   : > { %v8586_v20 = vpop.f32.mrf.mxu0 }
0x1bf0   : > { %v5211_v6 = vsel %vm1715_vm4, %v5194_v37, -inf }
0x1bf1   : > { %5212 = vmax.xlane.f32.xlu0 %v5211_v6  ;;  %v5196_v49 = vpop.f32.mrf.mxu0 }
0x1bf3   : > { %v8587_v44 = vpop.f32.mrf.mxu0 }
0x1bf5   : > { %v5407_v23 = vpop.f32.mrf.mxu0 }
0x1bf6   : > { %v11292_v40 = vadd.f32 %v11289_v51, %v5407_v23 }
0x1bf7   : > { %v8616_v29 = vpop.f32.mrf.mxu0 }
0x1bf9   : > { %v5410_v24 = vpop.f32.mrf.mxu0 }
0x1bfa   : > { %v11295_v30 = vadd.f32 %v11289_v51, %v5410_v24 }
0x1bfb   : > { %v8617_v50 = vpop.f32.mrf.mxu0 }
0x1bfc   : > { %v5526_v56 = vpack.c.bf16 %v11295_v30, %v11292_v40  ;;  %v9275_v30 = vld [vmem:[%s11921_s3] sm:$0xff] }
0x1bfd   : > { %v5415_v17 = vpop.f32.mrf.mxu0 }
0x1bfe   : > { %v11300_v21 = vadd.f32 %v11289_v51, %v5415_v17 }
0x1bff   : > { %v8620_v26 = vpop.f32.mrf.mxu0 }
0x1c01   : > { %v5418_v45 = vpop.f32.mrf.mxu0 }
0x1c02   : > { %v11303_v58 = vadd.f32 %v11289_v51, %v5418_v45 }
0x1c03   : > { %v8621_v54 = vpop.f32.mrf.mxu0 }
0x1c04   : > { %v5527_v8 = vpack.c.bf16 %v11303_v58, %v11300_v21  ;;  %v8935_v54 = vld [vmem:[%s11924_s6 + $0x1f8] sm:$0xff]  }
0x1c05   : > { %v11307_v34 = vpop.f32.mrf.mxu0 }
0x1c07   : > { %v8624_v2 = vpop.f32.mrf.mxu0 }
0x1c09   : > { %v5426_v33 = vpop.f32.mrf.mxu0 }
0x1c0b   : > { %v8625_v0 = vpop.f32.mrf.mxu0 }
0x1c0c   : > { %v8936_v0 = vld [vmem:[%s11924_s6 + $0x1f0] sm:$0xff]  }
0x1c6a   : > { %v5201_v35 = vpop.xlane.xlu0 %5200 }
0x1c6b   : > { %v5214_v46 = vsub.f32 %v5178_v12, %v5201_v35 }
0x1c6d   : > { %v5219_v32 = vmul.f32 1.442695, %v5214_v46 }
0x1c6e   : > { %v5204_v60 = vpop.xlane.xlu1 %5203 }
0x1c6f   : > { %9173 = vpow2.f32 %v5219_v32  ;;  %v5215_v59 = vsub.f32 %v5181_v16, %v5204_v60  ;;  %v8937_v60 = vld [vmem:[%s11924_s6 + $0x1e8] sm:$0xff]  }
0x1c71   : > { %v5221_v7 = vmul.f32 1.442695, %v5215_v59 }
0x1c72   : > { %v5207_v47 = vpop.xlane.xlu0 %5206 }
0x1c73   : > { %9175 = vpow2.f32 %v5221_v7  ;;  %v5216_v57 = vsub.f32 %v5186_v13, %v5207_v47  ;;  %v8938_v47 = vld [vmem:[%s11924_s6 + $0x1e0] sm:$0xff]  }
0x1c75   : > { %v5223_v14 = vmul.f32 1.442695, %v5216_v57 }
0x1c76   : > { %v5210_v18 = vpop.xlane.xlu1 %5209 }
0x1c77   : > { %9177 = vpow2.f32 %v5223_v14  ;;  %v5217_v48 = vsub.f32 %v5189_v9, %v5210_v18 }
0x1c79   : > { %v5225_v5 = vmul.f32 1.442695, %v5217_v48 }
0x1c7a   : > { %v5213_v36 = vpop.xlane.xlu0 %5212 }
0x1c7b   : > { %9179 = vpow2.f32 %v5225_v5  ;;  %v5218_v38 = vsub.f32 %v5194_v37, %v5213_v36 }
0x1c7c   : > { %v9174_v3 = vpop.eup %9173 }
0x1c7d   : > { %v5227_v25 = vmul.f32 1.442695, %v5218_v38  ;;  %v5229_v12 = vsel %vm1715_vm4, %v9174_v3, 0.0 }
0x1c7e   : > { %5230 = vadd.xlane.f32.xlu1 %v5229_v12 }
0x1c7f   : > { %9181 = vpow2.f32 %v5227_v25 }
0x1c80   : > { %v9176_v41 = vpop.eup %9175 }
0x1c81   : > { %v5232_v16 = vsel %vm1715_vm4, %v9176_v41, 0.0 }
0x1c82   : > { %5233 = vadd.xlane.f32.xlu0 %v5232_v16 }
0x1c84   : > { %v9178_v4 = vpop.eup %9177 }
0x1c85   : > { %v5235_v13 = vsel %vm1715_vm4, %v9178_v4, 0.0 }
0x1c86   : > { %5236 = vadd.xlane.f32.xlu1 %v5235_v13 }
0x1c88   : > { %v9180_v20 = vpop.eup %9179 }
0x1c89   : > { %v5238_v9 = vsel %vm1715_vm4, %v9180_v20, 0.0 }
0x1c8a   : > { %5239 = vadd.xlane.f32.xlu0 %v5238_v9 }
0x1c8c   : > { %v9182_v6 = vpop.eup %9181 }
0x1c8d   : > { %v5241_v37 = vsel %vm1715_vm4, %v9182_v6, 0.0 }
0x1c8e   : > { %5242 = vadd.xlane.f32.xlu1 %v5241_v37 }
0x1d07   : > { %v5231_v49 = vpop.xlane.xlu1 %5230 }
0x1d08   : > { %9183 = vrcp.f32 %v5231_v49 }
0x1d0b   : > { %v5234_v44 = vpop.xlane.xlu0 %5233 }
0x1d0c   : > { %9185 = vrcp.f32 %v5234_v44 }
0x1d0f   : > { %v5237_v23 = vpop.xlane.xlu1 %5236 }
0x1d10   : > { %9187 = vrcp.f32 %v5237_v23 }
0x1d13   : > { %v5240_v29 = vpop.xlane.xlu0 %5239 }
0x1d14   : > { %9189 = vrcp.f32 %v5240_v29 }
0x1d15   : > { %v9184_v24 = vpop.eup %9183 }
0x1d16   : > { %v5245_v26 = vmul.f32 %v9184_v24, %v9174_v3  ;;  %v7436_v24 = vld [vmem:[%s11925_s7 + $0xf] ss:$0 sm:$0xff] }
0x1d17   : > { %v5243_v50 = vpop.xlane.xlu1 %5242 }
0x1d18   : > { %9191 = vrcp.f32 %v5243_v50 }
0x1d19   : > { %v9186_v17 = vpop.eup %9185 }
0x1d1a   : > { %v5247_v45 = vmul.f32 %v9186_v17, %v9176_v41 }
0x1d1c   : > { %v5254_v2 = vpack.c.bf16 %v5247_v45, %v5245_v26 }
0x1d1d   : > { %v9188_v33 = vpop.eup %9187 }
0x1d1e   : > { %8595 = vmatmul.mubr.msk.bf16.vlgmr.msra.gmra.mxu1 %vm1715_vm4, %v5254_v2  ;;  %v5249_v46 = vmul.f32 %v9188_v33, %v9178_v4 }
0x1d1f   : > { %8598 = vmatprep.mubr.msk.bf16.mxu1 %vm9289_vm1, %v11961_v39  ;;  %8627 = vmatpush3.bf16.msra.mxu1 %v8935_v54 }
0x1d20   : > { %8628 = vmatprep.subr.bf16.mxu1 %v11961_v39 }
0x1d21   : > { %v9190_v35 = vpop.eup %9189 }
0x1d22   : > { %v5251_v32 = vmul.f32 %v9190_v35, %v9180_v20 }
0x1d23   : > { %8629 = vmatpush3.bf16.msra.mxu1 %v8936_v0 }
0x1d24   : > { %v5255_v59 = vpack.c.bf16 %v5251_v32, %v5249_v46  ;;  %8630 = vmatprep.subr.bf16.mxu1 %v11961_v39 }
0x1d25   : > { %v9192_v7 = vpop.eup %9191 }
0x1d26   : > { %8599 = vmatmul.mubr.msk.bf16.gmra.mxu1 %vm1715_vm4, %v5255_v59  ;;  %v5253_v57 = vmul.f32 %v9192_v7, %v9182_v6  ;;  %v5424_v7 = vadd.f32 %v11289_v51, %v11307_v34  ;;  %v9276_v51 = vld [vmem:[%s11921_s3 + $0x8] sm:$0xff] }
0x1d27   : > { %8602 = vmatprep.mubr.msk.bf16.mxu1 %vm9289_vm1, %v11961_v39  ;;  %8631 = vmatpush3.bf16.msra.mxu1 %v8937_v60 }
0x1d28   : > { %8632 = vmatprep.subr.bf16.mxu1 %v11961_v39  ;;  %v5256_v14 = vpack.c.bf16 %v5253_v57, %v5253_v57 }
0x1d2b   : > { %8633 = vmatpush3.bf16.msra.mxu1 %v8938_v47  ;;  %v5528_v47 = vpack.c.bf16 %v5424_v7, %v5424_v7 }
0x1d2c   : > { %8664 = vmatprep.subr.bf16.mxu1 %v11961_v39 }
0x1d2e   : > { %8603 = vmatmul.mubr.msk.bf16.gmra.mxu1 %vm1715_vm4, %v5256_v14 }
0x1d2f   : > { %8634 = vmatprep.mubr.msk.bf16.mxu1 %vm9289_vm1, %v11961_v39 }
0x1d36   : > { %8635 = vmatmul.mubr.msk.bf16.vlgmr.msra.gmra.mxu1 %vm1243_vm0, %v10810_v52 }
0x1d37   : > { %8665 = vmatpush3.bf16.msra.mxu1 %v10878_v1  ;;  %8638 = vmatprep.mubr.msk.bf16.mxu1 %vm9289_vm1, %v11961_v39 }
0x1d38   : > { %8666 = vmatprep.subr.bf16.mxu1 %v11961_v39 }
0x1d3b   : > { %8667 = vmatpush3.bf16.msra.mxu1 %v10884_v11 }
0x1d3c   : > { %8668 = vmatprep.subr.bf16.mxu1 %v11961_v39 }
0x1d3e   : > { %8639 = vmatmul.mubr.msk.bf16.gmra.mxu1 %vm1243_vm0, %v10834_v15 }
0x1d3f   : > { %8669 = vmatpush3.bf16.msra.mxu1 %v10888_v62  ;;  %8642 = vmatprep.mubr.msk.bf16.mxu1 %vm9289_vm1, %v11961_v39 }
0x1d46   : > { %8643 = vmatmul.mubr.msk.bf16.gmra.mxu1 %vm1243_vm0, %v10849_v53 }
0x1d47   : > { %8670 = vmatprep.mubr.msk.bf16.mxu1 %vm9289_vm1, %v11961_v39 }
0x1dde   : > { %v5300_v52 = vpop.f32.mrf.mxu1 }
0x1ddf   : > { %v5322_v1 = vsel %vm10230_vm11, %v5300_v52, 0.0 }
0x1de0   : > { %v11359_v11 = vadd.f32 %v5322_v1, %v11192_v42  ;;  %v8596_v18 = vpop.f32.mrf.mxu1  ;;  %v9277_v1 = vld [vmem:[%s11921_s3 + $0x10] sm:$0xff] }
0x1de2   : > { %v5303_v15 = vpop.f32.mrf.mxu1 }
0x1de3   : > { %v5323_v62 = vsel %vm10230_vm11, %v5303_v15, 0.0 }
0x1de4   : > { %v11364_v48 = vadd.f32 %v5323_v62, %v11199_v27  ;;  %v8597_v5 = vpop.f32.mrf.mxu1 }
0x1de6   : > { %v5308_v53 = vpop.f32.mrf.mxu1 }
0x1de7   : > { %v5324_v36 = vsel %vm10230_vm11, %v5308_v53, 0.0  ;;  %v9278_v53 = vld [vmem:[%s11921_s3 + $0x18] sm:$0xff] }
0x1de8   : > { %v11369_v38 = vadd.f32 %v5324_v36, %v11206_v10  ;;  %v8600_v3 = vpop.f32.mrf.mxu1 }
0x1dea   : > { %v5311_v25 = vpop.f32.mrf.mxu1 }
0x1deb   : > { %v5325_v42 = vsel %vm10230_vm11, %v5311_v25, 0.0 }
0x1dec   : > { %v11374_v12 = vadd.f32 %v5325_v42, %v11213_v22  ;;  %v8601_v41 = vpop.f32.mrf.mxu1 }
0x1ded   : > { %v9279_v41 = vld [vmem:[%s11921_s3 + $0x20] sm:$0xff] }
0x1dee   : > { %v5316_v16 = vpop.f32.mrf.mxu1 }
0x1def   : > { %v5326_v27 = vsel %vm10230_vm11, %v5316_v16, 0.0 }
0x1df0   : > { %v11379_v4 = vadd.f32 %v5326_v27, %v11220_v28  ;;  %v8604_v13 = vpop.f32.mrf.mxu1 }
0x1df2   : > { %v5319_v20 = vpop.f32.mrf.mxu1 }
0x1df4   : > { %v8605_v10 = vpop.f32.mrf.mxu1 }
0x1df6   : > { %v5504_v9 = vpop.f32.mrf.mxu1 }
0x1df7   : > { %v5505_v32 = vadd.f32 %v7436_v24, %v5504_v9 }
0x1df8   : > { %v8636_v6 = vpop.f32.mrf.mxu1 }
0x1dfa   : > { %v5507_v37 = vpop.f32.mrf.mxu1 }
0x1dfb   : > { %v5508_v35 = vadd.f32 %v7436_v24, %v5507_v37 }
0x1dfc   : > { %v8637_v49 = vpop.f32.mrf.mxu1 }
0x1dfd   : > { %v5529_v60 = vpack.c.bf16 %v5508_v35, %v5505_v32 }
0x1dfe   : > { %v5512_v44 = vpop.f32.mrf.mxu1 }
0x1dff   : > { %v5513_v33 = vadd.f32 %v7436_v24, %v5512_v44  ;;  %v5542_v59 = vsel %vm1640_vm3, %v5529_v60, 0 }
0x1e00   : > { %v8640_v23 = vpop.f32.mrf.mxu1 }
0x1e02   : > { %v5515_v29 = vpop.f32.mrf.mxu1 }
0x1e03   : > { %v5516_v45 = vadd.f32 %v7436_v24, %v5515_v29 }
0x1e04   : > { %v8641_v22 = vpop.f32.mrf.mxu1 }
0x1e05   : > { %v5530_v0 = vpack.c.bf16 %v5516_v45, %v5513_v33 }
0x1e06   : > { %v5520_v19 = vpop.f32.mrf.mxu1 }
0x1e07   : > { %v5521_v50 = vadd.f32 %v7436_v24, %v5520_v19  ;;  %v5545_v46 = vsel %vm1640_vm3, %v5530_v0, 0 }
0x1e08   : > { %v8644_v17 = vpop.f32.mrf.mxu1 }
0x1e09   : > { %v5531_v28 = vpack.c.bf16 %v5521_v50, %v5521_v50 }
0x1e0a   : > { %v5523_v26 = vpop.f32.mrf.mxu1 }
0x1e0b   : > { %v5548_v54 = vsel %vm1640_vm3, %v5531_v28, 0 }
0x1e0c   : > { %v8645_v2 = vpop.f32.mrf.mxu1  ;;  %8647 = vmatpush3.bf16.xpose.msra.mxu0 %v5548_v54 }
0x1e0d   : > { %8648 = vmatprep.subr.bf16.mxu0 %v11961_v39 }
0x1e14   : > { %8649 = vmatpush3.bf16.xpose.msra.mxu0 %v5545_v46 }
0x1e15   : > { %8650 = vmatprep.subr.bf16.mxu0 %v11961_v39 }
0x1e1c   : > { %8651 = vmatpush3.bf16.xpose.msra.mxu0 %v5542_v59 }
0x1e1d   : > { %8682 = vmatprep.subr.bf16.mxu0 %v11961_v39 }
0x1e23   : > { %8653 = vmatmul.mubr.msk.bf16.vlgmr.msra.gmra.mxu0 %vm1640_vm3, %v5526_v56 }
0x1e24   : > { %8656 = vmatprep.mubr.msk.bf16.mxu0 %vm9289_vm1, %v11961_v39 }
0x1e2b   : > { %8657 = vmatmul.mubr.msk.bf16.gmra.mxu0 %vm1640_vm3, %v5527_v8 }
0x1e2c   : > { %8660 = vmatprep.mubr.msk.bf16.mxu0 %vm9289_vm1, %v11961_v39 }
0x1e33   : > { %8661 = vmatmul.mubr.msk.bf16.gmra.mxu0 %vm1640_vm3, %v5528_v47  ;;  %v8939_v47 = vld [vmem:[%s11926_s8 + $0x78] sm:$0xff]  }
0x1e34   : > { %8690 = vmatprep.mubr.msk.bf16.mxu0 %vm9289_vm1, %v11961_v39  ;;  %8683 = vmatpush3.bf16.msra.mxu0 %v8939_v47 }
0x1e35   : > { %8684 = vmatprep.subr.bf16.mxu0 %v11961_v39 }
0x1ee3   : > { %v5584_v40 = vpop.f32.mrf.mxu0 }
0x1ee4   : > { %v5585_v56 = vadd.f32 %v9275_v30, %v5584_v40  ;;  %v8940_v40 = vld [vmem:[%s11926_s8 + $0x70] sm:$0xff]  }
0x1ee5   : > { %v8654_v21 = vpop.f32.mrf.mxu0  ;;  %8685 = vmatpush3.bf16.msra.mxu0 %v8940_v40 }
0x1ee6   : > { %v5606_v58 = vsel %vm1715_vm4, %v5585_v56, -inf  ;;  %8686 = vmatprep.subr.bf16.mxu0 %v11961_v39 }
0x1ee7   : > { %5607 = vmax.xlane.f32.xlu0 %v5606_v58  ;;  %v5587_v8 = vpop.f32.mrf.mxu0 }
0x1ee8   : > { %v5588_v34 = vadd.f32 %v9276_v51, %v5587_v8 }
0x1ee9   : > { %v8655_v57 = vpop.f32.mrf.mxu0 }
0x1eea   : > { %v5609_v14 = vsel %vm1715_vm4, %v5588_v34, -inf }
0x1eeb   : > { %5610 = vmax.xlane.f32.xlu1 %v5609_v14  ;;  %v5592_v52 = vpop.f32.mrf.mxu0 }
0x1eec   : > { %v5593_v18 = vadd.f32 %v9277_v1, %v5592_v52 }
0x1eed   : > { %v8658_v15 = vpop.f32.mrf.mxu0 }
0x1eee   : > { %v5612_v62 = vsel %vm1715_vm4, %v5593_v18, -inf }
0x1eef   : > { %5613 = vmax.xlane.f32.xlu0 %v5612_v62  ;;  %v5595_v5 = vpop.f32.mrf.mxu0 }
0x1ef0   : > { %v5596_v36 = vadd.f32 %v9278_v53, %v5595_v5 }
0x1ef1   : > { %v8659_v3 = vpop.f32.mrf.mxu0 }
0x1ef2   : > { %v5615_v25 = vsel %vm1715_vm4, %v5596_v36, -inf }
0x1ef3   : > { %5616 = vmax.xlane.f32.xlu1 %v5615_v25  ;;  %v5600_v42 = vpop.f32.mrf.mxu0  ;;  %v11962_v25 = vmov 0  }
0x1ef4   : > { %v5601_v16 = vadd.f32 %v9279_v41, %v5600_v42  ;;  %v8941_v42 = vld [vmem:[%s11926_s8 + $0x68] sm:$0xff]   ;;  %v8942_v41 = vld [vmem:[%s11926_s8 + $0x60] sm:$0xff]  }
0x1ef5   : > { %v8662_v27 = vpop.f32.mrf.mxu0  ;;  %8687 = vmatpush3.bf16.msra.mxu0 %v8941_v42 }
0x1ef6   : > { %v5618_v13 = vsel %vm1715_vm4, %v5601_v16, -inf  ;;  %8688 = vmatprep.subr.bf16.mxu0 %v11961_v39 }
0x1ef7   : > { %5619 = vmax.xlane.f32.xlu0 %v5618_v13  ;;  %v5603_v20 = vpop.f32.mrf.mxu0 }
0x1ef9   : > { %v8663_v10 = vpop.f32.mrf.mxu0  ;;  %8689 = vmatpush3.bf16.msra.mxu0 %v8942_v41 }
0x1f70   : > { %v5608_v9 = vpop.xlane.xlu0 %5607 }
0x1f71   : > { %v5621_v6 = vsub.f32 %v5585_v56, %v5608_v9 }
0x1f73   : > { %v5626_v37 = vmul.f32 1.442695, %v5621_v6 }
0x1f74   : > { %v5611_v49 = vpop.xlane.xlu1 %5610 }
0x1f75   : > { %9193 = vpow2.f32 %v5626_v37  ;;  %v5622_v44 = vsub.f32 %v5588_v34, %v5611_v49 }
0x1f77   : > { %v5628_v23 = vmul.f32 1.442695, %v5622_v44 }
0x1f78   : > { %v5614_v29 = vpop.xlane.xlu0 %5613 }
0x1f79   : > { %9195 = vpow2.f32 %v5628_v23  ;;  %v5623_v22 = vsub.f32 %v5593_v18, %v5614_v29 }
0x1f7b   : > { %v5630_v24 = vmul.f32 1.442695, %v5623_v22 }
0x1f7c   : > { %v5617_v19 = vpop.xlane.xlu1 %5616 }
0x1f7d   : > { %9197 = vpow2.f32 %v5630_v24  ;;  %v5624_v50 = vsub.f32 %v5596_v36, %v5617_v19 }
0x1f7f   : > { %v5632_v17 = vmul.f32 1.442695, %v5624_v50 }
0x1f80   : > { %v5620_v28 = vpop.xlane.xlu0 %5619 }
0x1f81   : > { %9199 = vpow2.f32 %v5632_v17  ;;  %v5625_v26 = vsub.f32 %v5601_v16, %v5620_v28 }
0x1f82   : > { %v9194_v45 = vpop.eup %9193 }
0x1f83   : > { %v5634_v54 = vmul.f32 1.442695, %v5625_v26  ;;  %v5636_v2 = vsel %vm1715_vm4, %v9194_v45, 0.0 }
0x1f84   : > { %5637 = vadd.xlane.f32.xlu1 %v5636_v2 }
0x1f85   : > { %9201 = vpow2.f32 %v5634_v54 }
0x1f86   : > { %v9196_v33 = vpop.eup %9195 }
0x1f87   : > { %v5639_v0 = vsel %vm1715_vm4, %v9196_v33, 0.0 }
0x1f88   : > { %5640 = vadd.xlane.f32.xlu0 %v5639_v0 }
0x1f8a   : > { %v9198_v35 = vpop.eup %9197 }
0x1f8b   : > { %v5642_v46 = vsel %vm1715_vm4, %v9198_v35, 0.0 }
0x1f8c   : > { %5643 = vadd.xlane.f32.xlu1 %v5642_v46 }
0x1f8e   : > { %v9200_v32 = vpop.eup %9199 }
0x1f8f   : > { %v5645_v60 = vsel %vm1715_vm4, %v9200_v32, 0.0 }
0x1f90   : > { %5646 = vadd.xlane.f32.xlu0 %v5645_v60 }
0x1f92   : > { %v9202_v59 = vpop.eup %9201 }
0x1f93   : > { %v5648_v7 = vsel %vm1715_vm4, %v9202_v59, 0.0 }
0x1f94   : > { %5649 = vadd.xlane.f32.xlu1 %v5648_v7 }
0x200d   : > { %v5638_v30 = vpop.xlane.xlu1 %5637 }
0x200e   : > { %9203 = vrcp.f32 %v5638_v30 }
0x2011   : > { %v5641_v56 = vpop.xlane.xlu0 %5640 }
0x2012   : > { %9205 = vrcp.f32 %v5641_v56 }
0x2015   : > { %v5644_v21 = vpop.xlane.xlu1 %5643 }
0x2016   : > { %9207 = vrcp.f32 %v5644_v21 }
0x2019   : > { %v5647_v58 = vpop.xlane.xlu0 %5646 }
0x201a   : > { %9209 = vrcp.f32 %v5647_v58 }
0x201b   : > { %v9204_v8 = vpop.eup %9203 }
0x201c   : > { %v5652_v57 = vmul.f32 %v9204_v8, %v9194_v45 }
0x201d   : > { %v5650_v51 = vpop.xlane.xlu1 %5649 }
0x201e   : > { %9211 = vrcp.f32 %v5650_v51 }
0x201f   : > { %v9206_v34 = vpop.eup %9205 }
0x2020   : > { %v5654_v14 = vmul.f32 %v9206_v34, %v9196_v33 }
0x2022   : > { %v5661_v52 = vpack.c.bf16 %v5654_v14, %v5652_v57 }
0x2023   : > { %v9208_v1 = vpop.eup %9207 }
0x2024   : > { %8671 = vmatmul.mubr.msk.bf16.vlgmr.msra.gmra.mxu1 %vm1715_vm4, %v5661_v52  ;;  %v5656_v15 = vmul.f32 %v9208_v1, %v9198_v35 }
0x2025   : > { %8674 = vmatprep.mubr.msk.bf16.mxu1 %vm9289_vm1, %v11961_v39 }
0x2027   : > { %v9210_v18 = vpop.eup %9209 }
0x2028   : > { %v5658_v62 = vmul.f32 %v9210_v18, %v9200_v32 }
0x202a   : > { %v5662_v5 = vpack.c.bf16 %v5658_v62, %v5656_v15 }
0x202b   : > { %v9212_v53 = vpop.eup %9211 }
0x202c   : > { %8675 = vmatmul.mubr.msk.bf16.gmra.mxu1 %vm1715_vm4, %v5662_v5  ;;  %v5660_v36 = vmul.f32 %v9212_v53, %v9202_v59 }
0x202d   : > { %8678 = vmatprep.mubr.msk.bf16.mxu1 %vm9289_vm1, %v11961_v39 }
0x202e   : > { %v5663_v3 = vpack.c.bf16 %v5660_v36, %v5660_v36 }
0x2034   : > { %8679 = vmatmul.mubr.msk.bf16.gmra.mxu1 %vm1715_vm4, %v5663_v3 }
0x2035   : > { %6050 = vmatprep.mubr.bf16.mxu1 %v11962_v25 }
0x20e4   : > { %v5707_v16 = vpop.f32.mrf.mxu1 }
0x20e5   : > { %v5729_v20 = vsel %vm10334_vm14, %v5707_v16, 0.0 }
0x20e6   : > { %v8672_v27 = vpop.f32.mrf.mxu1  ;;  %v5734_v6 = vadd.f32 %v5729_v20, %v11359_v11 }
0x20e8   : > { %v5710_v10 = vpop.f32.mrf.mxu1 }
0x20e9   : > { %v5730_v9 = vsel %vm10334_vm14, %v5710_v10, 0.0 }
0x20ea   : > { %v5735_v37 = vadd.f32 %v5730_v9, %v11364_v48  ;;  %v8673_v49 = vpop.f32.mrf.mxu1 }
0x20ec   : > { %v5739_v44 = vpack.c.bf16 %v5735_v37, %v5734_v6  ;;  %v5715_v23 = vpop.f32.mrf.mxu1 }
0x20ed   : > { %v5731_v22 = vsel %vm10334_vm14, %v5715_v23, 0.0 }
0x20ee   : > { %v8676_v29 = vpop.f32.mrf.mxu1  ;;  %8691 = vmatmul.mubr.msk.bf16.vlgmr.msra.gmra.mxu0 %vm1243_vm0, %v5739_v44  ;;  %v5736_v11 = vadd.f32 %v5731_v22, %v11369_v38  ;;  %v7459_v38 = vld [vmem:[%s11927_s9 + $0x4] ss:$0 sm:$0xff] }
0x20ef   : > { %8694 = vmatprep.mubr.msk.bf16.mxu0 %vm9289_vm1, %v11961_v39 }
0x20f0   : > { %v5718_v24 = vpop.f32.mrf.mxu1 }
0x20f1   : > { %v5732_v19 = vsel %vm10334_vm14, %v5718_v24, 0.0 }
0x20f2   : > { %v5737_v48 = vadd.f32 %v5732_v19, %v11374_v12  ;;  %v8677_v50 = vpop.f32.mrf.mxu1 }
0x20f3   : > { %v8943_v50 = vld [vmem:[%s11928_s10 + $0x70] ss:$8 sps:$4 sm:$0xff]  }
0x20f4   : > { %v5740_v17 = vpack.c.bf16 %v5737_v48, %v5736_v11  ;;  %v5723_v28 = vpop.f32.mrf.mxu1 }
0x20f5   : > { %v5733_v26 = vsel %vm10334_vm14, %v5723_v28, 0.0  ;;  %v8946_v28 = vld [vmem:[%s11928_s10 + $0x60] ss:$8 sps:$4 sm:$0xff]  }
0x20f6   : > { %v8680_v45 = vpop.f32.mrf.mxu1  ;;  %8695 = vmatmul.mubr.msk.bf16.gmra.mxu0 %vm1243_vm0, %v5740_v17  ;;  %v5738_v54 = vadd.f32 %v5733_v26, %v11379_v4  ;;  %v8945_v17 = vld [vmem:[%s11928_s10 + $0x74] ss:$8 sps:$4 sm:$0xff]   ;;  %v8948_v26 = vld [vmem:[%s11928_s10 + $0x64] ss:$8 sps:$4 sm:$0xff]  }
0x20f7   : > { %8698 = vmatprep.mubr.msk.bf16.mxu0 %vm9289_vm1, %v11961_v39  ;;  %6026 = vmatprep.subr.bf16.mxu1 %v8945_v17  ;;  %v8951_v45 = vld [vmem:[%s11928_s10 + $0x54] ss:$8 sps:$4 sm:$0xff]  }
0x20f8   : > { %v5726_v2 = vpop.f32.mrf.mxu1  ;;  %v5741_v0 = vpack.c.bf16 %v5738_v54, %v5738_v54  ;;  %6027 = vmatpush1.bf16.msra.mxu1 %v8943_v50  ;;  %v8949_v54 = vld [vmem:[%s11928_s10 + $0x50] ss:$8 sps:$4 sm:$0xff]  }
0x20f9   : > { %6028 = vmatprep.subr.bf16.mxu1 %v8948_v26  ;;  %v8954_v2 = vld [vmem:[%s11928_s10 + $0x44] ss:$8 sps:$4 sm:$0xff]   ;;  %v8965_v50 = vld [vmem:[%s11930_s12 + $0xd0] sm:$0xff]  }
0x20fa   : > { %v8681_v33 = vpop.f32.mrf.mxu1  ;;  %v8966_v17 = vld [vmem:[%s11930_s12 + $0x90] sm:$0xff]   ;;  %v8968_v26 = vld [vmem:[%s11930_s12 + $0x88] sm:$0xff]  }
0x20fb   : > { %v8952_v33 = vld [vmem:[%s11928_s10 + $0x40] ss:$8 sps:$4 sm:$0xff]  }
0x20fc   : > { %6029 = vmatpush1.bf16.msra.mxu1 %v8946_v28  ;;  %v8967_v28 = vld [vmem:[%s11930_s12 + $0xc8] sm:$0xff]  }
0x20fd   : > { %6030 = vmatprep.subr.bf16.mxu1 %v8951_v45  ;;  %v8969_v45 = vld [vmem:[%s11930_s12 + $0xc0] sm:$0xff]  }
0x20fe   : > { %8699 = vmatmul.mubr.msk.bf16.gmra.mxu0 %vm1243_vm0, %v5741_v0 }
0x2100   : > { %6031 = vmatpush1.bf16.msra.mxu1 %v8949_v54  ;;  %v8970_v54 = vld [vmem:[%s11930_s12 + $0x80] sm:$0xff]  }
0x2101   : > { %6032 = vmatprep.subr.bf16.mxu1 %v8954_v2  ;;  %v7479_v2 = vld [vmem:[%s11929_s11 + $0x2] sm:$0x3] }
0x2104   : > { %6033 = vmatpush1.bf16.msra.mxu1 %v8952_v33  ;;  %v11964_v33 = vld [vmem:[#allocation3_spill] sm:$0xff] }
0x2105   : > { %8702 = vmatprep.subr.mxu1 %v11961_v39 }
0x21ae   : > { %v5826_v12 = vpop.f32.mrf.mxu0 }
0x21af   : > { %v5827_v35 = vadd.f32 %v7459_v38, %v5826_v12 }
0x21b0   : > { %v8692_v46 = vpop.f32.mrf.mxu0 }
0x21b1   : > { %v11481_v32 = vadd.f32 %v5827_v35, %v10716_v31 }
0x21b2   : > { %v5829_v60 = vpop.f32.mrf.mxu0 }
0x21b3   : > { %v5830_v59 = vadd.f32 %v7459_v38, %v5829_v60  ;;  %v5857_v4 = vsel %vm1243_vm0, %v11481_v32, 0.0 }
0x21b4   : > { %5858 = vadd.xlane.f32.xlu0 %v5857_v4  ;;  %v8693_v7 = vpop.f32.mrf.mxu0 }
0x21b5   : > { %v11486_v47 = vadd.f32 %v5830_v59, %v10721_v55 }
0x21b6   : > { %v5834_v40 = vpop.f32.mrf.mxu0 }
0x21b7   : > { %v5835_v30 = vadd.f32 %v7459_v38, %v5834_v40  ;;  %v5860_v56 = vsel %vm1243_vm0, %v11486_v47, 0.0 }
0x21b8   : > { %5861 = vadd.xlane.f32.xlu1 %v5860_v56  ;;  %v8696_v21 = vpop.f32.mrf.mxu0 }
0x21b9   : > { %v11491_v31 = vadd.f32 %v5835_v30, %v10726_v63 }
0x21ba   : > { %v5837_v58 = vpop.f32.mrf.mxu0 }
0x21bb   : > { %v5838_v8 = vadd.f32 %v7459_v38, %v5837_v58  ;;  %v5863_v51 = vsel %vm1243_vm0, %v11491_v31, 0.0 }
0x21bc   : > { %5864 = vadd.xlane.f32.xlu0 %v5863_v51  ;;  %v8697_v34 = vpop.f32.mrf.mxu0 }
0x21bd   : > { %v11496_v55 = vadd.f32 %v5838_v8, %v10731_v61 }
0x21be   : > { %v5842_v57 = vpop.f32.mrf.mxu0 }
0x21bf   : > { %v5843_v14 = vadd.f32 %v7459_v38, %v5842_v57  ;;  %v5866_v52 = vsel %vm1243_vm0, %v11496_v55, 0.0  ;;  %v7469_v57 = vld [vmem:[%s11923_s5 + $0x6] ss:$0 sm:$0xff] }
0x21c0   : > { %5867 = vadd.xlane.f32.xlu1 %v5866_v52  ;;  %v8700_v1 = vpop.f32.mrf.mxu0 }
0x21c1   : > { %v11501_v63 = vadd.f32 %v5843_v14, %v10736_v43 }
0x21c2   : > { %v5845_v18 = vpop.f32.mrf.mxu0 }
0x21c3   : > { %v5869_v15 = vsel %vm1243_vm0, %v11501_v63, 0.0  ;;  %v7470_v18 = vld [vmem:[%s11923_s5 + $0x7] ss:$0 sm:$0xff] }
0x21c4   : > { %5870 = vadd.xlane.f32.xlu0 %v5869_v15  ;;  %v8701_v62 = vpop.f32.mrf.mxu0 }
0x223d   : > { %v5859_v5 = vpop.xlane.xlu0 %5858 }
0x223e   : > { %v5872_v53 = vmul.f32 0.015625, %v5859_v5 }
0x2240   : > { %v11506_v61 = vsub.f32 %v11481_v32, %v5872_v53 }
0x2241   : > { %v5862_v36 = vpop.xlane.xlu1 %5861 }
0x2242   : > { %v5873_v3 = vmul.f32 0.015625, %v5862_v36  ;;  %v5882_v42 = vmul.f32 %v11506_v61, %v11506_v61 }
0x2244   : > { %v11511_v41 = vsub.f32 %v11486_v47, %v5873_v3  ;;  %v5887_v43 = vsel %vm1243_vm0, %v5882_v42, 0.0 }
0x2245   : > { %v5865_v16 = vpop.xlane.xlu0 %5864  ;;  %5888 = vadd.xlane.f32.xlu1 %v5887_v43 }
0x2246   : > { %v5874_v27 = vmul.f32 0.015625, %v5865_v16  ;;  %v5883_v13 = vmul.f32 %v11511_v41, %v11511_v41 }
0x2248   : > { %v11517_v20 = vsub.f32 %v11491_v31, %v5874_v27  ;;  %v5890_v10 = vsel %vm1243_vm0, %v5883_v13, 0.0 }
0x2249   : > { %v5868_v9 = vpop.xlane.xlu1 %5867  ;;  %5891 = vadd.xlane.f32.xlu0 %v5890_v10 }
0x224a   : > { %v5875_v6 = vmul.f32 0.015625, %v5868_v9  ;;  %v5884_v37 = vmul.f32 %v11517_v20, %v11517_v20 }
0x224c   : > { %v11523_v49 = vsub.f32 %v11496_v55, %v5875_v6  ;;  %v5893_v44 = vsel %vm1243_vm0, %v5884_v37, 0.0 }
0x224d   : > { %5894 = vadd.xlane.f32.xlu1 %v5893_v44  ;;  %v5871_v23 = vpop.xlane.xlu0 %5870  ;;  %v8956_v44 = vld [vmem:[%s11930_s12 + $0xb8] sm:$0xff]  }
0x224e   : > { %v5876_v29 = vmul.f32 0.015625, %v5871_v23  ;;  %v5885_v22 = vmul.f32 %v11523_v49, %v11523_v49  ;;  %v8958_v23 = vld [vmem:[%s11930_s12 + $0xb0] sm:$0xff]  }
0x2250   : > { %v11529_v24 = vsub.f32 %v11501_v63, %v5876_v29  ;;  %v5896_v19 = vsel %vm1243_vm0, %v5885_v22, 0.0  ;;  %v8959_v29 = vld [vmem:[%s11930_s12 + $0xe8] sm:$0xff]  }
0x2251   : > { %5897 = vadd.xlane.f32.xlu0 %v5896_v19  ;;  %v8960_v22 = vld [vmem:[%s11930_s12 + $0xa8] sm:$0xff]   ;;  %v8962_v19 = vld [vmem:[%s11930_s12 + $0xa0] sm:$0xff]  }
0x2252   : > { %v5886_v11 = vmul.f32 %v11529_v24, %v11529_v24 }
0x2254   : > { %v5899_v48 = vsel %vm1243_vm0, %v5886_v11, 0.0  ;;  %v8963_v11 = vld [vmem:[%s11930_s12 + $0xd8] sm:$0xff]  }
0x2255   : > { %5900 = vadd.xlane.f32.xlu1 %v5899_v48  ;;  %v8964_v48 = vld [vmem:[%s11930_s12 + $0x98] sm:$0xff]  }
0x22ce   : > { %v5889_v0 = vpop.xlane.xlu1 %5888 }
0x22cf   : > { %v5902_v38 = vmul.f32 0.015625, %v5889_v0  ;;  %v11965_v0 = vsub.s32 0, %v11964_v33 }
0x22d1   : > { %v5907_v12 = vadd.f32 1e-06, %v5902_v38  ;;  %v11632_v38 = vrot.slane %v7479_v2, %v11965_v0 }
0x22d2   : > { %v5892_v35 = vpop.xlane.xlu0 %5891 }
0x22d3   : > { %9213 = vrsqrt.f32 %v5907_v12  ;;  %v5903_v46 = vmul.f32 0.015625, %v5892_v35  ;;  %v11966_v12 = vsub.s32 1, %v11964_v33 }
0x22d5   : > { %v5908_v60 = vadd.f32 1e-06, %v5903_v46  ;;  %v11636_v35 = vrot.slane %v7479_v2, %v11966_v12 }
0x22d6   : > { %v5895_v59 = vpop.xlane.xlu1 %5894 }
0x22d7   : > { %9215 = vrsqrt.f32 %v5908_v60  ;;  %v5904_v4 = vmul.f32 0.015625, %v5895_v59 }
0x22d9   : > { %v5909_v7 = vadd.f32 1e-06, %v5904_v4 }
0x22da   : > { %v5898_v40 = vpop.xlane.xlu0 %5897 }
0x22db   : > { %9217 = vrsqrt.f32 %v5909_v7  ;;  %v5905_v30 = vmul.f32 0.015625, %v5898_v40 }
0x22dd   : > { %v5910_v56 = vadd.f32 1e-06, %v5905_v30 }
0x22de   : > { %v5901_v21 = vpop.xlane.xlu1 %5900 }
0x22df   : > { %9219 = vrsqrt.f32 %v5910_v56  ;;  %v5906_v58 = vmul.f32 0.015625, %v5901_v21 }
0x22e0   : > { %v9214_v8 = vpop.eup %9213 }
0x22e1   : > { %v5917_v51 = vmul.f32 %v9214_v8, %v11506_v61  ;;  %v5911_v34 = vadd.f32 1e-06, %v5906_v58 }
0x22e3   : > { %9221 = vrsqrt.f32 %v5911_v34  ;;  %v5928_v52 = vmul.f32 %v7469_v57, %v5917_v51 }
0x22e4   : > { %v9216_v14 = vpop.eup %9215 }
0x22e5   : > { %v5918_v1 = vmul.f32 %v9216_v14, %v11511_v41  ;;  %v5939_v5 = vadd.f32 %v7470_v18, %v5928_v52 }
0x22e7   : > { %v5929_v15 = vmul.f32 %v7469_v57, %v5918_v1 }
0x22e8   : > { %v9218_v62 = vpop.eup %9217 }
0x22e9   : > { %v5940_v53 = vadd.f32 %v7470_v18, %v5929_v15  ;;  %v5919_v61 = vmul.f32 %v9218_v62, %v11517_v20 }
0x22eb   : > { %v5944_v36 = vpack.c.bf16 %v5940_v53, %v5939_v5  ;;  %v5930_v43 = vmul.f32 %v7469_v57, %v5919_v61 }
0x22ec   : > { %v9220_v3 = vpop.eup %9219 }
0x22ed   : > { %v5920_v42 = vmul.f32 %v9220_v3, %v11523_v49  ;;  %7488 = vmatmul.mubr.msk.bf16.vlgmr.msra.gmra.mxu1 %vm1243_vm0, %v5944_v36  ;;  %v5941_v13 = vadd.f32 %v7470_v18, %v5930_v43  ;;  %v8955_v49 = vld [vmem:[%s11930_s12 + $0xf8] sm:$0xff]  }
0x22ee   : > { %6060 = vmatprep.mubr.bf16.mxu1 %v11962_v25  ;;  %7959 = vmatprep.subr.bf16.mxu0 %v8955_v49 }
0x22ef   : > { %v5931_v41 = vmul.f32 %v7469_v57, %v5920_v42  ;;  %7960 = vmatpush3.bf16.msra.mxu0 %v8956_v44 }
0x22f0   : > { %v9222_v16 = vpop.eup %9221 }
0x22f1   : > { %v5921_v27 = vmul.f32 %v9222_v16, %v11529_v24  ;;  %v5942_v10 = vadd.f32 %v7470_v18, %v5931_v41  ;;  %v8961_v24 = vld [vmem:[%s11930_s12 + $0xe0] sm:$0xff]  }
0x22f3   : > { %v5945_v9 = vpack.c.bf16 %v5942_v10, %v5941_v13  ;;  %v5932_v6 = vmul.f32 %v7469_v57, %v5921_v27 }
0x22f5   : > { %7489 = vmatmul.mubr.msk.bf16.gmra.mxu1 %vm1243_vm0, %v5945_v9  ;;  %v5943_v20 = vadd.f32 %v7470_v18, %v5932_v6 }
0x22f6   : > { %6070 = vmatprep.mubr.bf16.mxu1 %v11962_v25  ;;  %v8957_v25 = vld [vmem:[%s11930_s12 + $0xf0] sm:$0xff]  }
0x22f7   : > { %v5946_v37 = vpack.c.bf16 %v5943_v20, %v5943_v20  ;;  %7961 = vmatprep.subr.bf16.mxu0 %v8957_v25 }
0x22f8   : > { %7962 = vmatpush3.bf16.msra.mxu0 %v8958_v23 }
0x22f9   : > { %7963 = vmatprep.subr.bf16.mxu0 %v8959_v29 }
0x22fc   : > { %7964 = vmatpush3.bf16.msra.mxu0 %v8960_v22 }
0x22fd   : > { %7490 = vmatmul.mubr.msk.bf16.gmra.mxu1 %vm1243_vm0, %v5946_v37  ;;  %7965 = vmatprep.subr.bf16.mxu0 %v8961_v24 }
0x22fe   : > { %8712 = vmatprep.mubr.msk.f32.mxu1 %vm9289_vm1, %v11961_v39 }
0x2300   : > { %7966 = vmatpush3.bf16.msra.mxu0 %v8962_v19 }
0x2301   : > { %7967 = vmatprep.subr.bf16.mxu0 %v8963_v11 }
0x2304   : > { %7968 = vmatpush3.bf16.msra.mxu0 %v8964_v48 }
0x2305   : > { %7969 = vmatprep.subr.bf16.mxu0 %v8965_v50 }
0x2308   : > { %7970 = vmatpush3.bf16.msra.mxu0 %v8966_v17 }
0x2309   : > { %7971 = vmatprep.subr.bf16.mxu0 %v8967_v28 }
0x230c   : > { %7972 = vmatpush3.bf16.msra.mxu0 %v8968_v26 }
0x230d   : > { %7973 = vmatprep.subr.bf16.mxu0 %v8969_v45 }
0x2310   : > { %7974 = vmatpush3.bf16.msra.mxu0 %v8970_v54 }
0x2311   : > { %8727 = vmatprep.subr.bf16.mxu0 %v11961_v39 }
0x23ad   : > { %v6052_v46 = vpop.f32.mrf.mxu1 }
0x23ae   : > { %v11639_v60 = vadd.f32 %v6052_v46, %v11632_v38 }
0x23af   : > { %v6054_v59 = vpop.f32.mrf.mxu1 }
0x23b0   : > { %v11642_v4 = vmul.f32 0.70710677, %v11639_v60  ;;  %v6055_v7 = vadd.f32 %v6054_v59, %v11636_v35 }
0x23b1   : > { %v6056_v40 = vpop.f32.mrf.mxu1 }
0x23b2   : > { %v6089_v30 = vand.u32 2147483647, %v11642_v4  ;;  %v11646_v56 = vmul.f32 0.70710677, %v6055_v7  ;;  %v11649_v21 = vadd.f32 %v6056_v40, %v11632_v38  ;;  %vm6289_vm7 = vcmp.ge.f32.partialorder %v11642_v4, 0.0 }
0x23b3   : > { %v6058_v58 = vpop.f32.mrf.mxu1 }
0x23b4   : > { %v6099_v8 = vmul.f32 0.3275911, %v6089_v30  ;;  %v6090_v51 = vand.u32 2147483647, %v11646_v56  ;;  %v11653_v34 = vmul.f32 0.70710677, %v11649_v21  ;;  %v11656_v57 = vadd.f32 %v6058_v58, %v11636_v35 }
0x23b5   : > { %v6062_v14 = vpop.f32.mrf.mxu1  ;;  %v6229_v1 = vsub.f32 0.0, %v6089_v30  ;;  %v11693_v58 = vmul.f32 0.5, %v11639_v60  ;;  %vm6290_vm2 = vcmp.ge.f32.partialorder %v11646_v56, 0.0 }
0x23b6   : > { %v6109_v52 = vadd.f32 1.0, %v6099_v8  ;;  %v6100_v18 = vmul.f32 0.3275911, %v6090_v51  ;;  %v6091_v15 = vand.u32 2147483647, %v11653_v34  ;;  %v6230_v43 = vsub.f32 0.0, %v6090_v51 }
0x23b7   : > { %v11660_v62 = vmul.f32 0.70710677, %v11656_v57  ;;  %v6064_v5 = vpop.f32.mrf.mxu1  ;;  %v6239_v42 = vmul.f32 %v6229_v1, %v6089_v30  ;;  %v11664_v41 = vadd.f32 %v6062_v14, %v11632_v38  ;;  %v11695_v8 = vmul.f32 0.5, %v6055_v7 }
0x23b8   : > { %9223 = vrcp.f32 %v6109_v52  ;;  %v6110_v53 = vadd.f32 1.0, %v6100_v18  ;;  %v6101_v61 = vmul.f32 0.3275911, %v6091_v15  ;;  %v11667_v16 = vadd.f32 %v6064_v5, %v11636_v35 }
0x23b9   : > { %v6092_v36 = vand.u32 2147483647, %v11660_v62  ;;  %v6066_v3 = vpop.f32.mrf.mxu1  ;;  %v6231_v13 = vsub.f32 0.0, %v6091_v15  ;;  %v11670_v6 = vmul.f32 0.70710677, %v11664_v41  ;;  %v6240_v44 = vmul.f32 %v6230_v43, %v6090_v51 }
0x23ba   : > { %9225 = vrcp.f32 %v6110_v53  ;;  %v6111_v27 = vadd.f32 1.0, %v6101_v61  ;;  %v11673_v37 = vmul.f32 0.70710677, %v11667_v16  ;;  %v6249_v23 = vmul.f32 1.442695, %v6239_v42 }
0x23bb   : > { %v6102_v10 = vmul.f32 0.3275911, %v6092_v36  ;;  %v6068_v9 = vpop.f32.mrf.mxu1  ;;  %v6093_v25 = vand.u32 2147483647, %v11670_v6  ;;  %v6241_v29 = vmul.f32 %v6231_v13, %v6091_v15  ;;  %v11678_v24 = vadd.f32 %v6066_v3, %v11632_v38 }
0x23bc   : > { %9227 = vrcp.f32 %v6111_v27  ;;  %v6094_v22 = vand.u32 2147483647, %v11673_v37  ;;  %v6251_v28 = vmul.f32 1.442695, %v6240_v44  ;;  %v6232_v26 = vsub.f32 0.0, %v6092_v36 }
0x23bd   : > { %v6112_v20 = vadd.f32 1.0, %v6102_v10  ;;  %v6072_v49 = vpop.f32.mrf.mxu1  ;;  %v6103_v11 = vmul.f32 0.3275911, %v6093_v25  ;;  %v11681_v50 = vmul.f32 0.70710677, %v11678_v24  ;;  %v11684_v54 = vadd.f32 %v6068_v9, %v11636_v35 }
0x23be   : > { %v6104_v48 = vmul.f32 0.3275911, %v6094_v22  ;;  %v6253_v2 = vmul.f32 1.442695, %v6241_v29  ;;  %v6233_v46 = vsub.f32 0.0, %v6093_v25  ;;  %v6234_v59 = vsub.f32 0.0, %v6094_v22 }
0x23bf   : > { %v6074_v19 = vpop.f32.mrf.mxu1  ;;  %9229 = vrcp.f32 %v6112_v20  ;;  %v6113_v45 = vadd.f32 1.0, %v6103_v11  ;;  %v6095_v0 = vand.u32 2147483647, %v11681_v50  ;;  %v11688_v40 = vmul.f32 0.70710677, %v11684_v54 }
0x23c0   : > { %9231 = vpow2.f32 %v6249_v23  ;;  %v6114_v33 = vadd.f32 1.0, %v6104_v48  ;;  %v6242_v52 = vmul.f32 %v6232_v26, %v6092_v36  ;;  %v11700_v5 = vadd.f32 %v6072_v49, %v11632_v38 }
0x23c1   : > { %v6076_v17 = vpop.f32.mrf.mxu1  ;;  %9233 = vrcp.f32 %v6113_v45  ;;  %v6105_v51 = vmul.f32 0.3275911, %v6095_v0  ;;  %v6096_v1 = vand.u32 2147483647, %v11688_v40  ;;  %v6235_v15 = vsub.f32 0.0, %v6095_v0 }
0x23c2   : > { %9235 = vrcp.f32 %v6114_v33  ;;  %v6243_v61 = vmul.f32 %v6233_v46, %v6093_v25  ;;  %v6244_v7 = vmul.f32 %v6234_v59, %v6094_v22  ;;  %v11706_v43 = vmul.f32 0.5, %v11649_v21 }
0x23c3   : > { %v6077_v12 = vpop.f32.mrf.mxu1  ;;  %9237 = vpow2.f32 %v6251_v28  ;;  %v6115_v18 = vadd.f32 1.0, %v6105_v51  ;;  %v6106_v3 = vmul.f32 0.3275911, %v6096_v1  ;;  %v11709_v36 = vmul.f32 0.70710677, %v11700_v5 }
0x23c4   : > { %9239 = vpow2.f32 %v6253_v2  ;;  %v6255_v13 = vmul.f32 1.442695, %v6242_v52  ;;  %v11715_v9 = vadd.f32 %v6074_v19, %v11636_v35  ;;  %v6245_v44 = vmul.f32 %v6235_v15, %v6095_v0 }
0x23c5   : > { %v11690_v30 = vpop.eup %9223  ;;  %9241 = vrcp.f32 %v6115_v18  ;;  %v6116_v10 = vadd.f32 1.0, %v6106_v3  ;;  %v11719_v21 = vand.u32 2147483647, %v11709_v36  ;;  %v6257_v23 = vmul.f32 1.442695, %v6243_v61 }
0x23c6   : > { %v6139_v14 = vmul.f32 1.0614054, %v11690_v30  ;;  %v6259_v29 = vmul.f32 1.442695, %v6244_v7  ;;  %v6236_v17 = vsub.f32 0.0, %v6096_v1  ;;  %vm6291_vm3 = vcmp.ge.f32.partialorder %v11653_v34, 0.0 }
0x23c7   : > { %v11702_v53 = vpop.eup %9225  ;;  %9243 = vrcp.f32 %v6116_v10  ;;  %v6107_v35 = vmul.f32 0.3275911, %v11719_v21  ;;  %v11728_v26 = vmul.f32 0.70710677, %v11715_v9  ;;  %v6261_v33 = vmul.f32 1.442695, %v6245_v44 }
0x23c8   : > { %v7491_v60 = vadd.f32 -1.4531521, %v6139_v14  ;;  %v6140_v42 = vmul.f32 1.0614054, %v11702_v53  ;;  %9245 = vpow2.f32 %v6255_v13  ;;  %v6246_v15 = vmul.f32 %v6236_v17, %v6096_v1 }
0x23c9   : > { %v11711_v27 = vpop.eup %9227  ;;  %v6117_v0 = vadd.f32 1.0, %v6107_v35  ;;  %9247 = vpow2.f32 %v6257_v23  ;;  %v11732_v51 = vand.u32 2147483647, %v11728_v26  ;;  %vm6292_vm8 = vcmp.ge.f32.partialorder %v11660_v62, 0.0 }
0x23ca   : > { %v6159_v38 = vmul.f32 %v11690_v30, %v7491_v60  ;;  %v7492_v20 = vadd.f32 -1.4531521, %v6140_v42  ;;  %v6141_v49 = vmul.f32 1.0614054, %v11711_v27  ;;  %9249 = vpow2.f32 %v6259_v29 }
0x23cb   : > { %9251 = vrcp.f32 %v6117_v0  ;;  %v6238_v56 = vsub.f32 0.0, %v11732_v51  ;;  %vm6294_vm11 = vcmp.ge.f32.partialorder %v11673_v37, 0.0  ;;  %vm6295_vm14 = vcmp.ge.f32.partialorder %v11681_v50, 0.0 }
0x23cc   : > { %v6169_v25 = vadd.f32 1.4214138, %v6159_v38  ;;  %v11721_v22 = vpop.eup %9229  ;;  %v6160_v11 = vmul.f32 %v11702_v53, %v7492_v20  ;;  %v7493_v48 = vadd.f32 -1.4531521, %v6141_v49  ;;  %v6108_v20 = vmul.f32 0.3275911, %v11732_v51 }
0x23cd   : > { %v6142_v28 = vmul.f32 1.0614054, %v11721_v22  ;;  %v9232_v12 = vpop.eup %9231  ;;  %9253 = vpow2.f32 %v6261_v33  ;;  %vm6293_vm9 = vcmp.ge.f32.partialorder %v11670_v6, 0.0  ;;  %vm6296_vm10 = vcmp.ge.f32.partialorder %v11688_v40, 0.0 }
0x23ce   : > { %v6179_v19 = vmul.f32 %v11690_v30, %v6169_v25  ;;  %v6170_v45 = vadd.f32 1.4214138, %v6160_v11  ;;  %v6161_v2 = vmul.f32 %v11711_v27, %v7493_v48  ;;  %v11734_v14 = vpop.eup %9233  ;;  %v6263_v48 = vmul.f32 1.442695, %v6246_v15 }
0x23cf   : > { %v7494_v59 = vadd.f32 -1.4531521, %v6142_v28  ;;  %v11737_v60 = vpop.eup %9235  ;;  %v6143_v3 = vmul.f32 1.0614054, %v11734_v14  ;;  %v6118_v15 = vadd.f32 1.0, %v6108_v20  ;;  %v6325_v6 = vmul.f32 0.5, %v11678_v24 }
0x23d0   : > { %v7501_v46 = vadd.f32 -0.28449672, %v6179_v19  ;;  %v6180_v52 = vmul.f32 %v11702_v53, %v6170_v45  ;;  %v6171_v18 = vadd.f32 1.4214138, %v6161_v2  ;;  %v9238_v42 = vpop.eup %9237  ;;  %v6144_v10 = vmul.f32 1.0614054, %v11737_v60 }
0x23d1   : > { %v6162_v7 = vmul.f32 %v11721_v22, %v7494_v59  ;;  %v9240_v49 = vpop.eup %9239  ;;  %v7495_v25 = vadd.f32 -1.4531521, %v6143_v3  ;;  %v6237_v45 = vsub.f32 0.0, %v11719_v21  ;;  %9255 = vrcp.f32 %v6118_v15 }
0x23d2   : > { %v6199_v61 = vmul.f32 %v11690_v30, %v7501_v46  ;;  %v7502_v38 = vadd.f32 -0.28449672, %v6180_v52  ;;  %v6181_v13 = vmul.f32 %v11711_v27, %v6171_v18  ;;  %v7496_v11 = vadd.f32 -1.4531521, %v6144_v10  ;;  %v11746_v17 = vpop.eup %9241 }
0x23d3   : > { %v6172_v1 = vadd.f32 1.4214138, %v6162_v7  ;;  %v6163_v28 = vmul.f32 %v11734_v14, %v7495_v25  ;;  %v6145_v46 = vmul.f32 1.0614054, %v11746_v17  ;;  %9257 = vpow2.f32 %v6263_v48 }
0x23d4   : > { %v6209_v44 = vadd.f32 0.2548296, %v6199_v61  ;;  %v6200_v23 = vmul.f32 %v11702_v53, %v7502_v38  ;;  %v7503_v29 = vadd.f32 -0.28449672, %v6181_v13  ;;  %v6164_v33 = vmul.f32 %v11737_v60, %v7496_v11  ;;  %v11755_v61 = vpop.eup %9243 }
0x23d5   : > { %v6182_v19 = vmul.f32 %v11721_v22, %v6172_v1  ;;  %v6173_v18 = vadd.f32 1.4214138, %v6163_v28  ;;  %v7497_v38 = vadd.f32 -1.4531521, %v6145_v46  ;;  %v9246_v1 = vpop.eup %9245  ;;  %vm6297_vm12 = vcmp.ge.f32.partialorder %v11709_v36, 0.0 }
0x23d6   : > { %v6219_v35 = vmul.f32 %v11690_v30, %v6209_v44  ;;  %v6210_v2 = vadd.f32 0.2548296, %v6200_v23  ;;  %v6201_v0 = vmul.f32 %v11711_v27, %v7503_v29  ;;  %v6174_v3 = vadd.f32 1.4214138, %v6164_v33 }
0x23d7   : > { %v7504_v52 = vadd.f32 -0.28449672, %v6182_v19  ;;  %v6183_v44 = vmul.f32 %v11734_v14, %v6173_v18  ;;  %v6165_v23 = vmul.f32 %v11746_v17, %v7497_v38  ;;  %v9248_v19 = vpop.eup %9247  ;;  %vm6298_vm13 = vcmp.ge.f32.partialorder %v11728_v26, 0.0 }
0x23d8   : > { %v6269_v59 = vmul.f32 %v9232_v12, %v6219_v35  ;;  %v6220_v30 = vmul.f32 %v11702_v53, %v6210_v2  ;;  %v6211_v7 = vadd.f32 0.2548296, %v6201_v0  ;;  %v6146_v12 = vmul.f32 1.0614054, %v11755_v61  ;;  %v9250_v46 = vpop.eup %9249 }
0x23d9   : > { %v6202_v10 = vmul.f32 %v11721_v22, %v7504_v52  ;;  %v6184_v25 = vmul.f32 %v11737_v60, %v6174_v3  ;;  %v7505_v11 = vadd.f32 -0.28449672, %v6183_v44  ;;  %v6247_v35 = vmul.f32 %v6237_v45, %v11719_v21  ;;  %v11771_v52 = vpop.eup %9251 }
0x23da   : > { %v6279_v13 = vsub.f32 1.0, %v6269_v59  ;;  %v6270_v20 = vmul.f32 %v9238_v42, %v6220_v30  ;;  %v6221_v53 = vmul.f32 %v11711_v27, %v6211_v7  ;;  %v6175_v33 = vadd.f32 1.4214138, %v6165_v23  ;;  %v9254_v38 = vpop.eup %9253 }
0x23db   : > { %v6212_v29 = vadd.f32 0.2548296, %v6202_v10  ;;  %v7506_v0 = vadd.f32 -0.28449672, %v6184_v25  ;;  %v6203_v27 = vmul.f32 %v11734_v14, %v7505_v11  ;;  %v7498_v42 = vadd.f32 -1.4531521, %v6146_v12 }
0x23dc   : > { %v6280_v28 = vsub.f32 1.0, %v6270_v20  ;;  %v6271_v2 = vmul.f32 %v9240_v49, %v6221_v53  ;;  %v6299_v18 = vsub.f32 0.0, %v6279_v13  ;;  %v6185_v49 = vmul.f32 %v11746_v17, %v6175_v33 }
0x23dd   : > { %v6222_v59 = vmul.f32 %v11721_v22, %v6212_v29  ;;  %v6204_v21 = vmul.f32 %v11737_v60, %v7506_v0  ;;  %v6213_v15 = vadd.f32 0.2548296, %v6203_v27  ;;  %v6166_v3 = vmul.f32 %v11755_v61, %v7498_v42 }
0x23de   : > { %v6300_v30 = vsub.f32 0.0, %v6280_v28  ;;  %v6281_v7 = vsub.f32 1.0, %v6271_v2  ;;  %v6265_v44 = vmul.f32 1.442695, %v6247_v35  ;;  %v7507_v25 = vadd.f32 -0.28449672, %v6185_v49 }
0x23df   : > { %v6272_v45 = vmul.f32 %v9246_v1, %v6222_v59  ;;  %v6214_v10 = vadd.f32 0.2548296, %v6204_v21  ;;  %v6223_v53 = vmul.f32 %v11734_v14, %v6213_v15  ;;  %v6176_v29 = vadd.f32 1.4214138, %v6166_v3  ;;  %v11794_v21 = vpop.eup %9255 }
0x23e0   : > { %v6301_v22 = vsub.f32 0.0, %v6281_v7  ;;  %v6310_v12 = vsel %vm6290_vm2, %v6280_v28, %v6300_v30  ;;  %v6147_v11 = vmul.f32 1.0614054, %v11771_v52  ;;  %v6309_v2 = vsel %vm6289_vm7, %v6279_v13, %v6299_v18 }
0x23e1   : > { %v6282_v20 = vsub.f32 1.0, %v6272_v45  ;;  %v6224_v23 = vmul.f32 %v11737_v60, %v6214_v10  ;;  %v6205_v0 = vmul.f32 %v11746_v17, %v7507_v25  ;;  %v6186_v14 = vmul.f32 %v11755_v61, %v6176_v29 }
0x23e2   : > { %v6311_v1 = vsel %vm6291_vm3, %v6281_v7, %v6301_v22  ;;  %v7499_v33 = vadd.f32 -1.4531521, %v6147_v11  ;;  %v6330_v34 = vadd.f32 1.0, %v6310_v12  ;;  %v6322_v59 = vmul.f32 0.5, %v11656_v57 }
0x23e3   : > { %v6331_v48 = vadd.f32 1.0, %v6311_v1  ;;  %v6302_v35 = vsub.f32 0.0, %v6282_v20  ;;  %v6274_v28 = vmul.f32 %v9250_v46, %v6224_v23  ;;  %v6273_v27 = vmul.f32 %v9248_v19, %v6223_v53  ;;  %v9258_v23 = vpop.eup %9257 }
0x23e4   : > { %v6329_v42 = vadd.f32 1.0, %v6309_v2  ;;  %v6215_v13 = vadd.f32 0.2548296, %v6205_v0  ;;  %v7508_v18 = vadd.f32 -0.28449672, %v6186_v14  ;;  %v6167_v46 = vmul.f32 %v11771_v52, %v7499_v33 }
0x23e5   : > { %v6312_v60 = vsel %vm6292_vm8, %v6282_v20, %v6302_v35  ;;  %v6341_v30 = vmul.f32 %v6331_v48, %v11706_v43  ;;  %9259 = vpow2.f32 %v6265_v44  ;;  %v6248_v7 = vmul.f32 %v6238_v56, %v11732_v51 }
0x23e6   : > { %v6332_v4 = vadd.f32 1.0, %v6312_v60  ;;  %v6284_v15 = vsub.f32 1.0, %v6274_v28  ;;  %v6225_v62 = vmul.f32 %v11746_v17, %v6215_v13  ;;  %v6206_v57 = vmul.f32 %v11755_v61, %v7508_v18 }
0x23e7   : > { %v6340_v19 = vmul.f32 %v6330_v34, %v11695_v8  ;;  %v6283_v49 = vsub.f32 1.0, %v6273_v27  ;;  %v6177_v3 = vadd.f32 1.4214138, %v6167_v46  ;;  %v6339_v22 = vmul.f32 %v6329_v42, %v11693_v58 }
0x23e8   : > { %v6342_v45 = vmul.f32 %v6332_v4, %v6322_v59  ;;  %v6275_v43 = vmul.f32 %v9254_v38, %v6225_v62  ;;  %v6216_v10 = vadd.f32 0.2548296, %v6206_v57  ;;  %v6267_v12 = vmul.f32 1.442695, %v6248_v7 }
0x23e9   : > { %v6187_v44 = vmul.f32 %v11771_v52, %v6177_v3  ;;  %v6148_v20 = vmul.f32 1.0614054, %v11794_v21  ;;  %v6349_v53 = vpack.c.bf16 %v6341_v30, %v6339_v22  ;;  %v6304_v25 = vsub.f32 0.0, %v6284_v15 }
0x23ea   : > { %v6350_v51 = vpack.c.bf16 %v6342_v45, %v6340_v19  ;;  %v6285_v1 = vsub.f32 1.0, %v6275_v43  ;;  %v6226_v17 = vmul.f32 %v11755_v61, %v6216_v10  ;;  %v6303_v29 = vsub.f32 0.0, %v6283_v49 }
0x23eb   : > { %v7509_v8 = vadd.f32 -0.28449672, %v6187_v44  ;;  %v7500_v11 = vadd.f32 -1.4531521, %v6148_v20  ;;  %9261 = vpow2.f32 %v6267_v12  ;;  %v6314_v61 = vsel %vm6294_vm11, %v6284_v15, %v6304_v25 }
0x23ec   : > { %6524 = vmatprep.mubr.bf16.mxu0 %v6350_v51  ;;  %v6305_v58 = vsub.f32 0.0, %v6285_v1  ;;  %v6276_v38 = vmul.f32 %v9258_v23, %v6226_v17  ;;  %v6313_v28 = vsel %vm6293_vm9, %v6283_v49, %v6303_v29  ;;  %v6334_v34 = vadd.f32 1.0, %v6314_v61 }
0x23ed   : > { %6525 = vmatmul.mubr.bf16.vlgmr.msra.gmra.mxu0 %v6349_v53  ;;  %v6207_v2 = vmul.f32 %v11771_v52, %v7509_v8  ;;  %v6168_v48 = vmul.f32 %v11794_v21, %v7500_v11  ;;  %v6333_v27 = vadd.f32 1.0, %v6313_v28  ;;  %v6324_v42 = vmul.f32 0.5, %v11667_v16 }
0x23ee   : > { %v6315_v35 = vsel %vm6295_vm14, %v6285_v1, %v6305_v58  ;;  %v6286_v56 = vsub.f32 1.0, %v6276_v38  ;;  %v6326_v13 = vmul.f32 0.5, %v11684_v54  ;;  %v6323_v7 = vmul.f32 0.5, %v11664_v41 }
0x23ef   : > { %v6217_v0 = vadd.f32 0.2548296, %v6207_v2  ;;  %v6178_v14 = vadd.f32 1.4214138, %v6168_v48  ;;  %v6335_v33 = vadd.f32 1.0, %v6315_v35  ;;  %v6344_v40 = vmul.f32 %v6334_v34, %v6324_v42 }
0x23f0   : > { %v6306_v37 = vsub.f32 0.0, %v6286_v56  ;;  %v6343_v57 = vmul.f32 %v6333_v27, %v6323_v7  ;;  %v6327_v12 = vmul.f32 0.5, %v11700_v5  ;;  %v6328_v20 = vmul.f32 0.5, %v11715_v9  ;;  %v7544_v35 = vld [vmem:[%s11927_s9 + $0x5] ss:$0 sm:$0xff]  ;;  %v8971_v7 = vld [vmem:[%s11932_s14 + $0x18] sm:$0xff]  }
0x23f1   : > { %v6227_v50 = vmul.f32 %v11771_v52, %v6217_v0  ;;  %v6188_v60 = vmul.f32 %v11794_v21, %v6178_v14  ;;  %v6345_v45 = vmul.f32 %v6335_v33, %v6325_v6 }
0x23f2   : > { %v9260_v59 = vpop.eup %9259  ;;  %v6316_v4 = vsel %vm6296_vm10, %v6286_v56, %v6306_v37 }
0x23f3   : > { %v6336_v18 = vadd.f32 1.0, %v6316_v4  ;;  %v6277_v30 = vmul.f32 %v9260_v59, %v6227_v50  ;;  %v7510_v46 = vadd.f32 -0.28449672, %v6188_v60  ;;  %v6351_v16 = vpack.c.bf16 %v6345_v45, %v6343_v57  ;;  %v8972_v45 = vld [vmem:[%s11932_s14 + $0x10] sm:$0xff]  }
0x23f5   : > { %v6346_v15 = vmul.f32 %v6336_v18, %v6326_v13  ;;  %v6287_v52 = vsub.f32 1.0, %v6277_v30  ;;  %v6208_v62 = vmul.f32 %v11794_v21, %v7510_v46 }
0x23f7   : > { %v6352_v19 = vpack.c.bf16 %v6346_v15, %v6344_v40  ;;  %v6218_v49 = vadd.f32 0.2548296, %v6208_v62  ;;  %v6307_v3 = vsub.f32 0.0, %v6287_v52  ;;  %v8973_v40 = vld [vmem:[%s11932_s14 + $0x8] sm:$0xff]   ;;  %v8975_v15 = vld [vmem:[%s11933_s15 + $0x18] sm:$0xff]   ;;  %v8974_v62 = vld [vmem:[%s11932_s14] sm:$0xff]  }
0x23f8   : > { %v9262_v54 = vpop.eup %9261  ;;  %8728 = vmatpush3.bf16.msra.mxu0 %v8975_v15 }
0x23f9   : > { %6532 = vmatprep.mubr.bf16.mxu0 %v6352_v19  ;;  %v6228_v24 = vmul.f32 %v11794_v21, %v6218_v49  ;;  %v6317_v41 = vsel %vm6297_vm12, %v6287_v52, %v6307_v3  ;;  %v8976_v52 = vld [vmem:[%s11933_s15 + $0x10] sm:$0xff]   ;;  %8729 = vmatprep.subr.bf16.mxu0 %v11961_v39  ;;  %v7563_v3 = vld [vmem:[%s11931_s13] ss:$0 sm:$0xff] }
0x23fa   : > { %6533 = vmatmul.mubr.bf16.gmra.mxu0 %v6351_v16  ;;  %v6337_v10 = vadd.f32 1.0, %v6317_v41 }
0x23fb   : > { %v6278_v22 = vmul.f32 %v9262_v54, %v6228_v24  ;;  %v7564_v54 = vld [vmem:[%s11931_s13 + $0x1] ss:$0 sm:$0xff] }
0x23fc   : > { %v6347_v25 = vmul.f32 %v6337_v10, %v6327_v12  ;;  %8730 = vmatpush3.bf16.msra.mxu0 %v8976_v52  ;;  %v8977_v10 = vld [vmem:[%s11933_s15 + $0x8] sm:$0xff]   ;;  %v8979_v12 = vld [vmem:[%s11934_s16 + $0x18] sm:$0xff]  }
0x23fd   : > { %v6288_v43 = vsub.f32 1.0, %v6278_v22  ;;  %8731 = vmatprep.subr.bf16.mxu0 %v11961_v39 }
0x23fe   : > { %v6353_v17 = vpack.c.bf16 %v6347_v25, %v6347_v25 }
0x23ff   : > { %v6308_v44 = vsub.f32 0.0, %v6288_v43 }
0x2400   : > { %8732 = vmatpush3.bf16.msra.mxu0 %v8977_v10 }
0x2401   : > { %v6318_v51 = vsel %vm6298_vm13, %v6288_v43, %v6308_v44  ;;  %v8978_v44 = vld [vmem:[%s11933_s15] sm:$0xff]   ;;  %8733 = vmatprep.subr.bf16.mxu0 %v11961_v39 }
0x2402   : > { %v6338_v53 = vadd.f32 1.0, %v6318_v51  ;;  %v8980_v51 = vld [vmem:[%s11934_s16 + $0x10] sm:$0xff]  }
0x2404   : > { %v6348_v1 = vmul.f32 %v6338_v53, %v6328_v20  ;;  %8734 = vmatpush3.bf16.msra.mxu0 %v8978_v44  ;;  %v7565_v20 = vld [vmem:[%s11935_s17] ss:$0 sm:$0xff] }
0x2406   : > { %v6354_v21 = vpack.c.bf16 %v6348_v1, %v6348_v1 }
0x2408   : > { %6540 = vmatprep.mubr.bf16.mxu0 %v6354_v21 }
0x2409   : > { %6541 = vmatmul.mubr.bf16.gmra.mxu0 %v6353_v17 }
0x240a   : > { %8735 = vmatprep.mubr.msk.bf16.mxu0 %vm9289_vm1, %v11961_v39 }
0x24ad   : > { %v7975_v36 = vpop.f32.mrf.mxu0 }
0x24af   : > { %v7976_v23 = vpop.f32.mrf.mxu0 }
0x24b0   : > { %v7977_v37 = vadd.f32 %v7976_v23, %v7975_v36 }
0x24b1   : > { %v7978_v29 = vpop.f32.mrf.mxu0 }
0x24b2   : > { %v6527_v27 = vadd.f32 %v7977_v37, %v7544_v35 }
0x24b3   : > { %v7979_v8 = vpop.f32.mrf.mxu0 }
0x24b4   : > { %v7980_v28 = vadd.f32 %v7979_v8, %v7978_v29  ;;  %v6548_v4 = vadd.f32 %v6527_v27, %v11481_v32  ;;  %v8981_v29 = vld [vmem:[%s11934_s16 + $0x8] sm:$0xff]   ;;  %v8982_v8 = vld [vmem:[%s11934_s16] sm:$0xff]  }
0x24b6   : > { %v6530_v60 = vadd.f32 %v7980_v28, %v7544_v35 }
0x24b8   : > { %v6549_v6 = vadd.f32 %v6530_v60, %v11486_v47 }
0x24ba   : > { %v7981_v26 = vpop.f32.mrf.mxu0 }
0x24bc   : > { %v7982_v11 = vpop.f32.mrf.mxu0 }
0x24bd   : > { %v7983_v48 = vadd.f32 %v7982_v11, %v7981_v26  ;;  %v7572_v26 = vld [vmem:[%s11935_s17 + $0x1] ss:$0 sm:$0xff] }
0x24be   : > { %v7984_v5 = vpop.f32.mrf.mxu0 }
0x24bf   : > { %v6535_v34 = vadd.f32 %v7983_v48, %v7544_v35 }
0x24c0   : > { %v7985_v58 = vpop.f32.mrf.mxu0 }
0x24c1   : > { %v7986_v9 = vadd.f32 %v7985_v58, %v7984_v5  ;;  %v6550_v42 = vadd.f32 %v6535_v34, %v11491_v31 }
0x24c3   : > { %v6538_v0 = vadd.f32 %v7986_v9, %v7544_v35 }
0x24c5   : > { %v6551_v59 = vadd.f32 %v6538_v0, %v11496_v55  ;;  %v6553_v55 = vld [vmem:[%s11967_s26] sm:$0xff] }
0x24c9   : > { %v7987_v38 = vpop.f32.mrf.mxu0 }
0x24cb   : > { %v7988_v2 = vpop.f32.mrf.mxu0 }
0x24cc   : > { %v7989_v61 = vadd.f32 %v7988_v2, %v7987_v38 }
0x24cd   : > { %v7990_v56 = vpop.f32.mrf.mxu0 }
0x24ce   : > { %v6543_v14 = vadd.f32 %v7989_v61, %v7544_v35 }
0x24cf   : > { %v7991_v33 = vpop.f32.mrf.mxu0 }
0x24d0   : > { %v6552_v50 = vadd.f32 %v6543_v14, %v11501_v63 }
0x24d2   : > { %8703 = vmatpush3.msra.mxu1 %v6552_v50 }
0x24d3   : > { %8704 = vmatprep.subr.mxu1 %v11961_v39 }
0x24d4   : > { %8705 = vmatpush3.msra.mxu1 %v6551_v59 }
0x24d5   : > { %8706 = vmatprep.subr.mxu1 %v11961_v39 }
0x24d6   : > { %8707 = vmatpush3.msra.mxu1 %v6550_v42 }
0x24d7   : > { %8708 = vmatprep.subr.mxu1 %v11961_v39 }
0x24d8   : > { %8709 = vmatpush3.msra.mxu1 %v6549_v6 }
0x24d9   : > { %8710 = vmatprep.subr.mxu1 %v11961_v39 }
0x24da   : > { %8711 = vmatpush3.msra.mxu1 %v6548_v4 }
0x24db   : > { %8713 = vmatmul.mubr.msk.f32.vlgmr.msra.gmra.mxu1 %vm1715_vm4, %v6553_v55  ;;  %8715 = vmatprep.subr.bf16.mxu1 %v11961_v39 }
0x24dc   : > { %8723 = vmatprep.mubr.msk.bf16.mxu1 %vm9289_vm1, %v11961_v39  ;;  %8716 = vmatpush3.bf16.msra.mxu1 %v8971_v7 }
0x24dd   : > { %8717 = vmatprep.subr.bf16.mxu1 %v11961_v39 }
0x24e0   : > { %8718 = vmatpush3.bf16.msra.mxu1 %v8972_v45 }
0x24e1   : > { %8719 = vmatprep.subr.bf16.mxu1 %v11961_v39 }
0x24e4   : > { %8720 = vmatpush3.bf16.msra.mxu1 %v8973_v40 }
0x24e5   : > { %8721 = vmatprep.subr.bf16.mxu1 %v11961_v39 }
0x24e8   : > { %8722 = vmatpush3.bf16.msra.mxu1 %v8974_v62 }
0x24e9   : > { %8739 = vmatprep.subr.bf16.mxu1 %v11961_v39 }
0x259b   : > { %v6623_v47 = vpop.f32.mrf.mxu1 }
0x259c   : > { %v6630_v31 = vsel %vm1243_vm0, %v6623_v47, 0.0 }
0x259d   : > { %6631 = vadd.xlane.f32.xlu0 %v6630_v31  ;;  %v8714_v32 = vpop.f32.mrf.mxu1 }
0x2626   : > { %v6632_v63 = vpop.xlane.xlu0 %6631 }
0x2627   : > { %v6633_v13 = vmul.f32 0.015625, %v6632_v63 }
0x2629   : > { %v6634_v18 = vsub.f32 %v6623_v47, %v6633_v13 }
0x262b   : > { %v6635_v30 = vmul.f32 %v6634_v18, %v6634_v18 }
0x262d   : > { %v6636_v46 = vsel %vm1243_vm0, %v6635_v30, 0.0 }
0x262e   : > { %6637 = vadd.xlane.f32.xlu1 %v6636_v46 }
0x26b7   : > { %v6638_v57 = vpop.xlane.xlu1 %6637 }
0x26b8   : > { %v6639_v19 = vmul.f32 0.015625, %v6638_v57 }
0x26ba   : > { %v6640_v49 = vadd.f32 1e-06, %v6639_v19 }
0x26bc   : > { %9263 = vrsqrt.f32 %v6640_v49 }
0x26c9   : > { %v9264_v16 = vpop.eup %9263 }
0x26ca   : > { %v6642_v24 = vmul.f32 %v9264_v16, %v6634_v18 }
0x26cc   : > { %v6649_v22 = vmul.f32 %v7563_v3, %v6642_v24 }
0x26ce   : > { %v6656_v41 = vadd.f32 %v7564_v54, %v6649_v22 }
0x26d0   : > { %v6657_v43 = vpack.c.bf16 %v6656_v41, %v6656_v41 }
0x26d2   : > { %8724 = vmatmul.mubr.msk.bf16.vlgmr.msra.gmra.mxu1 %vm1243_vm0, %v6657_v43 }
0x26d3   : > { %8747 = vmatprep.mubr.msk.bf16.mxu1 %vm9289_vm1, %v11961_v39  ;;  %8740 = vmatpush3.bf16.msra.mxu1 %v8979_v12 }
0x26d4   : > { %8741 = vmatprep.subr.bf16.mxu1 %v11961_v39 }
0x26d7   : > { %8742 = vmatpush3.bf16.msra.mxu1 %v8980_v51 }
0x26d8   : > { %8743 = vmatprep.subr.bf16.mxu1 %v11961_v39 }
0x26db   : > { %8744 = vmatpush3.bf16.msra.mxu1 %v8981_v29 }
0x26dc   : > { %8745 = vmatprep.subr.bf16.mxu1 %v11961_v39  ;;  %v7579_v39 = vld [vmem:[%s11935_s17 + $0x2] ss:$0 sm:$0xff] }
0x26df   : > { %8746 = vmatpush3.bf16.msra.mxu1 %v8982_v8 }
0x2792   : > { %v6734_v53 = vpop.f32.mrf.mxu1 }
0x2793   : > { %v6735_v25 = vadd.f32 %v7565_v20, %v6734_v53 }
0x2794   : > { %v8725_v1 = vpop.f32.mrf.mxu1 }
0x2795   : > { %v6740_v21 = vmax.f32 %v6735_v25, 0.0 }
0x2796   : > { %v6737_v17 = vpop.f32.mrf.mxu1 }
0x2797   : > { %v6741_v36 = vpack.c.bf16 %v6740_v21, %v6740_v21 }
0x2798   : > { %v8726_v23 = vpop.f32.mrf.mxu1 }
0x2799   : > { %8736 = vmatmul.mubr.msk.bf16.vlgmr.msra.gmra.mxu0 %vm1243_vm0, %v6741_v36 }
0x2859   : > { %v6819_v11 = vpop.f32.mrf.mxu0 }
0x285a   : > { %v6820_v5 = vadd.f32 %v7572_v26, %v6819_v11 }
0x285b   : > { %v8737_v58 = vpop.f32.mrf.mxu0 }
0x285c   : > { %v6825_v38 = vmax.f32 %v6820_v5, 0.0 }
0x285d   : > { %v6822_v9 = vpop.f32.mrf.mxu0 }
0x285e   : > { %v6826_v2 = vpack.c.bf16 %v6825_v38, %v6825_v38 }
0x285f   : > { %v8738_v48 = vpop.f32.mrf.mxu0 }
0x2860   : > { %8748 = vmatmul.mubr.msk.bf16.vlgmr.msra.gmra.mxu1 %vm1243_vm0, %v6826_v2 }
0x2920   : > { %v6904_v61 = vpop.f32.mrf.mxu1 }
0x2921   : > { %v6905_v35 = vadd.f32 %v7579_v39, %v6904_v61 }
0x2922   : > { %v8749_v56 = vpop.f32.mrf.mxu1 }
0x2923   : > { %6910 = vst [vmem:[%s578_s30] sm:$0xff] %v6905_v35 }
0x2924   : > { %v6907_v28 = vpop.f32.mrf.mxu1 }
0x2926   : > { %v8750_v0 = vpop.f32.mrf.mxu1 }
0x2927 PF: > { %s28_s27 = sadd.s32 1, %s9286_s27  }
0x2928   : > { %p25_p5 = scmp.ge.s32.totalorder %s28_s27, 4  }
0x292a   :  { %27 = sbr.rel (!%p25_p5) target bundleno = 4 (0x4), region = 173 }

</bundles_post_ra>
